<compile_context>
chip_gen: v7x
topology: tpu7x:2x2x1
jax: 0.10.0
libtpu: 0.0.40
codegen_flags: <defaults>
</compile_context>

<pallas_src>
import functools

import jax
import jax.numpy as jnp
from jax.experimental import pallas as pl
from jax.experimental.pallas import tpu as pltpu


# ---------------------------------------------------------------------------
# In-kernel building blocks
# ---------------------------------------------------------------------------
def _fill_padded(scr_ref, val, W, M):
    """Drop `val` (C, M) into a flattened zero-padded scratch at lane offset
    W+1 (one zero image-row above/below plus 1-element margins) so every 3x3
    conv tap is a plain contiguous in-VMEM slice.  Only the borders are
    (re)zeroed; the interior is fully overwritten."""
    C, P = scr_ref.shape
    edge = jnp.zeros((C, W + 1), scr_ref.dtype)
    scr_ref[:, 0:W + 1] = edge
    scr_ref[:, W + 1 + M:P] = edge
    scr_ref[:, W + 1:W + 1 + M] = val.astype(scr_ref.dtype)


def _conv3x3(scr_ref, patch_ref, w_ref, b_ref, masks_ref, H, W):
    """3x3, stride-1, pad-1 convolution on the padded, flattened activation in
    `scr_ref` ((Cin, (H+2)*W+2)).  Returns (Cout, H*W) float32.

    Cin > 1: the nine shifted taps are staged into `patch_ref` (9*Cin, H*W) and
    contracted by one bf16 MXU matmul (f32 accumulation, lane-dense output).
    Cin == 1: degenerate contraction, done as 9 VPU multiply-accumulates.
    `masks_ref` holds the precomputed {0,1} bf16 column masks (row 0 used for
    dx == -1, row 1 for dx == +1) that zero wraparound taps."""
    cin = scr_ref.shape[0]
    cout = w_ref.shape[0]
    M = H * W
    base = W + 1
    mask_left = masks_ref[0:1, :]
    mask_right = masks_ref[1:2, :]

    def tap(dy, dx):
        s = base + dy * W + dx
        v = scr_ref[:, s:s + M]
        if dx == -1:
            v = v * mask_left
        elif dx == 1:
            v = v * mask_right
        return v

    if cin == 1:
        acc = jnp.zeros((cout, M), jnp.float32)
        off = 0
        for dy in (-1, 0, 1):
            for dx in (-1, 0, 1):
                w_col = w_ref[:, off:off + 1].astype(jnp.float32)    # (Cout, 1)
                acc = acc + w_col * tap(dy, dx).astype(jnp.float32)
                off += 1
    else:
        off = 0
        for dy in (-1, 0, 1):
            for dx in (-1, 0, 1):
                patch_ref[off * cin:(off + 1) * cin, :] = tap(dy, dx)
                off += 1
        acc = jnp.dot(w_ref[...], patch_ref[...],
                      preferred_element_type=jnp.float32)
    return acc + b_ref[...]                                          # (Cout, M)


def _stride2_maxpool(scr_ref, sel_ref, act, H, W):
    """Fused `stride-2 subsample of the stride-1 conv` + MaxPool2d(2, 2).

    conv2(stride=2) followed by a 2x2/2 max-pool equals, on the stride-1 conv
    output, a max over row/col offsets {0, 2} taken at every 4th row/col.  The
    max uses three shifted in-VMEM slices of a staging scratch; the every-4th
    selection is a precomputed 0/1 matmul (lane-dense MXU operand).  The
    staging/selection dtype follows the scratch dtype (bf16 for layer 1 -- an
    exact choice since layer 2 rounds to bf16 anyway -- and f32 for the final
    layer)."""
    M = H * W
    C, P = scr_ref.shape
    scr_ref[:, M:P] = jnp.zeros((C, P - M), scr_ref.dtype)
    a0 = act.astype(scr_ref.dtype)
    scr_ref[:, 0:M] = a0
    maxed = jnp.maximum(
        jnp.maximum(a0, scr_ref[:, 2:2 + M]),
        jnp.maximum(scr_ref[:, 2 * W:2 * W + M],
                    scr_ref[:, 2 * W + 2:2 * W + 2 + M]))
    return jnp.dot(maxed, sel_ref[...],
                   preferred_element_type=jnp.float32)               # (C, Mp)


def _encoder_kernel(x_ref,
                    w11_ref, b11_ref, w12_ref, b12_ref,
                    w21_ref, b21_ref, w22_ref, b22_ref,
                    m1_ref, m2_ref, sel1_ref, sel2_ref,
                    out_ref,
                    s1a, s1b, p1, s1p, s2a, p2a, s2b, p2b, s2p,
                    *, H, W):
    """One grid step == one image: both EncoderLayers end-to-end in VMEM."""
    M1 = H * W
    H2, W2 = H // 4, W // 4
    M2 = H2 * W2

    # ---- layer 1: conv1(1->C1) -> conv2(C1->C1, s=2) -> ReLU -> pool ----
    _fill_padded(s1a, x_ref[...], W, M1)
    a = _conv3x3(s1a, None, w11_ref, b11_ref, m1_ref, H, W)      # VPU (Cin=1)
    _fill_padded(s1b, a, W, M1)
    a = _conv3x3(s1b, p1, w12_ref, b12_ref, m1_ref, H, W)        # MXU, stride-1 superset
    a = jnp.maximum(a, 0.0)                                      # ReLU
    y1 = _stride2_maxpool(s1p, sel1_ref, a, H, W)                # (C1, M2) f32

    # ---- layer 2: conv1(C1->C2) -> conv2(C2->C2, s=2) -> ReLU -> pool ----
    _fill_padded(s2a, y1, W2, M2)
    a = _conv3x3(s2a, p2a, w21_ref, b21_ref, m2_ref, H2, W2)
    _fill_padded(s2b, a, W2, M2)
    a = _conv3x3(s2b, p2b, w22_ref, b22_ref, m2_ref, H2, W2)
    a = jnp.maximum(a, 0.0)
    out_ref[...] = _stride2_maxpool(s2p, sel2_ref, a, H2, W2)    # (C2, M2 // 16)


# ---------------------------------------------------------------------------
# Host-side helpers (per-step-invariant constants, weight prep)
# ---------------------------------------------------------------------------
def _prep_w(w):
    """(Cout, Cin, KH, KW) OIHW -> (Cout, KH*KW*Cin) bf16; column order
    (kh, kw, ci), matching the kernel's patch-row order."""
    cout, cin, kh, kw = w.shape
    return w.transpose(0, 2, 3, 1).reshape(cout, kh * kw * cin).astype(jnp.bfloat16)


def _prep_b(b):
    return b.reshape(-1, 1).astype(jnp.float32)


def _col_masks_host(W, M):
    """(2, M) bf16 {0,1} masks over the flattened row-major spatial axis that
    zero elements which would wrap across image rows under a +/-1 col shift."""
    col = (jnp.arange(M, dtype=jnp.int32) % W).reshape(1, M)
    mask_left = (col > 0).astype(jnp.bfloat16)        # used for dx == -1
    mask_right = (col < (W - 1)).astype(jnp.bfloat16)  # used for dx == +1
    return jnp.concatenate([mask_left, mask_right], axis=0)


def _pool_select_host(H, W, dtype):
    """(M, Mp) 0/1 matrix selecting every 4th row/col of the flattened H x W
    stride-1 conv output (== stride-2 conv followed by 2x2/2 max-pool sites)."""
    M = H * W
    Wp = W // 4
    Mp = (H // 4) * Wp
    k = jnp.arange(M, dtype=jnp.int32).reshape(M, 1)
    p = jnp.arange(Mp, dtype=jnp.int32).reshape(1, Mp)
    sel = (k == 4 * (p // Wp) * W + 4 * (p % Wp))
    return sel.astype(dtype)


def encoder_forward(x_nchw, params1, params2):
    """Forward pass of the PyTorch Encoder.  x_nchw: (N, 1, H, W) float32;
    params_i = (conv1_w, conv1_b, conv2_w, conv2_b), conv weights in OIHW."""
    w11, b11, w12, b12 = params1
    w21, b21, w22, b22 = params2
    N, cin, H, W = x_nchw.shape
    assert cin == 1 and H % 16 == 0 and W % 16 == 0
    C1 = w11.shape[0]
    C2 = w21.shape[0]
    M1 = H * W
    H2, W2 = H // 4, W // 4
    M2 = H2 * W2
    Mo = (H2 // 4) * (W2 // 4)
    P1 = (H + 2) * W + 2
    P2 = (H2 + 2) * W2 + 2

    x = x_nchw.reshape(N, 1, M1)       # NCHW row-major == flattened layout (free)

    masks1 = _col_masks_host(W, M1)
    masks2 = _col_masks_host(W2, M2)
    sel1 = _pool_select_host(H, W, jnp.bfloat16)     # (M1, M2) bf16
    sel2 = _pool_select_host(H2, W2, jnp.float32)    # (M2, Mo) f32

    flops = 2 * N * (9 * C1 * M1 + 9 * C1 * C1 * M1 + C1 * M1 * M2 +
                     9 * C1 * C2 * M2 + 9 * C2 * C2 * M2 + C2 * M2 * Mo)
    bytes_accessed = (4 * N * M1 + 4 * N * C2 * Mo +
                      2 * 9 * (C1 + C1 * C1 + C1 * C2 + C2 * C2) +
                      4 * 2 * (C1 + C2) +
                      2 * (2 * M1 + 2 * M2 + M1 * M2) + 4 * M2 * Mo)

    out = pl.pallas_call(
        functools.partial(_encoder_kernel, H=H, W=W),
        out_shape=jax.ShapeDtypeStruct((N, C2, Mo), jnp.float32),
        grid=(N,),
        in_specs=[
            pl.BlockSpec((None, 1, M1), lambda n: (n, 0, 0)),     # one image
            pl.BlockSpec((C1, 9), lambda n: (0, 0)),              # layer1 conv1 w
            pl.BlockSpec((C1, 1), lambda n: (0, 0)),              # layer1 conv1 b
            pl.BlockSpec((C1, 9 * C1), lambda n: (0, 0)),         # layer1 conv2 w
            pl.BlockSpec((C1, 1), lambda n: (0, 0)),              # layer1 conv2 b
            pl.BlockSpec((C2, 9 * C1), lambda n: (0, 0)),         # layer2 conv1 w
            pl.BlockSpec((C2, 1), lambda n: (0, 0)),              # layer2 conv1 b
            pl.BlockSpec((C2, 9 * C2), lambda n: (0, 0)),         # layer2 conv2 w
            pl.BlockSpec((C2, 1), lambda n: (0, 0)),              # layer2 conv2 b
            pl.BlockSpec((2, M1), lambda n: (0, 0)),              # layer1 col masks
            pl.BlockSpec((2, M2), lambda n: (0, 0)),              # layer2 col masks
            pl.BlockSpec((M1, M2), lambda n: (0, 0)),             # layer1 pool select
            pl.BlockSpec((M2, Mo), lambda n: (0, 0)),             # layer2 pool select
        ],
        out_specs=pl.BlockSpec((None, C2, Mo), lambda n: (n, 0, 0)),
        scratch_shapes=[
            pltpu.VMEM((1, P1), jnp.bfloat16),       # padded input, layer1 conv1
            pltpu.VMEM((C1, P1), jnp.bfloat16),      # padded input, layer1 conv2
            pltpu.VMEM((9 * C1, M1), jnp.bfloat16),  # im2col patches, layer1 conv2
            pltpu.VMEM((C1, P1), jnp.bfloat16),      # pool staging, layer1 (bf16 is exact here)
            pltpu.VMEM((C1, P2), jnp.bfloat16),      # padded input, layer2 conv1
            pltpu.VMEM((9 * C1, M2), jnp.bfloat16),  # im2col patches, layer2 conv1
            pltpu.VMEM((C2, P2), jnp.bfloat16),      # padded input, layer2 conv2
            pltpu.VMEM((9 * C2, M2), jnp.bfloat16),  # im2col patches, layer2 conv2
            pltpu.VMEM((C2, P2), jnp.float32),       # pool staging, layer2 (final, keep f32)
        ],
        compiler_params=pltpu.CompilerParams(
            dimension_semantics=("parallel",)),
        cost_estimate=pl.CostEstimate(
            flops=flops, transcendentals=0, bytes_accessed=bytes_accessed),
    )(x, _prep_w(w11), _prep_b(b11), _prep_w(w12), _prep_b(b12),
      _prep_w(w21), _prep_b(b21), _prep_w(w22), _prep_b(b22),
      masks1, masks2, sel1, sel2)

    return out.reshape(N, C2, H // 16, W // 16)


# ---------------------------------------------------------------------------
# Deterministic init (PyTorch-style uniform fan-in scaling) + pure-JAX reference
# ---------------------------------------------------------------------------
def init_conv(key, cin, cout, k=3):
    kw_, kb_ = jax.random.split(key)
    bound = 1.0 / float((cin * k * k) ** 0.5)
    w = jax.random.uniform(kw_, (cout, cin, k, k), jnp.float32, -bound, bound)
    b = jax.random.uniform(kb_, (cout,), jnp.float32, -bound, bound)
    return w, b


def _reference_forward(x, params1, params2):
    def conv(x, w, b, stride):
        y = jax.lax.conv_general_dilated(
            x, w, window_strides=(stride, stride), padding=((1, 1), (1, 1)),
            dimension_numbers=("NCHW", "OIHW", "NCHW"))
        return y + b.reshape(1, -1, 1, 1)

    def layer(x, p, stride):
        w1, b1, w2, b2 = p
        x = conv(x, w1, b1, 1)
        x = conv(x, w2, b2, stride)
        x = jnp.maximum(x, 0.0)
        return jax.lax.reduce_window(x, -jnp.inf, jax.lax.max,
                                     (1, 1, 2, 2), (1, 1, 2, 2), "VALID")

    return layer(layer(x, params1, 2), params2, 2)


if __name__ == "__main__":
    key = jax.random.PRNGKey(0)
    k0, k1, k2, k3, k4 = jax.random.split(key, 5)

    # layer1: EncoderLayer(1 -> 32, stride=2); layer2: EncoderLayer(32 -> 16, stride=2)
    w11, b11 = init_conv(k1, 1, 32)
    w12, b12 = init_conv(k2, 32, 32)
    w21, b21 = init_conv(k3, 32, 16)
    w22, b22 = init_conv(k4, 16, 16)
    params1 = (w11, b11, w12, b12)
    params2 = (w21, b21, w22, b22)

    # NCHW input, matching the PyTorch module's expectation (1 input channel).
    x = jax.random.normal(k0, (2, 1, 32, 32), jnp.float32)

    y = jax.jit(encoder_forward)(x, params1, params2)
    y = jax.block_until_ready(y)
    assert y.shape == (2, 16, 2, 2), y.shape
    assert bool(jnp.all(jnp.isfinite(y)))

    # Loose tolerance: the kernel feeds the MXU bf16 inputs (f32 accumulation),
    # so small rounding differences vs. the f32 XLA reference are expected.
    y_ref = _reference_forward(x, params1, params2)
    scale = max(1.0, float(jnp.max(jnp.abs(y_ref))))
    max_err = float(jnp.max(jnp.abs(y - y_ref)))
    assert max_err < 5e-2 * scale, f"max abs error vs reference: {max_err}"
    print("KERNEL_OK")
</pallas_src>

<mosaic_0001>
module attributes {stable_mosaic.version = 11 : i64} {
  func.func @_encoder_kernel(%arg0: i32, %arg1: memref<1x1x1024xf32, #tpu.memory_space<vmem>>, %arg2: memref<32x9xbf16, #tpu.memory_space<vmem>>, %arg3: memref<32x1xf32, #tpu.memory_space<vmem>>, %arg4: memref<32x288xbf16, #tpu.memory_space<vmem>>, %arg5: memref<32x1xf32, #tpu.memory_space<vmem>>, %arg6: memref<16x288xbf16, #tpu.memory_space<vmem>>, %arg7: memref<16x1xf32, #tpu.memory_space<vmem>>, %arg8: memref<16x144xbf16, #tpu.memory_space<vmem>>, %arg9: memref<16x1xf32, #tpu.memory_space<vmem>>, %arg10: memref<2x1024xbf16, #tpu.memory_space<vmem>>, %arg11: memref<2x64xbf16, #tpu.memory_space<vmem>>, %arg12: memref<1024x64xbf16, #tpu.memory_space<vmem>>, %arg13: memref<64x4xf32, #tpu.memory_space<vmem>>, %arg14: memref<1x16x4xf32, #tpu.memory_space<vmem>>, %arg15: memref<1x1090xbf16, #tpu.memory_space<vmem>>, %arg16: memref<32x1090xbf16, #tpu.memory_space<vmem>>, %arg17: memref<288x1024xbf16, #tpu.memory_space<vmem>>, %arg18: memref<32x1090xbf16, #tpu.memory_space<vmem>>, %arg19: memref<32x82xbf16, #tpu.memory_space<vmem>>, %arg20: memref<288x64xbf16, #tpu.memory_space<vmem>>, %arg21: memref<16x82xbf16, #tpu.memory_space<vmem>>, %arg22: memref<144x64xbf16, #tpu.memory_space<vmem>>, %arg23: memref<16x82xf32, #tpu.memory_space<vmem>>) attributes {dimension_semantics = [#tpu.dimension_semantics<parallel>], iteration_bounds = array<i64: 2>, scalar_prefetch = 0 : i64, scratch_operands = 9 : i64, tpu.core_type = #tpu.core_type<tc>, window_params = [{transform_indices = @transform_0, window_bounds = array<i64: 1, 1, 1024>}, {pipeline_mode = #tpu.pipeline_mode<synchronous>, transform_indices = @transform_1, window_bounds = array<i64: 32, 9>}, {pipeline_mode = #tpu.pipeline_mode<synchronous>, transform_indices = @transform_2, window_bounds = array<i64: 32, 1>}, {pipeline_mode = #tpu.pipeline_mode<synchronous>, transform_indices = @transform_3, window_bounds = array<i64: 32, 288>}, {pipeline_mode = #tpu.pipeline_mode<synchronous>, transform_indices = @transform_4, window_bounds = array<i64: 32, 1>}, {pipeline_mode = #tpu.pipeline_mode<synchronous>, transform_indices = @transform_5, window_bounds = array<i64: 16, 288>}, {pipeline_mode = #tpu.pipeline_mode<synchronous>, transform_indices = @transform_6, window_bounds = array<i64: 16, 1>}, {pipeline_mode = #tpu.pipeline_mode<synchronous>, transform_indices = @transform_7, window_bounds = array<i64: 16, 144>}, {pipeline_mode = #tpu.pipeline_mode<synchronous>, transform_indices = @transform_8, window_bounds = array<i64: 16, 1>}, {pipeline_mode = #tpu.pipeline_mode<synchronous>, transform_indices = @transform_9, window_bounds = array<i64: 2, 1024>}, {pipeline_mode = #tpu.pipeline_mode<synchronous>, transform_indices = @transform_10, window_bounds = array<i64: 2, 64>}, {pipeline_mode = #tpu.pipeline_mode<synchronous>, transform_indices = @transform_11, window_bounds = array<i64: 1024, 64>}, {pipeline_mode = #tpu.pipeline_mode<synchronous>, transform_indices = @transform_12, window_bounds = array<i64: 64, 4>}, {transform_indices = @transform_13, window_bounds = array<i64: 1, 16, 4>}]} {
    %c0 = arith.constant 0 : index
    %c0_0 = arith.constant 0 : index
    %c0_1 = arith.constant 0 : index
    %0 = vector.load %arg1[%c0, %c0_0, %c0_1] : memref<1x1x1024xf32, #tpu.memory_space<vmem>>, vector<1x1x1024xf32>
    %1 = vector.shape_cast %0 : vector<1x1x1024xf32> to vector<1x1024xf32>
    %cst = arith.constant 0.000000e+00 : bf16
    %2 = vector.broadcast %cst : bf16 to vector<1x33xbf16>
    %c0_2 = arith.constant 0 : index
    %c0_3 = arith.constant 0 : index
    %3 = vector.load %arg15[%c0_2, %c0_3] : memref<1x1090xbf16, #tpu.memory_space<vmem>>, vector<1x33xbf16>
    tpu.vector_store %arg15[%c0_2, %c0_3], %2 {strides = array<i32>} : memref<1x1090xbf16, #tpu.memory_space<vmem>>, vector<1x33xbf16>,
    %c0_4 = arith.constant 0 : index
    %c1057 = arith.constant 1057 : index
    %4 = vector.load %arg15[%c0_4, %c1057] : memref<1x1090xbf16, #tpu.memory_space<vmem>>, vector<1x33xbf16>
    tpu.vector_store %arg15[%c0_4, %c1057], %2 {strides = array<i32>} : memref<1x1090xbf16, #tpu.memory_space<vmem>>, vector<1x33xbf16>,
    %5 = arith.truncf %1 : vector<1x1024xf32> to vector<1x1024xbf16>
    %c0_5 = arith.constant 0 : index
    %c33 = arith.constant 33 : index
    %6 = vector.load %arg15[%c0_5, %c33] : memref<1x1090xbf16, #tpu.memory_space<vmem>>, vector<1x1024xbf16>
    tpu.vector_store %arg15[%c0_5, %c33], %5 {strides = array<i32>} : memref<1x1090xbf16, #tpu.memory_space<vmem>>, vector<1x1024xbf16>,
    %c0_6 = arith.constant 0 : index
    %c0_7 = arith.constant 0 : index
    %7 = vector.load %arg10[%c0_6, %c0_7] : memref<2x1024xbf16, #tpu.memory_space<vmem>>, vector<1x1024xbf16>
    %c1 = arith.constant 1 : index
    %c0_8 = arith.constant 0 : index
    %8 = vector.load %arg10[%c1, %c0_8] : memref<2x1024xbf16, #tpu.memory_space<vmem>>, vector<1x1024xbf16>
    %cst_9 = arith.constant 0.000000e+00 : f32
    %9 = vector.broadcast %cst_9 : f32 to vector<32x1024xf32>
    %c0_10 = arith.constant 0 : index
    %c0_11 = arith.constant 0 : index
    %10 = vector.load %arg2[%c0_10, %c0_11] : memref<32x9xbf16, #tpu.memory_space<vmem>>, vector<32x1xbf16>
    %11 = arith.extf %10 : vector<32x1xbf16> to vector<32x1xf32>
    %c0_12 = arith.constant 0 : index
    %c0_13 = arith.constant 0 : index
    %12 = vector.load %arg15[%c0_12, %c0_13] : memref<1x1090xbf16, #tpu.memory_space<vmem>>, vector<1x1024xbf16>
    %13 = arith.mulf %12, %7 : vector<1x1024xbf16>
    %14 = arith.extf %13 : vector<1x1024xbf16> to vector<1x1024xf32>
    %15 = vector.broadcast %11 : vector<32x1xf32> to vector<32x1024xf32>
    %16 = vector.broadcast %14 : vector<1x1024xf32> to vector<32x1024xf32>
    %17 = arith.mulf %15, %16 : vector<32x1024xf32>
    %18 = arith.addf %9, %17 : vector<32x1024xf32>
    %c0_14 = arith.constant 0 : index
    %c1_15 = arith.constant 1 : index
    %19 = vector.load %arg2[%c0_14, %c1_15] : memref<32x9xbf16, #tpu.memory_space<vmem>>, vector<32x1xbf16>
    %20 = arith.extf %19 : vector<32x1xbf16> to vector<32x1xf32>
    %c0_16 = arith.constant 0 : index
    %c1_17 = arith.constant 1 : index
    %21 = vector.load %arg15[%c0_16, %c1_17] : memref<1x1090xbf16, #tpu.memory_space<vmem>>, vector<1x1024xbf16>
    %22 = arith.extf %21 : vector<1x1024xbf16> to vector<1x1024xf32>
    %23 = vector.broadcast %20 : vector<32x1xf32> to vector<32x1024xf32>
    %24 = vector.broadcast %22 : vector<1x1024xf32> to vector<32x1024xf32>
    %25 = arith.mulf %23, %24 : vector<32x1024xf32>
    %26 = arith.addf %18, %25 : vector<32x1024xf32>
    %c0_18 = arith.constant 0 : index
    %c2 = arith.constant 2 : index
    %27 = vector.load %arg2[%c0_18, %c2] : memref<32x9xbf16, #tpu.memory_space<vmem>>, vector<32x1xbf16>
    %28 = arith.extf %27 : vector<32x1xbf16> to vector<32x1xf32>
    %c0_19 = arith.constant 0 : index
    %c2_20 = arith.constant 2 : index
    %29 = vector.load %arg15[%c0_19, %c2_20] : memref<1x1090xbf16, #tpu.memory_space<vmem>>, vector<1x1024xbf16>
    %30 = arith.mulf %29, %8 : vector<1x1024xbf16>
    %31 = arith.extf %30 : vector<1x1024xbf16> to vector<1x1024xf32>
    %32 = vector.broadcast %28 : vector<32x1xf32> to vector<32x1024xf32>
    %33 = vector.broadcast %31 : vector<1x1024xf32> to vector<32x1024xf32>
    %34 = arith.mulf %32, %33 : vector<32x1024xf32>
    %35 = arith.addf %26, %34 : vector<32x1024xf32>
    %c0_21 = arith.constant 0 : index
    %c3 = arith.constant 3 : index
    %36 = vector.load %arg2[%c0_21, %c3] : memref<32x9xbf16, #tpu.memory_space<vmem>>, vector<32x1xbf16>
    %37 = arith.extf %36 : vector<32x1xbf16> to vector<32x1xf32>
    %c0_22 = arith.constant 0 : index
    %c32 = arith.constant 32 : index
    %38 = vector.load %arg15[%c0_22, %c32] : memref<1x1090xbf16, #tpu.memory_space<vmem>>, vector<1x1024xbf16>
    %39 = arith.mulf %38, %7 : vector<1x1024xbf16>
    %40 = arith.extf %39 : vector<1x1024xbf16> to vector<1x1024xf32>
    %41 = vector.broadcast %37 : vector<32x1xf32> to vector<32x1024xf32>
    %42 = vector.broadcast %40 : vector<1x1024xf32> to vector<32x1024xf32>
    %43 = arith.mulf %41, %42 : vector<32x1024xf32>
    %44 = arith.addf %35, %43 : vector<32x1024xf32>
    %c0_23 = arith.constant 0 : index
    %c4 = arith.constant 4 : index
    %45 = vector.load %arg2[%c0_23, %c4] : memref<32x9xbf16, #tpu.memory_space<vmem>>, vector<32x1xbf16>
    %46 = arith.extf %45 : vector<32x1xbf16> to vector<32x1xf32>
    %c0_24 = arith.constant 0 : index
    %c33_25 = arith.constant 33 : index
    %47 = vector.load %arg15[%c0_24, %c33_25] : memref<1x1090xbf16, #tpu.memory_space<vmem>>, vector<1x1024xbf16>
    %48 = arith.extf %47 : vector<1x1024xbf16> to vector<1x1024xf32>
    %49 = vector.broadcast %46 : vector<32x1xf32> to vector<32x1024xf32>
    %50 = vector.broadcast %48 : vector<1x1024xf32> to vector<32x1024xf32>
    %51 = arith.mulf %49, %50 : vector<32x1024xf32>
    %52 = arith.addf %44, %51 : vector<32x1024xf32>
    %c0_26 = arith.constant 0 : index
    %c5 = arith.constant 5 : index
    %53 = vector.load %arg2[%c0_26, %c5] : memref<32x9xbf16, #tpu.memory_space<vmem>>, vector<32x1xbf16>
    %54 = arith.extf %53 : vector<32x1xbf16> to vector<32x1xf32>
    %c0_27 = arith.constant 0 : index
    %c34 = arith.constant 34 : index
    %55 = vector.load %arg15[%c0_27, %c34] : memref<1x1090xbf16, #tpu.memory_space<vmem>>, vector<1x1024xbf16>
    %56 = arith.mulf %55, %8 : vector<1x1024xbf16>
    %57 = arith.extf %56 : vector<1x1024xbf16> to vector<1x1024xf32>
    %58 = vector.broadcast %54 : vector<32x1xf32> to vector<32x1024xf32>
    %59 = vector.broadcast %57 : vector<1x1024xf32> to vector<32x1024xf32>
    %60 = arith.mulf %58, %59 : vector<32x1024xf32>
    %61 = arith.addf %52, %60 : vector<32x1024xf32>
    %c0_28 = arith.constant 0 : index
    %c6 = arith.constant 6 : index
    %62 = vector.load %arg2[%c0_28, %c6] : memref<32x9xbf16, #tpu.memory_space<vmem>>, vector<32x1xbf16>
    %63 = arith.extf %62 : vector<32x1xbf16> to vector<32x1xf32>
    %c0_29 = arith.constant 0 : index
    %c64 = arith.constant 64 : index
    %64 = vector.load %arg15[%c0_29, %c64] : memref<1x1090xbf16, #tpu.memory_space<vmem>>, vector<1x1024xbf16>
    %65 = arith.mulf %64, %7 : vector<1x1024xbf16>
    %66 = arith.extf %65 : vector<1x1024xbf16> to vector<1x1024xf32>
    %67 = vector.broadcast %63 : vector<32x1xf32> to vector<32x1024xf32>
    %68 = vector.broadcast %66 : vector<1x1024xf32> to vector<32x1024xf32>
    %69 = arith.mulf %67, %68 : vector<32x1024xf32>
    %70 = arith.addf %61, %69 : vector<32x1024xf32>
    %c0_30 = arith.constant 0 : index
    %c7 = arith.constant 7 : index
    %71 = vector.load %arg2[%c0_30, %c7] : memref<32x9xbf16, #tpu.memory_space<vmem>>, vector<32x1xbf16>
    %72 = arith.extf %71 : vector<32x1xbf16> to vector<32x1xf32>
    %c0_31 = arith.constant 0 : index
    %c65 = arith.constant 65 : index
    %73 = vector.load %arg15[%c0_31, %c65] : memref<1x1090xbf16, #tpu.memory_space<vmem>>, vector<1x1024xbf16>
    %74 = arith.extf %73 : vector<1x1024xbf16> to vector<1x1024xf32>
    %75 = vector.broadcast %72 : vector<32x1xf32> to vector<32x1024xf32>
    %76 = vector.broadcast %74 : vector<1x1024xf32> to vector<32x1024xf32>
    %77 = arith.mulf %75, %76 : vector<32x1024xf32>
    %78 = arith.addf %70, %77 : vector<32x1024xf32>
    %c0_32 = arith.constant 0 : index
    %c8 = arith.constant 8 : index
    %79 = vector.load %arg2[%c0_32, %c8] : memref<32x9xbf16, #tpu.memory_space<vmem>>, vector<32x1xbf16>
    %80 = arith.extf %79 : vector<32x1xbf16> to vector<32x1xf32>
    %c0_33 = arith.constant 0 : index
    %c66 = arith.constant 66 : index
    %81 = vector.load %arg15[%c0_33, %c66] : memref<1x1090xbf16, #tpu.memory_space<vmem>>, vector<1x1024xbf16>
    %82 = arith.mulf %81, %8 : vector<1x1024xbf16>
    %83 = arith.extf %82 : vector<1x1024xbf16> to vector<1x1024xf32>
    %84 = vector.broadcast %80 : vector<32x1xf32> to vector<32x1024xf32>
    %85 = vector.broadcast %83 : vector<1x1024xf32> to vector<32x1024xf32>
    %86 = arith.mulf %84, %85 : vector<32x1024xf32>
    %87 = arith.addf %78, %86 : vector<32x1024xf32>
    %c0_34 = arith.constant 0 : index
    %c0_35 = arith.constant 0 : index
    %88 = vector.load %arg3[%c0_34, %c0_35] : memref<32x1xf32, #tpu.memory_space<vmem>>, vector<32x1xf32>
    %89 = vector.broadcast %88 : vector<32x1xf32> to vector<32x1024xf32>
    %90 = arith.addf %87, %89 : vector<32x1024xf32>
    %cst_36 = arith.constant 0.000000e+00 : bf16
    %91 = vector.broadcast %cst_36 : bf16 to vector<32x33xbf16>
    %c0_37 = arith.constant 0 : index
    %c0_38 = arith.constant 0 : index
    %92 = vector.load %arg16[%c0_37, %c0_38] : memref<32x1090xbf16, #tpu.memory_space<vmem>>, vector<32x33xbf16>
    tpu.vector_store %arg16[%c0_37, %c0_38], %91 {strides = array<i32>} : memref<32x1090xbf16, #tpu.memory_space<vmem>>, vector<32x33xbf16>,
    %c0_39 = arith.constant 0 : index
    %c1057_40 = arith.constant 1057 : index
    %93 = vector.load %arg16[%c0_39, %c1057_40] : memref<32x1090xbf16, #tpu.memory_space<vmem>>, vector<32x33xbf16>
    tpu.vector_store %arg16[%c0_39, %c1057_40], %91 {strides = array<i32>} : memref<32x1090xbf16, #tpu.memory_space<vmem>>, vector<32x33xbf16>,
    %94 = arith.truncf %90 : vector<32x1024xf32> to vector<32x1024xbf16>
    %c0_41 = arith.constant 0 : index
    %c33_42 = arith.constant 33 : index
    %95 = vector.load %arg16[%c0_41, %c33_42] : memref<32x1090xbf16, #tpu.memory_space<vmem>>, vector<32x1024xbf16>
    tpu.vector_store %arg16[%c0_41, %c33_42], %94 {strides = array<i32>} : memref<32x1090xbf16, #tpu.memory_space<vmem>>, vector<32x1024xbf16>,
    %c0_43 = arith.constant 0 : index
    %c0_44 = arith.constant 0 : index
    %96 = vector.load %arg10[%c0_43, %c0_44] : memref<2x1024xbf16, #tpu.memory_space<vmem>>, vector<1x1024xbf16>
    %c1_45 = arith.constant 1 : index
    %c0_46 = arith.constant 0 : index
    %97 = vector.load %arg10[%c1_45, %c0_46] : memref<2x1024xbf16, #tpu.memory_space<vmem>>, vector<1x1024xbf16>
    %c0_47 = arith.constant 0 : index
    %c0_48 = arith.constant 0 : index
    %98 = vector.load %arg16[%c0_47, %c0_48] : memref<32x1090xbf16, #tpu.memory_space<vmem>>, vector<32x1024xbf16>
    %99 = vector.broadcast %96 : vector<1x1024xbf16> to vector<32x1024xbf16>
    %100 = arith.mulf %98, %99 : vector<32x1024xbf16>
    %c0_49 = arith.constant 0 : index
    %c0_50 = arith.constant 0 : index
    %101 = vector.load %arg17[%c0_49, %c0_50] : memref<288x1024xbf16, #tpu.memory_space<vmem>>, vector<32x1024xbf16>
    tpu.vector_store %arg17[%c0_49, %c0_50], %100 {strides = array<i32>} : memref<288x1024xbf16, #tpu.memory_space<vmem>>, vector<32x1024xbf16>,
    %c0_51 = arith.constant 0 : index
    %c1_52 = arith.constant 1 : index
    %102 = vector.load %arg16[%c0_51, %c1_52] : memref<32x1090xbf16, #tpu.memory_space<vmem>>, vector<32x1024xbf16>
    %c32_53 = arith.constant 32 : index
    %c0_54 = arith.constant 0 : index
    %103 = vector.load %arg17[%c32_53, %c0_54] : memref<288x1024xbf16, #tpu.memory_space<vmem>>, vector<32x1024xbf16>
    tpu.vector_store %arg17[%c32_53, %c0_54], %102 {strides = array<i32>} : memref<288x1024xbf16, #tpu.memory_space<vmem>>, vector<32x1024xbf16>,
    %c0_55 = arith.constant 0 : index
    %c2_56 = arith.constant 2 : index
    %104 = vector.load %arg16[%c0_55, %c2_56] : memref<32x1090xbf16, #tpu.memory_space<vmem>>, vector<32x1024xbf16>
    %105 = vector.broadcast %97 : vector<1x1024xbf16> to vector<32x1024xbf16>
    %106 = arith.mulf %104, %105 : vector<32x1024xbf16>
    %c64_57 = arith.constant 64 : index
    %c0_58 = arith.constant 0 : index
    %107 = vector.load %arg17[%c64_57, %c0_58] : memref<288x1024xbf16, #tpu.memory_space<vmem>>, vector<32x1024xbf16>
    tpu.vector_store %arg17[%c64_57, %c0_58], %106 {strides = array<i32>} : memref<288x1024xbf16, #tpu.memory_space<vmem>>, vector<32x1024xbf16>,
    %c0_59 = arith.constant 0 : index
    %c32_60 = arith.constant 32 : index
    %108 = vector.load %arg16[%c0_59, %c32_60] : memref<32x1090xbf16, #tpu.memory_space<vmem>>, vector<32x1024xbf16>
    %109 = vector.broadcast %96 : vector<1x1024xbf16> to vector<32x1024xbf16>
    %110 = arith.mulf %108, %109 : vector<32x1024xbf16>
    %c96 = arith.constant 96 : index
    %c0_61 = arith.constant 0 : index
    %111 = vector.load %arg17[%c96, %c0_61] : memref<288x1024xbf16, #tpu.memory_space<vmem>>, vector<32x1024xbf16>
    tpu.vector_store %arg17[%c96, %c0_61], %110 {strides = array<i32>} : memref<288x1024xbf16, #tpu.memory_space<vmem>>, vector<32x1024xbf16>,
    %c0_62 = arith.constant 0 : index
    %c33_63 = arith.constant 33 : index
    %112 = vector.load %arg16[%c0_62, %c33_63] : memref<32x1090xbf16, #tpu.memory_space<vmem>>, vector<32x1024xbf16>
    %c128 = arith.constant 128 : index
    %c0_64 = arith.constant 0 : index
    %113 = vector.load %arg17[%c128, %c0_64] : memref<288x1024xbf16, #tpu.memory_space<vmem>>, vector<32x1024xbf16>
    tpu.vector_store %arg17[%c128, %c0_64], %112 {strides = array<i32>} : memref<288x1024xbf16, #tpu.memory_space<vmem>>, vector<32x1024xbf16>,
    %c0_65 = arith.constant 0 : index
    %c34_66 = arith.constant 34 : index
    %114 = vector.load %arg16[%c0_65, %c34_66] : memref<32x1090xbf16, #tpu.memory_space<vmem>>, vector<32x1024xbf16>
    %115 = vector.broadcast %97 : vector<1x1024xbf16> to vector<32x1024xbf16>
    %116 = arith.mulf %114, %115 : vector<32x1024xbf16>
    %c160 = arith.constant 160 : index
    %c0_67 = arith.constant 0 : index
    %117 = vector.load %arg17[%c160, %c0_67] : memref<288x1024xbf16, #tpu.memory_space<vmem>>, vector<32x1024xbf16>
    tpu.vector_store %arg17[%c160, %c0_67], %116 {strides = array<i32>} : memref<288x1024xbf16, #tpu.memory_space<vmem>>, vector<32x1024xbf16>,
    %c0_68 = arith.constant 0 : index
    %c64_69 = arith.constant 64 : index
    %118 = vector.load %arg16[%c0_68, %c64_69] : memref<32x1090xbf16, #tpu.memory_space<vmem>>, vector<32x1024xbf16>
    %119 = vector.broadcast %96 : vector<1x1024xbf16> to vector<32x1024xbf16>
    %120 = arith.mulf %118, %119 : vector<32x1024xbf16>
    %c192 = arith.constant 192 : index
    %c0_70 = arith.constant 0 : index
    %121 = vector.load %arg17[%c192, %c0_70] : memref<288x1024xbf16, #tpu.memory_space<vmem>>, vector<32x1024xbf16>
    tpu.vector_store %arg17[%c192, %c0_70], %120 {strides = array<i32>} : memref<288x1024xbf16, #tpu.memory_space<vmem>>, vector<32x1024xbf16>,
    %c0_71 = arith.constant 0 : index
    %c65_72 = arith.constant 65 : index
    %122 = vector.load %arg16[%c0_71, %c65_72] : memref<32x1090xbf16, #tpu.memory_space<vmem>>, vector<32x1024xbf16>
    %c224 = arith.constant 224 : index
    %c0_73 = arith.constant 0 : index
    %123 = vector.load %arg17[%c224, %c0_73] : memref<288x1024xbf16, #tpu.memory_space<vmem>>, vector<32x1024xbf16>
    tpu.vector_store %arg17[%c224, %c0_73], %122 {strides = array<i32>} : memref<288x1024xbf16, #tpu.memory_space<vmem>>, vector<32x1024xbf16>,
    %c0_74 = arith.constant 0 : index
    %c66_75 = arith.constant 66 : index
    %124 = vector.load %arg16[%c0_74, %c66_75] : memref<32x1090xbf16, #tpu.memory_space<vmem>>, vector<32x1024xbf16>
    %125 = vector.broadcast %97 : vector<1x1024xbf16> to vector<32x1024xbf16>
    %126 = arith.mulf %124, %125 : vector<32x1024xbf16>
    %c256 = arith.constant 256 : index
    %c0_76 = arith.constant 0 : index
    %127 = vector.load %arg17[%c256, %c0_76] : memref<288x1024xbf16, #tpu.memory_space<vmem>>, vector<32x1024xbf16>
    tpu.vector_store %arg17[%c256, %c0_76], %126 {strides = array<i32>} : memref<288x1024xbf16, #tpu.memory_space<vmem>>, vector<32x1024xbf16>,
    %c0_77 = arith.constant 0 : index
    %c0_78 = arith.constant 0 : index
    %128 = vector.load %arg4[%c0_77, %c0_78] : memref<32x288xbf16, #tpu.memory_space<vmem>>, vector<32x288xbf16>
    %c0_79 = arith.constant 0 : index
    %c0_80 = arith.constant 0 : index
    %129 = vector.load %arg17[%c0_79, %c0_80] : memref<288x1024xbf16, #tpu.memory_space<vmem>>, vector<288x1024xbf16>
    %cst_81 = arith.constant dense<0.000000e+00> : vector<32x1024xf32>
    %130 = tpu.matmul %128, %129, %cst_81 {dimension_numbers = #tpu.dot_dimension_numbers<[1], [0], [0], [1], [0, 0, 1, 1], [], []>} : vector<32x288xbf16>, vector<288x1024xbf16>, vector<32x1024xf32> -> vector<32x1024xf32>
    %c0_82 = arith.constant 0 : index
    %c0_83 = arith.constant 0 : index
    %131 = vector.load %arg5[%c0_82, %c0_83] : memref<32x1xf32, #tpu.memory_space<vmem>>, vector<32x1xf32>
    %132 = vector.broadcast %131 : vector<32x1xf32> to vector<32x1024xf32>
    %133 = arith.addf %130, %132 : vector<32x1024xf32>
    %cst_84 = arith.constant 0.000000e+00 : f32
    %134 = vector.broadcast %cst_84 : f32 to vector<32x1024xf32>
    %135 = arith.maximumf %133, %134 : vector<32x1024xf32>
    %cst_85 = arith.constant 0.000000e+00 : bf16
    %136 = vector.broadcast %cst_85 : bf16 to vector<32x66xbf16>
    %c0_86 = arith.constant 0 : index
    %c1024 = arith.constant 1024 : index
    %137 = vector.load %arg18[%c0_86, %c1024] : memref<32x1090xbf16, #tpu.memory_space<vmem>>, vector<32x66xbf16>
    tpu.vector_store %arg18[%c0_86, %c1024], %136 {strides = array<i32>} : memref<32x1090xbf16, #tpu.memory_space<vmem>>, vector<32x66xbf16>,
    %138 = arith.truncf %135 : vector<32x1024xf32> to vector<32x1024xbf16>
    %c0_87 = arith.constant 0 : index
    %c0_88 = arith.constant 0 : index
    %139 = vector.load %arg18[%c0_87, %c0_88] : memref<32x1090xbf16, #tpu.memory_space<vmem>>, vector<32x1024xbf16>
    tpu.vector_store %arg18[%c0_87, %c0_88], %138 {strides = array<i32>} : memref<32x1090xbf16, #tpu.memory_space<vmem>>, vector<32x1024xbf16>,
    %c0_89 = arith.constant 0 : index
    %c2_90 = arith.constant 2 : index
    %140 = vector.load %arg18[%c0_89, %c2_90] : memref<32x1090xbf16, #tpu.memory_space<vmem>>, vector<32x1024xbf16>
    %141 = arith.maximumf %138, %140 : vector<32x1024xbf16>
    %c0_91 = arith.constant 0 : index
    %c64_92 = arith.constant 64 : index
    %142 = vector.load %arg18[%c0_91, %c64_92] : memref<32x1090xbf16, #tpu.memory_space<vmem>>, vector<32x1024xbf16>
    %c0_93 = arith.constant 0 : index
    %c66_94 = arith.constant 66 : index
    %143 = vector.load %arg18[%c0_93, %c66_94] : memref<32x1090xbf16, #tpu.memory_space<vmem>>, vector<32x1024xbf16>
    %144 = arith.maximumf %142, %143 : vector<32x1024xbf16>
    %145 = arith.maximumf %141, %144 : vector<32x1024xbf16>
    %c0_95 = arith.constant 0 : index
    %c0_96 = arith.constant 0 : index
    %146 = vector.load %arg12[%c0_95, %c0_96] : memref<1024x64xbf16, #tpu.memory_space<vmem>>, vector<1024x64xbf16>
    %cst_97 = arith.constant dense<0.000000e+00> : vector<32x64xf32>
    %147 = tpu.matmul %145, %146, %cst_97 {dimension_numbers = #tpu.dot_dimension_numbers<[1], [0], [0], [1], [0, 0, 1, 1], [], []>} : vector<32x1024xbf16>, vector<1024x64xbf16>, vector<32x64xf32> -> vector<32x64xf32>
    %cst_98 = arith.constant 0.000000e+00 : bf16
    %148 = vector.broadcast %cst_98 : bf16 to vector<32x9xbf16>
    %c0_99 = arith.constant 0 : index
    %c0_100 = arith.constant 0 : index
    %149 = vector.load %arg19[%c0_99, %c0_100] : memref<32x82xbf16, #tpu.memory_space<vmem>>, vector<32x9xbf16>
    tpu.vector_store %arg19[%c0_99, %c0_100], %148 {strides = array<i32>} : memref<32x82xbf16, #tpu.memory_space<vmem>>, vector<32x9xbf16>,
    %c0_101 = arith.constant 0 : index
    %c73 = arith.constant 73 : index
    %150 = vector.load %arg19[%c0_101, %c73] : memref<32x82xbf16, #tpu.memory_space<vmem>>, vector<32x9xbf16>
    tpu.vector_store %arg19[%c0_101, %c73], %148 {strides = array<i32>} : memref<32x82xbf16, #tpu.memory_space<vmem>>, vector<32x9xbf16>,
    %151 = arith.truncf %147 : vector<32x64xf32> to vector<32x64xbf16>
    %c0_102 = arith.constant 0 : index
    %c9 = arith.constant 9 : index
    %152 = vector.load %arg19[%c0_102, %c9] : memref<32x82xbf16, #tpu.memory_space<vmem>>, vector<32x64xbf16>
    tpu.vector_store %arg19[%c0_102, %c9], %151 {strides = array<i32>} : memref<32x82xbf16, #tpu.memory_space<vmem>>, vector<32x64xbf16>,
    %c0_103 = arith.constant 0 : index
    %c0_104 = arith.constant 0 : index
    %153 = vector.load %arg11[%c0_103, %c0_104] : memref<2x64xbf16, #tpu.memory_space<vmem>>, vector<1x64xbf16>
    %c1_105 = arith.constant 1 : index
    %c0_106 = arith.constant 0 : index
    %154 = vector.load %arg11[%c1_105, %c0_106] : memref<2x64xbf16, #tpu.memory_space<vmem>>, vector<1x64xbf16>
    %c0_107 = arith.constant 0 : index
    %c0_108 = arith.constant 0 : index
    %155 = vector.load %arg19[%c0_107, %c0_108] : memref<32x82xbf16, #tpu.memory_space<vmem>>, vector<32x64xbf16>
    %156 = vector.broadcast %153 : vector<1x64xbf16> to vector<32x64xbf16>
    %157 = arith.mulf %155, %156 : vector<32x64xbf16>
    %c0_109 = arith.constant 0 : index
    %c0_110 = arith.constant 0 : index
    %158 = vector.load %arg20[%c0_109, %c0_110] : memref<288x64xbf16, #tpu.memory_space<vmem>>, vector<32x64xbf16>
    tpu.vector_store %arg20[%c0_109, %c0_110], %157 {strides = array<i32>} : memref<288x64xbf16, #tpu.memory_space<vmem>>, vector<32x64xbf16>,
    %c0_111 = arith.constant 0 : index
    %c1_112 = arith.constant 1 : index
    %159 = vector.load %arg19[%c0_111, %c1_112] : memref<32x82xbf16, #tpu.memory_space<vmem>>, vector<32x64xbf16>
    %c32_113 = arith.constant 32 : index
    %c0_114 = arith.constant 0 : index
    %160 = vector.load %arg20[%c32_113, %c0_114] : memref<288x64xbf16, #tpu.memory_space<vmem>>, vector<32x64xbf16>
    tpu.vector_store %arg20[%c32_113, %c0_114], %159 {strides = array<i32>} : memref<288x64xbf16, #tpu.memory_space<vmem>>, vector<32x64xbf16>,
    %c0_115 = arith.constant 0 : index
    %c2_116 = arith.constant 2 : index
    %161 = vector.load %arg19[%c0_115, %c2_116] : memref<32x82xbf16, #tpu.memory_space<vmem>>, vector<32x64xbf16>
    %162 = vector.broadcast %154 : vector<1x64xbf16> to vector<32x64xbf16>
    %163 = arith.mulf %161, %162 : vector<32x64xbf16>
    %c64_117 = arith.constant 64 : index
    %c0_118 = arith.constant 0 : index
    %164 = vector.load %arg20[%c64_117, %c0_118] : memref<288x64xbf16, #tpu.memory_space<vmem>>, vector<32x64xbf16>
    tpu.vector_store %arg20[%c64_117, %c0_118], %163 {strides = array<i32>} : memref<288x64xbf16, #tpu.memory_space<vmem>>, vector<32x64xbf16>,
    %c0_119 = arith.constant 0 : index
    %c8_120 = arith.constant 8 : index
    %165 = vector.load %arg19[%c0_119, %c8_120] : memref<32x82xbf16, #tpu.memory_space<vmem>>, vector<32x64xbf16>
    %166 = vector.broadcast %153 : vector<1x64xbf16> to vector<32x64xbf16>
    %167 = arith.mulf %165, %166 : vector<32x64xbf16>
    %c96_121 = arith.constant 96 : index
    %c0_122 = arith.constant 0 : index
    %168 = vector.load %arg20[%c96_121, %c0_122] : memref<288x64xbf16, #tpu.memory_space<vmem>>, vector<32x64xbf16>
    tpu.vector_store %arg20[%c96_121, %c0_122], %167 {strides = array<i32>} : memref<288x64xbf16, #tpu.memory_space<vmem>>, vector<32x64xbf16>,
    %c0_123 = arith.constant 0 : index
    %c9_124 = arith.constant 9 : index
    %169 = vector.load %arg19[%c0_123, %c9_124] : memref<32x82xbf16, #tpu.memory_space<vmem>>, vector<32x64xbf16>
    %c128_125 = arith.constant 128 : index
    %c0_126 = arith.constant 0 : index
    %170 = vector.load %arg20[%c128_125, %c0_126] : memref<288x64xbf16, #tpu.memory_space<vmem>>, vector<32x64xbf16>
    tpu.vector_store %arg20[%c128_125, %c0_126], %169 {strides = array<i32>} : memref<288x64xbf16, #tpu.memory_space<vmem>>, vector<32x64xbf16>,
    %c0_127 = arith.constant 0 : index
    %c10 = arith.constant 10 : index
    %171 = vector.load %arg19[%c0_127, %c10] : memref<32x82xbf16, #tpu.memory_space<vmem>>, vector<32x64xbf16>
    %172 = vector.broadcast %154 : vector<1x64xbf16> to vector<32x64xbf16>
    %173 = arith.mulf %171, %172 : vector<32x64xbf16>
    %c160_128 = arith.constant 160 : index
    %c0_129 = arith.constant 0 : index
    %174 = vector.load %arg20[%c160_128, %c0_129] : memref<288x64xbf16, #tpu.memory_space<vmem>>, vector<32x64xbf16>
    tpu.vector_store %arg20[%c160_128, %c0_129], %173 {strides = array<i32>} : memref<288x64xbf16, #tpu.memory_space<vmem>>, vector<32x64xbf16>,
    %c0_130 = arith.constant 0 : index
    %c16 = arith.constant 16 : index
    %175 = vector.load %arg19[%c0_130, %c16] : memref<32x82xbf16, #tpu.memory_space<vmem>>, vector<32x64xbf16>
    %176 = vector.broadcast %153 : vector<1x64xbf16> to vector<32x64xbf16>
    %177 = arith.mulf %175, %176 : vector<32x64xbf16>
    %c192_131 = arith.constant 192 : index
    %c0_132 = arith.constant 0 : index
    %178 = vector.load %arg20[%c192_131, %c0_132] : memref<288x64xbf16, #tpu.memory_space<vmem>>, vector<32x64xbf16>
    tpu.vector_store %arg20[%c192_131, %c0_132], %177 {strides = array<i32>} : memref<288x64xbf16, #tpu.memory_space<vmem>>, vector<32x64xbf16>,
    %c0_133 = arith.constant 0 : index
    %c17 = arith.constant 17 : index
    %179 = vector.load %arg19[%c0_133, %c17] : memref<32x82xbf16, #tpu.memory_space<vmem>>, vector<32x64xbf16>
    %c224_134 = arith.constant 224 : index
    %c0_135 = arith.constant 0 : index
    %180 = vector.load %arg20[%c224_134, %c0_135] : memref<288x64xbf16, #tpu.memory_space<vmem>>, vector<32x64xbf16>
    tpu.vector_store %arg20[%c224_134, %c0_135], %179 {strides = array<i32>} : memref<288x64xbf16, #tpu.memory_space<vmem>>, vector<32x64xbf16>,
    %c0_136 = arith.constant 0 : index
    %c18 = arith.constant 18 : index
    %181 = vector.load %arg19[%c0_136, %c18] : memref<32x82xbf16, #tpu.memory_space<vmem>>, vector<32x64xbf16>
    %182 = vector.broadcast %154 : vector<1x64xbf16> to vector<32x64xbf16>
    %183 = arith.mulf %181, %182 : vector<32x64xbf16>
    %c256_137 = arith.constant 256 : index
    %c0_138 = arith.constant 0 : index
    %184 = vector.load %arg20[%c256_137, %c0_138] : memref<288x64xbf16, #tpu.memory_space<vmem>>, vector<32x64xbf16>
    tpu.vector_store %arg20[%c256_137, %c0_138], %183 {strides = array<i32>} : memref<288x64xbf16, #tpu.memory_space<vmem>>, vector<32x64xbf16>,
    %c0_139 = arith.constant 0 : index
    %c0_140 = arith.constant 0 : index
    %185 = vector.load %arg6[%c0_139, %c0_140] : memref<16x288xbf16, #tpu.memory_space<vmem>>, vector<16x288xbf16>
    %c0_141 = arith.constant 0 : index
    %c0_142 = arith.constant 0 : index
    %186 = vector.load %arg20[%c0_141, %c0_142] : memref<288x64xbf16, #tpu.memory_space<vmem>>, vector<288x64xbf16>
    %cst_143 = arith.constant dense<0.000000e+00> : vector<16x64xf32>
    %187 = tpu.matmul %185, %186, %cst_143 {dimension_numbers = #tpu.dot_dimension_numbers<[1], [0], [0], [1], [0, 0, 1, 1], [], []>} : vector<16x288xbf16>, vector<288x64xbf16>, vector<16x64xf32> -> vector<16x64xf32>
    %c0_144 = arith.constant 0 : index
    %c0_145 = arith.constant 0 : index
    %188 = vector.load %arg7[%c0_144, %c0_145] : memref<16x1xf32, #tpu.memory_space<vmem>>, vector<16x1xf32>
    %189 = vector.broadcast %188 : vector<16x1xf32> to vector<16x64xf32>
    %190 = arith.addf %187, %189 : vector<16x64xf32>
    %cst_146 = arith.constant 0.000000e+00 : bf16
    %191 = vector.broadcast %cst_146 : bf16 to vector<16x9xbf16>
    %c0_147 = arith.constant 0 : index
    %c0_148 = arith.constant 0 : index
    %192 = vector.load %arg21[%c0_147, %c0_148] : memref<16x82xbf16, #tpu.memory_space<vmem>>, vector<16x9xbf16>
    tpu.vector_store %arg21[%c0_147, %c0_148], %191 {strides = array<i32>} : memref<16x82xbf16, #tpu.memory_space<vmem>>, vector<16x9xbf16>,
    %c0_149 = arith.constant 0 : index
    %c73_150 = arith.constant 73 : index
    %193 = vector.load %arg21[%c0_149, %c73_150] : memref<16x82xbf16, #tpu.memory_space<vmem>>, vector<16x9xbf16>
    tpu.vector_store %arg21[%c0_149, %c73_150], %191 {strides = array<i32>} : memref<16x82xbf16, #tpu.memory_space<vmem>>, vector<16x9xbf16>,
    %194 = arith.truncf %190 : vector<16x64xf32> to vector<16x64xbf16>
    %c0_151 = arith.constant 0 : index
    %c9_152 = arith.constant 9 : index
    %195 = vector.load %arg21[%c0_151, %c9_152] : memref<16x82xbf16, #tpu.memory_space<vmem>>, vector<16x64xbf16>
    tpu.vector_store %arg21[%c0_151, %c9_152], %194 {strides = array<i32>} : memref<16x82xbf16, #tpu.memory_space<vmem>>, vector<16x64xbf16>,
    %c0_153 = arith.constant 0 : index
    %c0_154 = arith.constant 0 : index
    %196 = vector.load %arg11[%c0_153, %c0_154] : memref<2x64xbf16, #tpu.memory_space<vmem>>, vector<1x64xbf16>
    %c1_155 = arith.constant 1 : index
    %c0_156 = arith.constant 0 : index
    %197 = vector.load %arg11[%c1_155, %c0_156] : memref<2x64xbf16, #tpu.memory_space<vmem>>, vector<1x64xbf16>
    %c0_157 = arith.constant 0 : index
    %c0_158 = arith.constant 0 : index
    %198 = vector.load %arg21[%c0_157, %c0_158] : memref<16x82xbf16, #tpu.memory_space<vmem>>, vector<16x64xbf16>
    %199 = vector.broadcast %196 : vector<1x64xbf16> to vector<16x64xbf16>
    %200 = arith.mulf %198, %199 : vector<16x64xbf16>
    %c0_159 = arith.constant 0 : index
    %c0_160 = arith.constant 0 : index
    %201 = vector.load %arg22[%c0_159, %c0_160] : memref<144x64xbf16, #tpu.memory_space<vmem>>, vector<16x64xbf16>
    tpu.vector_store %arg22[%c0_159, %c0_160], %200 {strides = array<i32>} : memref<144x64xbf16, #tpu.memory_space<vmem>>, vector<16x64xbf16>,
    %c0_161 = arith.constant 0 : index
    %c1_162 = arith.constant 1 : index
    %202 = vector.load %arg21[%c0_161, %c1_162] : memref<16x82xbf16, #tpu.memory_space<vmem>>, vector<16x64xbf16>
    %c16_163 = arith.constant 16 : index
    %c0_164 = arith.constant 0 : index
    %203 = vector.load %arg22[%c16_163, %c0_164] : memref<144x64xbf16, #tpu.memory_space<vmem>>, vector<16x64xbf16>
    tpu.vector_store %arg22[%c16_163, %c0_164], %202 {strides = array<i32>} : memref<144x64xbf16, #tpu.memory_space<vmem>>, vector<16x64xbf16>,
    %c0_165 = arith.constant 0 : index
    %c2_166 = arith.constant 2 : index
    %204 = vector.load %arg21[%c0_165, %c2_166] : memref<16x82xbf16, #tpu.memory_space<vmem>>, vector<16x64xbf16>
    %205 = vector.broadcast %197 : vector<1x64xbf16> to vector<16x64xbf16>
    %206 = arith.mulf %204, %205 : vector<16x64xbf16>
    %c32_167 = arith.constant 32 : index
    %c0_168 = arith.constant 0 : index
    %207 = vector.load %arg22[%c32_167, %c0_168] : memref<144x64xbf16, #tpu.memory_space<vmem>>, vector<16x64xbf16>
    tpu.vector_store %arg22[%c32_167, %c0_168], %206 {strides = array<i32>} : memref<144x64xbf16, #tpu.memory_space<vmem>>, vector<16x64xbf16>,
    %c0_169 = arith.constant 0 : index
    %c8_170 = arith.constant 8 : index
    %208 = vector.load %arg21[%c0_169, %c8_170] : memref<16x82xbf16, #tpu.memory_space<vmem>>, vector<16x64xbf16>
    %209 = vector.broadcast %196 : vector<1x64xbf16> to vector<16x64xbf16>
    %210 = arith.mulf %208, %209 : vector<16x64xbf16>
    %c48 = arith.constant 48 : index
    %c0_171 = arith.constant 0 : index
    %211 = vector.load %arg22[%c48, %c0_171] : memref<144x64xbf16, #tpu.memory_space<vmem>>, vector<16x64xbf16>
    tpu.vector_store %arg22[%c48, %c0_171], %210 {strides = array<i32>} : memref<144x64xbf16, #tpu.memory_space<vmem>>, vector<16x64xbf16>,
    %c0_172 = arith.constant 0 : index
    %c9_173 = arith.constant 9 : index
    %212 = vector.load %arg21[%c0_172, %c9_173] : memref<16x82xbf16, #tpu.memory_space<vmem>>, vector<16x64xbf16>
    %c64_174 = arith.constant 64 : index
    %c0_175 = arith.constant 0 : index
    %213 = vector.load %arg22[%c64_174, %c0_175] : memref<144x64xbf16, #tpu.memory_space<vmem>>, vector<16x64xbf16>
    tpu.vector_store %arg22[%c64_174, %c0_175], %212 {strides = array<i32>} : memref<144x64xbf16, #tpu.memory_space<vmem>>, vector<16x64xbf16>,
    %c0_176 = arith.constant 0 : index
    %c10_177 = arith.constant 10 : index
    %214 = vector.load %arg21[%c0_176, %c10_177] : memref<16x82xbf16, #tpu.memory_space<vmem>>, vector<16x64xbf16>
    %215 = vector.broadcast %197 : vector<1x64xbf16> to vector<16x64xbf16>
    %216 = arith.mulf %214, %215 : vector<16x64xbf16>
    %c80 = arith.constant 80 : index
    %c0_178 = arith.constant 0 : index
    %217 = vector.load %arg22[%c80, %c0_178] : memref<144x64xbf16, #tpu.memory_space<vmem>>, vector<16x64xbf16>
    tpu.vector_store %arg22[%c80, %c0_178], %216 {strides = array<i32>} : memref<144x64xbf16, #tpu.memory_space<vmem>>, vector<16x64xbf16>,
    %c0_179 = arith.constant 0 : index
    %c16_180 = arith.constant 16 : index
    %218 = vector.load %arg21[%c0_179, %c16_180] : memref<16x82xbf16, #tpu.memory_space<vmem>>, vector<16x64xbf16>
    %219 = vector.broadcast %196 : vector<1x64xbf16> to vector<16x64xbf16>
    %220 = arith.mulf %218, %219 : vector<16x64xbf16>
    %c96_181 = arith.constant 96 : index
    %c0_182 = arith.constant 0 : index
    %221 = vector.load %arg22[%c96_181, %c0_182] : memref<144x64xbf16, #tpu.memory_space<vmem>>, vector<16x64xbf16>
    tpu.vector_store %arg22[%c96_181, %c0_182], %220 {strides = array<i32>} : memref<144x64xbf16, #tpu.memory_space<vmem>>, vector<16x64xbf16>,
    %c0_183 = arith.constant 0 : index
    %c17_184 = arith.constant 17 : index
    %222 = vector.load %arg21[%c0_183, %c17_184] : memref<16x82xbf16, #tpu.memory_space<vmem>>, vector<16x64xbf16>
    %c112 = arith.constant 112 : index
    %c0_185 = arith.constant 0 : index
    %223 = vector.load %arg22[%c112, %c0_185] : memref<144x64xbf16, #tpu.memory_space<vmem>>, vector<16x64xbf16>
    tpu.vector_store %arg22[%c112, %c0_185], %222 {strides = array<i32>} : memref<144x64xbf16, #tpu.memory_space<vmem>>, vector<16x64xbf16>,
    %c0_186 = arith.constant 0 : index
    %c18_187 = arith.constant 18 : index
    %224 = vector.load %arg21[%c0_186, %c18_187] : memref<16x82xbf16, #tpu.memory_space<vmem>>, vector<16x64xbf16>
    %225 = vector.broadcast %197 : vector<1x64xbf16> to vector<16x64xbf16>
    %226 = arith.mulf %224, %225 : vector<16x64xbf16>
    %c128_188 = arith.constant 128 : index
    %c0_189 = arith.constant 0 : index
    %227 = vector.load %arg22[%c128_188, %c0_189] : memref<144x64xbf16, #tpu.memory_space<vmem>>, vector<16x64xbf16>
    tpu.vector_store %arg22[%c128_188, %c0_189], %226 {strides = array<i32>} : memref<144x64xbf16, #tpu.memory_space<vmem>>, vector<16x64xbf16>,
    %c0_190 = arith.constant 0 : index
    %c0_191 = arith.constant 0 : index
    %228 = vector.load %arg8[%c0_190, %c0_191] : memref<16x144xbf16, #tpu.memory_space<vmem>>, vector<16x144xbf16>
    %c0_192 = arith.constant 0 : index
    %c0_193 = arith.constant 0 : index
    %229 = vector.load %arg22[%c0_192, %c0_193] : memref<144x64xbf16, #tpu.memory_space<vmem>>, vector<144x64xbf16>
    %cst_194 = arith.constant dense<0.000000e+00> : vector<16x64xf32>
    %230 = tpu.matmul %228, %229, %cst_194 {dimension_numbers = #tpu.dot_dimension_numbers<[1], [0], [0], [1], [0, 0, 1, 1], [], []>} : vector<16x144xbf16>, vector<144x64xbf16>, vector<16x64xf32> -> vector<16x64xf32>
    %c0_195 = arith.constant 0 : index
    %c0_196 = arith.constant 0 : index
    %231 = vector.load %arg9[%c0_195, %c0_196] : memref<16x1xf32, #tpu.memory_space<vmem>>, vector<16x1xf32>
    %232 = vector.broadcast %231 : vector<16x1xf32> to vector<16x64xf32>
    %233 = arith.addf %230, %232 : vector<16x64xf32>
    %cst_197 = arith.constant 0.000000e+00 : f32
    %234 = vector.broadcast %cst_197 : f32 to vector<16x64xf32>
    %235 = arith.maximumf %233, %234 : vector<16x64xf32>
    %cst_198 = arith.constant 0.000000e+00 : f32
    %236 = vector.broadcast %cst_198 : f32 to vector<16x18xf32>
    %c0_199 = arith.constant 0 : index
    %c64_200 = arith.constant 64 : index
    %237 = vector.load %arg23[%c0_199, %c64_200] : memref<16x82xf32, #tpu.memory_space<vmem>>, vector<16x18xf32>
    tpu.vector_store %arg23[%c0_199, %c64_200], %236 {strides = array<i32>} : memref<16x82xf32, #tpu.memory_space<vmem>>, vector<16x18xf32>,
    %c0_201 = arith.constant 0 : index
    %c0_202 = arith.constant 0 : index
    %238 = vector.load %arg23[%c0_201, %c0_202] : memref<16x82xf32, #tpu.memory_space<vmem>>, vector<16x64xf32>
    tpu.vector_store %arg23[%c0_201, %c0_202], %235 {strides = array<i32>} : memref<16x82xf32, #tpu.memory_space<vmem>>, vector<16x64xf32>,
    %c0_203 = arith.constant 0 : index
    %c2_204 = arith.constant 2 : index
    %239 = vector.load %arg23[%c0_203, %c2_204] : memref<16x82xf32, #tpu.memory_space<vmem>>, vector<16x64xf32>
    %240 = arith.maximumf %235, %239 : vector<16x64xf32>
    %c0_205 = arith.constant 0 : index
    %c16_206 = arith.constant 16 : index
    %241 = vector.load %arg23[%c0_205, %c16_206] : memref<16x82xf32, #tpu.memory_space<vmem>>, vector<16x64xf32>
    %c0_207 = arith.constant 0 : index
    %c18_208 = arith.constant 18 : index
    %242 = vector.load %arg23[%c0_207, %c18_208] : memref<16x82xf32, #tpu.memory_space<vmem>>, vector<16x64xf32>
    %243 = arith.maximumf %241, %242 : vector<16x64xf32>
    %244 = arith.maximumf %240, %243 : vector<16x64xf32>
    %c0_209 = arith.constant 0 : index
    %c0_210 = arith.constant 0 : index
    %245 = vector.load %arg13[%c0_209, %c0_210] : memref<64x4xf32, #tpu.memory_space<vmem>>, vector<64x4xf32>
    %cst_211 = arith.constant dense<0.000000e+00> : vector<16x4xf32>
    %246 = tpu.matmul %244, %245, %cst_211 {dimension_numbers = #tpu.dot_dimension_numbers<[1], [0], [0], [1], [0, 0, 1, 1], [], []>} : vector<16x64xf32>, vector<64x4xf32>, vector<16x4xf32> -> vector<16x4xf32>
    %c0_212 = arith.constant 0 : index
    %c0_213 = arith.constant 0 : index
    %c0_214 = arith.constant 0 : index
    %247 = vector.load %arg14[%c0_212, %c0_213, %c0_214] : memref<1x16x4xf32, #tpu.memory_space<vmem>>, vector<1x16x4xf32>
    %248 = vector.shape_cast %247 : vector<1x16x4xf32> to vector<16x4xf32>
    %249 = vector.shape_cast %246 : vector<16x4xf32> to vector<1x16x4xf32>
    tpu.vector_store %arg14[%c0_212, %c0_213, %c0_214], %249 {strides = array<i32>} : memref<1x16x4xf32, #tpu.memory_space<vmem>>, vector<1x16x4xf32>,
    return
  }
  func.func @transform_0(%arg0: i32) -> (i32, i32, i32) {
    %c0_i32 = arith.constant 0 : i32
    %c0_i32_0 = arith.constant 0 : i32
    %c0_i32_1 = arith.constant 0 : i32
    return %arg0, %c0_i32, %c0_i32_0 : i32, i32, i32
  }
  func.func @transform_1(%arg0: i32) -> (i32, i32) {
    %c0_i32 = arith.constant 0 : i32
    %c0_i32_0 = arith.constant 0 : i32
    %c0_i32_1 = arith.constant 0 : i32
    return %c0_i32, %c0_i32_0 : i32, i32
  }
  func.func @transform_2(%arg0: i32) -> (i32, i32) {
    %c0_i32 = arith.constant 0 : i32
    %c0_i32_0 = arith.constant 0 : i32
    %c0_i32_1 = arith.constant 0 : i32
    return %c0_i32, %c0_i32_0 : i32, i32
  }
  func.func @transform_3(%arg0: i32) -> (i32, i32) {
    %c0_i32 = arith.constant 0 : i32
    %c0_i32_0 = arith.constant 0 : i32
    %c0_i32_1 = arith.constant 0 : i32
    return %c0_i32, %c0_i32_0 : i32, i32
  }
  func.func @transform_4(%arg0: i32) -> (i32, i32) {
    %c0_i32 = arith.constant 0 : i32
    %c0_i32_0 = arith.constant 0 : i32
    %c0_i32_1 = arith.constant 0 : i32
    return %c0_i32, %c0_i32_0 : i32, i32
  }
  func.func @transform_5(%arg0: i32) -> (i32, i32) {
    %c0_i32 = arith.constant 0 : i32
    %c0_i32_0 = arith.constant 0 : i32
    %c0_i32_1 = arith.constant 0 : i32
    return %c0_i32, %c0_i32_0 : i32, i32
  }
  func.func @transform_6(%arg0: i32) -> (i32, i32) {
    %c0_i32 = arith.constant 0 : i32
    %c0_i32_0 = arith.constant 0 : i32
    %c0_i32_1 = arith.constant 0 : i32
    return %c0_i32, %c0_i32_0 : i32, i32
  }
  func.func @transform_7(%arg0: i32) -> (i32, i32) {
    %c0_i32 = arith.constant 0 : i32
    %c0_i32_0 = arith.constant 0 : i32
    %c0_i32_1 = arith.constant 0 : i32
    return %c0_i32, %c0_i32_0 : i32, i32
  }
  func.func @transform_8(%arg0: i32) -> (i32, i32) {
    %c0_i32 = arith.constant 0 : i32
    %c0_i32_0 = arith.constant 0 : i32
    %c0_i32_1 = arith.constant 0 : i32
    return %c0_i32, %c0_i32_0 : i32, i32
  }
  func.func @transform_9(%arg0: i32) -> (i32, i32) {
    %c0_i32 = arith.constant 0 : i32
    %c0_i32_0 = arith.constant 0 : i32
    %c0_i32_1 = arith.constant 0 : i32
    return %c0_i32, %c0_i32_0 : i32, i32
  }
  func.func @transform_10(%arg0: i32) -> (i32, i32) {
    %c0_i32 = arith.constant 0 : i32
    %c0_i32_0 = arith.constant 0 : i32
    %c0_i32_1 = arith.constant 0 : i32
    return %c0_i32, %c0_i32_0 : i32, i32
  }
  func.func @transform_11(%arg0: i32) -> (i32, i32) {
    %c0_i32 = arith.constant 0 : i32
    %c0_i32_0 = arith.constant 0 : i32
    %c0_i32_1 = arith.constant 0 : i32
    return %c0_i32, %c0_i32_0 : i32, i32
  }
  func.func @transform_12(%arg0: i32) -> (i32, i32) {
    %c0_i32 = arith.constant 0 : i32
    %c0_i32_0 = arith.constant 0 : i32
    %c0_i32_1 = arith.constant 0 : i32
    return %c0_i32, %c0_i32_0 : i32, i32
  }
  func.func @transform_13(%arg0: i32) -> (i32, i32, i32) {
    %c0_i32 = arith.constant 0 : i32
    %c0_i32_0 = arith.constant 0 : i32
    %c0_i32_1 = arith.constant 0 : i32
    return %arg0, %c0_i32, %c0_i32_0 : i32, i32, i32
  }
}

</mosaic_0001>

<bundles_post_ra>
// kernel: encoder_forward.1
= control target key start
LH: loop header
LB: loop body
LE: loop exit
PB: predicated region body
PF: predicated region fallthrough
CT: control target
= control target key end

     0   :  { %s8037_s25 = smov 0   ;;  %s12783_s0 = inlined_call_operand.vmem [shape: f32[2,1,1024], index: 0, kind: input, shape index: {}]   ;;  %s12784_s1 = inlined_call_operand.vmem [shape: bf16[32,9], index: 1, kind: input, shape index: {}]   ;;  %s12785_s2 = inlined_call_operand.vmem [shape: f32[32,1], index: 2, kind: input, shape index: {}]   ;;  %s12786_s3 = inlined_call_operand.vmem [shape: bf16[32,288], index: 3, kind: input, shape index: {}]   ;;  %s12787_s4 = inlined_call_operand.vmem [shape: f32[32,1], index: 4, kind: input, shape index: {}]   ;;  %s12788_s5 = inlined_call_operand.vmem [shape: bf16[16,288], index: 5, kind: input, shape index: {}]   ;;  %s12789_s6 = inlined_call_operand.vmem [shape: f32[16,1], index: 6, kind: input, shape index: {}]   ;;  %s12790_s7 = inlined_call_operand.vmem [shape: bf16[16,144], index: 7, kind: input, shape index: {}]   ;;  %s12791_s8 = inlined_call_operand.vmem [shape: f32[16,1], index: 8, kind: input, shape index: {}]   ;;  %s12792_s9 = inlined_call_operand.vmem [shape: bf16[2,1024], index: 9, kind: input, shape index: {}]   ;;  %s12793_s10 = inlined_call_operand.vmem [shape: bf16[2,64], index: 10, kind: input, shape index: {}]   ;;  %s12794_s11 = inlined_call_operand.vmem [shape: bf16[1024,64], index: 11, kind: input, shape index: {}]   ;;  %s12795_s12 = inlined_call_operand.vmem [shape: f32[64,4], index: 12, kind: input, shape index: {}]   ;;  %s12796_s13 = inlined_call_operand.vmem [shape: f32[2,16,4], index: 13, kind: output, shape index: {}]  }
   0x1 LB: > { %s7325_s26 = sadd.s32 4294967295, %s7929_s25   ;;  %p7329_p0 = scmp.ge.s32.totalorder %s7929_s25, 1  ;;  %s7929_s25 = sphi %s8037_s25, %s23_s25  }
   0x2   : > { %p386_p1 = scmp.lt.s32.totalorder %s7929_s25, 3 }
   0x4   : > { %p387_p2 = pnand %p7329_p0, %p386_p1 }
   0x6   : > { %390 = sbr.rel (%p387_p2) target bundleno = 3466 (0xd8a), region = 72 }
   0xd   : > { %v7428_v0 = vld [vmem:[%s12784_s1] sm:$0xff]   ;;  %v452_v2 = vlaneseq  ;;  %v7931_v3 = vmov 1   ;;  %v7932_v7 = vmov 2   ;;  %v7435_v8 = vld [vmem:[%s12784_s1 + $0x8] sm:$0xff]   ;;  %p429_p3 = scmp.lt.s32.totalorder %s7325_s26, 1  ;;  %s7934_s20 = smov 2  }
   0xe   : > { %v8051_v1 = vld [vmem:[%s12792_s9] sm:$0xff]  ;;  %7734 = vset.pattern.permute.xlu1 %v7931_v3  ;;  %v7429_v4 = vunpack.c.l.bf16 %v7428_v0  ;;  %v7430_v5 = vunpack.c.h.bf16 %v7428_v0  ;;  %7740 = vset.pattern.permute.xlu0 %v7932_v7  ;;  %v7433_v12 = vunpack.c.l.bf16 %v7435_v8  ;;  %v7434_v13 = vunpack.c.h.bf16 %v7435_v8  ;;  %s7935_s21 = smov 32   ;;  %s12864_s22 = smov 34   ;;  %v448_v50 = vld [vmem:[#allocation2 + $0x8] sm:$0x1] }
   0xf   : > { %v1118_v6 = vshrl.u32 %v8051_v1, 16  ;;  %v453_v9 = vshrl.u32 %v452_v2, 7  ;;  %s13872_s26 = smov (!%p429_p3, %s7325_s26), 1  ;;  %v7933_v23 = vmov 1966171168   ;;  %v7937_v47 = vmov 4  }
  0x10   : > { %v8058_v10 = vpack.i.bf16 %v7430_v5, %v7429_v4  ;;  %s7330_s16 = sshll.u32 %s13872_s26, 3  ;;  %v513_v24 = vunpack.c.l.s4 %v7933_v23  ;;  %v8079_v25 = vpack.i.bf16 %v7434_v13, %v7433_v12  ;;  %v443_v48 = vld [vmem:[#allocation2] sm:$0x1]  ;;  %v7938_v49 = vmov 3   ;;  %s7940_s23 = smov 33  }
  0x11   : > { %v1120_v11 = vrot.slane %v1118_v6, 7  ;;  %v8062_v14 = vsub.s32 0, %v453_v9  ;;  %v458_v15 = vsub.s32 1, %v453_v9  ;;  %v8064_v16 = vsub.s32 2, %v453_v9  ;;  %s432_s19 = scalar_lea.vmem %s12783_s0, %s7330_s16  ;;  %s7941_s24 = smov 64  }
  0x12   : > { %7736 = vperm.xlu1 %7734, %v8058_v10   ;;  %v466_v18 = vsub.s32 3, %v453_v9  ;;  %v8070_v19 = vsub.s32 4, %v453_v9  ;;  %v474_v20 = vsub.s32 5, %v453_v9  ;;  %v8075_v21 = vsub.s32 6, %v453_v9  ;;  %v439_v26 = vld [vmem:[%s432_s19] sm:$0xff]  ;;  %s12862_s27 = smov 66  }
  0x13   : > { %13136 = vst [vmem:[#allocation11_spill] sm:$0xff] %v8062_v14  ;;  %13137 = vst [vmem:[#allocation12_spill] sm:$0xff] %v8064_v16  ;;  %v8067_v17 = vrot.slane %v1120_v11, 1  ;;  %v482_v22 = vsub.s32 7, %v453_v9  ;;  %v455_v27 = vrot.slane %v439_v26, %v8062_v14  ;;  %v459_v28 = vrot.slane %v439_v26, %v458_v15  ;;  %s7947_s28 = smov 127   ;;  %s7948_s29 = smov 95  }
  0x14   : > { %13138 = vst [vmem:[#allocation13_spill] sm:$0xff] %v8070_v19  ;;  %13139 = vst [vmem:[#allocation14_spill] sm:$0xff] %v8075_v21  ;;  %v463_v29 = vrot.slane %v439_v26, %v8064_v16  ;;  %v467_v30 = vrot.slane %v439_v26, %v466_v18  ;;  %v471_v31 = vrot.slane %v439_v26, %v8070_v19  ;;  %v514_v37 = vunpack.c.0.s8 %v513_v24  ;;  %s7949_s30 = smov 126   ;;  %s7950_s14 = smov 96  }
  0x15   : > { %1122 = vrot.lane.b32.xlu0 %v8067_v17, %s7934_s20  ;;  %v475_v32 = vrot.slane %v439_v26, %v474_v20  ;;  %v479_v33 = vrot.slane %v439_v26, %v8075_v21  ;;  %v483_v34 = vrot.slane %v439_v26, %v482_v22  ;;  %v7333_v35 = vpack.c.bf16 %v459_v28, %v455_v27  ;;  %s7951_s15 = smov 94   ;;  %s7952_s16 = smov 63  }
  0x16   : > { %1476 = vrot.lane.b32.xlu1 %v8051_v1, %s7935_s21  ;;  %v7334_v36 = vpack.c.bf16 %v467_v30, %v463_v29  ;;  %v8088_v40 = vsub.s32 %v514_v37, %v453_v9  ;;  %vm440_vm0 = vcmask 262144   ;;  %vm441_vm1 = vsmask.f32 256  ;;  %s7953_s17 = smov 62   ;;  %s13132_s18 = smov 118  }
  0x17   : > { %v7335_v38 = vpack.c.bf16 %v475_v32, %v471_v31  ;;  %v7336_v39 = vpack.c.bf16 %v483_v34, %v479_v33  ;;  %vm8101_vm2 = vmand %vm440_vm0, %vm441_vm1  ;;  %v13141_v53 = vmov 0  ;;  %vm446_vm3 = vcmask 532744   ;;  %s13135_s19 = smov 111  }
  0x18   : > { %13140 = vst [vmem:[#allocation15_spill] sm:$0xff] %v8088_v40  ;;  %v518_v41 = vrot.slane %v7333_v35, %v8088_v40  ;;  %v525_v42 = vrot.slane %v7334_v36, %v8088_v40  ;;  %v13142_v53 = vsel %vm8101_vm2, 4294967295, %v13141_v53  ;;  %vm12798_vm4 = vcmask 269312   ;;  %vm447_vm5 = vmand %vm446_vm3, %vm441_vm1 }
  0x19   : > { %7742 = vperm.xlu0 %7740, %v8058_v10   ;;  %v532_v43 = vrot.slane %v7335_v38, %v8088_v40  ;;  %v539_v44 = vrot.slane %v7336_v39, %v8088_v40  ;;  %v444_v54 = vsel %vm8101_vm2, 0, %v443_v48  ;;  %v12800_v55 = vmov 0  }
  0x1a   : > { %7747 = vperm.xlu1 %7734, %v8079_v25   ;;  %v540_v45 = vcombine.low %v518_v41, %v525_v42  ;;  %3459 = vst.msk [vmem:[#allocation3] sm:$0xff] %vm12798_vm4, %v12800_v55  ;;  %3460 = vst.msk [vmem:[#allocation3 + $0x48] sm:$0xff] %vm12798_vm4, %v12800_v55  ;;  %v449_v57 = vsel %vm447_vm5, 0, %v448_v50  ;;  %v7942_v58 = vmov 5   ;;  %v7944_v59 = vmov 7  }
  0x1b   : > { %v541_v46 = vcombine.low %v532_v43, %v539_v44  ;;  %445 = vst [vmem:[#allocation2] sm:$0x1] %v444_v54  ;;  %450 = vst [vmem:[#allocation2 + $0x8] sm:$0x1] %v449_v57  ;;  %vm12797_vm6 = vcmask 539648   ;;  %v7945_v60 = vmov 6  }
  0x1c   : > { %v548_v51 = vrot.slane %v540_v45, %v8088_v40  ;;  %5693 = vst.msk [vmem:[#allocation5 + $0x40] sm:$0xff] %vm12797_vm6, %v12800_v55  ;;  %5694 = vst.msk [vmem:[#allocation5 + $0x88] sm:$0xff] %vm12797_vm6, %v12800_v55  ;;  %v7946_v61 = vmov 8   ;;  %vm564_vm7 = vcmask 1040648   ;;  %vm566_vm8 = vcmask 1041409  }
  0x1d   : > { %2086 = vrot.lane.b32.xlu0 %v8067_v17, %s12864_s22  ;;  %v555_v52 = vrot.slane %v541_v46, %v8088_v40  ;;  %vm567_vm9 = vsmask.f32 1280  ;;  %vm565_vm10 = vmand %vm564_vm7, %vm441_vm1  ;;  %vm570_vm12 = vcmask 1042434   ;;  %vm571_vm13 = vsmask.f32 2304  ;;  %s13674_s22 = smov 34  }
  0x1e   : > { %7763 = vset.pattern.permute.xlu0 %v7937_v47  ;;  %7751 = vset.pattern.permute.xlu1 %v7938_v49  ;;  %vm568_vm11 = vmand %vm566_vm8, %vm567_vm9  ;;  %vm574_vm0 = vcmask 1043459   ;;  %vm575_vm3 = vsmask.f32 3328  ;;  %vm578_vm4 = vcmask 1044484   ;;  %vm579_vm2 = vsmask.f32 4352 }
  0x1f   : > { %7753 = vperm.xlu1 %7751, %v8058_v10   ;;  %v556_v56 = vcombine.low %v548_v51, %v555_v52  ;;  %vm569_vm14 = vmor %vm568_vm11, %vm565_vm10  ;;  %vm582_vm8 = vcmask 1045509   ;;  %vm583_vm9 = vsmask.f32 5376 }
  0x20   : > { %vm572_vm15 = vmand %vm570_vm12, %vm571_vm13  ;;  %vm586_vm12 = vcmask 1046534   ;;  %vm587_vm13 = vsmask.f32 6400 }
  0x21   : > { %557 = vrot.lane.b32.xlu0 %v556_v56, %s7940_s23  ;;  %vm573_vm5 = vmor %vm572_vm15, %vm569_vm14 }
  0x22   : > { %vm576_vm6 = vmand %vm574_vm0, %vm575_vm3  ;;  %vm590_vm0 = vcmask 1047559   ;;  %vm591_vm3 = vsmask.f32 7424  ;;  %v594_v3 = vld [vmem:[#allocation2] sm:$0xff] }
  0x23   : > { %7757 = vset.pattern.permute.xlu1 %v7932_v7  ;;  %vm577_vm1 = vmor %vm576_vm6, %vm573_vm5 }
  0x24   : > { %7759 = vperm.xlu1 %7757, %v8079_v25   ;;  %vm580_vm7 = vmand %vm578_vm4, %vm579_vm2  ;;  %vm13145_vm4 = vcmask 269312  }
  0x25   : > { %7765 = vperm.xlu0 %7763, %v8058_v10   ;;  %vm581_vm10 = vmor %vm580_vm7, %vm577_vm1  ;;  %vm13146_vm1 = vnez %v13142_v53  ;;  %vm1125_vm7 = vcmask 15360  }
  0x26   : > { %vm584_vm11 = vmand %vm582_vm8, %vm583_vm9  ;;  %vm1479_vm8 = vcmask 261120   ;;  %vm2442_vm9 = vcmask 523264  }
  0x27   : > { %vm585_vm14 = vmor %vm584_vm11, %vm581_vm10  ;;  %vm13157_vm10 = vcmask 539648   ;;  %vm2089_vm11 = vcmask 277504  }
  0x28   : > { %2439 = vrot.lane.b32.xlu1 %v8051_v1, %s7941_s24  ;;  %vm588_vm15 = vmand %vm586_vm12, %vm587_vm13  ;;  %v597_v1 = vld [vmem:[#allocation2 + $0x8] sm:$0x1]  ;;  %vm1020_vm12 = vcmask 1039360   ;;  %vm1989_vm13 = vcmask 777216  }
  0x29   : > { %7769 = vset.pattern.permute.xlu1 %v7938_v49  ;;  %7775 = vset.pattern.permute.xlu0 %v7942_v58  ;;  %vm589_vm5 = vmor %vm588_vm15, %vm585_vm14  ;;  %vm1378_vm14 = vcmask 1031168   ;;  %vm1732_vm15 = vcmask 785408  }
  0x2a   : > { %7777 = vperm.xlu0 %7775, %v8058_v10   ;;  %vm592_vm6 = vmand %vm590_vm0, %vm591_vm3  ;;  %vm2342_vm0 = vcmask 769024   ;;  %vm2952_vm3 = vcmask 515072  }
  0x2b   : > { %vm593_vm2 = vmor %vm592_vm6, %vm589_vm5  ;;  %vm3305_vm5 = vcmask 506880   ;;  %vm3560_vm6 = vcmask 1047816  }
  0x2c   : > { %7771 = vperm.xlu1 %7769, %v8079_v25  }
  0x2e   : > { %3049 = vrot.lane.b32.xlu0 %v8067_v17, %s12862_s27  ;;  %s13739_s27 = smov 66  }
  0x2f   : > { %7799 = vset.pattern.permute.xlu0 %v7944_v59 }
  0x30   : > { %7781 = vset.pattern.permute.xlu1 %v7937_v47 }
  0x31   : > { %7783 = vperm.xlu1 %7781, %v8079_v25  }
  0x32   : > { %7801 = vperm.xlu0 %7799, %v8058_v10  }
  0x35   : > { %7787 = vset.pattern.permute.xlu1 %v7945_v60 }
  0x36   : > { %7789 = vperm.xlu1 %7787, %v8058_v10   ;;  %7818 = vperm.xlu0 %7799, %v8079_v25  }
  0x3a   : > { %7793 = vset.pattern.permute.xlu1 %v7942_v58  ;;  %7827 = vset.pattern.permute.xlu0 %v12800_v55 }
  0x3b   : > { %7795 = vperm.xlu1 %7793, %v8079_v25   ;;  %7829 = vperm.xlu0 %7827, %v8058_v10  }
  0x3f   : > { %7805 = vset.pattern.permute.xlu1 %v7945_v60 }
  0x40   : > { %7807 = vperm.xlu1 %7805, %v8079_v25  }
  0x44   : > { %7811 = vset.pattern.permute.xlu1 %v7946_v61 }
  0x45   : > { %7813 = vperm.xlu1 %7811, %v8058_v10  }
  0x49   : > { %7823 = vperm.xlu1 %7811, %v8079_v25  }
  0x4d   : > { %7833 = vset.pattern.permute.xlu1 %v12800_v55 }
  0x4e   : > { %7835 = vperm.xlu1 %7833, %v8079_v25  }
  0x87   : > { %v8139_v62 = vpop.permute.xlu0 %1122 }
  0x88   : > { %13143 = vst [vmem:[#allocation16_spill] sm:$0xff] %v8139_v62  ;;  %v12803_v45 = vrot.slane %v8139_v62, 7 }
  0x8a   : > { %v1126_v50 = vsel %vm1125_vm7, %v12803_v45, %v8139_v62 }
  0x91   : > { %v7737_v9 = vpop.permute.xlu1 %7736 }
  0x92   : > { %v8152_v10 = vunpack.i.l.bf16 %v7737_v9  ;;  %v8176_v25 = vunpack.i.h.bf16 %v7737_v9 }
  0x94   : > { %13147 = vst [vmem:[#allocation18_spill] sm:$0xff] %v8152_v10  ;;  %13148 = vst [vmem:[#allocation19_spill] sm:$0xff] %v8176_v25 }
  0x95   : > { %v8180_v27 = vpop.permute.xlu1 %1476 }
  0x96   : > { %13149 = vst [vmem:[#allocation20_spill] sm:$0xff] %v8180_v27 }
  0x98   : > { %v8141_v63 = vpop.permute.xlu0 %7742 }
  0x99   : > { %v7748_v31 = vpop.permute.xlu1 %7747 }
  0x9a   : > { %v8192_v32 = vunpack.i.l.bf16 %v7748_v31  ;;  %v8206_v37 = vunpack.i.h.bf16 %v7748_v31 }
  0x9c   : > { %v8143_v0 = vpop.permute.xlu0 %2086  ;;  %13150 = vst [vmem:[#allocation21_spill] sm:$0xff] %v8192_v32  ;;  %13151 = vst [vmem:[#allocation22_spill] sm:$0xff] %v8206_v37 }
  0x9d   : > { %13144 = vst [vmem:[#allocation17_spill] sm:$0xff] %v8143_v0 }
  0x9e   : > { %v8208_v38 = vpop.permute.xlu1 %7753 }
  0xa0   : > { %v558_v2 = vpop.permute.xlu0 %557 }
  0xa1   : > { %v559_v4 = vrot.slane %v558_v2, 7 }
  0xa3   : > { %v561_v5 = vsel %vm13145_vm4, %v559_v4, %v558_v2  ;;  %v598_v6 = vsel %vm13146_vm1, %v559_v4, %v597_v1  ;;  %v8220_v44 = vpop.permute.xlu1 %7759  ;;  %v12802_v2 = vrot.slane %v8180_v27, 7 }
  0xa4   : > { %v8148_v7 = vsel %vm593_vm2, %v561_v5, %v594_v3  ;;  %599 = vst [vmem:[#allocation2 + $0x8] sm:$0x1] %v598_v6  ;;  %v7766_v46 = vpop.permute.xlu0 %7765  ;;  %vm13588_vm2 = vmmov %vm13145_vm4 }
  0xa5   : > { %596 = vst [vmem:[#allocation2] sm:$0xff] %v8148_v7  ;;  %v773_v8 = vunpack.c.l.bf16 %v8148_v7  ;;  %v8225_v47 = vunpack.i.l.bf16 %v7766_v46  ;;  %v8242_v53 = vmul.bf16 %v1126_v50, %v8148_v7  ;;  %v8248_v56 = vunpack.i.h.bf16 %v7766_v46  ;;  %vm13595_vm4 = vmmov %vm13588_vm2 }
  0xa6   : > { %vm13653_vm1 = vmmov %vm13588_vm2 }
  0xa7   : > { %v798_v11 = vrot.slane %v773_v8, %v8062_v14  ;;  %v802_v12 = vrot.slane %v773_v8, %v8064_v16  ;;  %v810_v13 = vrot.slane %v773_v8, %v8075_v21  ;;  %v806_v15 = vrot.slane %v773_v8, %v8070_v19  ;;  %13152 = vst [vmem:[#allocation23_spill] sm:$0xff] %v8225_v47  ;;  %v8237_v51 = vpop.permute.xlu1 %2439 }
  0xa8   : > { %13153 = vst [vmem:[#allocation24_spill] sm:$0xff] %v8248_v56  ;;  %v1131_v58 = vunpack.c.l.bf16 %v8242_v53 }
  0xa9   : > { %v8159_v17 = vrot.slane %v798_v11, %v8062_v14  ;;  %v8162_v18 = vrot.slane %v802_v12, %v8062_v14  ;;  %v8165_v20 = vrot.slane %v810_v13, %v8062_v14  ;;  %v8170_v23 = vrot.slane %v806_v15, %v8062_v14 }
  0xaa   : > { %v1160_v1 = vrot.slane %v1131_v58, %v8064_v16  ;;  %v1156_v4 = vrot.slane %v1131_v58, %v8062_v14  ;;  %v1168_v9 = vrot.slane %v1131_v58, %v8075_v21  ;;  %v1480_v11 = vsel %vm1479_vm8, %v12802_v2, %v8180_v27 }
  0xab   : > { %v877_v22 = vmul.f32 %v8152_v10, %v8162_v18  ;;  %v876_v24 = vmul.f32 %v8152_v10, %v8159_v17  ;;  %v879_v26 = vmul.f32 %v8152_v10, %v8165_v20  ;;  %v878_v28 = vmul.f32 %v8152_v10, %v8170_v23  ;;  %v8255_v60 = vpop.permute.xlu1 %7771 }
  0xac   : > { %v886_v29 = vmul.f32 %v8176_v25, %v8162_v18  ;;  %v885_v30 = vmul.f32 %v8176_v25, %v8159_v17  ;;  %v888_v33 = vmul.f32 %v8176_v25, %v8165_v20  ;;  %v887_v34 = vmul.f32 %v8176_v25, %v8170_v23 }
  0xad   : > { %950 = vrot.lane.b32.xlu0 %v877_v22, %s7947_s28  ;;  %948 = vrot.lane.b32.xlu1 %v876_v24, %s7947_s28  ;;  %v895_v35 = vmul.f32 %v8192_v32, %v8162_v18  ;;  %v894_v36 = vmul.f32 %v8192_v32, %v8159_v17  ;;  %v897_v39 = vmul.f32 %v8192_v32, %v8165_v20  ;;  %v8287_v22 = vunpack.i.l.bf16 %v8141_v63 }
  0xae   : > { %v896_v41 = vmul.f32 %v8192_v32, %v8170_v23  ;;  %v904_v42 = vmul.f32 %v8206_v37, %v8162_v18  ;;  %v903_v43 = vmul.f32 %v8206_v37, %v8159_v17  ;;  %v906_v48 = vmul.f32 %v8206_v37, %v8165_v20 }
  0xaf   : > { %v905_v49 = vmul.f32 %v8206_v37, %v8170_v23  ;;  %v1846_v52 = vmul.f32 %v8225_v47, %v8162_v18  ;;  %v1845_v54 = vmul.f32 %v8225_v47, %v8159_v17  ;;  %v1848_v57 = vmul.f32 %v8225_v47, %v8165_v20  ;;  %13154 = vst [vmem:[#allocation25_spill] sm:$0xff] %v8287_v22 }
  0xb0   : > { %v1847_v59 = vmul.f32 %v8225_v47, %v8170_v23  ;;  %v1855_v61 = vmul.f32 %v8248_v56, %v8162_v18  ;;  %v1854_v3 = vmul.f32 %v8248_v56, %v8159_v17  ;;  %v8268_v5 = vpop.permute.xlu1 %7783  ;;  %v1857_v6 = vmul.f32 %v8248_v56, %v8165_v20 }
  0xb1   : > { %954 = vrot.lane.b32.xlu0 %v879_v26, %s7947_s28  ;;  %952 = vrot.lane.b32.xlu1 %v878_v28, %s7947_s28  ;;  %v8273_v8 = vrot.slane %v1160_v1, %v8062_v14  ;;  %v1856_v12 = vmul.f32 %v8248_v56, %v8170_v23  ;;  %v8283_v13 = vrot.slane %v1156_v4, %v8062_v14 }
  0xb2   : > { %v1164_v15 = vrot.slane %v1131_v58, %v8070_v19  ;;  %v8294_v26 = vrot.slane %v1168_v9, %v8062_v14  ;;  %v8297_v28 = vmul.bf16 %v1480_v11, %v8148_v7  ;;  %v8359_v9 = vunpack.c.h.bf16 %v8148_v7 }
  0xb3   : > { %v1235_v24 = vmul.f32 %v8287_v22, %v8273_v8 }
  0xb4   : > { %v8304_v31 = vrot.slane %v1164_v15, %v8062_v14 }
  0xb5   : > { %968 = vrot.lane.b32.xlu0 %v886_v29, %s7947_s28  ;;  %966 = vrot.lane.b32.xlu1 %v885_v30, %s7947_s28  ;;  %v8299_v29 = vpop.permute.xlu0 %7777  ;;  %v1234_v30 = vmul.f32 %v8287_v22, %v8283_v13 }
  0xb9   : > { %972 = vrot.lane.b32.xlu0 %v888_v33, %s7947_s28  ;;  %970 = vrot.lane.b32.xlu1 %v887_v34, %s7947_s28  ;;  %v8306_v33 = vpop.permute.xlu1 %7789  ;;  %v1237_v34 = vmul.f32 %v8287_v22, %v8294_v26 }
  0xbd   : > { %986 = vrot.lane.b32.xlu0 %v895_v35, %s7947_s28  ;;  %984 = vrot.lane.b32.xlu1 %v894_v36, %s7947_s28  ;;  %v1485_v35 = vunpack.c.l.bf16 %v8297_v28  ;;  %v1236_v36 = vmul.f32 %v8287_v22, %v8304_v31 }
  0xbf   : > { %v1514_v46 = vrot.slane %v1485_v35, %v8064_v16  ;;  %v1522_v58 = vrot.slane %v1485_v35, %v8075_v21 }
  0xc1   : > { %990 = vrot.lane.b32.xlu0 %v897_v39, %s7947_s28  ;;  %988 = vrot.lane.b32.xlu1 %v896_v41, %s7947_s28  ;;  %v8316_v39 = vunpack.i.h.bf16 %v8141_v63  ;;  %v8319_v41 = vpop.permute.xlu0 %3049  ;;  %v1510_v63 = vrot.slane %v1485_v35, %v8062_v14  ;;  %v8368_v15 = vrot.slane %v1522_v58, %v8062_v14 }
  0xc2   : > { %v12804_v50 = vrot.slane %v8319_v41, 7 }
  0xc3   : > { %13155 = vst [vmem:[#allocation26_spill] sm:$0xff] %v8316_v39  ;;  %v8350_v1 = vrot.slane %v1510_v63, %v8062_v14 }
  0xc4   : > { %v3053_v4 = vsel %vm13157_vm10, %v12804_v50, %v8319_v41  ;;  %vm13655_vm10 = vmmov %vm13653_vm1 }
  0xc5   : > { %1004 = vrot.lane.b32.xlu0 %v904_v42, %s7947_s28  ;;  %1002 = vrot.lane.b32.xlu1 %v903_v43, %s7947_s28  ;;  %v8322_v42 = vpop.permute.xlu1 %7795  ;;  %v1244_v43 = vmul.f32 %v8316_v39, %v8273_v8 }
  0xc9   : > { %1008 = vrot.lane.b32.xlu0 %v906_v48, %s7947_s28  ;;  %1006 = vrot.lane.b32.xlu1 %v905_v49, %s7947_s28  ;;  %v12805_v48 = vrot.slane %v8237_v51, 7  ;;  %v1243_v49 = vmul.f32 %v8316_v39, %v8283_v13 }
  0xcd   : > { %1919 = vrot.lane.b32.xlu0 %v1846_v52, %s7948_s29  ;;  %1917 = vrot.lane.b32.xlu1 %v1845_v54, %s7948_s29  ;;  %v8335_v52 = vunpack.i.l.bf16 %v8208_v38  ;;  %v1246_v54 = vmul.f32 %v8316_v39, %v8294_v26 }
  0xcf   : > { %13156 = vst [vmem:[#allocation27_spill] sm:$0xff] %v8335_v52 }
  0xd1   : > { %1923 = vrot.lane.b32.xlu0 %v1848_v57, %s7948_s29  ;;  %1921 = vrot.lane.b32.xlu1 %v1847_v59, %s7948_s29  ;;  %v8340_v57 = vrot.slane %v1514_v46, %v8062_v14  ;;  %v2443_v59 = vsel %vm2442_vm9, %v12805_v48, %v8237_v51  ;;  %v818_v46 = vrot.slane %v8359_v9, %v8064_v16 }
  0xd2   : > { %v8363_v11 = vmul.bf16 %v2443_v59, %v8148_v7 }
  0xd5   : > { %1937 = vrot.lane.b32.xlu0 %v1855_v61, %s7948_s29  ;;  %1935 = vrot.lane.b32.xlu1 %v1854_v3, %s7948_s29  ;;  %v1245_v61 = vmul.f32 %v8316_v39, %v8304_v31  ;;  %v1518_v3 = vrot.slane %v1485_v35, %v8070_v19  ;;  %v7802_v35 = vpop.permute.xlu0 %7801 }
  0xd9   : > { %1941 = vrot.lane.b32.xlu0 %v1857_v6, %s7948_s29  ;;  %1939 = vrot.lane.b32.xlu1 %v1856_v12, %s7948_s29  ;;  %v7808_v6 = vpop.permute.xlu1 %7807  ;;  %v1589_v12 = vmul.f32 %v8335_v52, %v8340_v57  ;;  %v7819_v55 = vpop.permute.xlu0 %7818 }
  0xda   : > { %v8424_v2 = vunpack.i.l.bf16 %v7808_v6  ;;  %v8443_v40 = vunpack.i.l.bf16 %v7819_v55 }
  0xdd   : > { %1308 = vrot.lane.b32.xlu0 %v1235_v24, %s7949_s30  ;;  %1306 = vrot.lane.b32.xlu1 %v1234_v30, %s7949_s30  ;;  %v8371_v24 = vmul.bf16 %v3053_v4, %v8148_v7  ;;  %v1588_v30 = vmul.f32 %v8335_v52, %v8350_v1  ;;  %v7814_v63 = vpop.permute.xlu1 %7813  ;;  %v8407_v4 = vrot.slane %v818_v46, %v8062_v14 }
  0xdf   : > { %v8393_v58 = vunpack.c.h.bf16 %v8371_v24 }
  0xe1   : > { %1312 = vrot.lane.b32.xlu0 %v1237_v34, %s7949_s30  ;;  %1310 = vrot.lane.b32.xlu1 %v1236_v36, %s7949_s30  ;;  %v8376_v34 = vrot.slane %v1518_v3, %v8062_v14  ;;  %v814_v36 = vrot.slane %v8359_v9, %v8062_v14  ;;  %v7824_v45 = vpop.permute.xlu1 %7823  ;;  %v3103_v62 = vrot.slane %v8393_v58, %v8064_v16 }
  0xe2   : > { %v8458_v47 = vunpack.i.h.bf16 %v7824_v45 }
  0xe3   : > { %v1590_v59 = vmul.f32 %v8335_v52, %v8376_v34  ;;  %v8403_v3 = vrot.slane %v814_v36, %v8062_v14  ;;  %v3099_v36 = vrot.slane %v8393_v58, %v8062_v14 }
  0xe5   : > { %1326 = vrot.lane.b32.xlu0 %v1244_v43, %s7949_s30  ;;  %1324 = vrot.lane.b32.xlu1 %v1243_v49, %s7949_s30  ;;  %v8383_v43 = vunpack.i.h.bf16 %v8208_v38  ;;  %v8388_v49 = vunpack.c.h.bf16 %v8363_v11  ;;  %v8399_v38 = vunpack.i.l.bf16 %v7802_v35 }
  0xe7   : > { %13158 = vst [vmem:[#allocation28_spill] sm:$0xff] %v8383_v43  ;;  %13160 = vst [vmem:[#allocation30_spill] sm:$0xff] %v8399_v38  ;;  %v1597_v46 = vmul.f32 %v8383_v43, %v8350_v1  ;;  %v8429_v50 = vmul.f32 %v8399_v38, %v8407_v4  ;;  %v8433_v48 = vmul.f32 %v8399_v38, %v8403_v3 }
  0xe9   : > { %1330 = vrot.lane.b32.xlu0 %v1246_v54, %s7949_s30  ;;  %1328 = vrot.lane.b32.xlu1 %v1245_v61, %s7949_s30  ;;  %v1591_v54 = vmul.f32 %v8335_v52, %v8368_v15  ;;  %v8397_v61 = vunpack.i.h.bf16 %v7802_v35  ;;  %v1598_v35 = vmul.f32 %v8383_v43, %v8340_v57  ;;  %13162 = vst [vmem:[#allocation32_spill] sm:$0xff] %v8429_v50  ;;  %13163 = vst [vmem:[#allocation33_spill] sm:$0xff] %v8433_v48 }
  0xea   : > { %v8448_v50 = vunpack.i.l.bf16 %v7814_v63  ;;  %v1600_v48 = vmul.f32 %v8383_v43, %v8368_v15  ;;  %v8460_v52 = vunpack.i.l.bf16 %v7824_v45 }
  0xeb   : > { %13159 = vst [vmem:[#allocation29_spill] sm:$0xff] %v8397_v61  ;;  %v8437_v27 = vmul.f32 %v8397_v61, %v8407_v4 }
  0xed   : > { %1662 = vrot.lane.b32.xlu0 %v1589_v12, %s7950_s14  ;;  %1660 = vrot.lane.b32.xlu1 %v1588_v30, %s7950_s14  ;;  %v2489_v12 = vrot.slane %v8388_v49, %v8062_v14  ;;  %v2493_v30 = vrot.slane %v8388_v49, %v8064_v16  ;;  %13164 = vst [vmem:[#allocation34_spill] sm:$0xff] %v8437_v27 }
  0xef   : > { %v8453_v56 = vrot.slane %v2493_v30, %v8062_v14  ;;  %v8456_v27 = vrot.slane %v2489_v12, %v8062_v14 }
  0xf1   : > { %1666 = vrot.lane.b32.xlu0 %v1591_v54, %s7950_s14  ;;  %1664 = vrot.lane.b32.xlu1 %v1590_v59, %s7950_s14  ;;  %v8416_v54 = vunpack.i.l.bf16 %v8220_v44  ;;  %v8420_v59 = vunpack.i.h.bf16 %v7808_v6  ;;  %v8441_v6 = vunpack.i.h.bf16 %v7819_v55  ;;  %13165 = vst [vmem:[#allocation35_spill] sm:$0xff] %v8456_v27  ;;  %v1599_v55 = vmul.f32 %v8383_v43, %v8376_v34 }
  0xf2   : > { %v8473_v12 = vmul.f32 %v8424_v2, %v8453_v56  ;;  %v8477_v45 = vmul.f32 %v8424_v2, %v8456_v27  ;;  %v3144_v43 = vrot.slane %v3099_v36, %v8062_v14 }
  0xf3   : > { %13161 = vst [vmem:[#allocation31_spill] sm:$0xff] %v8416_v54  ;;  %v8481_v30 = vmul.f32 %v8420_v59, %v8453_v56 }
  0xf4   : > { %13167 = vst [vmem:[#allocation37_spill] sm:$0xff] %v8473_v12  ;;  %13168 = vst [vmem:[#allocation38_spill] sm:$0xff] %v8477_v45  ;;  %v8492_v12 = vmul.f32 %v8443_v40, %v8407_v4  ;;  %v1252_v45 = vmul.f32 %v8416_v54, %v8283_v13 }
  0xf5   : > { %1680 = vrot.lane.b32.xlu0 %v1598_v35, %s7950_s14  ;;  %v8445_v35 = vunpack.i.h.bf16 %v7814_v63  ;;  %1678 = vrot.lane.b32.xlu1 %v1597_v46, %s7950_s14  ;;  %v1253_v63 = vmul.f32 %v8416_v54, %v8273_v8  ;;  %v8469_v46 = vmul.f32 %v8397_v61, %v8403_v3  ;;  %13169 = vst [vmem:[#allocation39_spill] sm:$0xff] %v8481_v30 }
  0xf6   : > { %13171 = vst [vmem:[#allocation41_spill] sm:$0xff] %v8492_v12  ;;  %v8498_v30 = vmul.f32 %v8443_v40, %v8403_v3  ;;  %v8512_v12 = vmul.f32 %v8448_v50, %v3144_v43 }
  0xf7   : > { %13166 = vst [vmem:[#allocation36_spill] sm:$0xff] %v8469_v46  ;;  %v3148_v46 = vrot.slane %v3103_v62, %v8062_v14  ;;  %v8506_v62 = vmul.f32 %v8441_v6, %v8403_v3 }
  0xf8   : > { %13172 = vst [vmem:[#allocation42_spill] sm:$0xff] %v8498_v30  ;;  %13176 = vst [vmem:[#allocation46_spill] sm:$0xff] %v8512_v12  ;;  %v8525_v30 = vmul.f32 %v8460_v52, %v3144_v43 }
  0xf9   : > { %1684 = vrot.lane.b32.xlu0 %v1600_v48, %s7950_s14  ;;  %1682 = vrot.lane.b32.xlu1 %v1599_v55, %s7950_s14  ;;  %v8486_v48 = vmul.f32 %v8420_v59, %v8456_v27  ;;  %v8502_v55 = vmul.f32 %v8441_v6, %v8407_v4  ;;  %13174 = vst [vmem:[#allocation44_spill] sm:$0xff] %v8506_v62 }
  0xfa   : > { %v8509_v36 = vmul.f32 %v8448_v50, %v3148_v46  ;;  %v8518_v27 = vmul.f32 %v8445_v35, %v3144_v43  ;;  %13180 = vst [vmem:[#allocation50_spill] sm:$0xff] %v8525_v30  ;;  %v8528_v62 = vmul.f32 %v8458_v47, %v3148_v46 }
  0xfb   : > { %13170 = vst [vmem:[#allocation40_spill] sm:$0xff] %v8486_v48  ;;  %13173 = vst [vmem:[#allocation43_spill] sm:$0xff] %v8502_v55  ;;  %v8515_v48 = vmul.f32 %v8445_v35, %v3148_v46  ;;  %v8522_v55 = vmul.f32 %v8460_v52, %v3148_v46 }
  0xfc   : > { %13175 = vst [vmem:[#allocation45_spill] sm:$0xff] %v8509_v36  ;;  %13178 = vst [vmem:[#allocation48_spill] sm:$0xff] %v8518_v27  ;;  %v8531_v36 = vmul.f32 %v8458_v47, %v3144_v43  ;;  %v8815_v27 = vunpack.i.h.bf16 %v8268_v5 }
  0xfd   : > { %13177 = vst [vmem:[#allocation47_spill] sm:$0xff] %v8515_v48  ;;  %1344 = vrot.lane.b32.xlu0 %v1253_v63, %s7949_s30  ;;  %13179 = vst [vmem:[#allocation49_spill] sm:$0xff] %v8522_v55  ;;  %1342 = vrot.lane.b32.xlu1 %v1252_v45, %s7949_s30  ;;  %v8535_v48 = vunpack.i.h.bf16 %v8220_v44  ;;  %v1255_v63 = vmul.f32 %v8416_v54, %v8294_v26  ;;  %v1254_v55 = vmul.f32 %v8416_v54, %v8304_v31 }
  0xfe   : > { %13181 = vst [vmem:[#allocation51_spill] sm:$0xff] %v8528_v62  ;;  %13182 = vst [vmem:[#allocation52_spill] sm:$0xff] %v8531_v36  ;;  %v12820_v45 = vrot.slane %v8143_v0, 7  ;;  %v822_v44 = vrot.slane %v8359_v9, %v8070_v19  ;;  %v826_v36 = vrot.slane %v8359_v9, %v8075_v21  ;;  %v13185_v62 = vrot.slane %v8237_v51, 7 }
  0xff   : > { %13183 = vst [vmem:[#allocation53_spill] sm:$0xff] %v8535_v48  ;;  %v1262_v46 = vmul.f32 %v8535_v48, %v8273_v8  ;;  %v1261_v43 = vmul.f32 %v8535_v48, %v8283_v13  ;;  %v1264_v8 = vmul.f32 %v8535_v48, %v8294_v26  ;;  %v8559_v13 = vld [vmem:[#allocation2 + $0x8] sm:$0x1]  ;;  %v2501_v26 = vrot.slane %v8388_v49, %v8075_v21 }
 0x100   : > { %v8569_v9 = vrot.slane %v822_v44, %v8062_v14  ;;  %v13186_v44 = vrot.slane %v8319_v41, 7  ;;  %v3111_v41 = vrot.slane %v8393_v58, %v8075_v21  ;;  %13230 = vst [vmem:[#allocation98_spill] sm:$0xff] %v8815_v27 }
 0x101   : > { %1348 = vrot.lane.b32.xlu0 %v1255_v63, %s7949_s30  ;;  %1346 = vrot.lane.b32.xlu1 %v1254_v55, %s7949_s30  ;;  %v8555_v55 = vunpack.i.l.bf16 %v8255_v60  ;;  %v1263_v63 = vmul.f32 %v8535_v48, %v8304_v31 }
 0x102   : > { %v8598_v51 = vmul.f32 %v8399_v38, %v8569_v9 }
 0x103   : > { %13184 = vst [vmem:[#allocation54_spill] sm:$0xff] %v8555_v55  ;;  %v1609_v30 = vmul.f32 %v8555_v55, %v8368_v15 }
 0x104   : > { %13188 = vst [vmem:[#allocation56_spill] sm:$0xff] %v8598_v51 }
 0x105   : > { %1362 = vrot.lane.b32.xlu0 %v1262_v46, %s7949_s30  ;;  %1360 = vrot.lane.b32.xlu1 %v1261_v43, %s7949_s30  ;;  %v2090_v46 = vsel %vm2089_vm11, %v12820_v45, %v8143_v0  ;;  %v8572_v43 = vrot.slane %v826_v36, %v8062_v14  ;;  %v2447_v45 = vmul.bf16 %v13185_v62, %v8559_v13  ;;  %v8605_v62 = vunpack.i.h.bf16 %v8255_v60 }
 0x106   : > { %v8578_v31 = vmul.bf16 %v2090_v46, %v8148_v7  ;;  %v3057_v36 = vmul.bf16 %v13186_v44, %v8559_v13  ;;  %v1607_v0 = vmul.f32 %v8555_v55, %v8340_v57  ;;  %v3107_v46 = vrot.slane %v8393_v58, %v8070_v19 }
 0x107   : > { %v8594_v7 = vmul.f32 %v8399_v38, %v8572_v43  ;;  %13189 = vst [vmem:[#allocation57_spill] sm:$0xff] %v8605_v62  ;;  %v2450_v51 = vunpack.c.l.bf16 %v2447_v45  ;;  %v1608_v60 = vmul.f32 %v8555_v55, %v8376_v34  ;;  %v8623_v58 = vmul.f32 %v8397_v61, %v8572_v43 }
 0x108   : > { %v2095_v44 = vunpack.c.l.bf16 %v8578_v31 }
 0x109   : > { %1366 = vrot.lane.b32.xlu0 %v1264_v8, %s7949_s30  ;;  %1364 = vrot.lane.b32.xlu1 %v1263_v63, %s7949_s30  ;;  %v2497_v8 = vrot.slane %v8388_v49, %v8070_v19  ;;  %v1606_v63 = vmul.f32 %v8555_v55, %v8350_v1  ;;  %13187 = vst [vmem:[#allocation55_spill] sm:$0xff] %v8594_v7  ;;  %v775_v49 = vunpack.c.l.bf16 %v8559_v13  ;;  %v3060_v13 = vunpack.c.l.bf16 %v3057_v36 }
 0x10a   : > { %v8612_v7 = vrot.slane %v2501_v26, %v8062_v14  ;;  %13192 = vst [vmem:[#allocation60_spill] sm:$0xff] %v8623_v58  ;;  %v3152_v58 = vrot.slane %v3107_v46, %v8062_v14  ;;  %v1615_v46 = vmul.f32 %v8605_v62, %v8350_v1 }
 0x10c   : > { %13190 = vst [vmem:[#allocation58_spill] sm:$0xff] %v8612_v7  ;;  %v8631_v45 = vmul.f32 %v8424_v2, %v8612_v7 }
 0x10d   : > { %1698 = vrot.lane.b32.xlu0 %v1607_v0, %s7950_s14  ;;  %1696 = vrot.lane.b32.xlu1 %v1606_v63, %s7950_s14  ;;  %v8617_v0 = vrot.slane %v2497_v8, %v8062_v14  ;;  %v8627_v63 = vmul.f32 %v8397_v61, %v8569_v9  ;;  %v8640_v8 = vmul.f32 %v8420_v59, %v8612_v7 }
 0x10e   : > { %13194 = vst [vmem:[#allocation62_spill] sm:$0xff] %v8631_v45  ;;  %v1616_v45 = vmul.f32 %v8605_v62, %v8340_v57  ;;  %v8668_v57 = vmul.f32 %v8443_v40, %v8572_v43 }
 0x10f   : > { %13191 = vst [vmem:[#allocation59_spill] sm:$0xff] %v8617_v0  ;;  %13193 = vst [vmem:[#allocation61_spill] sm:$0xff] %v8627_v63  ;;  %v8636_v26 = vmul.f32 %v8424_v2, %v8617_v0  ;;  %v8644_v36 = vmul.f32 %v8420_v59, %v8617_v0  ;;  %v3156_v63 = vrot.slane %v3111_v41, %v8062_v14  ;;  %v8695_v0 = vunpack.i.l.bf16 %v8299_v29 }
 0x110   : > { %13196 = vst [vmem:[#allocation64_spill] sm:$0xff] %v8640_v8  ;;  %v8664_v41 = vmul.f32 %v8441_v6, %v8569_v9  ;;  %13202 = vst [vmem:[#allocation70_spill] sm:$0xff] %v8668_v57  ;;  %v8688_v57 = vmul.f32 %v8458_v47, %v3152_v58 }
 0x111   : > { %1702 = vrot.lane.b32.xlu0 %v1609_v30, %s7950_s14  ;;  %13195 = vst [vmem:[#allocation63_spill] sm:$0xff] %v8636_v26  ;;  %13197 = vst [vmem:[#allocation65_spill] sm:$0xff] %v8644_v36  ;;  %1700 = vrot.lane.b32.xlu1 %v1608_v60, %s7950_s14  ;;  %v2124_v30 = vrot.slane %v2095_v44, %v8064_v16  ;;  %v8654_v26 = vmul.f32 %v8443_v40, %v8569_v9 }
 0x112   : > { %v8657_v8 = vmul.f32 %v8448_v50, %v3156_v63  ;;  %v8660_v36 = vmul.f32 %v8445_v35, %v3156_v63  ;;  %13201 = vst [vmem:[#allocation69_spill] sm:$0xff] %v8664_v41  ;;  %v2120_v60 = vrot.slane %v2095_v44, %v8062_v14  ;;  %v8685_v41 = vmul.f32 %v8441_v6, %v8572_v43 }
 0x113   : > { %13198 = vst [vmem:[#allocation66_spill] sm:$0xff] %v8654_v26  ;;  %v8674_v26 = vmul.f32 %v8448_v50, %v3152_v58  ;;  %13207 = vst [vmem:[#allocation75_spill] sm:$0xff] %v8688_v57  ;;  %v8691_v1 = vmul.f32 %v8460_v52, %v3156_v63  ;;  %v8706_v57 = vmul.f32 %v8458_v47, %v3156_v63 }
 0x114   : > { %13199 = vst [vmem:[#allocation67_spill] sm:$0xff] %v8657_v8  ;;  %13200 = vst [vmem:[#allocation68_spill] sm:$0xff] %v8660_v36  ;;  %v8677_v8 = vmul.f32 %v8445_v35, %v3152_v58  ;;  %v8681_v36 = vmul.f32 %v8460_v52, %v3152_v58  ;;  %v2132_v58 = vrot.slane %v2095_v44, %v8075_v21 }
 0x115   : > { %13203 = vst [vmem:[#allocation71_spill] sm:$0xff] %v8674_v26  ;;  %1716 = vrot.lane.b32.xlu0 %v1616_v45, %s7950_s14  ;;  %13206 = vst [vmem:[#allocation74_spill] sm:$0xff] %v8685_v41  ;;  %v2505_v26 = vrot.slane %v2450_v51, %v8062_v14  ;;  %v3115_v45 = vrot.slane %v3060_v13, %v8062_v14  ;;  %1714 = vrot.lane.b32.xlu1 %v1615_v46, %s7950_s14 }
 0x116   : > { %13204 = vst [vmem:[#allocation72_spill] sm:$0xff] %v8677_v8  ;;  %13205 = vst [vmem:[#allocation73_spill] sm:$0xff] %v8681_v36  ;;  %v1618_v36 = vmul.f32 %v8605_v62, %v8368_v15  ;;  %v8702_v41 = vrot.slane %v2124_v30, %v8062_v14  ;;  %v830_v51 = vrot.slane %v775_v49, %v8062_v14  ;;  %v8721_v30 = vpop.permute.xlu0 %7829 }
 0x117   : > { %13208 = vst [vmem:[#allocation76_spill] sm:$0xff] %v8691_v1  ;;  %13209 = vst [vmem:[#allocation77_spill] sm:$0xff] %v8695_v0  ;;  %v1617_v1 = vmul.f32 %v8605_v62, %v8376_v34  ;;  %v8712_v13 = vrot.slane %v2120_v60, %v8062_v14  ;;  %v2128_v46 = vrot.slane %v2095_v44, %v8070_v19  ;;  %v8731_v44 = vpop.permute.xlu1 %7835 }
 0x118   : > { %13210 = vst [vmem:[#allocation78_spill] sm:$0xff] %v8706_v57  ;;  %v8717_v15 = vrot.slane %v2505_v26, %v8062_v14  ;;  %v3160_v63 = vrot.slane %v3115_v45, %v8062_v14  ;;  %v2199_v49 = vmul.f32 %v8695_v0, %v8702_v41  ;;  %v8726_v34 = vrot.slane %v2132_v58, %v8062_v14 }
 0x119   : > { %1720 = vrot.lane.b32.xlu0 %v1618_v36, %s7950_s14  ;;  %1718 = vrot.lane.b32.xlu1 %v1617_v1, %s7950_s14  ;;  %v8729_v60 = vrot.slane %v830_v51, %v8062_v14  ;;  %v2198_v26 = vmul.f32 %v8695_v0, %v8712_v13  ;;  %v8736_v36 = vrot.slane %v2128_v46, %v8062_v14  ;;  %v8751_v51 = vunpack.i.h.bf16 %v8299_v29 }
 0x11a   : > { %13211 = vst [vmem:[#allocation79_spill] sm:$0xff] %v8717_v15  ;;  %v8740_v1 = vmul.f32 %v8424_v2, %v8717_v15  ;;  %v8744_v45 = vmul.f32 %v8448_v50, %v3160_v63  ;;  %v8748_v58 = vmul.f32 %v8420_v59, %v8717_v15  ;;  %v8755_v46 = vmul.f32 %v8445_v35, %v3160_v63 }
 0x11b   : > { %13212 = vst [vmem:[#allocation80_spill] sm:$0xff] %v8729_v60  ;;  %13216 = vst [vmem:[#allocation84_spill] sm:$0xff] %v8751_v51  ;;  %v8770_v29 = vmul.f32 %v8458_v47, %v3160_v63 }
 0x11c   : > { %13213 = vst [vmem:[#allocation81_spill] sm:$0xff] %v8740_v1  ;;  %13214 = vst [vmem:[#allocation82_spill] sm:$0xff] %v8744_v45  ;;  %v8759_v1 = vmul.f32 %v8443_v40, %v8729_v60  ;;  %v2201_v45 = vmul.f32 %v8695_v0, %v8726_v34 }
 0x11d   : > { %2272 = vrot.lane.b32.xlu0 %v2199_v49, %s7951_s15  ;;  %13215 = vst [vmem:[#allocation83_spill] sm:$0xff] %v8748_v58  ;;  %2270 = vrot.lane.b32.xlu1 %v2198_v26, %s7951_s15  ;;  %13217 = vst [vmem:[#allocation85_spill] sm:$0xff] %v8755_v46  ;;  %v8767_v58 = vmul.f32 %v8441_v6, %v8729_v60  ;;  %v8773_v26 = vmul.f32 %v8460_v52, %v3160_v63 }
 0x11e   : > { %13218 = vst [vmem:[#allocation86_spill] sm:$0xff] %v8759_v1  ;;  %13220 = vst [vmem:[#allocation88_spill] sm:$0xff] %v8770_v29  ;;  %v2200_v1 = vmul.f32 %v8695_v0, %v8736_v36  ;;  %v2207_v63 = vmul.f32 %v8751_v51, %v8712_v13  ;;  %v2209_v60 = vmul.f32 %v8751_v51, %v8736_v36 }
 0x11f   : > { %v8761_v49 = vpop.permute.xlu0 %950  ;;  %13219 = vst [vmem:[#allocation87_spill] sm:$0xff] %v8767_v58  ;;  %13221 = vst [vmem:[#allocation89_spill] sm:$0xff] %v8773_v26  ;;  %v8775_v46 = vpop.permute.xlu1 %948  ;;  %v2208_v58 = vmul.f32 %v8751_v51, %v8702_v41  ;;  %v8792_v26 = vunpack.i.l.bf16 %v8268_v5  ;;  %v1873_v5 = vmul.f32 %v8815_v27, %v8162_v18 }
 0x120   : > { %13222 = vst [vmem:[#allocation90_spill] sm:$0xff] %v8775_v46 }
 0x121   : > { %2276 = vrot.lane.b32.xlu0 %v2201_v45, %s7951_s15  ;;  %2274 = vrot.lane.b32.xlu1 %v2200_v1, %s7951_s15  ;;  %13225 = vst [vmem:[#allocation93_spill] sm:$0xff] %v8792_v26  ;;  %v2210_v1 = vmul.f32 %v8751_v51, %v8726_v34  ;;  %v1863_v7 = vmul.f32 %v8792_v26, %v8159_v17 }
 0x122   : > { %v1865_v12 = vmul.f32 %v8792_v26, %v8170_v23 }
 0x123   : > { %v8781_v15 = vpop.permute.xlu0 %954  ;;  %v8785_v57 = vpop.permute.xlu1 %952 }
 0x124   : > { %13223 = vst [vmem:[#allocation91_spill] sm:$0xff] %v8781_v15  ;;  %13224 = vst [vmem:[#allocation92_spill] sm:$0xff] %v8785_v57 }
 0x125   : > { %2290 = vrot.lane.b32.xlu0 %v2208_v58, %s7951_s15  ;;  %2288 = vrot.lane.b32.xlu1 %v2207_v63, %s7951_s15  ;;  %v1864_v63 = vmul.f32 %v8792_v26, %v8162_v18 }
 0x127   : > { %v8794_v45 = vpop.permute.xlu0 %968  ;;  %v8798_v29 = vpop.permute.xlu1 %966 }
 0x128   : > { %13226 = vst [vmem:[#allocation94_spill] sm:$0xff] %v8794_v45  ;;  %13227 = vst [vmem:[#allocation95_spill] sm:$0xff] %v8798_v29  ;;  %v1874_v29 = vmul.f32 %v8815_v27, %v8170_v23 }
 0x129   : > { %2294 = vrot.lane.b32.xlu0 %v2210_v1, %s7951_s15  ;;  %2292 = vrot.lane.b32.xlu1 %v2209_v60, %s7951_s15  ;;  %v1866_v60 = vmul.f32 %v8792_v26, %v8165_v20 }
 0x12b   : > { %v8804_v58 = vpop.permute.xlu0 %972  ;;  %v8808_v8 = vpop.permute.xlu1 %970 }
 0x12c   : > { %13228 = vst [vmem:[#allocation96_spill] sm:$0xff] %v8804_v58  ;;  %13229 = vst [vmem:[#allocation97_spill] sm:$0xff] %v8808_v8  ;;  %v2448_v8 = vunpack.c.l.bf16 %v8363_v11 }
 0x12d   : > { %1955 = vrot.lane.b32.xlu0 %v1864_v63, %s7948_s29  ;;  %1953 = vrot.lane.b32.xlu1 %v1863_v7, %s7948_s29 }
 0x12e   : > { %v2473_v11 = vrot.slane %v2448_v8, %v8062_v14  ;;  %v2481_v45 = vrot.slane %v2448_v8, %v8070_v19 }
 0x12f   : > { %v8817_v1 = vpop.permute.xlu0 %986  ;;  %v8821_v58 = vpop.permute.xlu1 %984 }
 0x130   : > { %13231 = vst [vmem:[#allocation99_spill] sm:$0xff] %v8817_v1  ;;  %13232 = vst [vmem:[#allocation100_spill] sm:$0xff] %v8821_v58  ;;  %v1872_v1 = vmul.f32 %v8815_v27, %v8159_v17  ;;  %v2477_v58 = vrot.slane %v2448_v8, %v8064_v16 }
 0x131   : > { %1959 = vrot.lane.b32.xlu0 %v1866_v60, %s7948_s29  ;;  %1957 = vrot.lane.b32.xlu1 %v1865_v12, %s7948_s29  ;;  %v8841_v12 = vunpack.i.l.bf16 %v8306_v33 }
 0x133   : > { %v8828_v7 = vpop.permute.xlu0 %990  ;;  %v8832_v63 = vpop.permute.xlu1 %988  ;;  %13235 = vst [vmem:[#allocation103_spill] sm:$0xff] %v8841_v12 }
 0x134   : > { %13233 = vst [vmem:[#allocation101_spill] sm:$0xff] %v8828_v7  ;;  %13234 = vst [vmem:[#allocation102_spill] sm:$0xff] %v8832_v63  ;;  %v1875_v7 = vmul.f32 %v8815_v27, %v8165_v20 }
 0x135   : > { %1973 = vrot.lane.b32.xlu0 %v1873_v5, %s7948_s29  ;;  %1971 = vrot.lane.b32.xlu1 %v1872_v1, %s7948_s29  ;;  %v8853_v5 = vrot.slane %v2477_v58, %v8062_v14  ;;  %v2485_v1 = vrot.slane %v2448_v8, %v8075_v21  ;;  %v8875_v8 = vrot.slane %v2481_v45, %v8062_v14 }
 0x137   : > { %v8843_v60 = vpop.permute.xlu0 %1004  ;;  %v8847_v63 = vpop.permute.xlu1 %1002 }
 0x138   : > { %13236 = vst [vmem:[#allocation104_spill] sm:$0xff] %v8843_v60  ;;  %13237 = vst [vmem:[#allocation105_spill] sm:$0xff] %v8847_v63  ;;  %v8859_v60 = vrot.slane %v2473_v11, %v8062_v14  ;;  %v2552_v63 = vmul.f32 %v8841_v12, %v8853_v5 }
 0x139   : > { %1977 = vrot.lane.b32.xlu0 %v1875_v7, %s7948_s29  ;;  %1975 = vrot.lane.b32.xlu1 %v1874_v29, %s7948_s29  ;;  %v8871_v7 = vrot.slane %v2485_v1, %v8062_v14  ;;  %v8878_v29 = vunpack.i.h.bf16 %v8306_v33 }
 0x13a   : > { %v2551_v58 = vmul.f32 %v8841_v12, %v8859_v60 }
 0x13b   : > { %v8861_v15 = vpop.permute.xlu0 %1008  ;;  %v8865_v57 = vpop.permute.xlu1 %1006  ;;  %13240 = vst [vmem:[#allocation108_spill] sm:$0xff] %v8878_v29  ;;  %v2561_v33 = vmul.f32 %v8878_v29, %v8853_v5 }
 0x13c   : > { %13238 = vst [vmem:[#allocation106_spill] sm:$0xff] %v8861_v15  ;;  %13239 = vst [vmem:[#allocation107_spill] sm:$0xff] %v8865_v57  ;;  %v2554_v15 = vmul.f32 %v8841_v12, %v8871_v7 }
 0x13d   : > { %2625 = vrot.lane.b32.xlu0 %v2552_v63, %s7941_s24  ;;  %2623 = vrot.lane.b32.xlu1 %v2551_v58, %s7941_s24  ;;  %v2553_v63 = vmul.f32 %v8841_v12, %v8875_v8  ;;  %v2560_v58 = vmul.f32 %v8878_v29, %v8859_v60 }
 0x13f   : > { %v8880_v11 = vpop.permute.xlu0 %1919  ;;  %v8884_v57 = vpop.permute.xlu1 %1917 }
 0x140   : > { %13241 = vst [vmem:[#allocation109_spill] sm:$0xff] %v8880_v11  ;;  %13242 = vst [vmem:[#allocation110_spill] sm:$0xff] %v8884_v57 }
 0x141   : > { %2629 = vrot.lane.b32.xlu0 %v2554_v15, %s7941_s24  ;;  %2627 = vrot.lane.b32.xlu1 %v2553_v63, %s7941_s24  ;;  %v2563_v15 = vmul.f32 %v8878_v29, %v8871_v7 }
 0x143   : > { %v8890_v1 = vpop.permute.xlu0 %1923  ;;  %v8894_v45 = vpop.permute.xlu1 %1921 }
 0x144   : > { %13243 = vst [vmem:[#allocation111_spill] sm:$0xff] %v8890_v1  ;;  %13244 = vst [vmem:[#allocation112_spill] sm:$0xff] %v8894_v45  ;;  %v2562_v1 = vmul.f32 %v8878_v29, %v8875_v8 }
 0x145   : > { %2643 = vrot.lane.b32.xlu0 %v2561_v33, %s7941_s24  ;;  %2641 = vrot.lane.b32.xlu1 %v2560_v58, %s7941_s24  ;;  %v3403_v33 = vld [vmem:[%s12785_s2 + $0x8] sm:$0xff]  ;;  %v8914_v58 = vunpack.i.l.bf16 %v8322_v42 }
 0x147   : > { %v8900_v57 = vpop.permute.xlu0 %1937  ;;  %v8904_v63 = vpop.permute.xlu1 %1935  ;;  %13247 = vst [vmem:[#allocation115_spill] sm:$0xff] %v8914_v58  ;;  %v2216_v46 = vmul.f32 %v8914_v58, %v8712_v13 }
 0x148   : > { %13245 = vst [vmem:[#allocation113_spill] sm:$0xff] %v8900_v57  ;;  %13246 = vst [vmem:[#allocation114_spill] sm:$0xff] %v8904_v63  ;;  %v3402_v63 = vld [vmem:[%s12785_s2] sm:$0xff] }
 0x149   : > { %2647 = vrot.lane.b32.xlu0 %v2563_v15, %s7941_s24  ;;  %2645 = vrot.lane.b32.xlu1 %v2562_v1, %s7941_s24  ;;  %v2217_v1 = vmul.f32 %v8914_v58, %v8702_v41 }
 0x14b   : > { %v8916_v57 = vpop.permute.xlu0 %1941  ;;  %v8921_v45 = vpop.permute.xlu1 %1939 }
 0x14c   : > { %13248 = vst [vmem:[#allocation116_spill] sm:$0xff] %v8916_v57  ;;  %13249 = vst [vmem:[#allocation117_spill] sm:$0xff] %v8921_v45  ;;  %v8934_v57 = vunpack.i.h.bf16 %v8322_v42 }
 0x14d   : > { %3413 = vperm.xlu0 %7827, %v3403_v33   ;;  %3408 = vperm.xlu1 %7833, %v3402_v63   ;;  %v2219_v63 = vmul.f32 %v8914_v58, %v8726_v34 }
 0x14e   : > { %13251 = vst [vmem:[#allocation119_spill] sm:$0xff] %v8934_v57  ;;  %v2226_v42 = vmul.f32 %v8934_v57, %v8702_v41 }
 0x14f   : > { %v8923_v15 = vpop.permute.xlu0 %1308  ;;  %v8927_v11 = vpop.permute.xlu1 %1306 }
 0x150   : > { %13250 = vst [vmem:[#allocation118_spill] sm:$0xff] %v8927_v11  ;;  %v2218_v11 = vmul.f32 %v8914_v58, %v8736_v36 }
 0x151   : > { %2308 = vrot.lane.b32.xlu0 %v2217_v1, %s7951_s15  ;;  %2306 = vrot.lane.b32.xlu1 %v2216_v46, %s7951_s15 }
 0x153   : > { %v8936_v45 = vpop.permute.xlu0 %1312  ;;  %v8940_v33 = vpop.permute.xlu1 %1310 }
 0x154   : > { %13252 = vst [vmem:[#allocation120_spill] sm:$0xff] %v8936_v45  ;;  %13253 = vst [vmem:[#allocation121_spill] sm:$0xff] %v8940_v33  ;;  %v2225_v45 = vmul.f32 %v8934_v57, %v8712_v13  ;;  %v2809_v13 = vmul.f32 %v8399_v38, %v8162_v18 }
 0x155   : > { %2312 = vrot.lane.b32.xlu0 %v2219_v63, %s7951_s15  ;;  %2310 = vrot.lane.b32.xlu1 %v2218_v11, %s7951_s15  ;;  %v2228_v63 = vmul.f32 %v8934_v57, %v8726_v34 }
 0x157   : > { %v8946_v1 = vpop.permute.xlu0 %1326  ;;  %v8950_v46 = vpop.permute.xlu1 %1324 }
 0x158   : > { %13254 = vst [vmem:[#allocation122_spill] sm:$0xff] %v8946_v1  ;;  %v2227_v1 = vmul.f32 %v8934_v57, %v8736_v36  ;;  %v2811_v36 = vmul.f32 %v8399_v38, %v8165_v20 }
 0x159   : > { %2326 = vrot.lane.b32.xlu0 %v2226_v42, %s7951_s15  ;;  %2324 = vrot.lane.b32.xlu1 %v2225_v45, %s7951_s15  ;;  %v2808_v42 = vmul.f32 %v8399_v38, %v8159_v17 }
 0x15b   : > { %v8956_v33 = vpop.permute.xlu0 %1330  ;;  %v8960_v11 = vpop.permute.xlu1 %1328 }
 0x15c   : > { %13255 = vst [vmem:[#allocation123_spill] sm:$0xff] %v8956_v33 }
 0x15d   : > { %2330 = vrot.lane.b32.xlu0 %v2228_v63, %s7951_s15  ;;  %2328 = vrot.lane.b32.xlu1 %v2227_v1, %s7951_s15  ;;  %v2810_v63 = vmul.f32 %v8399_v38, %v8170_v23  ;;  %v2819_v38 = vmul.f32 %v8397_v61, %v8170_v23 }
 0x15f   : > { %v8966_v41 = vpop.permute.xlu0 %1662  ;;  %v8970_v45 = vpop.permute.xlu1 %1660 }
 0x161   : > { %2882 = vrot.lane.b32.xlu0 %v2809_v13, %s7952_s16  ;;  %2880 = vrot.lane.b32.xlu1 %v2808_v42, %s7952_s16  ;;  %v2818_v13 = vmul.f32 %v8397_v61, %v8162_v18 }
 0x163   : > { %v8976_v34 = vpop.permute.xlu0 %1666  ;;  %v8980_v1 = vpop.permute.xlu1 %1664 }
 0x164   : > { %13256 = vst [vmem:[#allocation124_spill] sm:$0xff] %v8976_v34  ;;  %13257 = vst [vmem:[#allocation125_spill] sm:$0xff] %v8980_v1  ;;  %v2817_v34 = vmul.f32 %v8397_v61, %v8159_v17 }
 0x165   : > { %2886 = vrot.lane.b32.xlu0 %v2811_v36, %s7952_s16  ;;  %2884 = vrot.lane.b32.xlu1 %v2810_v63, %s7952_s16  ;;  %v2820_v36 = vmul.f32 %v8397_v61, %v8165_v20  ;;  %v2571_v61 = vmul.f32 %v8424_v2, %v8875_v8 }
 0x167   : > { %v8986_v33 = vpop.permute.xlu0 %1680  ;;  %v8990_v42 = vpop.permute.xlu1 %1678 }
 0x168   : > { %13258 = vst [vmem:[#allocation126_spill] sm:$0xff] %v8990_v42 }
 0x169   : > { %2900 = vrot.lane.b32.xlu0 %v2818_v13, %s7952_s16  ;;  %2898 = vrot.lane.b32.xlu1 %v2817_v34, %s7952_s16  ;;  %v2570_v13 = vmul.f32 %v8424_v2, %v8853_v5 }
 0x16b   : > { %v8996_v1 = vpop.permute.xlu0 %1684  ;;  %v9000_v63 = vpop.permute.xlu1 %1682 }
 0x16c   : > { %13259 = vst [vmem:[#allocation127_spill] sm:$0xff] %v8996_v1  ;;  %13260 = vst [vmem:[#allocation128_spill] sm:$0xff] %v9000_v63  ;;  %v2569_v1 = vmul.f32 %v8424_v2, %v8859_v60 }
 0x16d   : > { %2904 = vrot.lane.b32.xlu0 %v2820_v36, %s7952_s16  ;;  %2902 = vrot.lane.b32.xlu1 %v2819_v38, %s7952_s16  ;;  %v2572_v36 = vmul.f32 %v8424_v2, %v8871_v7 }
 0x16f   : > { %v9006_v42 = vpop.permute.xlu0 %1344  ;;  %v9010_v34 = vpop.permute.xlu1 %1342 }
 0x170   : > { %13261 = vst [vmem:[#allocation129_spill] sm:$0xff] %v9006_v42  ;;  %13262 = vst [vmem:[#allocation130_spill] sm:$0xff] %v9010_v34  ;;  %v3058_v42 = vunpack.c.l.bf16 %v8371_v24 }
 0x171   : > { %2661 = vrot.lane.b32.xlu0 %v2570_v13, %s7941_s24  ;;  %2659 = vrot.lane.b32.xlu1 %v2569_v1, %s7941_s24  ;;  %v2579_v1 = vmul.f32 %v8420_v59, %v8853_v5  ;;  %v2580_v5 = vmul.f32 %v8420_v59, %v8875_v8 }
 0x172   : > { %v3083_v2 = vrot.slane %v3058_v42, %v8062_v14 }
 0x173   : > { %v9016_v63 = vpop.permute.xlu0 %1348  ;;  %v9020_v38 = vpop.permute.xlu1 %1346 }
 0x174   : > { %13263 = vst [vmem:[#allocation131_spill] sm:$0xff] %v9016_v63  ;;  %13264 = vst [vmem:[#allocation132_spill] sm:$0xff] %v9020_v38  ;;  %v2578_v63 = vmul.f32 %v8420_v59, %v8859_v60  ;;  %v3087_v38 = vrot.slane %v3058_v42, %v8064_v16  ;;  %v3095_v60 = vrot.slane %v3058_v42, %v8075_v21 }
 0x175   : > { %2665 = vrot.lane.b32.xlu0 %v2572_v36, %s7941_s24  ;;  %2663 = vrot.lane.b32.xlu1 %v2571_v61, %s7941_s24  ;;  %v2581_v61 = vmul.f32 %v8420_v59, %v8871_v7 }
 0x177   : > { %v9027_v34 = vpop.permute.xlu0 %1362  ;;  %v9031_v13 = vpop.permute.xlu1 %1360 }
 0x178   : > { %13265 = vst [vmem:[#allocation133_spill] sm:$0xff] %v9027_v34  ;;  %13266 = vst [vmem:[#allocation134_spill] sm:$0xff] %v9031_v13  ;;  %v3091_v13 = vrot.slane %v3058_v42, %v8070_v19  ;;  %v9067_v42 = vrot.slane %v3095_v60, %v8062_v14 }
 0x179   : > { %2679 = vrot.lane.b32.xlu0 %v2579_v1, %s7941_s24  ;;  %2677 = vrot.lane.b32.xlu1 %v2578_v63, %s7941_s24  ;;  %v9050_v1 = vrot.slane %v3087_v38, %v8062_v14  ;;  %v9055_v63 = vrot.slane %v3083_v2, %v8062_v14 }
 0x17a   : > { %v9071_v38 = vrot.slane %v3091_v13, %v8062_v14 }
 0x17b   : > { %v9039_v24 = vpop.permute.xlu0 %1366  ;;  %v9043_v36 = vpop.permute.xlu1 %1364  ;;  %v3161_v8 = vmul.f32 %v8448_v50, %v9055_v63  ;;  %v3171_v13 = vmul.f32 %v8445_v35, %v9050_v1 }
 0x17c   : > { %13267 = vst [vmem:[#allocation135_spill] sm:$0xff] %v9039_v24  ;;  %13268 = vst [vmem:[#allocation136_spill] sm:$0xff] %v9043_v36  ;;  %v3162_v24 = vmul.f32 %v8448_v50, %v9050_v1  ;;  %v2835_v36 = vmul.f32 %v8441_v6, %v8159_v17 }
 0x17d   : > { %2683 = vrot.lane.b32.xlu0 %v2581_v61, %s7941_s24  ;;  %2681 = vrot.lane.b32.xlu1 %v2580_v5, %s7941_s24  ;;  %v3164_v61 = vmul.f32 %v8448_v50, %v9067_v42 }
 0x17f   : > { %v9057_v7 = vpop.permute.xlu0 %1698  ;;  %v9061_v59 = vpop.permute.xlu1 %1696 }
 0x180   : > { %13269 = vst [vmem:[#allocation137_spill] sm:$0xff] %v9057_v7  ;;  %13270 = vst [vmem:[#allocation138_spill] sm:$0xff] %v9061_v59  ;;  %v3163_v59 = vmul.f32 %v8448_v50, %v9071_v38  ;;  %v3173_v50 = vmul.f32 %v8445_v35, %v9067_v42 }
 0x181   : > { %3235 = vrot.lane.b32.xlu0 %v3162_v24, %s7953_s17  ;;  %3233 = vrot.lane.b32.xlu1 %v3161_v8, %s7953_s17  ;;  %v3170_v8 = vmul.f32 %v8445_v35, %v9055_v63 }
 0x183   : > { %v9073_v2 = vpop.permute.xlu0 %1702  ;;  %v9077_v5 = vpop.permute.xlu1 %1700 }
 0x184   : > { %13271 = vst [vmem:[#allocation139_spill] sm:$0xff] %v9073_v2  ;;  %13272 = vst [vmem:[#allocation140_spill] sm:$0xff] %v9077_v5  ;;  %v2828_v5 = vmul.f32 %v8443_v40, %v8170_v23 }
 0x185   : > { %3239 = vrot.lane.b32.xlu0 %v3164_v61, %s7953_s17  ;;  %3237 = vrot.lane.b32.xlu1 %v3163_v59, %s7953_s17  ;;  %v3172_v61 = vmul.f32 %v8445_v35, %v9071_v38  ;;  %v2827_v35 = vmul.f32 %v8443_v40, %v8162_v18 }
 0x187   : > { %v9083_v24 = vpop.permute.xlu0 %1716  ;;  %v9087_v60 = vpop.permute.xlu1 %1714 }
 0x188   : > { %13273 = vst [vmem:[#allocation141_spill] sm:$0xff] %v9083_v24  ;;  %13274 = vst [vmem:[#allocation142_spill] sm:$0xff] %v9087_v60 }
 0x189   : > { %3253 = vrot.lane.b32.xlu0 %v3171_v13, %s7953_s17  ;;  %3251 = vrot.lane.b32.xlu1 %v3170_v8, %s7953_s17  ;;  %v3405_v13 = vld [vmem:[%s12785_s2 + $0x18] sm:$0xff]  ;;  %v3404_v8 = vld [vmem:[%s12785_s2 + $0x10] sm:$0xff] }
 0x18b   : > { %v9093_v2 = vpop.permute.xlu0 %1720  ;;  %v9097_v59 = vpop.permute.xlu1 %1718 }
 0x18c   : > { %13275 = vst [vmem:[#allocation143_spill] sm:$0xff] %v9093_v2  ;;  %13276 = vst [vmem:[#allocation144_spill] sm:$0xff] %v9097_v59 }
 0x18d   : > { %3257 = vrot.lane.b32.xlu0 %v3173_v50, %s7953_s17  ;;  %3255 = vrot.lane.b32.xlu1 %v3172_v61, %s7953_s17  ;;  %v2826_v61 = vmul.f32 %v8443_v40, %v8159_v17  ;;  %v3180_v17 = vmul.f32 %v8460_v52, %v9050_v1 }
 0x18f   : > { %v9106_v60 = vpop.permute.xlu0 %2272  ;;  %v9111_v2 = vpop.permute.xlu1 %2270 }
 0x191   : > { %3423 = vperm.xlu0 %7827, %v3405_v13   ;;  %3418 = vperm.xlu1 %7833, %v3404_v8   ;;  %v2829_v13 = vmul.f32 %v8443_v40, %v8165_v20  ;;  %v2838_v40 = vmul.f32 %v8441_v6, %v8165_v20  ;;  %v3182_v20 = vmul.f32 %v8460_v52, %v9067_v42 }
 0x193   : > { %v9113_v59 = vpop.permute.xlu0 %2276  ;;  %v9117_v50 = vpop.permute.xlu1 %2274 }
 0x194   : > { %13277 = vst [vmem:[#allocation145_spill] sm:$0xff] %v9113_v59 }
 0x195   : > { %2918 = vrot.lane.b32.xlu0 %v2827_v35, %s7952_s16  ;;  %2916 = vrot.lane.b32.xlu1 %v2826_v61, %s7952_s16  ;;  %v2836_v35 = vmul.f32 %v8441_v6, %v8162_v18 }
 0x197   : > { %v9123_v24 = vpop.permute.xlu0 %2290  ;;  %v9127_v8 = vpop.permute.xlu1 %2288 }
 0x199   : > { %2922 = vrot.lane.b32.xlu0 %v2829_v13, %s7952_s16  ;;  %2920 = vrot.lane.b32.xlu1 %v2828_v5, %s7952_s16  ;;  %v2837_v13 = vmul.f32 %v8441_v6, %v8170_v23  ;;  %v3181_v23 = vmul.f32 %v8460_v52, %v9071_v38 }
 0x19b   : > { %v9133_v7 = vpop.permute.xlu0 %2294  ;;  %v9137_v61 = vpop.permute.xlu1 %2292 }
 0x19c   : > { %13278 = vst [vmem:[#allocation146_spill] sm:$0xff] %v9133_v7 }
 0x19d   : > { %2936 = vrot.lane.b32.xlu0 %v2836_v35, %s7952_s16  ;;  %2934 = vrot.lane.b32.xlu1 %v2835_v36, %s7952_s16  ;;  %v3179_v36 = vmul.f32 %v8460_v52, %v9055_v63  ;;  %v3191_v52 = vmul.f32 %v8458_v47, %v9067_v42 }
 0x19f   : > { %v9143_v34 = vpop.permute.xlu0 %1955  ;;  %v9147_v5 = vpop.permute.xlu1 %1953 }
 0x1a0   : > { %13279 = vst [vmem:[#allocation147_spill] sm:$0xff] %v9143_v34  ;;  %13280 = vst [vmem:[#allocation148_spill] sm:$0xff] %v9147_v5  ;;  %v907_v5 = vmul.f32 %v8206_v37, %v8403_v3 }
 0x1a1   : > { %2940 = vrot.lane.b32.xlu0 %v2838_v40, %s7952_s16  ;;  %2938 = vrot.lane.b32.xlu1 %v2837_v13, %s7952_s16  ;;  %v3189_v13 = vmul.f32 %v8458_v47, %v9050_v1  ;;  %v881_v1 = vmul.f32 %v8152_v10, %v8407_v4 }
 0x1a3   : > { %v9155_v18 = vpop.permute.xlu0 %1959  ;;  %v9159_v35 = vpop.permute.xlu1 %1957 }
 0x1a4   : > { %13281 = vst [vmem:[#allocation149_spill] sm:$0xff] %v9155_v18  ;;  %13282 = vst [vmem:[#allocation150_spill] sm:$0xff] %v9159_v35 }
 0x1a5   : > { %3271 = vrot.lane.b32.xlu0 %v3180_v17, %s7953_s17  ;;  %3269 = vrot.lane.b32.xlu1 %v3179_v36, %s7953_s17  ;;  %v3188_v17 = vmul.f32 %v8458_v47, %v9055_v63  ;;  %v9182_v36 = vunpack.c.h.bf16 %v8242_v53  ;;  %v880_v53 = vmul.f32 %v8152_v10, %v8403_v3 }
 0x1a7   : > { %v9168_v6 = vpop.permute.xlu0 %1973  ;;  %v9171_v40 = vpop.permute.xlu1 %1971  ;;  %v1176_v63 = vrot.slane %v9182_v36, %v8064_v16  ;;  %v1172_v42 = vrot.slane %v9182_v36, %v8062_v14 }
 0x1a8   : > { %13283 = vst [vmem:[#allocation151_spill] sm:$0xff] %v9168_v6  ;;  %13284 = vst [vmem:[#allocation152_spill] sm:$0xff] %v9171_v40 }
 0x1a9   : > { %3275 = vrot.lane.b32.xlu0 %v3182_v20, %s7953_s17  ;;  %3273 = vrot.lane.b32.xlu1 %v3181_v23, %s7953_s17  ;;  %v3190_v23 = vmul.f32 %v8458_v47, %v9071_v38 }
 0x1ab   : > { %v9184_v20 = vpop.permute.xlu0 %1977  ;;  %v9188_v18 = vpop.permute.xlu1 %1975 }
 0x1ac   : > { %13285 = vst [vmem:[#allocation153_spill] sm:$0xff] %v9184_v20  ;;  %13286 = vst [vmem:[#allocation154_spill] sm:$0xff] %v9188_v18 }
 0x1ad   : > { %3289 = vrot.lane.b32.xlu0 %v3189_v13, %s7953_s17  ;;  %3287 = vrot.lane.b32.xlu1 %v3188_v17, %s7953_s17  ;;  %v890_v13 = vmul.f32 %v8176_v25, %v8407_v4  ;;  %v1221_v17 = vrot.slane %v1176_v63, %v8062_v14 }
 0x1af   : > { %v9201_v47 = vpop.permute.xlu0 %2625  ;;  %v9204_v38 = vpop.permute.xlu1 %2623  ;;  %v1248_v63 = vmul.f32 %v8316_v39, %v1221_v17 }
 0x1b1   : > { %3293 = vrot.lane.b32.xlu0 %v3191_v52, %s7953_s17  ;;  %3291 = vrot.lane.b32.xlu1 %v3190_v23, %s7953_s17  ;;  %v889_v52 = vmul.f32 %v8176_v25, %v8403_v3  ;;  %v1217_v23 = vrot.slane %v1172_v42, %v8062_v14  ;;  %v9224_v42 = vunpack.c.h.bf16 %v8297_v28  ;;  %v898_v28 = vmul.f32 %v8192_v32, %v8403_v3 }
 0x1b3   : > { %v9215_v20 = vpop.permute.xlu0 %2629  ;;  %v9218_v18 = vpop.permute.xlu1 %2627  ;;  %13288 = vst [vmem:[#allocation156_spill] sm:$0xff] %v9224_v42  ;;  %v1526_v40 = vrot.slane %v9224_v42, %v8062_v14 }
 0x1b4   : > { %13287 = vst [vmem:[#allocation155_spill] sm:$0xff] %v9215_v20 }
 0x1b5   : > { %958 = vrot.lane.b32.xlu0 %v881_v1, %s7947_s28  ;;  %956 = vrot.lane.b32.xlu1 %v880_v53, %s7947_s28  ;;  %v1239_v1 = vmul.f32 %v8287_v22, %v1221_v17  ;;  %v1238_v53 = vmul.f32 %v8287_v22, %v1217_v23  ;;  %v1571_v34 = vrot.slane %v1526_v40, %v8062_v14 }
 0x1b7   : > { %v9231_v35 = vpop.permute.xlu1 %2641 }
 0x1b9   : > { %976 = vrot.lane.b32.xlu0 %v890_v13, %s7947_s28  ;;  %974 = vrot.lane.b32.xlu1 %v889_v52, %s7947_s28  ;;  %v1247_v13 = vmul.f32 %v8316_v39, %v1217_v23  ;;  %v9228_v52 = vpop.permute.xlu0 %2643 }
 0x1bb   : > { %v9251_v39 = vpop.permute.xlu1 %2645 }
 0x1bd   : > { %1316 = vrot.lane.b32.xlu0 %v1239_v1, %s7949_s30  ;;  %1314 = vrot.lane.b32.xlu1 %v1238_v53, %s7949_s30  ;;  %v899_v1 = vmul.f32 %v8192_v32, %v8407_v4  ;;  %v1530_v53 = vrot.slane %v9224_v42, %v8064_v16  ;;  %v9246_v6 = vpop.permute.xlu0 %2647 }
 0x1be   : > { %13289 = vst [vmem:[#allocation157_spill] sm:$0xff] %v9246_v6 }
 0x1c1   : > { %1334 = vrot.lane.b32.xlu0 %v1248_v63, %s7949_s30  ;;  %1332 = vrot.lane.b32.xlu1 %v1247_v13, %s7949_s30  ;;  %v908_v63 = vmul.f32 %v8206_v37, %v8407_v4  ;;  %v1575_v13 = vrot.slane %v1530_v53, %v8062_v14  ;;  %v13293_v37 = vld [vmem:[#allocation28_spill] sm:$0xff] }
 0x1c3   : > { %v1602_v40 = vmul.f32 %v13293_v37, %v1575_v13 }
 0x1c5   : > { %994 = vrot.lane.b32.xlu0 %v899_v1, %s7947_s28  ;;  %992 = vrot.lane.b32.xlu1 %v898_v28, %s7947_s28  ;;  %v13290_v1 = vld [vmem:[#allocation27_spill] sm:$0xff] }
 0x1c6   : > { %v1593_v28 = vmul.f32 %v13290_v1, %v1575_v13  ;;  %v1592_v42 = vmul.f32 %v13290_v1, %v1571_v34 }
 0x1c9   : > { %1012 = vrot.lane.b32.xlu0 %v908_v63, %s7947_s28  ;;  %1010 = vrot.lane.b32.xlu1 %v907_v5, %s7947_s28  ;;  %v1601_v63 = vmul.f32 %v13293_v37, %v1571_v34  ;;  %v1257_v5 = vmul.f32 %v8416_v54, %v1221_v17 }
 0x1cc   : > { %v9256_v22 = vpop.permute.xlu0 %3413  ;;  %v9259_v53 = vpop.permute.xlu1 %3408 }
 0x1cd   : > { %13291 = vst [vmem:[#allocation158_spill] sm:$0xff] %v9256_v22  ;;  %13292 = vst [vmem:[#allocation159_spill] sm:$0xff] %v9259_v53  ;;  %1670 = vrot.lane.b32.xlu0 %v1593_v28, %s7950_s14  ;;  %1668 = vrot.lane.b32.xlu1 %v1592_v42, %s7950_s14  ;;  %v1256_v28 = vmul.f32 %v8416_v54, %v1217_v23  ;;  %v1266_v42 = vmul.f32 %v8535_v48, %v1221_v17  ;;  %v13303_v17 = vld [vmem:[#allocation24_spill] sm:$0xff] }
 0x1d0   : > { %v9264_v20 = vpop.permute.xlu0 %2308  ;;  %v9267_v6 = vpop.permute.xlu1 %2306 }
 0x1d1   : > { %13294 = vst [vmem:[#allocation160_spill] sm:$0xff] %v9264_v20  ;;  %13295 = vst [vmem:[#allocation161_spill] sm:$0xff] %v9267_v6  ;;  %1688 = vrot.lane.b32.xlu0 %v1602_v40, %s7950_s14  ;;  %1686 = vrot.lane.b32.xlu1 %v1601_v63, %s7950_s14  ;;  %v1265_v40 = vmul.f32 %v8535_v48, %v1217_v23  ;;  %v13300_v63 = vld [vmem:[#allocation23_spill] sm:$0xff]  ;;  %v1859_v23 = vmul.f32 %v13303_v17, %v8407_v4 }
 0x1d2   : > { %v1850_v54 = vmul.f32 %v13300_v63, %v8407_v4  ;;  %v1858_v48 = vmul.f32 %v13303_v17, %v8403_v3  ;;  %v1619_v20 = vmul.f32 %v8605_v62, %v1571_v34 }
 0x1d4   : > { %v9272_v1 = vpop.permute.xlu0 %2312  ;;  %v9275_v53 = vpop.permute.xlu1 %2310 }
 0x1d5   : > { %13296 = vst [vmem:[#allocation162_spill] sm:$0xff] %v9272_v1  ;;  %13297 = vst [vmem:[#allocation163_spill] sm:$0xff] %v9275_v53  ;;  %1352 = vrot.lane.b32.xlu0 %v1257_v5, %s7949_s30  ;;  %1350 = vrot.lane.b32.xlu1 %v1256_v28, %s7949_s30  ;;  %v1849_v5 = vmul.f32 %v13300_v63, %v8403_v3 }
 0x1d8   : > { %v9280_v37 = vpop.permute.xlu0 %2326  ;;  %v9283_v6 = vpop.permute.xlu1 %2324 }
 0x1d9   : > { %13298 = vst [vmem:[#allocation164_spill] sm:$0xff] %v9280_v37  ;;  %13299 = vst [vmem:[#allocation165_spill] sm:$0xff] %v9283_v6  ;;  %1370 = vrot.lane.b32.xlu0 %v1266_v42, %s7949_s30  ;;  %1368 = vrot.lane.b32.xlu1 %v1265_v40, %s7949_s30  ;;  %v9300_v42 = vunpack.c.h.bf16 %v8578_v31  ;;  %v1610_v31 = vmul.f32 %v8555_v55, %v1571_v34 }
 0x1db   : > { %13304 = vst [vmem:[#allocation168_spill] sm:$0xff] %v9300_v42 }
 0x1dc   : > { %v9289_v1 = vpop.permute.xlu0 %2330  ;;  %v9293_v28 = vpop.permute.xlu1 %2328 }
 0x1dd   : > { %13301 = vst [vmem:[#allocation166_spill] sm:$0xff] %v9289_v1  ;;  %13302 = vst [vmem:[#allocation167_spill] sm:$0xff] %v9293_v28  ;;  %1927 = vrot.lane.b32.xlu0 %v1850_v54, %s7948_s29  ;;  %1925 = vrot.lane.b32.xlu1 %v1849_v5, %s7948_s29  ;;  %v1611_v54 = vmul.f32 %v8555_v55, %v1575_v13  ;;  %v2140_v5 = vrot.slane %v9300_v42, %v8064_v16 }
 0x1de   : > { %v2136_v28 = vrot.slane %v9300_v42, %v8062_v14 }
 0x1e0   : > { %v9302_v40 = vpop.permute.xlu0 %2882  ;;  %v9306_v1 = vpop.permute.xlu1 %2880  ;;  %v2181_v6 = vrot.slane %v2136_v28, %v8062_v14 }
 0x1e1   : > { %1945 = vrot.lane.b32.xlu0 %v1859_v23, %s7948_s29  ;;  %1943 = vrot.lane.b32.xlu1 %v1858_v48, %s7948_s29  ;;  %v1620_v48 = vmul.f32 %v8605_v62, %v1575_v13  ;;  %v2185_v23 = vrot.slane %v2140_v5, %v8062_v14 }
 0x1e2   : > { %v2202_v13 = vmul.f32 %v8695_v0, %v2181_v6  ;;  %v2211_v5 = vmul.f32 %v8751_v51, %v2181_v6 }
 0x1e3   : > { %v2212_v34 = vmul.f32 %v8751_v51, %v2185_v23  ;;  %v1877_v51 = vmul.f32 %v8815_v27, %v8407_v4 }
 0x1e4   : > { %v9313_v63 = vpop.permute.xlu0 %2886  ;;  %v9318_v53 = vpop.permute.xlu1 %2884 }
 0x1e5   : > { %13305 = vst [vmem:[#allocation169_spill] sm:$0xff] %v9313_v63  ;;  %1706 = vrot.lane.b32.xlu0 %v1611_v54, %s7950_s14  ;;  %1704 = vrot.lane.b32.xlu1 %v1610_v31, %s7950_s14  ;;  %v2203_v54 = vmul.f32 %v8695_v0, %v2185_v23 }
 0x1e8   : > { %v9324_v17 = vpop.permute.xlu0 %2900  ;;  %v9328_v55 = vpop.permute.xlu1 %2898 }
 0x1e9   : > { %1724 = vrot.lane.b32.xlu0 %v1620_v48, %s7950_s14  ;;  %1722 = vrot.lane.b32.xlu1 %v1619_v20, %s7950_s14  ;;  %v1868_v20 = vmul.f32 %v8792_v26, %v8407_v4 }
 0x1ec   : > { %v9333_v42 = vpop.permute.xlu0 %2904  ;;  %v9336_v31 = vpop.permute.xlu1 %2902 }
 0x1ed   : > { %13306 = vst [vmem:[#allocation170_spill] sm:$0xff] %v9333_v42  ;;  %2280 = vrot.lane.b32.xlu0 %v2203_v54, %s7951_s15  ;;  %2278 = vrot.lane.b32.xlu1 %v2202_v13, %s7951_s15  ;;  %v1867_v54 = vmul.f32 %v8792_v26, %v8403_v3  ;;  %v2556_v26 = vmul.f32 %v8841_v12, %v8453_v56 }
 0x1f0   : > { %v9341_v28 = vpop.permute.xlu0 %2661  ;;  %v9344_v48 = vpop.permute.xlu1 %2659 }
 0x1f1   : > { %13307 = vst [vmem:[#allocation171_spill] sm:$0xff] %v9341_v28  ;;  %13308 = vst [vmem:[#allocation172_spill] sm:$0xff] %v9344_v48  ;;  %2298 = vrot.lane.b32.xlu0 %v2212_v34, %s7951_s15  ;;  %2296 = vrot.lane.b32.xlu1 %v2211_v5, %s7951_s15  ;;  %v1876_v5 = vmul.f32 %v8815_v27, %v8403_v3  ;;  %v2565_v3 = vmul.f32 %v8878_v29, %v8453_v56  ;;  %v13332_v28 = vld [vmem:[#allocation38_spill] sm:$0xff] }
 0x1f2   : > { %v2230_v56 = vmul.f32 %v8934_v57, %v2185_v23 }
 0x1f4   : > { %v9350_v0 = vpop.permute.xlu0 %2665  ;;  %v9354_v13 = vpop.permute.xlu1 %2663 }
 0x1f5   : > { %13309 = vst [vmem:[#allocation173_spill] sm:$0xff] %v9350_v0  ;;  %13310 = vst [vmem:[#allocation174_spill] sm:$0xff] %v9354_v13  ;;  %1963 = vrot.lane.b32.xlu0 %v1868_v20, %s7948_s29  ;;  %1961 = vrot.lane.b32.xlu1 %v1867_v54, %s7948_s29  ;;  %v13314_v54 = vld [vmem:[#allocation35_spill] sm:$0xff] }
 0x1f6   : > { %v2555_v13 = vmul.f32 %v8841_v12, %v13314_v54  ;;  %v2221_v12 = vmul.f32 %v8914_v58, %v2185_v23 }
 0x1f8   : > { %v9360_v34 = vpop.permute.xlu0 %2679  ;;  %v9364_v62 = vpop.permute.xlu1 %2677 }
 0x1f9   : > { %13311 = vst [vmem:[#allocation175_spill] sm:$0xff] %v9360_v34  ;;  %13312 = vst [vmem:[#allocation176_spill] sm:$0xff] %v9364_v62  ;;  %1981 = vrot.lane.b32.xlu0 %v1877_v51, %s7948_s29  ;;  %1979 = vrot.lane.b32.xlu1 %v1876_v5, %s7948_s29  ;;  %v2564_v5 = vmul.f32 %v8878_v29, %v13314_v54 }
 0x1fc   : > { %v9370_v20 = vpop.permute.xlu0 %2683  ;;  %v9374_v4 = vpop.permute.xlu1 %2681 }
 0x1fd   : > { %13313 = vst [vmem:[#allocation177_spill] sm:$0xff] %v9370_v20  ;;  %13315 = vst [vmem:[#allocation35_spill] sm:$0xff] %v9374_v4  ;;  %2633 = vrot.lane.b32.xlu0 %v2556_v26, %s7941_s24  ;;  %2631 = vrot.lane.b32.xlu1 %v2555_v13, %s7941_s24  ;;  %v2220_v26 = vmul.f32 %v8914_v58, %v2181_v6  ;;  %v7919_v58 = vld [vmem:[#allocation2] sm:$0xff] }
 0x200   : > { %v9380_v51 = vpop.permute.xlu0 %3235  ;;  %v9384_v27 = vpop.permute.xlu1 %3233 }
 0x201   : > { %2651 = vrot.lane.b32.xlu0 %v2565_v3, %s7941_s24  ;;  %2649 = vrot.lane.b32.xlu1 %v2564_v5, %s7941_s24  ;;  %v2229_v3 = vmul.f32 %v8934_v57, %v2181_v6  ;;  %v7918_v5 = vld [vmem:[%s12792_s9] sm:$0xff] }
 0x202   : > { %v9406_v4 = vmul.bf16 %v7919_v58, %v7918_v5  ;;  %v13324_v58 = vld [vmem:[#allocation34_spill] sm:$0xff]  ;;  %v13325_v5 = vld [vmem:[#allocation36_spill] sm:$0xff] }
 0x204   : > { %v9389_v0 = vpop.permute.xlu0 %3239  ;;  %v9392_v13 = vpop.permute.xlu1 %3237  ;;  %13317 = vst [vmem:[#allocation179_spill] sm:$0xff] %v9406_v4  ;;  %v9416_v6 = vunpack.c.l.bf16 %v9406_v4  ;;  %v9433_v4 = vunpack.i.l.bf16 %v8721_v30 }
 0x205   : > { %13316 = vst [vmem:[#allocation178_spill] sm:$0xff] %v9389_v0  ;;  %2316 = vrot.lane.b32.xlu0 %v2221_v12, %s7951_s15  ;;  %2314 = vrot.lane.b32.xlu1 %v2220_v26, %s7951_s15  ;;  %v13319_v26 = vld [vmem:[#allocation32_spill] sm:$0xff] }
 0x206   : > { %13320 = vst [vmem:[#allocation32_spill] sm:$0xff] %v9416_v6  ;;  %13326 = vst [vmem:[#allocation34_spill] sm:$0xff] %v9433_v4  ;;  %v13340_v0 = vld [vmem:[#allocation40_spill] sm:$0xff] }
 0x208   : > { %v9397_v54 = vpop.permute.xlu0 %3253  ;;  %v9400_v29 = vpop.permute.xlu1 %3251 }
 0x209   : > { %2334 = vrot.lane.b32.xlu0 %v2230_v56, %s7951_s15  ;;  %2332 = vrot.lane.b32.xlu1 %v2229_v3, %s7951_s15  ;;  %v13321_v56 = vld [vmem:[#allocation33_spill] sm:$0xff]  ;;  %v638_v3 = vrot.slane %v9416_v6, %v8062_v14 }
 0x20c   : > { %v9409_v12 = vpop.permute.xlu0 %3257  ;;  %v9411_v23 = vpop.permute.xlu1 %3255 }
 0x20d   : > { %13318 = vst [vmem:[#allocation180_spill] sm:$0xff] %v9409_v12  ;;  %2890 = vrot.lane.b32.xlu0 %v13319_v26, %s7952_s16  ;;  %2888 = vrot.lane.b32.xlu1 %v13321_v56, %s7952_s16  ;;  %v642_v26 = vrot.slane %v9416_v6, %v8064_v16  ;;  %v646_v56 = vrot.slane %v9416_v6, %v8070_v19  ;;  %v9453_v6 = vunpack.i.h.bf16 %v8731_v44 }
 0x20e   : > { %v678_v16 = vrot.slane %v638_v3, %v8062_v14 }
 0x20f   : > { %v686_v62 = vrot.slane %v646_v56, %v8062_v14 }
 0x210   : > { %v9420_v57 = vpop.permute.xlu0 %3423  ;;  %v9422_v20 = vpop.permute.xlu1 %3418 }
 0x211   : > { %13322 = vst [vmem:[#allocation33_spill] sm:$0xff] %v9420_v57  ;;  %13323 = vst [vmem:[#allocation181_spill] sm:$0xff] %v9422_v20  ;;  %2908 = vrot.lane.b32.xlu0 %v13324_v58, %s7952_s16  ;;  %2906 = vrot.lane.b32.xlu1 %v13325_v5, %s7952_s16  ;;  %v9440_v20 = vunpack.i.h.bf16 %v8721_v30  ;;  %v9443_v58 = vunpack.i.l.bf16 %v8731_v44  ;;  %v13331_v5 = vld [vmem:[#allocation37_spill] sm:$0xff]  ;;  %v707_v30 = vmul.f32 %v9433_v4, %v678_v16 }
 0x212   : > { %13333 = vst [vmem:[#allocation37_spill] sm:$0xff] %v9453_v6  ;;  %v709_v37 = vmul.f32 %v9433_v4, %v686_v62 }
 0x213   : > { %13328 = vst [vmem:[#allocation182_spill] sm:$0xff] %v9440_v20  ;;  %13329 = vst [vmem:[#allocation183_spill] sm:$0xff] %v9443_v58  ;;  %v717_v56 = vmul.f32 %v9440_v20, %v686_v62  ;;  %v9476_v22 = vmul.f32 %v9443_v58, %v686_v62 }
 0x214   : > { %v9437_v57 = vpop.permute.xlu0 %2918  ;;  %v9445_v48 = vpop.permute.xlu1 %2916 }
 0x215   : > { %13327 = vst [vmem:[#allocation36_spill] sm:$0xff] %v9437_v57  ;;  %13330 = vst [vmem:[#allocation184_spill] sm:$0xff] %v9445_v48  ;;  %2669 = vrot.lane.b32.xlu0 %v13331_v5, %s7941_s24  ;;  %2667 = vrot.lane.b32.xlu1 %v13332_v28, %s7941_s24  ;;  %v682_v57 = vrot.slane %v642_v26, %v8062_v14  ;;  %v715_v5 = vmul.f32 %v9440_v20, %v678_v16  ;;  %v13337_v26 = vld [vmem:[#allocation39_spill] sm:$0xff] }
 0x216   : > { %v9464_v28 = vmul.f32 %v9443_v58, %v678_v16  ;;  %13339 = vst [vmem:[#allocation187_spill] sm:$0xff] %v9476_v22  ;;  %v13353_v22 = vld [vmem:[#allocation94_spill] sm:$0xff] }
 0x217   : > { %v708_v48 = vmul.f32 %v9433_v4, %v682_v57  ;;  %v716_v3 = vmul.f32 %v9440_v20, %v682_v57  ;;  %v1180_v20 = vrot.slane %v9182_v36, %v8070_v19  ;;  %v13356_v19 = vld [vmem:[#allocation46_spill] sm:$0xff] }
 0x218   : > { %v9458_v34 = vpop.permute.xlu0 %2922  ;;  %13335 = vst [vmem:[#allocation185_spill] sm:$0xff] %v9464_v28  ;;  %v9466_v44 = vpop.permute.xlu1 %2920  ;;  %v9481_v28 = vmul.f32 %v9453_v6, %v678_v16  ;;  %v9499_v16 = vmul.f32 %v8152_v10, %v8569_v9 }
 0x219   : > { %13334 = vst [vmem:[#allocation38_spill] sm:$0xff] %v9458_v34  ;;  %13336 = vst [vmem:[#allocation186_spill] sm:$0xff] %v9466_v44  ;;  %2687 = vrot.lane.b32.xlu0 %v13337_v26, %s7941_s24  ;;  %v9473_v34 = vmul.f32 %v9443_v58, %v682_v57  ;;  %2685 = vrot.lane.b32.xlu1 %v13340_v0, %s7941_s24  ;;  %v9484_v44 = vmul.f32 %v9453_v6, %v682_v57  ;;  %v13347_v57 = vld [vmem:[#allocation90_spill] sm:$0xff] }
 0x21a   : > { %13341 = vst [vmem:[#allocation40_spill] sm:$0xff] %v9481_v28  ;;  %v9487_v26 = vmul.f32 %v9453_v6, %v686_v62  ;;  %v9495_v0 = vmul.f32 %v8152_v10, %v8572_v43  ;;  %13346 = vst [vmem:[#allocation192_spill] sm:$0xff] %v9499_v16  ;;  %v1021_v62 = vsel %vm1020_vm12, %v13347_v57, %v8761_v49  ;;  %v13348_v6 = vld [vmem:[#allocation92_spill] sm:$0xff]  ;;  %v13351_v28 = vld [vmem:[#allocation45_spill] sm:$0xff] }
 0x21b   : > { %13338 = vst [vmem:[#allocation39_spill] sm:$0xff] %v9473_v34  ;;  %13342 = vst [vmem:[#allocation188_spill] sm:$0xff] %v9484_v44  ;;  %v1022_v4 = vsel %vm1020_vm12, %v8761_v49, %v13348_v6  ;;  %v9516_v10 = vmul.f32 %v8176_v25, %v8572_v43  ;;  %v13354_v34 = vld [vmem:[#allocation95_spill] sm:$0xff]  ;;  %v13355_v16 = vld [vmem:[#allocation97_spill] sm:$0xff] }
 0x21c   : > { %13343 = vst [vmem:[#allocation189_spill] sm:$0xff] %v9487_v26  ;;  %v9491_v58 = vpop.permute.xlu0 %2936  ;;  %13345 = vst [vmem:[#allocation191_spill] sm:$0xff] %v9495_v0  ;;  %v13349_v26 = vld [vmem:[#allocation91_spill] sm:$0xff]  ;;  %v9510_v44 = vpop.permute.xlu1 %2934  ;;  %v1029_v57 = vsel %vm1020_vm12, %v13354_v34, %v13353_v22  ;;  %v1030_v49 = vsel %vm1020_vm12, %v13353_v22, %v13355_v16  ;;  %v9536_v34 = vrot.slane %v1180_v20, %v8062_v14 }
 0x21d   : > { %13344 = vst [vmem:[#allocation190_spill] sm:$0xff] %v9491_v58  ;;  %v1023_v58 = vsel %vm1020_vm12, %v13348_v6, %v13349_v26  ;;  %13350 = vst [vmem:[#allocation90_spill] sm:$0xff] %v9510_v44  ;;  %3243 = vrot.lane.b32.xlu0 %v13351_v28, %s7953_s17  ;;  %3241 = vrot.lane.b32.xlu1 %v13356_v19, %s7953_s17  ;;  %v9528_v6 = vmul.f32 %v8176_v25, %v8569_v9  ;;  %v13358_v26 = vld [vmem:[#allocation96_spill] sm:$0xff] }
 0x21e   : > { %13352 = vst [vmem:[#allocation92_spill] sm:$0xff] %v9516_v10  ;;  %v1184_v28 = vrot.slane %v9182_v36, %v8075_v21  ;;  %v1031_v44 = vsel %vm1020_vm12, %v13355_v16, %v13358_v26  ;;  %13359 = vst [vmem:[#allocation94_spill] sm:$0xff] %v9536_v34  ;;  %v9540_v22 = vmul.f32 %v8192_v32, %v8569_v9  ;;  %v13362_v36 = vld [vmem:[#allocation118_spill] sm:$0xff]  ;;  %v13364_v26 = vld [vmem:[#allocation121_spill] sm:$0xff] }
 0x21f   : > { %13357 = vst [vmem:[#allocation45_spill] sm:$0xff] %v9528_v6  ;;  %v9544_v19 = vmul.f32 %v8192_v32, %v8572_v43  ;;  %v1085_v25 = vadd.f32 %v1021_v62, %v707_v30  ;;  %v1086_v6 = vadd.f32 %v1022_v4, %v708_v48  ;;  %v1087_v10 = vadd.f32 %v1023_v58, %v709_v37  ;;  %v13366_v37 = vld [vmem:[#allocation47_spill] sm:$0xff]  ;;  %v13367_v4 = vld [vmem:[#allocation122_spill] sm:$0xff]  ;;  %v13371_v62 = vld [vmem:[#allocation124_spill] sm:$0xff] }
 0x220   : > { %13360 = vst [vmem:[#allocation95_spill] sm:$0xff] %v9540_v22  ;;  %v1379_v21 = vsel %vm1378_vm14, %v13362_v36, %v8923_v15  ;;  %v9549_v0 = vpop.permute.xlu0 %2940  ;;  %v1093_v16 = vadd.f32 %v1029_v57, %v715_v5  ;;  %v1094_v20 = vadd.f32 %v1030_v49, %v716_v3  ;;  %v1380_v34 = vsel %vm1378_vm14, %v8923_v15, %v13364_v26  ;;  %v13365_v22 = vld [vmem:[#allocation120_spill] sm:$0xff] }
 0x221   : > { %13361 = vst [vmem:[#allocation97_spill] sm:$0xff] %v9544_v19  ;;  %13363 = vst [vmem:[#allocation46_spill] sm:$0xff] %v9549_v0  ;;  %v1381_v32 = vsel %vm1378_vm14, %v13364_v26, %v13365_v22  ;;  %v9557_v19 = vpop.permute.xlu1 %2938  ;;  %3261 = vrot.lane.b32.xlu0 %v13366_v37, %s7953_s17  ;;  %v1095_v48 = vadd.f32 %v1031_v44, %v717_v56  ;;  %v1387_v58 = vsel %vm1378_vm14, %v8950_v46, %v13367_v4  ;;  %v13368_v5 = vld [vmem:[#allocation48_spill] sm:$0xff]  ;;  %v13369_v26 = vld [vmem:[#allocation123_spill] sm:$0xff] }
 0x222   : > { %v1388_v30 = vsel %vm1378_vm14, %v13367_v4, %v8960_v11  ;;  %v1733_v15 = vsel %vm1732_vm15, %v8970_v45, %v8966_v41  ;;  %3259 = vrot.lane.b32.xlu1 %v13368_v5, %s7953_s17  ;;  %v1443_v3 = vadd.f32 %v1379_v21, %v1085_v25  ;;  %v1389_v44 = vsel %vm1378_vm14, %v8960_v11, %v13369_v26  ;;  %v13370_v56 = vld [vmem:[#allocation125_spill] sm:$0xff]  ;;  %v13372_v45 = vld [vmem:[#allocation126_spill] sm:$0xff]  ;;  %v13373_v4 = vld [vmem:[#allocation128_spill] sm:$0xff] }
 0x223   : > { %v1734_v46 = vsel %vm1732_vm15, %v8966_v41, %v13370_v56  ;;  %v1735_v57 = vsel %vm1732_vm15, %v13370_v56, %v13371_v62  ;;  %v1444_v49 = vadd.f32 %v1380_v34, %v1086_v6  ;;  %v1445_v36 = vadd.f32 %v1381_v32, %v1087_v10  ;;  %v13374_v41 = vld [vmem:[#allocation127_spill] sm:$0xff]  ;;  %v13375_v10 = vld [vmem:[#allocation41_spill] sm:$0xff]  ;;  %v13433_v62 = vld [vmem:[#allocation136_spill] sm:$0xff] }
 0x224   : > { %v1741_v37 = vsel %vm1732_vm15, %v13372_v45, %v8986_v33  ;;  %v1742_v21 = vsel %vm1732_vm15, %v8986_v33, %v13373_v4  ;;  %v9587_v25 = vpop.permute.xlu0 %3271  ;;  %v1451_v11 = vadd.f32 %v1387_v58, %v1093_v16  ;;  %v1452_v5 = vadd.f32 %v1388_v30, %v1094_v20  ;;  %v13376_v45 = vld [vmem:[#allocation42_spill] sm:$0xff]  ;;  %v13377_v16 = vld [vmem:[#allocation109_spill] sm:$0xff] }
 0x225   : > { %v1797_v26 = vadd.f32 %v1733_v15, %v1443_v3  ;;  %v1743_v22 = vsel %vm1732_vm15, %v13373_v4, %v13374_v41  ;;  %v9592_v56 = vpop.permute.xlu1 %3269  ;;  %2926 = vrot.lane.b32.xlu0 %v13375_v10, %s7952_s16  ;;  %v1453_v32 = vadd.f32 %v1389_v44, %v1095_v48  ;;  %v1798_v6 = vadd.f32 %v1734_v46, %v1444_v49  ;;  %v13378_v20 = vld [vmem:[#allocation110_spill] sm:$0xff]  ;;  %v13379_v3 = vld [vmem:[#allocation112_spill] sm:$0xff]  ;;  %v13380_v48 = vld [vmem:[#allocation111_spill] sm:$0xff] }
 0x226   : > { %v1799_v34 = vadd.f32 %v1735_v57, %v1445_v36  ;;  %2924 = vrot.lane.b32.xlu1 %v13376_v45, %s7952_s16  ;;  %v9599_v33 = vrot.slane %v1184_v28, %v8062_v14  ;;  %v1990_v58 = vsel %vm1989_vm13, %v13378_v20, %v13377_v16  ;;  %v1805_v30 = vadd.f32 %v1741_v37, %v1451_v11  ;;  %v13381_v46 = vld [vmem:[#allocation113_spill] sm:$0xff]  ;;  %v13382_v57 = vld [vmem:[#allocation114_spill] sm:$0xff] }
 0x227   : > { %v1806_v15 = vadd.f32 %v1742_v21, %v1452_v5  ;;  %v1991_v4 = vsel %vm1989_vm13, %v13377_v16, %v13379_v3  ;;  %v1992_v44 = vsel %vm1989_vm13, %v13379_v3, %v13380_v48  ;;  %v1998_v28 = vsel %vm1989_vm13, %v13382_v57, %v13381_v46  ;;  %v13384_v10 = vld [vmem:[#allocation117_spill] sm:$0xff]  ;;  %v13385_v21 = vld [vmem:[#allocation116_spill] sm:$0xff]  ;;  %v13386_v16 = vld [vmem:[#allocation43_spill] sm:$0xff] }
 0x228   : > { %v1807_v49 = vadd.f32 %v1743_v22, %v1453_v32  ;;  %v9613_v36 = vpop.permute.xlu0 %3275  ;;  %v1999_v37 = vsel %vm1989_vm13, %v13381_v46, %v13384_v10  ;;  %v2000_v11 = vsel %vm1989_vm13, %v13384_v10, %v13385_v21  ;;  %v2054_v5 = vadd.f32 %v1990_v58, %v1797_v26  ;;  %v13387_v46 = vld [vmem:[#allocation44_spill] sm:$0xff]  ;;  %v13430_v48 = vld [vmem:[#allocation131_spill] sm:$0xff] }
 0x229   : > { %13383 = vst [vmem:[#allocation118_spill] sm:$0xff] %v9613_v36  ;;  %v9621_v45 = vpop.permute.xlu1 %3273  ;;  %2944 = vrot.lane.b32.xlu0 %v13386_v16, %s7952_s16  ;;  %v2343_v22 = vsel %vm2342_vm0, %v9111_v2, %v9106_v60  ;;  %v2055_v32 = vadd.f32 %v1991_v4, %v1798_v6  ;;  %v2056_v20 = vadd.f32 %v1992_v44, %v1799_v34 }
 0x22a   : > { %v2352_v3 = vsel %vm2342_vm0, %v9123_v24, %v9137_v61  ;;  %2942 = vrot.lane.b32.xlu1 %v13387_v46, %s7952_s16  ;;  %v2344_v26 = vsel %vm2342_vm0, %v9106_v60, %v9117_v50  ;;  %v2062_v58 = vadd.f32 %v1998_v28, %v1805_v30  ;;  %v2351_v57 = vsel %vm2342_vm0, %v9127_v8, %v9123_v24 }
 0x22b   : > { %v2063_v10 = vadd.f32 %v1999_v37, %v1806_v15  ;;  %v2064_v2 = vadd.f32 %v2000_v11, %v1807_v49  ;;  %v2353_v6 = vsel %vm2342_vm0, %v9137_v61, %v9133_v7  ;;  %v2705_v34 = vsel %vm2442_vm9, %v9228_v52, %v9251_v39  ;;  %v13388_v61 = vld [vmem:[#allocation49_spill] sm:$0xff]  ;;  %v13389_v11 = vld [vmem:[#allocation50_spill] sm:$0xff] }
 0x22c   : > { %v9645_v4 = vpop.permute.xlu0 %3289  ;;  %v2407_v44 = vadd.f32 %v2343_v22, %v2054_v5  ;;  %v2697_v30 = vsel %vm2442_vm9, %v9201_v47, %v9218_v18  ;;  %v2704_v24 = vsel %vm2442_vm9, %v9231_v35, %v9228_v52  ;;  %v2345_v15 = vsel %vm2342_vm0, %v9117_v50, %v9113_v59  ;;  %v13428_v59 = vld [vmem:[#allocation188_spill] sm:$0xff] }
 0x22d   : > { %v2416_v60 = vadd.f32 %v2352_v3, %v2063_v10  ;;  %v9653_v8 = vpop.permute.xlu1 %3287  ;;  %3279 = vrot.lane.b32.xlu0 %v13388_v61, %s7953_s17  ;;  %v2408_v28 = vadd.f32 %v2344_v26, %v2055_v32  ;;  %v2415_v49 = vadd.f32 %v2351_v57, %v2062_v58  ;;  %v2962_v37 = vsel %vm2952_vm3, %v9324_v17, %v9336_v31  ;;  %v13391_v26 = vld [vmem:[#allocation157_spill] sm:$0xff]  ;;  %v13392_v57 = vld [vmem:[#allocation51_spill] sm:$0xff] }
 0x22e   : > { %3277 = vrot.lane.b32.xlu1 %v13389_v11, %s7953_s17  ;;  %v2417_v5 = vadd.f32 %v2353_v6, %v2064_v2  ;;  %v2696_v35 = vsel %vm2442_vm9, %v9204_v38, %v9201_v47  ;;  %v2961_v16 = vsel %vm2952_vm3, %v9328_v55, %v9324_v17  ;;  %v2954_v32 = vsel %vm2952_vm3, %v9302_v40, %v9318_v53  ;;  %v13393_v2 = vld [vmem:[#allocation155_spill] sm:$0xff] }
 0x22f   : > { %v2769_v52 = vadd.f32 %v2705_v34, %v2416_v60  ;;  %v2761_v50 = vadd.f32 %v2697_v30, %v2408_v28  ;;  %v2768_v22 = vadd.f32 %v2704_v24, %v2415_v49  ;;  %v3315_v3 = vsel %vm3305_vm5, %v9397_v54, %v9411_v23 }
 0x230   : > { %v9677_v46 = vpop.permute.xlu0 %3293  ;;  %v2706_v47 = vsel %vm2442_vm9, %v9251_v39, %v13391_v26  ;;  %v2953_v55 = vsel %vm2952_vm3, %v9306_v1, %v9302_v40  ;;  %v3314_v17 = vsel %vm3305_vm5, %v9400_v29, %v9397_v54  ;;  %v2760_v10 = vadd.f32 %v2696_v35, %v2407_v44  ;;  %v13394_v40 = vld [vmem:[#allocation52_spill] sm:$0xff] }
 0x231   : > { %13390 = vst [vmem:[#allocation121_spill] sm:$0xff] %v9677_v46  ;;  %v3026_v38 = vadd.f32 %v2962_v37, %v2769_v52  ;;  %v9688_v58 = vpop.permute.xlu1 %3291  ;;  %3297 = vrot.lane.b32.xlu0 %v13392_v57, %s7953_s17  ;;  %v2698_v6 = vsel %vm2442_vm9, %v9218_v18, %v13393_v2  ;;  %v3025_v39 = vadd.f32 %v2961_v16, %v2768_v22  ;;  %v13399_v52 = vld [vmem:[#allocation192_spill] sm:$0xff]  ;;  %v13402_v22 = vld [vmem:[#allocation158_spill] sm:$0xff]  ;;  %v13422_v2 = vld [vmem:[#allocation27_spill] sm:$0xff] }
 0x232   : > { %v3307_v1 = vsel %vm3305_vm5, %v9380_v51, %v9392_v13  ;;  %3295 = vrot.lane.b32.xlu1 %v13394_v40, %s7953_s17  ;;  %v3018_v34 = vadd.f32 %v2954_v32, %v2761_v50  ;;  %v2963_v29 = vsel %vm2952_vm3, %v9336_v31, %v9333_v42  ;;  %v3306_v54 = vsel %vm3305_vm5, %v9384_v27, %v9380_v51  ;;  %v13396_v27 = vld [vmem:[#allocation191_spill] sm:$0xff]  ;;  %v13397_v51 = vld [vmem:[#allocation13_spill] sm:$0xff]  ;;  %v13401_v50 = vld [vmem:[#allocation178_spill] sm:$0xff] }
 0x233   : > { %v3379_v44 = vadd.f32 %v3315_v3, %v3026_v38  ;;  %v2409_v60 = vadd.f32 %v2345_v15, %v2056_v20  ;;  %v2770_v18 = vadd.f32 %v2706_v47, %v2417_v5  ;;  %v3017_v30 = vadd.f32 %v2953_v55, %v2760_v10  ;;  %v13398_v20 = vld [vmem:[#allocation156_spill] sm:$0xff]  ;;  %v13403_v3 = vld [vmem:[#allocation94_spill] sm:$0xff]  ;;  %v13404_v47 = vld [vmem:[#allocation25_spill] sm:$0xff] }
 0x234   : > { %v3378_v24 = vadd.f32 %v3314_v17, %v3025_v39  ;;  %v9706_v61 = vpop.permute.xlu0 %958  ;;  %v2955_v28 = vsel %vm2952_vm3, %v9318_v53, %v9313_v63  ;;  %v3371_v49 = vadd.f32 %v3307_v1, %v3018_v34  ;;  %v3316_v31 = vsel %vm3305_vm5, %v9411_v23, %v9409_v12  ;;  %v13400_v53 = vld [vmem:[#allocation22_spill] sm:$0xff]  ;;  %v13407_v34 = vld [vmem:[#allocation92_spill] sm:$0xff]  ;;  %v13420_v63 = vld [vmem:[#allocation185_spill] sm:$0xff] }
 0x235   : > { %13395 = vst [vmem:[#allocation47_spill] sm:$0xff] %v9706_v61  ;;  %v9714_v37 = vpop.permute.xlu1 %956  ;;  %962 = vrot.lane.b32.xlu0 %v13396_v27, %s7947_s28  ;;  %v1534_v15 = vrot.slane %v13398_v20, %v13397_v51  ;;  %v2762_v11 = vadd.f32 %v2698_v6, %v2409_v60  ;;  %v3027_v5 = vadd.f32 %v2963_v29, %v2770_v18  ;;  %v13408_v29 = vld [vmem:[#allocation26_spill] sm:$0xff] }
 0x236   : > { %v3370_v35 = vadd.f32 %v3306_v54, %v3017_v30  ;;  %960 = vrot.lane.b32.xlu1 %v13399_v52, %s7947_s28  ;;  %v9724_v16 = vmul.f32 %v13400_v53, %v8569_v9  ;;  %v3308_v23 = vsel %vm3305_vm5, %v9392_v13, %v13401_v50  ;;  %v3435_v32 = vadd.f32 %v13402_v22, %v3379_v44  ;;  %v13406_v13 = vld [vmem:[#allocation159_spill] sm:$0xff]  ;;  %v13409_v60 = vld [vmem:[#allocation14_spill] sm:$0xff]  ;;  %v13414_v52 = vld [vmem:[#allocation101_spill] sm:$0xff] }
 0x237   : > { %v1240_v55 = vmul.f32 %v13404_v47, %v13403_v3  ;;  %v9734_v38 = vmul.f32 %v13400_v53, %v8572_v43  ;;  %v3019_v17 = vadd.f32 %v2955_v28, %v2762_v11  ;;  %v3434_v57 = vadd.f32 %v13402_v22, %v3378_v24  ;;  %v13410_v30 = vld [vmem:[#allocation99_spill] sm:$0xff]  ;;  %v13411_v24 = vld [vmem:[#allocation100_spill] sm:$0xff] }
 0x238   : > { %v3380_v10 = vadd.f32 %v3316_v31, %v3027_v5  ;;  %v9737_v6 = vpop.permute.xlu0 %976  ;;  %v9741_v39 = vmul.f32 %v13404_v47, %v9599_v33  ;;  %v3427_v1 = vadd.f32 %v13406_v13, %v3371_v49  ;;  %v1249_v54 = vmul.f32 %v13408_v29, %v13403_v3  ;;  %v13412_v31 = vld [vmem:[#allocation102_spill] sm:$0xff]  ;;  %v13413_v5 = vld [vmem:[#allocation45_spill] sm:$0xff] }
 0x239   : > { %13405 = vst [vmem:[#allocation122_spill] sm:$0xff] %v9737_v6  ;;  %v9744_v40 = vpop.permute.xlu1 %974  ;;  %980 = vrot.lane.b32.xlu0 %v13407_v34, %s7947_s28  ;;  %v9751_v44 = vrot.slane %v1534_v15, %v8062_v14  ;;  %v1538_v18 = vrot.slane %v13398_v20, %v13409_v60  ;;  %v1037_v28 = vsel %vm1020_vm12, %v13411_v24, %v13410_v30  ;;  %v13415_v34 = vld [vmem:[#allocation104_spill] sm:$0xff]  ;;  %v13416_v20 = vld [vmem:[#allocation105_spill] sm:$0xff] }
 0x23a   : > { %v1038_v49 = vsel %vm1020_vm12, %v13410_v30, %v13412_v31  ;;  %v3426_v27 = vadd.f32 %v13406_v13, %v3370_v35  ;;  %v3372_v11 = vadd.f32 %v3308_v23, %v3019_v17  ;;  %978 = vrot.lane.b32.xlu1 %v13413_v5, %s7947_s28  ;;  %v1039_v15 = vsel %vm1020_vm12, %v13412_v31, %v13414_v52  ;;  %v13417_v30 = vld [vmem:[#allocation107_spill] sm:$0xff]  ;;  %v13418_v23 = vld [vmem:[#allocation106_spill] sm:$0xff] }
 0x23b   : > { %v1045_v53 = vsel %vm1020_vm12, %v13416_v20, %v13415_v34  ;;  %v3465_v50 = vpack.c.bf16 %v3435_v32, %v3427_v1  ;;  %v9772_v24 = vmul.f32 %v13408_v29, %v9599_v33  ;;  %v1046_v35 = vsel %vm1020_vm12, %v13415_v34, %v13417_v30  ;;  %v13421_v32 = vld [vmem:[#allocation39_spill] sm:$0xff] }
 0x23c   : > { %v1047_v17 = vsel %vm1020_vm12, %v13417_v30, %v13418_v23  ;;  %v3464_v5 = vpack.c.bf16 %v3434_v57, %v3426_v27  ;;  %v3436_v31 = vadd.f32 %v13402_v22, %v3380_v10  ;;  %v9781_v12 = vpop.permute.xlu0 %1316  ;;  %v1101_v20 = vadd.f32 %v1037_v28, %v13420_v63  ;;  %v13423_v57 = vld [vmem:[#allocation187_spill] sm:$0xff]  ;;  %v13424_v10 = vld [vmem:[#allocation129_spill] sm:$0xff]  ;;  %v13425_v30 = vld [vmem:[#allocation130_spill] sm:$0xff] }
 0x23d   : > { %13419 = vst [vmem:[#allocation48_spill] sm:$0xff] %v9781_v12  ;;  %v1102_v1 = vadd.f32 %v1038_v49, %v13421_v32  ;;  %v9785_v42 = vpop.permute.xlu1 %1314  ;;  %3498 = vrot.lane.b32.xlu0 %v3465_v50, %s7940_s23  ;;  %v9790_v34 = vmul.f32 %v13422_v2, %v9751_v44  ;;  %v9793_v26 = vrot.slane %v1538_v18, %v8062_v14  ;;  %v13426_v63 = vld [vmem:[#allocation132_spill] sm:$0xff]  ;;  %v13429_v18 = vld [vmem:[#allocation189_spill] sm:$0xff]  ;;  %v13440_v23 = vld [vmem:[#allocation139_spill] sm:$0xff] }
 0x23e   : > { %v1103_v27 = vadd.f32 %v1039_v15, %v13423_v57  ;;  %v1395_v22 = vsel %vm1378_vm14, %v13425_v30, %v13424_v10  ;;  %v1396_v28 = vsel %vm1378_vm14, %v13424_v10, %v13426_v63  ;;  %v3428_v49 = vadd.f32 %v13406_v13, %v3372_v11  ;;  %3496 = vrot.lane.b32.xlu1 %v3464_v5, %s7940_s23  ;;  %v13427_v50 = vld [vmem:[#allocation40_spill] sm:$0xff]  ;;  %v13431_v57 = vld [vmem:[#allocation133_spill] sm:$0xff]  ;;  %v13432_v30 = vld [vmem:[#allocation134_spill] sm:$0xff] }
 0x23f   : > { %v1109_v32 = vadd.f32 %v1045_v53, %v13427_v50  ;;  %v1110_v7 = vadd.f32 %v1046_v35, %v13428_v59  ;;  %v1111_v21 = vadd.f32 %v1047_v17, %v13429_v18  ;;  %v1397_v15 = vsel %vm1378_vm14, %v13426_v63, %v13430_v48  ;;  %v13434_v10 = vld [vmem:[#allocation135_spill] sm:$0xff]  ;;  %v13436_v50 = vld [vmem:[#allocation137_spill] sm:$0xff]  ;;  %v13437_v18 = vld [vmem:[#allocation138_spill] sm:$0xff] }
 0x240   : > { %v1403_v41 = vsel %vm1378_vm14, %v13432_v30, %v13431_v57  ;;  %v1404_v11 = vsel %vm1378_vm14, %v13431_v57, %v13433_v62  ;;  %v1405_v53 = vsel %vm1378_vm14, %v13433_v62, %v13434_v10  ;;  %v9819_v5 = vpop.permute.xlu0 %1334  ;;  %v3466_v59 = vpack.c.bf16 %v3436_v31, %v3428_v49  ;;  %v13438_v13 = vld [vmem:[#allocation140_spill] sm:$0xff]  ;;  %v13441_v31 = vld [vmem:[#allocation141_spill] sm:$0xff]  ;;  %v13444_v10 = vld [vmem:[#allocation143_spill] sm:$0xff] }
 0x241   : > { %13435 = vst [vmem:[#allocation125_spill] sm:$0xff] %v9819_v5  ;;  %v1459_v35 = vadd.f32 %v1395_v22, %v1101_v20  ;;  %v1460_v17 = vadd.f32 %v1396_v28, %v1102_v1  ;;  %v1749_v63 = vsel %vm1732_vm15, %v13437_v18, %v13436_v50  ;;  %v1750_v30 = vsel %vm1732_vm15, %v13436_v50, %v13438_v13  ;;  %v9827_v48 = vpop.permute.xlu1 %1332  ;;  %v13442_v22 = vld [vmem:[#allocation142_spill] sm:$0xff]  ;;  %v13443_v1 = vld [vmem:[#allocation144_spill] sm:$0xff] }
 0x242   : > { %13439 = vst [vmem:[#allocation126_spill] sm:$0xff] %v9827_v48  ;;  %1318 = vrot.lane.b32.xlu0 %v1240_v55, %s7949_s30  ;;  %v1461_v57 = vadd.f32 %v1397_v15, %v1103_v27  ;;  %v1751_v62 = vsel %vm1732_vm15, %v13438_v13, %v13440_v23  ;;  %v1757_v20 = vsel %vm1732_vm15, %v13442_v22, %v13441_v31  ;;  %v13445_v13 = vld [vmem:[#allocation147_spill] sm:$0xff]  ;;  %v13446_v23 = vld [vmem:[#allocation148_spill] sm:$0xff] }
 0x243   : > { %v1758_v28 = vsel %vm1732_vm15, %v13441_v31, %v13443_v1  ;;  %3500 = vrot.lane.b32.xlu1 %v3466_v59, %s7940_s23  ;;  %v1467_v49 = vadd.f32 %v1403_v41, %v1109_v32  ;;  %v1468_v50 = vadd.f32 %v1404_v11, %v1110_v7  ;;  %v1469_v18 = vadd.f32 %v1405_v53, %v1111_v21  ;;  %v13447_v22 = vld [vmem:[#allocation151_spill] sm:$0xff]  ;;  %v13448_v5 = vld [vmem:[#allocation152_spill] sm:$0xff]  ;;  %v13450_v21 = vld [vmem:[#allocation150_spill] sm:$0xff] }
 0x244   : > { %v1759_v55 = vsel %vm1732_vm15, %v13443_v1, %v13444_v10  ;;  %v1813_v27 = vadd.f32 %v1749_v63, %v1459_v35  ;;  %v1814_v15 = vadd.f32 %v1750_v30, %v1460_v17  ;;  %v2006_v52 = vsel %vm1989_vm13, %v13446_v23, %v13445_v13  ;;  %v9849_v31 = vpop.permute.xlu0 %994  ;;  %v13451_v35 = vld [vmem:[#allocation149_spill] sm:$0xff]  ;;  %v13452_v17 = vld [vmem:[#allocation154_spill] sm:$0xff]  ;;  %v13453_v63 = vld [vmem:[#allocation164_spill] sm:$0xff] }
 0x245   : > { %v2014_v48 = vsel %vm1989_vm13, %v13448_v5, %v13447_v22  ;;  %13449 = vst [vmem:[#allocation128_spill] sm:$0xff] %v9849_v31  ;;  %v1815_v59 = vadd.f32 %v1751_v62, %v1461_v57  ;;  %v1821_v41 = vadd.f32 %v1757_v20, %v1467_v49  ;;  %v1822_v7 = vadd.f32 %v1758_v28, %v1468_v50  ;;  %v9854_v11 = vpop.permute.xlu1 %992  ;;  %v13454_v30 = vld [vmem:[#allocation165_spill] sm:$0xff]  ;;  %v13456_v28 = vld [vmem:[#allocation160_spill] sm:$0xff]  ;;  %v13468_v31 = vld [vmem:[#allocation190_spill] sm:$0xff] }
 0x246   : > { %v2007_v32 = vsel %vm1989_vm13, %v13445_v13, %v13450_v21  ;;  %1336 = vrot.lane.b32.xlu0 %v1249_v54, %s7949_s30  ;;  %v1823_v53 = vadd.f32 %v1759_v55, %v1469_v18  ;;  %v2008_v23 = vsel %vm1989_vm13, %v13450_v21, %v13451_v35  ;;  %v2015_v5 = vsel %vm1989_vm13, %v13447_v22, %v13452_v17  ;;  %v13455_v1 = vld [vmem:[#allocation153_spill] sm:$0xff]  ;;  %v13458_v55 = vld [vmem:[#allocation163_spill] sm:$0xff]  ;;  %v13459_v22 = vld [vmem:[#allocation162_spill] sm:$0xff] }
 0x247   : > { %v2367_v57 = vsel %vm2342_vm0, %v13454_v30, %v13453_v63  ;;  %1320 = vrot.lane.b32.xlu1 %v9741_v39, %s7949_s30  ;;  %v2070_v62 = vadd.f32 %v2006_v52, %v1813_v27  ;;  %v2078_v20 = vadd.f32 %v2014_v48, %v1821_v41  ;;  %v2016_v54 = vsel %vm1989_vm13, %v13452_v17, %v13455_v1  ;;  %v13457_v49 = vld [vmem:[#allocation161_spill] sm:$0xff]  ;;  %v13460_v39 = vld [vmem:[#allocation175_spill] sm:$0xff]  ;;  %v13461_v52 = vld [vmem:[#allocation176_spill] sm:$0xff] }
 0x248   : > { %v2359_v50 = vsel %vm2342_vm0, %v13457_v49, %v13456_v28  ;;  %v2071_v18 = vadd.f32 %v2007_v32, %v1814_v15  ;;  %v2360_v13 = vsel %vm2342_vm0, %v13456_v28, %v13458_v55  ;;  %v2361_v21 = vsel %vm2342_vm0, %v13458_v55, %v13459_v22  ;;  %v9883_v27 = vpop.permute.xlu0 %1012  ;;  %v13463_v35 = vld [vmem:[#allocation166_spill] sm:$0xff]  ;;  %v13464_v49 = vld [vmem:[#allocation167_spill] sm:$0xff]  ;;  %v13467_v10 = vld [vmem:[#allocation172_spill] sm:$0xff] }
 0x249   : > { %v2720_v48 = vsel %vm2442_vm9, %v13461_v52, %v13460_v39  ;;  %13462 = vst [vmem:[#allocation41_spill] sm:$0xff] %v9883_v27  ;;  %v2072_v41 = vadd.f32 %v2008_v23, %v1815_v59  ;;  %v2079_v17 = vadd.f32 %v2015_v5, %v1822_v7  ;;  %v2431_v30 = vadd.f32 %v2367_v57, %v2078_v20  ;;  %v9888_v32 = vpop.permute.xlu1 %1010  ;;  %v13465_v28 = vld [vmem:[#allocation95_spill] sm:$0xff]  ;;  %v13469_v27 = vld [vmem:[#allocation90_spill] sm:$0xff] }
 0x24a   : > { %v2369_v15 = vsel %vm2342_vm0, %v13464_v49, %v13463_v35  ;;  %996 = vrot.lane.b32.xlu0 %v13465_v28, %s7947_s28  ;;  %v2080_v1 = vadd.f32 %v2016_v54, %v1823_v53  ;;  %v2423_v55 = vadd.f32 %v2359_v50, %v2070_v62  ;;  %v13466_v22 = vld [vmem:[#allocation171_spill] sm:$0xff]  ;;  %v2977_v59 = vsel %vm2952_vm3, %v13469_v27, %v13468_v31  ;;  %v13470_v62 = vld [vmem:[#allocation177_spill] sm:$0xff]  ;;  %v13473_v50 = vld [vmem:[#allocation184_spill] sm:$0xff] }
 0x24b   : > { %v2712_v52 = vsel %vm2442_vm9, %v13467_v10, %v13466_v22  ;;  %1338 = vrot.lane.b32.xlu1 %v9772_v24, %s7949_s30  ;;  %v2424_v7 = vadd.f32 %v2360_v13, %v2071_v18  ;;  %v2425_v23 = vadd.f32 %v2361_v21, %v2072_v41  ;;  %v2368_v5 = vsel %vm2342_vm0, %v13453_v63, %v13464_v49  ;;  %v13471_v20 = vld [vmem:[#allocation35_spill] sm:$0xff]  ;;  %v13472_v10 = vld [vmem:[#allocation36_spill] sm:$0xff]  ;;  %v13474_v21 = vld [vmem:[#allocation173_spill] sm:$0xff] }
 0x24c   : > { %v2784_v57 = vadd.f32 %v2720_v48, %v2431_v30  ;;  %v2433_v53 = vadd.f32 %v2369_v15, %v2080_v1  ;;  %v2722_v54 = vsel %vm2442_vm9, %v13471_v20, %v13470_v62  ;;  %v2969_v28 = vsel %vm2952_vm3, %v13473_v50, %v13472_v10  ;;  %v9912_v18 = vpop.permute.xlu0 %1670  ;;  %v13475_v27 = vld [vmem:[#allocation174_spill] sm:$0xff]  ;;  %v13538_v35 = vld [vmem:[#allocation179_spill] sm:$0xff] }
 0x24d   : > { %v3330_v24 = vsel %vm3305_vm5, %v9653_v8, %v9645_v4  ;;  %v2776_v13 = vadd.f32 %v2712_v52, %v2423_v55  ;;  %v2714_v63 = vsel %vm2442_vm9, %v13475_v27, %v13474_v21  ;;  %v2721_v1 = vsel %vm2442_vm9, %v13460_v39, %v13471_v20  ;;  %v9920_v41 = vpop.permute.xlu1 %1668  ;;  %v13476_v39 = vld [vmem:[#allocation97_spill] sm:$0xff] }
 0x24e   : > { %v3041_v48 = vadd.f32 %v2977_v59, %v2784_v57  ;;  %1014 = vrot.lane.b32.xlu0 %v9724_v16, %s7947_s28  ;;  %v2432_v30 = vadd.f32 %v2368_v5, %v2079_v17  ;;  %v2713_v8 = vsel %vm2442_vm9, %v13466_v22, %v13475_v27  ;;  %v2979_v49 = vsel %vm2952_vm3, %v9557_v19, %v9549_v0  ;;  %v13477_v5 = vld [vmem:[#allocation38_spill] sm:$0xff]  ;;  %v13528_v21 = vld [vmem:[#allocation61_spill] sm:$0xff] }
 0x24f   : > { %v3322_v15 = vsel %vm3305_vm5, %v9592_v56, %v9587_v25  ;;  %998 = vrot.lane.b32.xlu1 %v13476_v39, %s7947_s28  ;;  %v2786_v55 = vadd.f32 %v2722_v54, %v2433_v53  ;;  %v3033_v52 = vadd.f32 %v2969_v28, %v2776_v13  ;;  %v2978_v16 = vsel %vm2952_vm3, %v13468_v31, %v9557_v19  ;;  %v13478_v57 = vld [vmem:[#allocation186_spill] sm:$0xff] }
 0x250   : > { %v3394_v17 = vadd.f32 %v3330_v24, %v3041_v48  ;;  %v2778_v59 = vadd.f32 %v2714_v63, %v2425_v23  ;;  %v2785_v22 = vadd.f32 %v2721_v1, %v2432_v30  ;;  %v2971_v20 = vsel %vm2952_vm3, %v13478_v57, %v13477_v5  ;;  %v9944_v50 = vpop.permute.xlu0 %1688  ;;  %v13527_v5 = vld [vmem:[#allocation60_spill] sm:$0xff] }
 0x251   : > { %v3332_v56 = vsel %vm3305_vm5, %v9688_v58, %v9677_v46  ;;  %v2970_v53 = vsel %vm2952_vm3, %v13472_v10, %v13478_v57  ;;  %v3043_v54 = vadd.f32 %v2979_v49, %v2786_v55  ;;  %v3386_v28 = vadd.f32 %v3322_v15, %v3033_v52  ;;  %v9952_v31 = vpop.permute.xlu1 %1686  ;;  %v13479_v10 = vld [vmem:[#allocation28_spill] sm:$0xff]  ;;  %v13481_v49 = vld [vmem:[#allocation181_spill] sm:$0xff] }
 0x252   : > { %v3331_v19 = vsel %vm3305_vm5, %v9645_v4, %v9688_v58  ;;  %1672 = vrot.lane.b32.xlu0 %v9790_v34, %s7950_s14  ;;  %v2777_v23 = vadd.f32 %v2713_v8, %v2424_v7  ;;  %v3042_v24 = vadd.f32 %v2978_v16, %v2785_v22  ;;  %v3324_v13 = vsel %vm3305_vm5, %v9621_v45, %v9613_v36  ;;  %v13480_v58 = vld [vmem:[#allocation33_spill] sm:$0xff] }
 0x253   : > { %1016 = vrot.lane.b32.xlu1 %v9734_v38, %s7947_s28  ;;  %v1603_v27 = vmul.f32 %v13479_v10, %v9751_v44  ;;  %v3035_v63 = vadd.f32 %v2971_v20, %v2778_v59  ;;  %v3323_v4 = vsel %vm3305_vm5, %v9587_v25, %v9621_v45  ;;  %v3450_v1 = vadd.f32 %v13480_v58, %v3394_v17 }
 0x254   : > { %v3396_v34 = vadd.f32 %v3332_v56, %v3043_v54  ;;  %v3034_v7 = vadd.f32 %v2970_v53, %v2777_v23  ;;  %v3395_v48 = vadd.f32 %v3331_v19, %v3042_v24  ;;  %v9967_v30 = vpop.permute.xlu0 %1352  ;;  %v1595_v8 = vmul.f32 %v13422_v2, %v9793_v26 }
 0x255   : > { %v3442_v38 = vadd.f32 %v13481_v49, %v3386_v28  ;;  %v3388_v15 = vadd.f32 %v3324_v13, %v3035_v63  ;;  %v9972_v39 = vpop.permute.xlu1 %1350  ;;  %v1604_v17 = vmul.f32 %v13479_v10, %v9793_v26  ;;  %v13483_v28 = vld [vmem:[#allocation31_spill] sm:$0xff] }
 0x256   : > { %1690 = vrot.lane.b32.xlu0 %v1603_v27, %s7950_s14  ;;  %v3387_v55 = vadd.f32 %v3323_v4, %v3034_v7  ;;  %v3452_v45 = vadd.f32 %v13480_v58, %v3396_v34  ;;  %v3451_v52 = vadd.f32 %v13480_v58, %v3395_v48  ;;  %v1259_v19 = vmul.f32 %v13483_v28, %v9599_v33  ;;  %v13484_v27 = vld [vmem:[#allocation53_spill] sm:$0xff]  ;;  %v13487_v7 = vld [vmem:[#allocation23_spill] sm:$0xff] }
 0x257   : > { %1674 = vrot.lane.b32.xlu1 %v1595_v8, %s7950_s14  ;;  %v3472_v25 = vpack.c.bf16 %v3450_v1, %v3442_v38  ;;  %v3444_v59 = vadd.f32 %v13481_v49, %v3388_v15  ;;  %v1258_v24 = vmul.f32 %v13483_v28, %v13403_v3  ;;  %v1268_v63 = vmul.f32 %v13484_v27, %v9599_v33 }
 0x258   : > { %v9978_v16 = vpop.permute.xlu0 %1370  ;;  %v3443_v57 = vadd.f32 %v13481_v49, %v3387_v55  ;;  %v1267_v1 = vmul.f32 %v13484_v27, %v13403_v3  ;;  %v1852_v48 = vmul.f32 %v13487_v7, %v8572_v43  ;;  %v1851_v38 = vmul.f32 %v13487_v7, %v8569_v9  ;;  %v13490_v3 = vld [vmem:[#allocation24_spill] sm:$0xff]  ;;  %v13509_v27 = vld [vmem:[#allocation103_spill] sm:$0xff] }
 0x259   : > { %v9983_v22 = vpop.permute.xlu1 %1368  ;;  %v3474_v20 = vpack.c.bf16 %v3452_v45, %v3444_v59  ;;  %v1861_v15 = vmul.f32 %v13490_v3, %v8572_v43  ;;  %v13493_v59 = vld [vmem:[#allocation168_spill] sm:$0xff] }
 0x25a   : > { %13482 = vst [vmem:[#allocation42_spill] sm:$0xff] %v9983_v22  ;;  %3512 = vrot.lane.b32.xlu0 %v3472_v25, %s7940_s23  ;;  %v3473_v53 = vpack.c.bf16 %v3451_v52, %v3443_v57  ;;  %v1860_v25 = vmul.f32 %v13490_v3, %v8569_v9  ;;  %v13492_v52 = vld [vmem:[#allocation54_spill] sm:$0xff]  ;;  %v2148_v57 = vrot.slane %v13493_v59, %v13409_v60 }
 0x25b   : > { %1692 = vrot.lane.b32.xlu1 %v1604_v17, %s7950_s14  ;;  %v1613_v17 = vmul.f32 %v13492_v52, %v9793_v26 }
 0x25c   : > { %v9988_v56 = vpop.permute.xlu0 %1927 }
 0x25d   : > { %v9990_v54 = vpop.permute.xlu1 %1925 }
 0x25e   : > { %3516 = vrot.lane.b32.xlu0 %v3474_v20, %s7940_s23 }
 0x25f   : > { %3514 = vrot.lane.b32.xlu1 %v3473_v53, %s7940_s23  ;;  %v1612_v53 = vmul.f32 %v13492_v52, %v9751_v44 }
 0x260   : > { %v9996_v23 = vpop.permute.xlu0 %1945 }
 0x261   : > { %v10000_v13 = vpop.permute.xlu1 %1943 }
 0x262   : > { %1356 = vrot.lane.b32.xlu0 %v1259_v19, %s7949_s30  ;;  %v2144_v19 = vrot.slane %v13493_v59, %v13397_v51 }
 0x263   : > { %1354 = vrot.lane.b32.xlu1 %v1258_v24, %s7949_s30 }
 0x264   : > { %v10006_v4 = vpop.permute.xlu0 %1706 }
 0x265   : > { %13485 = vst [vmem:[#allocation109_spill] sm:$0xff] %v10006_v4  ;;  %v10010_v34 = vpop.permute.xlu1 %1704 }
 0x266   : > { %13486 = vst [vmem:[#allocation110_spill] sm:$0xff] %v10010_v34  ;;  %1374 = vrot.lane.b32.xlu0 %v1268_v63, %s7949_s30  ;;  %v13495_v63 = vld [vmem:[#allocation57_spill] sm:$0xff] }
 0x267   : > { %1372 = vrot.lane.b32.xlu1 %v1267_v1, %s7949_s30  ;;  %v1622_v1 = vmul.f32 %v13495_v63, %v9793_v26 }
 0x268   : > { %v10016_v8 = vpop.permute.xlu0 %1724 }
 0x269   : > { %13488 = vst [vmem:[#allocation112_spill] sm:$0xff] %v10016_v8  ;;  %v10020_v33 = vpop.permute.xlu1 %1722  ;;  %v13558_v8 = vld [vmem:[#allocation183_spill] sm:$0xff] }
 0x26a   : > { %13489 = vst [vmem:[#allocation113_spill] sm:$0xff] %v10020_v33  ;;  %1931 = vrot.lane.b32.xlu0 %v1852_v48, %s7948_s29  ;;  %v2193_v48 = vrot.slane %v2148_v57, %v8062_v14 }
 0x26b   : > { %1929 = vrot.lane.b32.xlu1 %v1851_v38, %s7948_s29 }
 0x26c   : > { %v10026_v55 = vpop.permute.xlu0 %2280 }
 0x26d   : > { %13491 = vst [vmem:[#allocation114_spill] sm:$0xff] %v10026_v55  ;;  %v10030_v45 = vpop.permute.xlu1 %2278 }
 0x26e   : > { %1949 = vrot.lane.b32.xlu0 %v1861_v15, %s7948_s29  ;;  %v1621_v15 = vmul.f32 %v13495_v63, %v9751_v44  ;;  %v13501_v44 = vld [vmem:[#allocation84_spill] sm:$0xff] }
 0x26f   : > { %1947 = vrot.lane.b32.xlu1 %v1860_v25, %s7948_s29  ;;  %v2189_v25 = vrot.slane %v2144_v19, %v8062_v14  ;;  %v2214_v19 = vmul.f32 %v13501_v44, %v2193_v48 }
 0x270   : > { %v10038_v20 = vpop.permute.xlu0 %2298 }
 0x271   : > { %13494 = vst [vmem:[#allocation117_spill] sm:$0xff] %v10038_v20  ;;  %v10044_v24 = vpop.permute.xlu1 %2296 }
 0x272   : > { %1710 = vrot.lane.b32.xlu0 %v1613_v17, %s7950_s14  ;;  %v13498_v17 = vld [vmem:[#allocation77_spill] sm:$0xff] }
 0x273   : > { %1708 = vrot.lane.b32.xlu1 %v1612_v53, %s7950_s14  ;;  %v2205_v59 = vmul.f32 %v13498_v17, %v2193_v48  ;;  %v2204_v26 = vmul.f32 %v13498_v17, %v2189_v25 }
 0x274   : > { %v10051_v38 = vpop.permute.xlu0 %1963 }
 0x275   : > { %13496 = vst [vmem:[#allocation43_spill] sm:$0xff] %v10051_v38  ;;  %v10056_v52 = vpop.permute.xlu1 %1961 }
 0x276   : > { %13497 = vst [vmem:[#allocation44_spill] sm:$0xff] %v10056_v52  ;;  %1728 = vrot.lane.b32.xlu0 %v1622_v1, %s7950_s14  ;;  %v2213_v1 = vmul.f32 %v13501_v44, %v2189_v25  ;;  %v13505_v44 = vld [vmem:[#allocation98_spill] sm:$0xff]  ;;  %v13545_v52 = vld [vmem:[#allocation71_spill] sm:$0xff] }
 0x277   : > { %1726 = vrot.lane.b32.xlu1 %v1621_v15, %s7950_s14  ;;  %v13503_v15 = vld [vmem:[#allocation93_spill] sm:$0xff]  ;;  %v1879_v3 = vmul.f32 %v13505_v44, %v8572_v43 }
 0x278   : > { %v10061_v53 = vpop.permute.xlu0 %1981  ;;  %v1870_v17 = vmul.f32 %v13503_v15, %v8572_v43 }
 0x279   : > { %13499 = vst [vmem:[#allocation49_spill] sm:$0xff] %v10061_v53  ;;  %v10064_v57 = vpop.permute.xlu1 %1979 }
 0x27a   : > { %13500 = vst [vmem:[#allocation50_spill] sm:$0xff] %v10064_v57  ;;  %2284 = vrot.lane.b32.xlu0 %v2205_v59, %s7951_s15  ;;  %v1869_v59 = vmul.f32 %v13503_v15, %v8569_v9  ;;  %v13508_v15 = vld [vmem:[#allocation58_spill] sm:$0xff] }
 0x27b   : > { %2282 = vrot.lane.b32.xlu1 %v2204_v26, %s7951_s15  ;;  %v2558_v49 = vmul.f32 %v13509_v27, %v13508_v15 }
 0x27c   : > { %v10069_v51 = vpop.permute.xlu0 %2633 }
 0x27d   : > { %13502 = vst [vmem:[#allocation51_spill] sm:$0xff] %v10069_v51  ;;  %v10072_v63 = vpop.permute.xlu1 %2631 }
 0x27e   : > { %2302 = vrot.lane.b32.xlu0 %v2214_v19, %s7951_s15 }
 0x27f   : > { %2300 = vrot.lane.b32.xlu1 %v2213_v1, %s7951_s15  ;;  %v1878_v1 = vmul.f32 %v13505_v44, %v8569_v9  ;;  %v13513_v9 = vld [vmem:[#allocation108_spill] sm:$0xff] }
 0x280   : > { %v10078_v7 = vpop.permute.xlu0 %2651  ;;  %v2567_v44 = vmul.f32 %v13513_v9, %v13508_v15  ;;  %v13517_v15 = vld [vmem:[#allocation119_spill] sm:$0xff] }
 0x281   : > { %13504 = vst [vmem:[#allocation52_spill] sm:$0xff] %v10078_v7  ;;  %v10082_v26 = vpop.permute.xlu1 %2649 }
 0x282   : > { %1967 = vrot.lane.b32.xlu0 %v1870_v17, %s7948_s29 }
 0x283   : > { %1965 = vrot.lane.b32.xlu1 %v1869_v59, %s7948_s29  ;;  %v13511_v59 = vld [vmem:[#allocation59_spill] sm:$0xff] }
 0x284   : > { %v10088_v19 = vpop.permute.xlu0 %2316  ;;  %v2557_v2 = vmul.f32 %v13509_v27, %v13511_v59  ;;  %v13515_v27 = vld [vmem:[#allocation115_spill] sm:$0xff] }
 0x285   : > { %13506 = vst [vmem:[#allocation191_spill] sm:$0xff] %v10088_v19  ;;  %v10092_v28 = vpop.permute.xlu1 %2314  ;;  %v2223_v58 = vmul.f32 %v13515_v27, %v2193_v48 }
 0x286   : > { %13507 = vst [vmem:[#allocation156_spill] sm:$0xff] %v10092_v28  ;;  %1985 = vrot.lane.b32.xlu0 %v1879_v3, %s7948_s29 }
 0x287   : > { %1983 = vrot.lane.b32.xlu1 %v1878_v1, %s7948_s29  ;;  %v2566_v1 = vmul.f32 %v13513_v9, %v13511_v59  ;;  %v2232_v59 = vmul.f32 %v13517_v15, %v2193_v48  ;;  %v13523_v48 = vld [vmem:[#allocation55_spill] sm:$0xff] }
 0x288   : > { %v10098_v17 = vpop.permute.xlu0 %2334 }
 0x289   : > { %13510 = vst [vmem:[#allocation192_spill] sm:$0xff] %v10098_v17  ;;  %v10102_v43 = vpop.permute.xlu1 %2332 }
 0x28a   : > { %13512 = vst [vmem:[#allocation94_spill] sm:$0xff] %v10102_v43  ;;  %2637 = vrot.lane.b32.xlu0 %v2558_v49, %s7941_s24 }
 0x28b   : > { %2635 = vrot.lane.b32.xlu1 %v2557_v2, %s7941_s24  ;;  %v2222_v2 = vmul.f32 %v13515_v27, %v2189_v25  ;;  %v13524_v27 = vld [vmem:[#allocation15_spill] sm:$0xff] }
 0x28c   : > { %v10108_v3 = vpop.permute.xlu0 %2890 }
 0x28d   : > { %13514 = vst [vmem:[#allocation25_spill] sm:$0xff] %v10108_v3  ;;  %v10112_v10 = vpop.permute.xlu1 %2888 }
 0x28e   : > { %2655 = vrot.lane.b32.xlu0 %v2567_v44, %s7941_s24  ;;  %v2231_v44 = vmul.f32 %v13517_v15, %v2189_v25  ;;  %v13525_v15 = vld [vmem:[#allocation56_spill] sm:$0xff] }
 0x28f   : > { %2653 = vrot.lane.b32.xlu1 %v2566_v1, %s7941_s24  ;;  %v10135_v1 = vld [vmem:[%s12792_s9] sm:$0xff] }
 0x290   : > { %v10117_v36 = vpop.permute.xlu0 %2908  ;;  %13520 = vst [vmem:[#allocation100_spill] sm:$0xff] %v10135_v1  ;;  %v3604_v25 = vrot.slane %v10135_v1, %v13524_v27  ;;  %v13530_v1 = vld [vmem:[#allocation62_spill] sm:$0xff] }
 0x291   : > { %13516 = vst [vmem:[#allocation92_spill] sm:$0xff] %v10117_v36  ;;  %v10120_v49 = vpop.permute.xlu1 %2906 }
 0x292   : > { %2320 = vrot.lane.b32.xlu0 %v2223_v58, %s7951_s15  ;;  %v3612_v0 = vcombine.high %v3604_v25, %v3604_v25  ;;  %v10167_v62 = vrot.slane %v3604_v25, %v13524_v27  ;;  %v13540_v25 = vld [vmem:[#allocation65_spill] sm:$0xff] }
 0x293   : > { %2318 = vrot.lane.b32.xlu1 %v2222_v2, %s7951_s15 }
 0x294   : > { %v10125_v9 = vpop.permute.xlu0 %2669 }
 0x295   : > { %13518 = vst [vmem:[#allocation26_spill] sm:$0xff] %v10125_v9  ;;  %v10128_v46 = vpop.permute.xlu1 %2667  ;;  %v13531_v9 = vld [vmem:[#allocation63_spill] sm:$0xff] }
 0x296   : > { %13519 = vst [vmem:[#allocation99_spill] sm:$0xff] %v10128_v46  ;;  %2338 = vrot.lane.b32.xlu0 %v2232_v59, %s7951_s15 }
 0x297   : > { %2336 = vrot.lane.b32.xlu1 %v2231_v44, %s7951_s15 }
 0x298   : > { %v10137_v58 = vpop.permute.xlu0 %2687 }
 0x299   : > { %13521 = vst [vmem:[#allocation102_spill] sm:$0xff] %v10137_v58  ;;  %v10139_v2 = vpop.permute.xlu1 %2685 }
 0x29a   : > { %13522 = vst [vmem:[#allocation45_spill] sm:$0xff] %v10139_v2  ;;  %2894 = vrot.lane.b32.xlu0 %v13523_v48, %s7952_s16  ;;  %v10171_v2 = vld [vmem:[#allocation2 + $0x8] sm:$0x1] }
 0x29b   : > { %2892 = vrot.lane.b32.xlu1 %v13525_v15, %s7952_s16  ;;  %v10162_v15 = vrot.slane %v3612_v0, %v13524_v27  ;;  %13533 = vst [vmem:[#allocation185_spill] sm:$0xff] %v10171_v2  ;;  %v3873_v27 = vshrl.u32 %v10167_v62, 16 }
 0x29c   : > { %v10147_v59 = vpop.permute.xlu0 %3243 }
 0x29d   : > { %13526 = vst [vmem:[#allocation104_spill] sm:$0xff] %v10147_v59  ;;  %v10149_v44 = vpop.permute.xlu1 %3241  ;;  %v3880_v0 = vshrl.u32 %v10162_v15, 16  ;;  %v3874_v38 = vpack.i.b16 %v3873_v27, %v3873_v27 }
 0x29e   : > { %2912 = vrot.lane.b32.xlu0 %v13527_v5, %s7952_s16 }
 0x29f   : > { %2910 = vrot.lane.b32.xlu1 %v13528_v21, %s7952_s16  ;;  %v13534_v21 = vld [vmem:[#allocation16_spill] sm:$0xff]  ;;  %v3881_v43 = vpack.i.b16 %v3880_v0, %v3880_v0 }
 0x2a0   : > { %v10155_v46 = vpop.permute.xlu0 %3261  ;;  %v13535_v58 = vrot.slane %v13534_v21, 7  ;;  %v10189_v21 = vcombine.high %v10167_v62, %v10167_v62 }
 0x2a1   : > { %13529 = vst [vmem:[#allocation105_spill] sm:$0xff] %v10155_v46  ;;  %v10157_v48 = vpop.permute.xlu1 %3259 }
 0x2a2   : > { %2673 = vrot.lane.b32.xlu0 %v13530_v1, %s7941_s24  ;;  %v1130_v28 = vmul.bf16 %v10171_v2, %v13535_v58  ;;  %v13537_v1 = vld [vmem:[#allocation64_spill] sm:$0xff]  ;;  %v3887_v57 = vshrl.u32 %v10189_v21, 16 }
 0x2a3   : > { %2671 = vrot.lane.b32.xlu1 %v13531_v9, %s7941_s24  ;;  %v10182_v9 = vunpack.c.h.bf16 %v13538_v35  ;;  %v13544_v35 = vld [vmem:[#allocation32_spill] sm:$0xff] }
 0x2a4   : > { %v10169_v5 = vpop.permute.xlu0 %2926  ;;  %v650_v17 = vrot.slane %v13544_v35, %v13409_v60  ;;  %v13550_v35 = vld [vmem:[#allocation68_spill] sm:$0xff]  ;;  %v10215_v60 = vrot.slane %v3881_v43, %v8062_v14 }
 0x2a5   : > { %13532 = vst [vmem:[#allocation107_spill] sm:$0xff] %v10169_v5  ;;  %v10176_v19 = vpop.permute.xlu1 %2924  ;;  %13539 = vst [vmem:[#allocation187_spill] sm:$0xff] %v10182_v9 }
 0x2a6   : > { %13536 = vst [vmem:[#allocation39_spill] sm:$0xff] %v10176_v19  ;;  %2691 = vrot.lane.b32.xlu0 %v13537_v1, %s7941_s24  ;;  %v1133_v19 = vunpack.c.l.bf16 %v1130_v28  ;;  %v13543_v1 = vld [vmem:[#allocation67_spill] sm:$0xff]  ;;  %13551 = vst [vmem:[#allocation188_spill] sm:$0xff] %v10215_v60  ;;  %v690_v27 = vrot.slane %v650_v17, %v8062_v14  ;;  %v13557_v17 = vld [vmem:[#allocation182_spill] sm:$0xff] }
 0x2a7   : > { %2689 = vrot.lane.b32.xlu1 %v13540_v25, %s7941_s24  ;;  %v654_v25 = vrot.slane %v10182_v9, %v8062_v14  ;;  %v3888_v9 = vpack.i.b16 %v3887_v57, %v3887_v57  ;;  %v13560_v57 = vld [vmem:[#allocation91_spill] sm:$0xff] }
 0x2a8   : > { %v10191_v58 = vpop.permute.xlu0 %2944  ;;  %v1188_v0 = vrot.slane %v1133_v19, %v8062_v14  ;;  %v718_v33 = vmul.f32 %v13557_v17, %v690_v27 }
 0x2a9   : > { %13541 = vst [vmem:[#allocation129_spill] sm:$0xff] %v10191_v58  ;;  %v10193_v5 = vpop.permute.xlu1 %2942  ;;  %v13546_v58 = vld [vmem:[#allocation20_spill] sm:$0xff] }
 0x2aa   : > { %13542 = vst [vmem:[#allocation130_spill] sm:$0xff] %v10193_v5  ;;  %3247 = vrot.lane.b32.xlu0 %v13543_v1, %s7953_s17  ;;  %v13547_v28 = vrot.slane %v13546_v58, 7  ;;  %v13552_v58 = vld [vmem:[#allocation72_spill] sm:$0xff]  ;;  %v10229_v43 = vrot.slane %v1188_v0, %v8062_v14  ;;  %v1025_v0 = vsel %vm1020_vm12, %v9714_v37, %v9706_v61 }
 0x2ab   : > { %3245 = vrot.lane.b32.xlu1 %v13545_v52, %s7953_s17  ;;  %v694_v52 = vrot.slane %v654_v25, %v8062_v14 }
 0x2ac   : > { %v1484_v5 = vmul.bf16 %v10171_v2, %v13547_v28  ;;  %v10207_v53 = vpop.permute.xlu0 %3279  ;;  %v10222_v28 = vrot.slane %v3874_v38, %v8062_v14  ;;  %v13554_v2 = vld [vmem:[#allocation34_spill] sm:$0xff]  ;;  %13556 = vst [vmem:[#allocation134_spill] sm:$0xff] %v10229_v43 }
 0x2ad   : > { %13548 = vst [vmem:[#allocation132_spill] sm:$0xff] %v10207_v53  ;;  %v10210_v1 = vpop.permute.xlu1 %3277  ;;  %v711_v53 = vmul.f32 %v13554_v2, %v694_v52  ;;  %v719_v25 = vmul.f32 %v13557_v17, %v694_v52  ;;  %v727_v38 = vmul.f32 %v13558_v8, %v694_v52 }
 0x2ae   : > { %13549 = vst [vmem:[#allocation40_spill] sm:$0xff] %v10210_v1  ;;  %3265 = vrot.lane.b32.xlu0 %v13550_v35, %s7953_s17  ;;  %13553 = vst [vmem:[#allocation189_spill] sm:$0xff] %v10222_v28  ;;  %v1487_v19 = vunpack.c.l.bf16 %v1484_v5  ;;  %v710_v1 = vmul.f32 %v13554_v2, %v690_v27  ;;  %v1024_v5 = vsel %vm1020_vm12, %v13560_v57, %v9714_v37  ;;  %v13561_v2 = vld [vmem:[#allocation37_spill] sm:$0xff]  ;;  %v13565_v57 = vld [vmem:[#allocation18_spill] sm:$0xff] }
 0x2af   : > { %3263 = vrot.lane.b32.xlu1 %v13552_v58, %s7953_s17  ;;  %v726_v58 = vmul.f32 %v13558_v8, %v690_v27  ;;  %v10249_v8 = vrot.slane %v3888_v9, %v8062_v14  ;;  %v10252_v17 = vmul.f32 %v13561_v2, %v694_v52  ;;  %v1033_v9 = vsel %vm1020_vm12, %v9744_v40, %v9737_v6 }
 0x2b0   : > { %v10226_v35 = vpop.permute.xlu0 %3297  ;;  %v10263_v37 = vrot.slane %v1487_v19, %v8062_v14  ;;  %v1088_v19 = vadd.f32 %v1024_v5, %v710_v1  ;;  %v13575_v1 = vld [vmem:[#allocation101_spill] sm:$0xff] }
 0x2b1   : > { %13555 = vst [vmem:[#allocation133_spill] sm:$0xff] %v10226_v35  ;;  %v10235_v4 = vpop.permute.xlu1 %3295  ;;  %v734_v35 = vmul.f32 %v13561_v2, %v690_v27  ;;  %13562 = vst [vmem:[#allocation137_spill] sm:$0xff] %v10249_v8  ;;  %v13567_v27 = vld [vmem:[#allocation96_spill] sm:$0xff]  ;;  %v1089_v2 = vadd.f32 %v1025_v0, %v711_v53  ;;  %v1097_v0 = vadd.f32 %v1033_v9, %v719_v25  ;;  %v13579_v25 = vld [vmem:[#allocation69_spill] sm:$0xff] }
 0x2b2   : > { %13559 = vst [vmem:[#allocation136_spill] sm:$0xff] %v10235_v4  ;;  %3939 = vrot.lane.b32.xlu0 %v10215_v60, %s7934_s20  ;;  %v13563_v60 = vld [vmem:[#allocation80_spill] sm:$0xff]  ;;  %v13564_v4 = vld [vmem:[#allocation19_spill] sm:$0xff]  ;;  %13566 = vst [vmem:[#allocation138_spill] sm:$0xff] %v10263_v37  ;;  %v1032_v61 = vsel %vm1020_vm12, %v13567_v27, %v9744_v40  ;;  %v1383_v40 = vsel %vm1378_vm14, %v9785_v42, %v9781_v12  ;;  %v3654_v12 = vpack.i.b16 %v10162_v15, %v10162_v15 }
 0x2b3   : > { %3937 = vrot.lane.b32.xlu1 %v10222_v28, %s7934_s20  ;;  %v10256_v34 = vmul.f32 %v13564_v4, %v13563_v60  ;;  %v10260_v22 = vmul.f32 %v13565_v57, %v13563_v60  ;;  %v10275_v4 = vmul.f32 %v13408_v29, %v10229_v43  ;;  %v10279_v57 = vmul.f32 %v13404_v47, %v10229_v43  ;;  %v13569_v28 = vld [vmem:[#allocation120_spill] sm:$0xff]  ;;  %v13572_v29 = vld [vmem:[#allocation126_spill] sm:$0xff]  ;;  %v13573_v37 = vld [vmem:[#allocation123_spill] sm:$0xff] }
 0x2b4   : > { %v10271_v52 = vpop.permute.xlu0 %962  ;;  %v1382_v27 = vsel %vm1378_vm14, %v13569_v28, %v9785_v42  ;;  %v1390_v47 = vsel %vm1378_vm14, %v13573_v37, %v13572_v29  ;;  %v13574_v43 = vld [vmem:[#allocation125_spill] sm:$0xff]  ;;  %v1040_v28 = vsel %vm1020_vm12, %v13575_v1, %v9854_v11  ;;  %v3647_v42 = vpack.i.b16 %v10167_v62, %v10167_v62  ;;  %v13580_v9 = vld [vmem:[#allocation124_spill] sm:$0xff] }
 0x2b5   : > { %13568 = vst [vmem:[#allocation140_spill] sm:$0xff] %v10271_v52  ;;  %v10287_v6 = vpop.permute.xlu1 %960  ;;  %v13571_v52 = vld [vmem:[#allocation66_spill] sm:$0xff]  ;;  %v1391_v53 = vsel %vm1378_vm14, %v13572_v29, %v13574_v43  ;;  %v1096_v5 = vadd.f32 %v1032_v61, %v718_v33  ;;  %v1446_v29 = vadd.f32 %v1382_v27, %v1088_v19  ;;  %v1447_v43 = vadd.f32 %v1383_v40, %v1089_v2  ;;  %v13582_v40 = vld [vmem:[#allocation41_spill] sm:$0xff] }
 0x2b6   : > { %13570 = vst [vmem:[#allocation141_spill] sm:$0xff] %v10287_v6  ;;  %2928 = vrot.lane.b32.xlu0 %v13571_v52, %s7952_s16  ;;  %v13576_v52 = vld [vmem:[#allocation128_spill] sm:$0xff]  ;;  %v3661_v1 = vpack.i.b16 %v10189_v21, %v10189_v21  ;;  %v1455_v60 = vadd.f32 %v1391_v53, %v1097_v0  ;;  %v10313_v62 = vadd.f32 %v1040_v28, %v726_v58  ;;  %v13578_v61 = vld [vmem:[#allocation106_spill] sm:$0xff]  ;;  %v13583_v53 = vld [vmem:[#allocation127_spill] sm:$0xff] }
 0x2b7   : > { %3941 = vrot.lane.b32.xlu1 %v10249_v8, %s7934_s20  ;;  %v1041_v37 = vsel %vm1020_vm12, %v9854_v11, %v13576_v52  ;;  %v1454_v8 = vadd.f32 %v1390_v47, %v1096_v5  ;;  %v1048_v33 = vsel %vm1020_vm12, %v13578_v61, %v9888_v32  ;;  %v1736_v19 = vsel %vm1732_vm15, %v13580_v9, %v9920_v41  ;;  %v13581_v58 = vld [vmem:[#allocation70_spill] sm:$0xff] }
 0x2b8   : > { %v10309_v6 = vpop.permute.xlu0 %980  ;;  %v10322_v2 = vadd.f32 %v1041_v37, %v727_v38  ;;  %v1745_v21 = vsel %vm1732_vm15, %v9952_v31, %v9944_v50  ;;  %v10333_v27 = vrot.slane %v3647_v42, %v8062_v14  ;;  %v10338_v47 = vsel %vm1020_vm12, %v9888_v32, %v13582_v40  ;;  %v13584_v42 = vld [vmem:[#allocation111_spill] sm:$0xff] }
 0x2b9   : > { %13577 = vst [vmem:[#allocation142_spill] sm:$0xff] %v10309_v6  ;;  %v10318_v11 = vpop.permute.xlu1 %978  ;;  %v1737_v38 = vsel %vm1732_vm15, %v9920_v41, %v9912_v18  ;;  %v1744_v28 = vsel %vm1732_vm15, %v13583_v53, %v9952_v31  ;;  %v10347_v5 = vrot.slane %v3654_v12, %v8062_v14  ;;  %v10349_v0 = vadd.f32 %v1048_v33, %v734_v35  ;;  %v13586_v31 = vld [vmem:[#allocation116_spill] sm:$0xff] }
 0x2ba   : > { %2946 = vrot.lane.b32.xlu0 %v13579_v25, %s7952_s16  ;;  %v1993_v37 = vsel %vm1989_vm13, %v13584_v42, %v9990_v54  ;;  %v2002_v32 = vsel %vm1989_vm13, %v10000_v13, %v9996_v23  ;;  %v10358_v41 = vrot.slane %v3661_v1, %v8062_v14  ;;  %v1800_v25 = vadd.f32 %v1736_v19, %v1446_v29  ;;  %v13590_v19 = vld [vmem:[#allocation146_spill] sm:$0xff] }
 0x2bb   : > { %2930 = vrot.lane.b32.xlu1 %v13581_v58, %s7952_s16  ;;  %v1809_v9 = vadd.f32 %v1745_v21, %v1455_v60  ;;  %v1994_v12 = vsel %vm1989_vm13, %v9990_v54, %v9988_v56  ;;  %v2001_v35 = vsel %vm1989_vm13, %v13586_v31, %v10000_v13  ;;  %v13587_v58 = vld [vmem:[#allocation73_spill] sm:$0xff]  ;;  %v1801_v53 = vadd.f32 %v1737_v38, %v1447_v43  ;;  %v13589_v54 = vld [vmem:[#allocation74_spill] sm:$0xff] }
 0x2bc   : > { %v3499_v61 = vpop.permute.xlu0 %3498  ;;  %13585 = vst [vmem:[#allocation144_spill] sm:$0xff] %v10358_v41  ;;  %v1808_v42 = vadd.f32 %v1744_v28, %v1454_v8  ;;  %v2355_v1 = vsel %vm2342_vm0, %v10044_v24, %v10038_v20  ;;  %v2057_v29 = vadd.f32 %v1993_v37, %v1800_v25  ;;  %v2354_v21 = vsel %vm2342_vm0, %v13590_v19, %v10044_v24  ;;  %v13591_v25 = vld [vmem:[#allocation145_spill] sm:$0xff] }
 0x2bd   : > { %v3497_v33 = vpop.permute.xlu1 %3496  ;;  %v2066_v13 = vadd.f32 %v2002_v32, %v1809_v9  ;;  %v2058_v43 = vadd.f32 %v1994_v12, %v1801_v53  ;;  %v2347_v28 = vsel %vm2342_vm0, %v10030_v45, %v10026_v55  ;;  %v2708_v37 = vsel %vm2442_vm9, %v10082_v26, %v10078_v7  ;;  %v13592_v31 = vld [vmem:[#allocation157_spill] sm:$0xff] }
 0x2be   : > { %3281 = vrot.lane.b32.xlu0 %v13587_v58, %s7953_s17  ;;  %v10372_v60 = vsel %vm13588_vm2, %v3497_v33, %v3499_v61  ;;  %3561 = vst.msk [vmem:[#allocation3] sm:$0xff] %vm3560_vm6, %v3497_v33  ;;  %v2065_v38 = vadd.f32 %v2001_v35, %v1808_v42  ;;  %v2346_v24 = vsel %vm2342_vm0, %v13591_v25, %v10030_v45  ;;  %v13594_v33 = vld [vmem:[#allocation75_spill] sm:$0xff]  ;;  %vm13799_vm2 = vmmov %vm13653_vm1 }
 0x2bf   : > { %2948 = vrot.lane.b32.xlu1 %v13589_v54, %s7952_s16  ;;  %3562 = vst [vmem:[#allocation3 + $0x8] sm:$0xff] %v10372_v60  ;;  %v3703_v8 = vmul.bf16 %v10347_v5, %v10372_v60  ;;  %v2419_v9 = vadd.f32 %v2355_v1, %v2066_v13  ;;  %v2707_v12 = vsel %vm2442_vm9, %v13592_v31, %v10082_v26  ;;  %v13596_v26 = vld [vmem:[#allocation76_spill] sm:$0xff]  ;;  %v13597_v54 = vld [vmem:[#allocation155_spill] sm:$0xff] }
 0x2c0   : > { %v10389_v32 = vpop.permute.xlu0 %1318  ;;  %v2418_v58 = vadd.f32 %v2354_v21, %v2065_v38  ;;  %v2700_v53 = vsel %vm2442_vm9, %v10072_v63, %v10069_v51  ;;  %v2965_v45 = vsel %vm2952_vm3, %v10120_v49, %v10117_v36  ;;  %v2411_v1 = vadd.f32 %v2347_v28, %v2058_v43  ;;  %v13598_v21 = vld [vmem:[#allocation170_spill] sm:$0xff]  ;;  %v13600_v31 = vld [vmem:[#allocation180_spill] sm:$0xff] }
 0x2c1   : > { %v10397_v35 = vpop.permute.xlu1 %3500  ;;  %5236 = vmatprep.subr.bf16.mxu0 %v3703_v8  ;;  %v2699_v13 = vsel %vm2442_vm9, %v13597_v54, %v10072_v63  ;;  %v2772_v19 = vadd.f32 %v2708_v37, %v2419_v9  ;;  %v2964_v8 = vsel %vm2952_vm3, %v13598_v21, %v10120_v49  ;;  %v2410_v38 = vadd.f32 %v2346_v24, %v2057_v29  ;;  %v13599_v37 = vld [vmem:[#allocation169_spill] sm:$0xff]  ;;  %v13603_v54 = vld [vmem:[#allocation178_spill] sm:$0xff] }
 0x2c2   : > { %13593 = vst [vmem:[#allocation147_spill] sm:$0xff] %v10397_v35  ;;  %3299 = vrot.lane.b32.xlu0 %v13594_v33, %s7953_s17  ;;  %v10409_v42 = vsel %vm13595_vm4, %v3499_v61, %v10397_v35  ;;  %v2771_v25 = vadd.f32 %v2707_v12, %v2418_v58  ;;  %v2957_v61 = vsel %vm2952_vm3, %v10112_v10, %v10108_v3  ;;  %v13614_v35 = vld [vmem:[#allocation50_spill] sm:$0xff]  ;;  %vm13807_vm4 = vmmov %vm13653_vm1 }
 0x2c3   : > { %3283 = vrot.lane.b32.xlu1 %v13596_v26, %s7953_s17  ;;  %3563 = vst [vmem:[#allocation3 + $0x10] sm:$0xff] %v10409_v42  ;;  %v3318_v43 = vsel %vm3305_vm5, %v10157_v48, %v10155_v46  ;;  %v2764_v63 = vadd.f32 %v2700_v53, %v2411_v1  ;;  %v2956_v9 = vsel %vm2952_vm3, %v13599_v37, %v10112_v10  ;;  %v13601_v10 = vld [vmem:[#allocation78_spill] sm:$0xff] }
 0x2c4   : > { %v10426_v28 = vpop.permute.xlu0 %1336  ;;  %v3029_v49 = vadd.f32 %v2965_v45, %v2772_v19  ;;  %v3317_v29 = vsel %vm3305_vm5, %v13600_v31, %v10157_v48  ;;  %v2763_v33 = vadd.f32 %v2699_v13, %v2410_v38  ;;  %v3028_v58 = vadd.f32 %v2964_v8, %v2771_v25  ;;  %v13602_v48 = vld [vmem:[#allocation131_spill] sm:$0xff]  ;;  %v13604_v8 = vld [vmem:[#allocation42_spill] sm:$0xff] }
 0x2c5   : > { %v10434_v24 = vpop.permute.xlu1 %1320  ;;  %v10438_v12 = vld [vmem:[#allocation3] sm:$0xff]  ;;  %v3310_v53 = vsel %vm3305_vm5, %v10149_v44, %v10147_v59  ;;  %v1398_v26 = vsel %vm1378_vm14, %v13602_v48, %v9972_v39  ;;  %v3021_v1 = vadd.f32 %v2957_v61, %v2764_v63  ;;  %v3309_v13 = vsel %vm3305_vm5, %v13603_v54, %v10149_v44  ;;  %v13625_v3 = vld [vmem:[#allocation102_spill] sm:$0xff] }
 0x2c6   : > { %4116 = vrot.lane.b32.xlu0 %v10333_v27, %s7935_s21  ;;  %v3702_v45 = vmul.bf16 %v10333_v27, %v10438_v12  ;;  %v3382_v19 = vadd.f32 %v3318_v43, %v3029_v49  ;;  %v1399_v21 = vsel %vm1378_vm14, %v9972_v39, %v9967_v30  ;;  %v1407_v38 = vsel %vm1378_vm14, %v13604_v8, %v9978_v16  ;;  %v13605_v63 = vld [vmem:[#allocation135_spill] sm:$0xff]  ;;  %v13606_v43 = vld [vmem:[#allocation110_spill] sm:$0xff] }
 0x2c7   : > { %3301 = vrot.lane.b32.xlu1 %v13601_v10, %s7953_s17  ;;  %v3020_v25 = vadd.f32 %v2956_v9, %v2763_v33  ;;  %v3381_v37 = vadd.f32 %v3317_v29, %v3028_v58  ;;  %v1113_v61 = vadd.f32 %v10338_v47, %v10252_v17  ;;  %v1406_v44 = vsel %vm1378_vm14, %v13605_v63, %v13604_v8  ;;  %v13607_v49 = vld [vmem:[#allocation139_spill] sm:$0xff]  ;;  %v13608_v29 = vld [vmem:[#allocation109_spill] sm:$0xff]  ;;  %v13609_v47 = vld [vmem:[#allocation112_spill] sm:$0xff] }
 0x2c8   : > { %v10459_v31 = vpop.permute.xlu0 %996  ;;  %5237 = vmatpush1.bf16.msra.mxu0 %v3702_v45  ;;  %v1752_v39 = vsel %vm1732_vm15, %v13607_v49, %v13606_v43  ;;  %v3374_v10 = vadd.f32 %v3310_v53, %v3021_v1  ;;  %v1462_v9 = vadd.f32 %v1398_v26, %v10313_v62  ;;  %v1753_v17 = vsel %vm1732_vm15, %v13606_v43, %v13608_v29  ;;  %v13610_v33 = vld [vmem:[#allocation113_spill] sm:$0xff]  ;;  %v13611_v54 = vld [vmem:[#allocation143_spill] sm:$0xff]  ;;  %v13612_v62 = vld [vmem:[#allocation158_spill] sm:$0xff] }
 0x2c9   : > { %v10469_v48 = vpop.permute.xlu1 %1338  ;;  %v1761_v58 = vsel %vm1732_vm15, %v13610_v33, %v13609_v47  ;;  %v3373_v45 = vadd.f32 %v3309_v13, %v3020_v25  ;;  %v1463_v53 = vadd.f32 %v1399_v21, %v10322_v2  ;;  %v1471_v1 = vadd.f32 %v1407_v38, %v1113_v61  ;;  %v13613_v49 = vld [vmem:[#allocation49_spill] sm:$0xff]  ;;  %v13616_v61 = vld [vmem:[#allocation159_spill] sm:$0xff] }
 0x2ca   : > { %4120 = vrot.lane.b32.xlu0 %v10358_v41, %s7935_s21  ;;  %v1760_v8 = vsel %vm1732_vm15, %v13611_v54, %v13610_v33  ;;  %v3438_v26 = vadd.f32 %v13612_v62, %v3382_v19  ;;  %v1470_v63 = vadd.f32 %v1406_v44, %v10349_v0  ;;  %v1816_v43 = vadd.f32 %v1752_v39, %v1462_v9  ;;  %v13615_v21 = vld [vmem:[#allocation153_spill] sm:$0xff]  ;;  %v13617_v44 = vld [vmem:[#allocation43_spill] sm:$0xff]  ;;  %v13618_v39 = vld [vmem:[#allocation44_spill] sm:$0xff] }
 0x2cb   : > { %4118 = vrot.lane.b32.xlu1 %v10347_v5, %s7935_s21  ;;  %v2018_v59 = vsel %vm1989_vm13, %v13614_v35, %v13613_v49  ;;  %v3437_v13 = vadd.f32 %v13612_v62, %v3381_v37  ;;  %v1817_v46 = vadd.f32 %v1753_v17, %v1463_v53  ;;  %v1825_v2 = vadd.f32 %v1761_v58, %v1471_v1  ;;  %v13619_v9 = vld [vmem:[#allocation192_spill] sm:$0xff]  ;;  %v13620_v54 = vld [vmem:[#allocation94_spill] sm:$0xff]  ;;  %v13686_v49 = vld [vmem:[#allocation115_spill] sm:$0xff] }
 0x2cc   : > { %v10492_v25 = vpop.permute.xlu0 %1014  ;;  %v2017_v38 = vsel %vm1989_vm13, %v13615_v21, %v13614_v35  ;;  %v3430_v33 = vadd.f32 %v13616_v61, %v3374_v10  ;;  %v1824_v0 = vadd.f32 %v1760_v8, %v1470_v63  ;;  %v2010_v37 = vsel %vm1989_vm13, %v13618_v39, %v13617_v44  ;;  %v13621_v35 = vld [vmem:[#allocation149_spill] sm:$0xff]  ;;  %v13623_v21 = vld [vmem:[#allocation191_spill] sm:$0xff]  ;;  %v13624_v62 = vld [vmem:[#allocation156_spill] sm:$0xff] }
 0x2cd   : > { %v10498_v19 = vpop.permute.xlu1 %998  ;;  %v2371_v17 = vsel %vm2342_vm0, %v13620_v54, %v13619_v9  ;;  %v3429_v58 = vadd.f32 %v13616_v61, %v3373_v45  ;;  %v2009_v10 = vsel %vm1989_vm13, %v13621_v35, %v13618_v39  ;;  %v2082_v53 = vadd.f32 %v2018_v59, %v1825_v2  ;;  %v13626_v45 = vld [vmem:[#allocation45_spill] sm:$0xff]  ;;  %v13627_v59 = vld [vmem:[#allocation162_spill] sm:$0xff] }
 0x2ce   : > { %982 = vrot.lane.b32.xlu0 %v10256_v34, %s7947_s28  ;;  %v13622_v34 = vld [vmem:[#allocation166_spill] sm:$0xff]  ;;  %v3468_v8 = vpack.c.bf16 %v3438_v26, %v3430_v33  ;;  %v2081_v63 = vadd.f32 %v2017_v38, %v1824_v0  ;;  %v2363_v9 = vsel %vm2342_vm0, %v13624_v62, %v13623_v21  ;;  %v2724_v61 = vsel %vm2442_vm9, %v13626_v45, %v13625_v3  ;;  %v13628_v26 = vld [vmem:[#allocation177_spill] sm:$0xff]  ;;  %v13681_v3 = vld [vmem:[#allocation103_spill] sm:$0xff] }
 0x2cf   : > { %964 = vrot.lane.b32.xlu1 %v10260_v22, %s7947_s28  ;;  %v2370_v1 = vsel %vm2342_vm0, %v13622_v34, %v13620_v54  ;;  %v3467_v36 = vpack.c.bf16 %v3437_v13, %v3429_v58  ;;  %v2074_v51 = vadd.f32 %v2010_v37, %v1817_v46  ;;  %v2362_v2 = vsel %vm2342_vm0, %v13627_v59, %v13624_v62  ;;  %v13629_v35 = vld [vmem:[#allocation26_spill] sm:$0xff]  ;;  %v13630_v34 = vld [vmem:[#allocation99_spill] sm:$0xff]  ;;  %v13631_v46 = vld [vmem:[#allocation129_spill] sm:$0xff] }
 0x2d0   : > { %v10523_v22 = vpop.permute.xlu0 %1672  ;;  %v2435_v39 = vadd.f32 %v2371_v17, %v2082_v53  ;;  %v2723_v38 = vsel %vm2442_vm9, %v13628_v26, %v13626_v45  ;;  %v2073_v0 = vadd.f32 %v2009_v10, %v1816_v43  ;;  %v2434_v54 = vadd.f32 %v2370_v1, %v2081_v63  ;;  %v13632_v37 = vld [vmem:[#allocation130_spill] sm:$0xff]  ;;  %v13633_v17 = vld [vmem:[#allocation173_spill] sm:$0xff]  ;;  %v13635_v63 = vld [vmem:[#allocation107_spill] sm:$0xff] }
 0x2d1   : > { %v10531_v33 = vpop.permute.xlu1 %1016  ;;  %v2716_v13 = vsel %vm2442_vm9, %v13630_v34, %v13629_v35  ;;  %v2981_v58 = vsel %vm2952_vm3, %v13632_v37, %v13631_v46  ;;  %v2427_v62 = vadd.f32 %v2363_v9, %v2074_v51  ;;  %v2715_v53 = vsel %vm2442_vm9, %v13633_v17, %v13630_v34  ;;  %v13636_v59 = vld [vmem:[#allocation39_spill] sm:$0xff]  ;;  %v13637_v35 = vld [vmem:[#allocation133_spill] sm:$0xff]  ;;  %v13638_v46 = vld [vmem:[#allocation136_spill] sm:$0xff] }
 0x2d2   : > { %3504 = vrot.lane.b32.xlu0 %v3468_v8, %s7940_s23  ;;  %v2788_v45 = vadd.f32 %v2724_v61, %v2435_v39  ;;  %v13634_v8 = vld [vmem:[#allocation46_spill] sm:$0xff]  ;;  %v2426_v10 = vadd.f32 %v2362_v2, %v2073_v0  ;;  %v2787_v1 = vadd.f32 %v2723_v38, %v2434_v54  ;;  %v2973_v26 = vsel %vm2952_vm3, %v13636_v59, %v13635_v63  ;;  %v13641_v17 = vld [vmem:[#allocation132_spill] sm:$0xff] }
 0x2d3   : > { %3502 = vrot.lane.b32.xlu1 %v3467_v36, %s7940_s23  ;;  %v2980_v43 = vsel %vm2952_vm3, %v13634_v8, %v13632_v37  ;;  %v3334_v36 = vsel %vm3305_vm5, %v13638_v46, %v13637_v35  ;;  %v2780_v9 = vadd.f32 %v2716_v13, %v2427_v62  ;;  %v13639_v34 = vld [vmem:[#allocation38_spill] sm:$0xff]  ;;  %v13640_v37 = vld [vmem:[#allocation121_spill] sm:$0xff]  ;;  %v13642_v8 = vld [vmem:[#allocation40_spill] sm:$0xff] }
 0x2d4   : > { %v10553_v51 = vpop.permute.xlu0 %1690  ;;  %v2972_v61 = vsel %vm2952_vm3, %v13639_v34, %v13636_v59  ;;  %v3045_v39 = vadd.f32 %v2981_v58, %v2788_v45  ;;  %v3333_v2 = vsel %vm3305_vm5, %v13640_v37, %v13638_v46  ;;  %v2779_v0 = vadd.f32 %v2715_v53, %v2426_v10  ;;  %v13643_v62 = vld [vmem:[#allocation80_spill] sm:$0xff]  ;;  %v13644_v58 = vld [vmem:[#allocation22_spill] sm:$0xff] }
 0x2d5   : > { %v10561_v38 = vpop.permute.xlu1 %1674  ;;  %v3044_v54 = vadd.f32 %v2980_v43, %v2787_v1  ;;  %v3326_v13 = vsel %vm3305_vm5, %v13642_v8, %v13641_v17  ;;  %v911_v45 = vmul.f32 %v13644_v58, %v13643_v62  ;;  %v3037_v59 = vadd.f32 %v2973_v26, %v2780_v9  ;;  %v13645_v46 = vld [vmem:[#allocation118_spill] sm:$0xff]  ;;  %v13647_v17 = vld [vmem:[#allocation21_spill] sm:$0xff] }
 0x2d6   : > { %1340 = vrot.lane.b32.xlu0 %v10275_v4, %s7949_s30  ;;  %v3325_v34 = vsel %vm3305_vm5, %v13645_v46, %v13642_v8  ;;  %v3398_v37 = vadd.f32 %v3334_v36, %v3045_v39  ;;  %v13646_v4 = vld [vmem:[#allocation138_spill] sm:$0xff]  ;;  %v3036_v43 = vadd.f32 %v2972_v61, %v2779_v0  ;;  %v902_v35 = vmul.f32 %v13647_v17, %v13643_v62  ;;  %v13648_v36 = vld [vmem:[#allocation33_spill] sm:$0xff]  ;;  %v13649_v39 = vld [vmem:[#allocation28_spill] sm:$0xff] }
 0x2d7   : > { %1322 = vrot.lane.b32.xlu1 %v10279_v57, %s7949_s30  ;;  %v1587_v53 = vrot.slane %v13646_v4, %v8062_v14  ;;  %v3397_v10 = vadd.f32 %v3333_v2, %v3044_v54  ;;  %v3390_v63 = vadd.f32 %v3326_v13, %v3037_v59  ;;  %v13651_v0 = vld [vmem:[#allocation27_spill] sm:$0xff]  ;;  %v13652_v17 = vld [vmem:[#allocation181_spill] sm:$0xff] }
 0x2d8   : > { %v3513_v1 = vpop.permute.xlu0 %3512  ;;  %v3389_v26 = vadd.f32 %v3325_v34, %v3036_v43  ;;  %v3454_v9 = vadd.f32 %v13648_v36, %v3398_v37  ;;  %v13657_v34 = vld [vmem:[#allocation17_spill] sm:$0xff] }
 0x2d9   : > { %3570 = vst.msk [vmem:[#allocation3 + $0x48] sm:$0xff] %vm3560_vm6, %v3513_v1  ;;  %v10580_v57 = vpop.permute.xlu1 %1692  ;;  %v1605_v8 = vmul.f32 %v13649_v39, %v1587_v53  ;;  %v3453_v61 = vadd.f32 %v13648_v36, %v3397_v10  ;;  %v1596_v54 = vmul.f32 %v13651_v0, %v1587_v53  ;;  %v3446_v13 = vadd.f32 %v13652_v17, %v3390_v63  ;;  %v13659_v4 = vld [vmem:[#allocation185_spill] sm:$0xff]  ;;  %vm13798_vm6 = vmmov %vm13653_vm1 }
 0x2da   : > { %1018 = vrot.lane.b32.xlu0 %v911_v45, %s7947_s28  ;;  %v3445_v45 = vadd.f32 %v13652_v17, %v3389_v26  ;;  %v13658_v37 = vrot.slane %v13657_v34, 7  ;;  %v13663_v0 = vld [vmem:[#allocation53_spill] sm:$0xff] }
 0x2db   : > { %1000 = vrot.lane.b32.xlu1 %v902_v35, %s7947_s28  ;;  %v3476_v46 = vpack.c.bf16 %v3454_v9, %v3446_v13 }
 0x2dc   : > { %v10587_v2 = vpop.permute.xlu0 %3516  ;;  %v2094_v43 = vmul.bf16 %v13659_v4, %v13658_v37 }
 0x2dd   : > { %13650 = vst [vmem:[#allocation148_spill] sm:$0xff] %v10587_v2  ;;  %v3515_v58 = vpop.permute.xlu1 %3514 }
 0x2de   : > { %1694 = vrot.lane.b32.xlu0 %v1605_v8, %s7950_s14  ;;  %v10594_v59 = vsel %vm13653_vm1, %v3513_v1, %v3515_v58  ;;  %v10598_v35 = vsel %vm13655_vm10, %v3515_v58, %v10587_v2  ;;  %v3475_v1 = vpack.c.bf16 %v3453_v61, %v3445_v45  ;;  %v13662_v8 = vld [vmem:[#allocation134_spill] sm:$0xff]  ;;  %v2097_v13 = vunpack.c.l.bf16 %v2094_v43  ;;  %v13665_v61 = vld [vmem:[#allocation31_spill] sm:$0xff] }
 0x2df   : > { %13654 = vst [vmem:[#allocation151_spill] sm:$0xff] %v10594_v59  ;;  %13656 = vst [vmem:[#allocation152_spill] sm:$0xff] %v10598_v35  ;;  %1676 = vrot.lane.b32.xlu1 %v1596_v54, %s7950_s14  ;;  %v3711_v63 = vmul.bf16 %v10347_v5, %v10594_v59  ;;  %v1269_v54 = vmul.f32 %v13663_v0, %v13662_v8  ;;  %v1260_v45 = vmul.f32 %v13665_v61, %v13662_v8  ;;  %v13667_v43 = vld [vmem:[#allocation23_spill] sm:$0xff]  ;;  %v13668_v8 = vld [vmem:[#allocation57_spill] sm:$0xff]  ;;  %vm3461_vm10 = vcmask 539912  }
 0x2e0   : > { %3571 = vst [vmem:[#allocation3 + $0x50] sm:$0xff] %v10594_v59  ;;  %3572 = vst [vmem:[#allocation3 + $0x58] sm:$0xff] %v10598_v35  ;;  %v10608_v10 = vpop.permute.xlu0 %1356  ;;  %v10610_v26 = vld [vmem:[#allocation3 + $0x48] sm:$0xff]  ;;  %v2152_v37 = vrot.slane %v2097_v13, %v8062_v14  ;;  %v1623_v0 = vmul.f32 %v13668_v8, %v1587_v53  ;;  %v13683_v59 = vld [vmem:[#allocation98_spill] sm:$0xff] }
 0x2e1   : > { %13660 = vst [vmem:[#allocation150_spill] sm:$0xff] %v10608_v10  ;;  %13661 = vst [vmem:[#allocation154_spill] sm:$0xff] %v10610_v26  ;;  %v10612_v39 = vpop.permute.xlu1 %1354  ;;  %5238 = vmatprep.subr.bf16.mxu0 %v3711_v63  ;;  %v3710_v9 = vmul.bf16 %v10333_v27, %v10610_v26  ;;  %v13675_v8 = vld [vmem:[#allocation188_spill] sm:$0xff]  ;;  %v1880_v35 = vmul.f32 %v13683_v59, %v13643_v62  ;;  %v3644_v59 = vcombine.high %v10162_v15, %v10162_v15 }
 0x2e2   : > { %3520 = vrot.lane.b32.xlu0 %v3476_v46, %s7940_s23  ;;  %v13666_v46 = vld [vmem:[#allocation24_spill] sm:$0xff] }
 0x2e3   : > { %3518 = vrot.lane.b32.xlu1 %v3475_v1, %s7940_s23  ;;  %5239 = vmatpush1.bf16.msra.mxu0 %v3710_v9  ;;  %v1862_v63 = vmul.f32 %v13666_v46, %v13643_v62  ;;  %v1853_v1 = vmul.f32 %v13667_v43, %v13643_v62  ;;  %v13670_v43 = vld [vmem:[#allocation84_spill] sm:$0xff] }
 0x2e4   : > { %v10620_v58 = vpop.permute.xlu0 %1374 }
 0x2e5   : > { %13664 = vst [vmem:[#allocation164_spill] sm:$0xff] %v10620_v58  ;;  %v10624_v34 = vpop.permute.xlu1 %1372 }
 0x2e6   : > { %1376 = vrot.lane.b32.xlu0 %v1269_v54, %s7949_s30  ;;  %v2197_v54 = vrot.slane %v2152_v37, %v8062_v14 }
 0x2e7   : > { %1358 = vrot.lane.b32.xlu1 %v1260_v45, %s7949_s30  ;;  %v13669_v45 = vld [vmem:[#allocation54_spill] sm:$0xff] }
 0x2e8   : > { %v10631_v4 = vpop.permute.xlu0 %1931  ;;  %v1614_v46 = vmul.f32 %v13669_v45, %v1587_v53  ;;  %v2215_v2 = vmul.f32 %v13670_v43, %v2197_v54  ;;  %v13677_v45 = vld [vmem:[#allocation93_spill] sm:$0xff]  ;;  %v2224_v44 = vmul.f32 %v13686_v49, %v2197_v54 }
 0x2e9   : > { %v10635_v9 = vpop.permute.xlu1 %1929 }
 0x2ea   : > { %1951 = vrot.lane.b32.xlu0 %v1862_v63, %s7948_s29  ;;  %v13672_v63 = vld [vmem:[#allocation77_spill] sm:$0xff] }
 0x2eb   : > { %1933 = vrot.lane.b32.xlu1 %v1853_v1, %s7948_s29  ;;  %v2206_v1 = vmul.f32 %v13672_v63, %v2197_v54 }
 0x2ec   : > { %v10641_v61 = vpop.permute.xlu0 %1949 }
 0x2ed   : > { %v10644_v13 = vpop.permute.xlu1 %1947 }
 0x2ee   : > { %1730 = vrot.lane.b32.xlu0 %v1623_v0, %s7950_s14  ;;  %v13676_v0 = vld [vmem:[#allocation189_spill] sm:$0xff] }
 0x2ef   : > { %1712 = vrot.lane.b32.xlu1 %v1614_v46, %s7950_s14  ;;  %v1871_v46 = vmul.f32 %v13677_v45, %v13643_v62  ;;  %v13685_v45 = vld [vmem:[#allocation100_spill] sm:$0xff] }
 0x2f0   : > { %v10649_v17 = vpop.permute.xlu0 %1710 }
 0x2f1   : > { %13671 = vst [vmem:[#allocation165_spill] sm:$0xff] %v10649_v17  ;;  %v10652_v36 = vpop.permute.xlu1 %1708 }
 0x2f2   : > { %2304 = vrot.lane.b32.xlu0 %v2215_v2, %s7951_s15  ;;  %v13679_v2 = vld [vmem:[#allocation137_spill] sm:$0xff] }
 0x2f3   : > { %2286 = vrot.lane.b32.xlu1 %v2206_v1, %s7951_s15  ;;  %v13680_v1 = vld [vmem:[#allocation79_spill] sm:$0xff] }
 0x2f4   : > { %v10656_v37 = vpop.permute.xlu0 %1728  ;;  %v2559_v21 = vmul.f32 %v13681_v3, %v13680_v1  ;;  %v13688_v3 = vld [vmem:[#allocation108_spill] sm:$0xff] }
 0x2f5   : > { %13673 = vst [vmem:[#allocation160_spill] sm:$0xff] %v10656_v37  ;;  %v10658_v53 = vpop.permute.xlu1 %1726 }
 0x2f6   : > { %4410 = vrot.lane.b32.xlu0 %v13675_v8, %s13674_s22 }
 0x2f7   : > { %4408 = vrot.lane.b32.xlu1 %v13676_v0, %s13674_s22 }
 0x2f8   : > { %v10666_v43 = vpop.permute.xlu0 %2284 }
 0x2f9   : > { %13678 = vst [vmem:[#allocation161_spill] sm:$0xff] %v10666_v43  ;;  %v10668_v63 = vpop.permute.xlu1 %2282 }
 0x2fa   : > { %1969 = vrot.lane.b32.xlu0 %v1871_v46, %s7948_s29  ;;  %v3597_v46 = vcombine.high %v13685_v45, %v13685_v45  ;;  %v13692_v45 = vld [vmem:[#allocation30_spill] sm:$0xff] }
 0x2fb   : > { %4412 = vrot.lane.b32.xlu1 %v13679_v2, %s13674_s22  ;;  %v2568_v2 = vmul.f32 %v13688_v3, %v13680_v1  ;;  %v2816_v49 = vmul.f32 %v13692_v45, %v13643_v62 }
 0x2fc   : > { %v10675_v26 = vpop.permute.xlu0 %2302 }
 0x2fd   : > { %13682 = vst [vmem:[#allocation163_spill] sm:$0xff] %v10675_v26  ;;  %v10679_v7 = vpop.permute.xlu1 %2300 }
 0x2fe   : > { %13684 = vst [vmem:[#allocation175_spill] sm:$0xff] %v10679_v7  ;;  %2639 = vrot.lane.b32.xlu0 %v2559_v21, %s7941_s24  ;;  %v13690_v21 = vld [vmem:[#allocation15_spill] sm:$0xff] }
 0x2ff   : > { %1987 = vrot.lane.b32.xlu1 %v1880_v35, %s7948_s29  ;;  %v10697_v35 = vrot.slane %v3597_v46, %v13690_v21  ;;  %v13698_v46 = vld [vmem:[#allocation29_spill] sm:$0xff] }
 0x300   : > { %v10686_v8 = vpop.permute.xlu0 %1967  ;;  %v2825_v3 = vmul.f32 %v13698_v46, %v13643_v62  ;;  %v13704_v62 = vld [vmem:[#allocation83_spill] sm:$0xff] }
 0x301   : > { %13687 = vst [vmem:[#allocation176_spill] sm:$0xff] %v10686_v8  ;;  %v10690_v26 = vpop.permute.xlu1 %1965  ;;  %13691 = vst [vmem:[#allocation95_spill] sm:$0xff] %v10697_v35  ;;  %v13694_v8 = vld [vmem:[#allocation119_spill] sm:$0xff]  ;;  %v10710_v15 = vrot.slane %v10697_v35, %v13690_v21  ;;  %v13703_v21 = vld [vmem:[#allocation82_spill] sm:$0xff] }
 0x302   : > { %13689 = vst [vmem:[#allocation167_spill] sm:$0xff] %v10690_v26  ;;  %2322 = vrot.lane.b32.xlu0 %v2224_v44, %s7951_s15  ;;  %v2233_v7 = vmul.f32 %v13694_v8, %v2197_v54  ;;  %v3894_v44 = vshrl.u32 %v3644_v59, 16  ;;  %v13700_v54 = vld [vmem:[#allocation81_spill] sm:$0xff] }
 0x303   : > { %2657 = vrot.lane.b32.xlu1 %v2568_v2, %s7941_s24  ;;  %13696 = vst [vmem:[#allocation190_spill] sm:$0xff] %v10710_v15  ;;  %v13735_v26 = vld [vmem:[#allocation37_spill] sm:$0xff] }
 0x304   : > { %v10701_v20 = vpop.permute.xlu0 %1985  ;;  %v3895_v8 = vpack.i.b16 %v3894_v44, %v3894_v44 }
 0x305   : > { %13693 = vst [vmem:[#allocation171_spill] sm:$0xff] %v10701_v20  ;;  %v10704_v1 = vpop.permute.xlu1 %1983 }
 0x306   : > { %13695 = vst [vmem:[#allocation172_spill] sm:$0xff] %v10704_v1  ;;  %2896 = vrot.lane.b32.xlu0 %v2816_v49, %s7952_s16  ;;  %v3901_v49 = vshrl.u32 %v10710_v15, 16  ;;  %v10729_v35 = vrot.slane %v3895_v8, %v8062_v14 }
 0x307   : > { %2340 = vrot.lane.b32.xlu1 %v2233_v7, %s7951_s15 }
 0x308   : > { %v10712_v2 = vpop.permute.xlu0 %2637  ;;  %v3902_v46 = vpack.i.b16 %v3901_v49, %v3901_v49 }
 0x309   : > { %13697 = vst [vmem:[#allocation90_spill] sm:$0xff] %v10712_v2  ;;  %v10716_v45 = vpop.permute.xlu1 %2635 }
 0x30a   : > { %13699 = vst [vmem:[#allocation35_spill] sm:$0xff] %v10716_v45  ;;  %2675 = vrot.lane.b32.xlu0 %v13700_v54, %s7941_s24  ;;  %v10742_v45 = vrot.slane %v3902_v46, %v8062_v14  ;;  %v13713_v46 = vld [vmem:[#allocation87_spill] sm:$0xff] }
 0x30b   : > { %2914 = vrot.lane.b32.xlu1 %v2825_v3, %s7952_s16  ;;  %v13707_v3 = vld [vmem:[#allocation85_spill] sm:$0xff] }
 0x30c   : > { %v10722_v7 = vpop.permute.xlu0 %2655 }
 0x30d   : > { %13701 = vst [vmem:[#allocation36_spill] sm:$0xff] %v10722_v7  ;;  %v10724_v20 = vpop.permute.xlu1 %2653  ;;  %v13734_v7 = vld [vmem:[#allocation183_spill] sm:$0xff] }
 0x30e   : > { %13702 = vst [vmem:[#allocation184_spill] sm:$0xff] %v10724_v20  ;;  %3249 = vrot.lane.b32.xlu0 %v13703_v21, %s7953_s17 }
 0x30f   : > { %2693 = vrot.lane.b32.xlu1 %v13704_v62, %s7941_s24  ;;  %v13710_v62 = vld [vmem:[#allocation86_spill] sm:$0xff] }
 0x310   : > { %v10733_v54 = vpop.permute.xlu0 %2320 }
 0x311   : > { %13705 = vst [vmem:[#allocation174_spill] sm:$0xff] %v10733_v54  ;;  %v10735_v44 = vpop.permute.xlu1 %2318 }
 0x312   : > { %13706 = vst [vmem:[#allocation97_spill] sm:$0xff] %v10735_v44  ;;  %3943 = vrot.lane.b32.xlu0 %v10729_v35, %s7934_s20  ;;  %v3668_v44 = vpack.i.b16 %v3644_v59, %v3644_v59 }
 0x313   : > { %3267 = vrot.lane.b32.xlu1 %v13707_v3, %s7953_s17 }
 0x314   : > { %v10744_v21 = vpop.permute.xlu0 %2338 }
 0x315   : > { %13708 = vst [vmem:[#allocation186_spill] sm:$0xff] %v10744_v21  ;;  %v10746_v8 = vpop.permute.xlu1 %2336 }
 0x316   : > { %13709 = vst [vmem:[#allocation168_spill] sm:$0xff] %v10746_v8  ;;  %2932 = vrot.lane.b32.xlu0 %v13710_v62, %s7952_s16  ;;  %v3675_v62 = vpack.i.b16 %v10710_v15, %v10710_v15  ;;  %v13716_v8 = vld [vmem:[#allocation12_spill] sm:$0xff]  ;;  %v13723_v15 = vld [vmem:[#allocation89_spill] sm:$0xff] }
 0x317   : > { %3945 = vrot.lane.b32.xlu1 %v10742_v45, %s7934_s20 }
 0x318   : > { %v10752_v49 = vpop.permute.xlu0 %2894 }
 0x319   : > { %13711 = vst [vmem:[#allocation58_spill] sm:$0xff] %v10752_v49  ;;  %v10754_v54 = vpop.permute.xlu1 %2892  ;;  %v13718_v49 = vld [vmem:[#allocation13_spill] sm:$0xff] }
 0x31a   : > { %13712 = vst [vmem:[#allocation59_spill] sm:$0xff] %v10754_v54  ;;  %4579 = vrot.lane.b32.xlu0 %v10333_v27, %s7941_s24  ;;  %v13717_v54 = vld [vmem:[#allocation187_spill] sm:$0xff] }
 0x31b   : > { %2950 = vrot.lane.b32.xlu1 %v13713_v46, %s7952_s16  ;;  %v658_v27 = vrot.slane %v13717_v54, %v13716_v8  ;;  %v662_v46 = vrot.slane %v13717_v54, %v13718_v49 }
 0x31c   : > { %v10760_v3 = vpop.permute.xlu0 %2912 }
 0x31d   : > { %13714 = vst [vmem:[#allocation55_spill] sm:$0xff] %v10760_v3  ;;  %v10762_v21 = vpop.permute.xlu1 %2910  ;;  %v698_v59 = vrot.slane %v658_v27, %v8062_v14  ;;  %v702_v8 = vrot.slane %v662_v46, %v8062_v14  ;;  %v13730_v27 = vld [vmem:[#allocation140_spill] sm:$0xff] }
 0x31e   : > { %13715 = vst [vmem:[#allocation56_spill] sm:$0xff] %v10762_v21  ;;  %4583 = vrot.lane.b32.xlu0 %v10358_v41, %s7941_s24  ;;  %v13721_v21 = vld [vmem:[#allocation88_spill] sm:$0xff]  ;;  %v10781_v41 = vrot.slane %v3675_v62, %v8062_v14 }
 0x31f   : > { %4581 = vrot.lane.b32.xlu1 %v10347_v5, %s7941_s24  ;;  %v10786_v5 = vrot.slane %v3668_v44, %v8062_v14  ;;  %v13731_v14 = vld [vmem:[#allocation182_spill] sm:$0xff]  ;;  %v728_v1 = vmul.f32 %v13734_v7, %v698_v59 }
 0x320   : > { %v10774_v2 = vpop.permute.xlu0 %2673  ;;  %13722 = vst [vmem:[#allocation62_spill] sm:$0xff] %v10781_v41 }
 0x321   : > { %13719 = vst [vmem:[#allocation60_spill] sm:$0xff] %v10774_v2  ;;  %v10776_v3 = vpop.permute.xlu1 %2671  ;;  %13724 = vst [vmem:[#allocation63_spill] sm:$0xff] %v10786_v5 }
 0x322   : > { %13720 = vst [vmem:[#allocation61_spill] sm:$0xff] %v10776_v3  ;;  %3303 = vrot.lane.b32.xlu0 %v13721_v21, %s7953_s17  ;;  %v13727_v21 = vld [vmem:[#allocation34_spill] sm:$0xff]  ;;  %v13728_v3 = vld [vmem:[#allocation141_spill] sm:$0xff] }
 0x323   : > { %3285 = vrot.lane.b32.xlu1 %v13723_v15, %s7953_s17  ;;  %v712_v62 = vmul.f32 %v13727_v21, %v698_v59  ;;  %v713_v2 = vmul.f32 %v13727_v21, %v702_v8  ;;  %v13729_v15 = vld [vmem:[#allocation47_spill] sm:$0xff]  ;;  %v1027_v46 = vsel %vm1020_vm12, %v13728_v3, %v13730_v27  ;;  %v1035_v21 = vsel %vm1020_vm12, %v10318_v11, %v10309_v6 }
 0x324   : > { %v10790_v49 = vpop.permute.xlu0 %2691  ;;  %v1026_v44 = vsel %vm1020_vm12, %v13729_v15, %v13728_v3  ;;  %v13733_v15 = vld [vmem:[#allocation48_spill] sm:$0xff]  ;;  %v736_v3 = vmul.f32 %v13735_v26, %v698_v59 }
 0x325   : > { %13725 = vst [vmem:[#allocation16_spill] sm:$0xff] %v10790_v49  ;;  %v10792_v54 = vpop.permute.xlu1 %2689  ;;  %v720_v49 = vmul.f32 %v13731_v14, %v698_v59  ;;  %v1090_v43 = vadd.f32 %v1026_v44, %v712_v62  ;;  %v1042_v62 = vsel %vm1020_vm12, %v13576_v52, %v10459_v31  ;;  %v737_v44 = vmul.f32 %v13735_v26, %v702_v8 }
 0x326   : > { %13726 = vst [vmem:[#allocation64_spill] sm:$0xff] %v10792_v54  ;;  %4124 = vrot.lane.b32.xlu0 %v10781_v41, %s7935_s21  ;;  %v721_v54 = vmul.f32 %v13731_v14, %v702_v8  ;;  %v13732_v41 = vld [vmem:[#allocation122_spill] sm:$0xff]  ;;  %v13737_v14 = vld [vmem:[#allocation125_spill] sm:$0xff]  ;;  %v1043_v52 = vsel %vm1020_vm12, %v10459_v31, %v10498_v19 }
 0x327   : > { %4122 = vrot.lane.b32.xlu1 %v10786_v5, %s7935_s21  ;;  %v1034_v20 = vsel %vm1020_vm12, %v13732_v41, %v10318_v11  ;;  %v1384_v5 = vsel %vm1378_vm14, %v13733_v15, %v10389_v32  ;;  %v1392_v55 = vsel %vm1378_vm14, %v13737_v14, %v10426_v28  ;;  %v1385_v41 = vsel %vm1378_vm14, %v10389_v32, %v10434_v24 }
 0x328   : > { %v10819_v27 = vpop.permute.xlu0 %3247  ;;  %v729_v11 = vmul.f32 %v13734_v7, %v702_v8  ;;  %v1091_v15 = vadd.f32 %v1027_v46, %v713_v2  ;;  %v1098_v59 = vadd.f32 %v1034_v20, %v720_v49  ;;  %v1099_v14 = vadd.f32 %v1035_v21, %v721_v54 }
 0x329   : > { %13736 = vst [vmem:[#allocation179_spill] sm:$0xff] %v10819_v27  ;;  %v10828_v6 = vpop.permute.xlu1 %3245  ;;  %v1448_v32 = vadd.f32 %v1384_v5, %v1090_v43  ;;  %v1393_v7 = vsel %vm1378_vm14, %v10426_v28, %v10469_v48  ;;  %v1050_v2 = vsel %vm1020_vm12, %v13582_v40, %v10492_v25  ;;  %v1738_v8 = vsel %vm1732_vm15, %v9912_v18, %v10523_v22 }
 0x32a   : > { %3774 = vrot.lane.b32.xlu0 %v10409_v42, %s7947_s28  ;;  %v1456_v20 = vadd.f32 %v1392_v55, %v1098_v59  ;;  %v1449_v49 = vadd.f32 %v1385_v41, %v1091_v15  ;;  %v1106_v43 = vadd.f32 %v1042_v62, %v728_v1  ;;  %v1051_v28 = vsel %vm1020_vm12, %v10492_v25, %v10531_v33 }
 0x32b   : > { %3772 = vrot.lane.b32.xlu1 %v10372_v60, %s7947_s28  ;;  %v1746_v55 = vsel %vm1732_vm15, %v9944_v50, %v10553_v51  ;;  %v1739_v40 = vsel %vm1732_vm15, %v10523_v22, %v10561_v38  ;;  %v1457_v18 = vadd.f32 %v1393_v7, %v1099_v14  ;;  %v1114_v5 = vadd.f32 %v1050_v2, %v736_v3 }
 0x32c   : > { %v10850_v54 = vpop.permute.xlu0 %3265  ;;  %v1747_v1 = vsel %vm1732_vm15, %v10553_v51, %v10580_v57  ;;  %v1400_v25 = vsel %vm1378_vm14, %v9967_v30, %v10612_v39  ;;  %v1107_v50 = vadd.f32 %v1043_v52, %v729_v11  ;;  %v1802_v22 = vadd.f32 %v1738_v8, %v1448_v32 }
 0x32d   : > { %13738 = vst [vmem:[#allocation65_spill] sm:$0xff] %v10850_v54  ;;  %v10861_v31 = vpop.permute.xlu1 %3263  ;;  %v1401_v21 = vsel %vm1378_vm14, %v10612_v39, %v10608_v10  ;;  %v1408_v7 = vsel %vm1378_vm14, %v9978_v16, %v10624_v34  ;;  %v1115_v46 = vadd.f32 %v1051_v28, %v737_v44  ;;  %v1810_v3 = vadd.f32 %v1746_v55, %v1456_v20  ;;  %v13740_v20 = vld [vmem:[#allocation114_spill] sm:$0xff]  ;;  %v13742_v28 = vld [vmem:[#allocation175_spill] sm:$0xff] }
 0x32e   : > { %4416 = vrot.lane.b32.xlu0 %v10742_v45, %s13674_s22  ;;  %v1803_v51 = vadd.f32 %v1739_v40, %v1449_v49  ;;  %v1409_v30 = vsel %vm1378_vm14, %v10624_v34, %v10620_v58  ;;  %v1811_v15 = vadd.f32 %v1747_v1, %v1457_v18  ;;  %v1464_v11 = vadd.f32 %v1400_v25, %v1106_v43  ;;  %v13741_v43 = vld [vmem:[#allocation161_spill] sm:$0xff]  ;;  %v13745_v25 = vld [vmem:[#allocation163_spill] sm:$0xff] }
 0x32f   : > { %4414 = vrot.lane.b32.xlu1 %v10729_v35, %s13674_s22  ;;  %v1995_v59 = vsel %vm1989_vm13, %v9988_v56, %v10635_v9  ;;  %v1996_v39 = vsel %vm1989_vm13, %v10635_v9, %v10631_v4  ;;  %v1465_v62 = vadd.f32 %v1401_v21, %v1107_v50  ;;  %v1472_v44 = vadd.f32 %v1408_v7, %v1114_v5  ;;  %v13747_v7 = vld [vmem:[#allocation167_spill] sm:$0xff] }
 0x330   : > { %v10882_v41 = vpop.permute.xlu0 %3939  ;;  %v2003_v34 = vsel %vm1989_vm13, %v9996_v23, %v10644_v13  ;;  %v2004_v14 = vsel %vm1989_vm13, %v10644_v13, %v10641_v61  ;;  %v1473_v56 = vadd.f32 %v1409_v30, %v1115_v46  ;;  %v1754_v9 = vsel %vm1732_vm15, %v13608_v29, %v10652_v36  ;;  %v13748_v46 = vld [vmem:[#allocation43_spill] sm:$0xff]  ;;  %v13750_v30 = vld [vmem:[#allocation49_spill] sm:$0xff] }
 0x331   : > { %v10890_v16 = vpop.permute.xlu1 %3937  ;;  %v1762_v23 = vsel %vm1732_vm15, %v13609_v47, %v10658_v53  ;;  %v2059_v32 = vadd.f32 %v1995_v59, %v1802_v22  ;;  %v2060_v2 = vadd.f32 %v1996_v39, %v1803_v51  ;;  %v1763_v13 = vsel %vm1732_vm15, %v10658_v53, %v10656_v37  ;;  %v13743_v47 = vld [vmem:[#allocation117_spill] sm:$0xff]  ;;  %v13746_v22 = vld [vmem:[#allocation188_spill] sm:$0xff] }
 0x332   : > { %4870 = vrot.lane.b32.xlu0 %v13676_v0, %s13739_s27  ;;  %v1755_v0 = vsel %vm1732_vm15, %v10652_v36, %v10649_v17  ;;  %v2348_v49 = vsel %vm2342_vm0, %v13740_v20, %v10668_v63  ;;  %v2067_v29 = vadd.f32 %v2003_v34, %v1810_v3  ;;  %v2068_v8 = vadd.f32 %v2004_v14, %v1811_v15  ;;  %v13744_v53 = vld [vmem:[#allocation137_spill] sm:$0xff]  ;;  %v13749_v51 = vld [vmem:[#allocation172_spill] sm:$0xff] }
 0x333   : > { %3770 = vrot.lane.b32.xlu1 %v10438_v12, %s7947_s28  ;;  %v2349_v36 = vsel %vm2342_vm0, %v10668_v63, %v13741_v43  ;;  %v2356_v55 = vsel %vm2342_vm0, %v13743_v47, %v13742_v28  ;;  %v1818_v18 = vadd.f32 %v1754_v9, %v1464_v11  ;;  %v1819_v5 = vadd.f32 %v1755_v0, %v1465_v62  ;;  %v13751_v39 = vld [vmem:[#allocation36_spill] sm:$0xff] }
 0x334   : > { %v10917_v52 = vpop.permute.xlu0 %2928  ;;  %v1826_v1 = vadd.f32 %v1762_v23, %v1472_v44  ;;  %v2357_v50 = vsel %vm2342_vm0, %v13742_v28, %v13745_v25  ;;  %v1827_v63 = vadd.f32 %v1763_v13, %v1473_v56  ;;  %v2412_v21 = vadd.f32 %v2348_v49, %v2059_v32  ;;  %v13752_v62 = vld [vmem:[#allocation184_spill] sm:$0xff]  ;;  %v13754_v23 = vld [vmem:[#allocation90_spill] sm:$0xff]  ;;  %v13755_v32 = vld [vmem:[#allocation35_spill] sm:$0xff] }
 0x335   : > { %v10925_v40 = vpop.permute.xlu1 %3941  ;;  %v2011_v3 = vsel %vm1989_vm13, %v13748_v46, %v13747_v7  ;;  %v2019_v15 = vsel %vm1989_vm13, %v13750_v30, %v13749_v51  ;;  %v2413_v11 = vadd.f32 %v2349_v36, %v2060_v2  ;;  %v2420_v59 = vadd.f32 %v2356_v55, %v2067_v29  ;;  %v13753_v9 = vld [vmem:[#allocation176_spill] sm:$0xff]  ;;  %v13758_v28 = vld [vmem:[#allocation171_spill] sm:$0xff] }
 0x336   : > { %4874 = vrot.lane.b32.xlu0 %v13744_v53, %s13739_s27  ;;  %v2710_v44 = vsel %vm2442_vm9, %v13752_v62, %v13751_v39  ;;  %v10946_v34 = vsel %vm1125_vm7, %v10890_v16, %v10882_v41  ;;  %v2421_v56 = vadd.f32 %v2357_v50, %v2068_v8  ;;  %v2012_v0 = vsel %vm1989_vm13, %v13747_v7, %v13753_v9  ;;  %v13756_v13 = vld [vmem:[#allocation52_spill] sm:$0xff]  ;;  %v13759_v55 = vld [vmem:[#allocation55_spill] sm:$0xff] }
 0x337   : > { %4872 = vrot.lane.b32.xlu1 %v13746_v22, %s13739_s27  ;;  %v2702_v2 = vsel %vm2442_vm9, %v13755_v32, %v13754_v23  ;;  %v2709_v20 = vsel %vm2442_vm9, %v13756_v13, %v13752_v62  ;;  %v13757_v29 = vld [vmem:[#allocation152_spill] sm:$0xff]  ;;  %v2075_v36 = vadd.f32 %v2011_v3, %v1818_v18  ;;  %v2020_v8 = vsel %vm1989_vm13, %v13749_v51, %v13758_v28  ;;  %v13761_v22 = vld [vmem:[#allocation151_spill] sm:$0xff] }
 0x338   : > { %v10948_v14 = vpop.permute.xlu0 %2946  ;;  %v2083_v47 = vadd.f32 %v2019_v15, %v1826_v1  ;;  %v13760_v53 = vld [vmem:[#allocation56_spill] sm:$0xff]  ;;  %v13762_v7 = vld [vmem:[#allocation51_spill] sm:$0xff]  ;;  %v2774_v30 = vadd.f32 %v2710_v44, %v2421_v56  ;;  %v3970_v3 = vmul.bf16 %v10946_v34, %v10372_v60  ;;  %v2766_v1 = vadd.f32 %v2702_v2, %v2413_v11  ;;  %v13764_v15 = vld [vmem:[#allocation58_spill] sm:$0xff] }
 0x339   : > { %v10959_v49 = vpop.permute.xlu1 %2930  ;;  %v2967_v50 = vsel %vm2952_vm3, %v13760_v53, %v13759_v55  ;;  %v2701_v46 = vsel %vm2442_vm9, %v13762_v7, %v13755_v32  ;;  %v13763_v62 = vld [vmem:[#allocation92_spill] sm:$0xff]  ;;  %v2773_v51 = vadd.f32 %v2709_v20, %v2420_v59  ;;  %v13765_v13 = vld [vmem:[#allocation59_spill] sm:$0xff]  ;;  %v3320_v9 = vsel %vm3305_vm5, %v10861_v31, %v10850_v54  ;;  %v13766_v44 = vld [vmem:[#allocation25_spill] sm:$0xff] }
 0x33a   : > { %3792 = vrot.lane.b32.xlu0 %v13757_v29, %s7947_s28  ;;  %v2966_v18 = vsel %vm2952_vm3, %v13763_v62, %v13760_v53  ;;  %v2959_v28 = vsel %vm2952_vm3, %v13765_v13, %v13764_v15  ;;  %v2958_v56 = vsel %vm2952_vm3, %v13766_v44, %v13765_v13  ;;  %v3031_v32 = vadd.f32 %v2967_v50, %v2774_v30  ;;  %v13767_v53 = vld [vmem:[#allocation105_spill] sm:$0xff]  ;;  %v13769_v7 = vld [vmem:[#allocation168_spill] sm:$0xff] }
 0x33b   : > { %3790 = vrot.lane.b32.xlu1 %v13761_v22, %s7947_s28  ;;  %v3319_v11 = vsel %vm3305_vm5, %v13767_v53, %v10861_v31  ;;  %v10996_v59 = vsel %vm1125_vm7, %v10882_v41, %v10925_v40  ;;  %v2765_v20 = vadd.f32 %v2701_v46, %v2412_v21  ;;  %v13770_v62 = vld [vmem:[#allocation192_spill] sm:$0xff]  ;;  %v3030_v13 = vadd.f32 %v2966_v18, %v2773_v51  ;;  %v13771_v31 = vld [vmem:[#allocation154_spill] sm:$0xff]  ;;  %v13772_v30 = vld [vmem:[#allocation97_spill] sm:$0xff] }
 0x33c   : > { %v10985_v37 = vpop.permute.xlu0 %3281  ;;  %v2372_v54 = vsel %vm2342_vm0, %v13770_v62, %v13769_v7  ;;  %v3312_v50 = vsel %vm3305_vm5, %v10828_v6, %v10819_v27  ;;  %v13773_v41 = vld [vmem:[#allocation191_spill] sm:$0xff]  ;;  %v3023_v53 = vadd.f32 %v2959_v28, %v2766_v1  ;;  %v3384_v46 = vadd.f32 %v3320_v9, %v3031_v32  ;;  %v13775_v62 = vld [vmem:[#allocation64_spill] sm:$0xff]  ;;  %v13776_v18 = vld [vmem:[#allocation102_spill] sm:$0xff] }
 0x33d   : > { %v10998_v2 = vpop.permute.xlu1 %2948  ;;  %v2364_v44 = vsel %vm2342_vm0, %v13773_v41, %v13772_v30  ;;  %v3022_v15 = vadd.f32 %v2958_v56, %v2765_v20  ;;  %v2725_v51 = vsel %vm2442_vm9, %v13776_v18, %v13775_v62  ;;  %v3383_v17 = vadd.f32 %v3319_v11, %v3030_v13  ;;  %v13778_v1 = vld [vmem:[#allocation63_spill] sm:$0xff]  ;;  %v13779_v9 = vld [vmem:[#allocation61_spill] sm:$0xff]  ;;  %v13780_v56 = vld [vmem:[#allocation26_spill] sm:$0xff] }
 0x33e   : > { %13768 = vst [vmem:[#allocation67_spill] sm:$0xff] %v10998_v2  ;;  %4007 = vrot.lane.b32.xlu0 %v3970_v3, %s7949_s30  ;;  %v13774_v3 = vld [vmem:[#allocation104_spill] sm:$0xff]  ;;  %v3971_v27 = vmul.bf16 %v10996_v59, %v10409_v42  ;;  %v2076_v55 = vadd.f32 %v2012_v0, %v1819_v5  ;;  %v2084_v23 = vadd.f32 %v2020_v8, %v1827_v63  ;;  %v13781_v11 = vld [vmem:[#allocation129_spill] sm:$0xff]  ;;  %v13782_v5 = vld [vmem:[#allocation186_spill] sm:$0xff] }
 0x33f   : > { %3788 = vrot.lane.b32.xlu1 %v13771_v31, %s7947_s28  ;;  %v3311_v21 = vsel %vm3305_vm5, %v13774_v3, %v10828_v6  ;;  %v2436_v10 = vadd.f32 %v2372_v54, %v2083_v47  ;;  %v3376_v41 = vadd.f32 %v3312_v50, %v3023_v53  ;;  %v2428_v6 = vadd.f32 %v2364_v44, %v2075_v36  ;;  %v13783_v0 = vld [vmem:[#allocation158_spill] sm:$0xff]  ;;  %v13785_v44 = vld [vmem:[#allocation107_spill] sm:$0xff]  ;;  %v13786_v53 = vld [vmem:[#allocation133_spill] sm:$0xff] }
 0x340   : > { %v3300_v58 = vpop.permute.xlu0 %3299  ;;  %v2717_v32 = vsel %vm2442_vm9, %v13780_v56, %v13779_v9  ;;  %v3375_v20 = vadd.f32 %v3311_v21, %v3022_v15  ;;  %v2982_v13 = vsel %vm2952_vm3, %v13781_v11, %v10948_v14  ;;  %v2373_v54 = vsel %vm2342_vm0, %v13769_v7, %v13782_v5  ;;  %v13784_v47 = vld [vmem:[#allocation174_spill] sm:$0xff]  ;;  %v13787_v21 = vld [vmem:[#allocation16_spill] sm:$0xff]  ;;  %v13788_v18 = vld [vmem:[#allocation159_spill] sm:$0xff] }
 0x341   : > { %v11020_v28 = vpop.permute.xlu1 %3283  ;;  %v2789_v63 = vadd.f32 %v2725_v51, %v2436_v10  ;;  %v3440_v8 = vadd.f32 %v13783_v0, %v3384_v46  ;;  %v3969_v36 = vmul.bf16 %v10890_v16, %v10438_v12  ;;  %v2365_v15 = vsel %vm2342_vm0, %v13772_v30, %v13784_v47  ;;  %v13790_v11 = vld [vmem:[#allocation60_spill] sm:$0xff] }
 0x342   : > { %13777 = vst [vmem:[#allocation32_spill] sm:$0xff] %v11020_v28  ;;  %4585 = vrot.lane.b32.xlu0 %v13778_v1, %s7941_s24  ;;  %v3439_v50 = vadd.f32 %v13783_v0, %v3383_v17  ;;  %v3335_v3 = vsel %vm3305_vm5, %v13786_v53, %v3300_v58  ;;  %v2781_v10 = vadd.f32 %v2717_v32, %v2428_v6  ;;  %v13791_v6 = vld [vmem:[#allocation132_spill] sm:$0xff] }
 0x343   : > { %4009 = vrot.lane.b32.xlu1 %v3971_v27, %s7949_s30  ;;  %v2974_v27 = vsel %vm2952_vm3, %v13785_v44, %v10917_v52  ;;  %v2726_v46 = vsel %vm2442_vm9, %v13775_v62, %v13787_v21  ;;  %v3432_v51 = vadd.f32 %v13788_v18, %v3376_v41  ;;  %v3046_v56 = vadd.f32 %v2982_v13, %v2789_v63  ;;  %v13792_v62 = vld [vmem:[#allocation62_spill] sm:$0xff] }
 0x344   : > { %v11046_v7 = vpop.permute.xlu0 %4116  ;;  %v2437_v17 = vadd.f32 %v2373_v54, %v2084_v23  ;;  %v2718_v44 = vsel %vm2442_vm9, %v13779_v9, %v13790_v11  ;;  %v3431_v53 = vadd.f32 %v13788_v18, %v3375_v20  ;;  %v3327_v32 = vsel %vm3305_vm5, %v13791_v6, %v10985_v37 }
 0x345   : > { %v11052_v30 = vpop.permute.xlu1 %3301  ;;  %v3038_v41 = vadd.f32 %v2974_v27, %v2781_v10  ;;  %v2983_v13 = vsel %vm2952_vm3, %v10948_v14, %v10998_v2  ;;  %v3399_v63 = vadd.f32 %v3335_v3, %v3046_v56  ;;  %v3470_v23 = vpack.c.bf16 %v3440_v8, %v3432_v51  ;;  %v13794_v8 = vld [vmem:[#allocation33_spill] sm:$0xff] }
 0x346   : > { %13789 = vst [vmem:[#allocation71_spill] sm:$0xff] %v11052_v30  ;;  %4005 = vrot.lane.b32.xlu0 %v3969_v36, %s7949_s30  ;;  %v2429_v54 = vadd.f32 %v2365_v15, %v2076_v55  ;;  %v2790_v36 = vadd.f32 %v2726_v46, %v2437_v17  ;;  %v3469_v9 = vpack.c.bf16 %v3439_v50, %v3431_v53  ;;  %v13795_v51 = vld [vmem:[#allocation181_spill] sm:$0xff] }
 0x347   : > { %4587 = vrot.lane.b32.xlu1 %v13792_v62, %s7941_s24  ;;  %v2975_v20 = vsel %vm2952_vm3, %v10917_v52, %v10959_v49  ;;  %v3391_v6 = vadd.f32 %v3327_v32, %v3038_v41  ;;  %v3336_v62 = vsel %vm3305_vm5, %v3300_v58, %v11052_v30  ;;  %v3980_v55 = vmul.bf16 %v10996_v59, %v13757_v29 }
 0x348   : > { %v11067_v21 = vpop.permute.xlu0 %4120  ;;  %v2782_v10 = vadd.f32 %v2718_v44, %v2429_v54  ;;  %v3047_v14 = vadd.f32 %v2983_v13, %v2790_v36  ;;  %v3455_v15 = vadd.f32 %v13794_v8, %v3399_v63  ;;  %v3328_v52 = vsel %vm3305_vm5, %v10985_v37, %v11020_v28  ;;  %v13797_v13 = vld [vmem:[#allocation147_spill] sm:$0xff]  ;;  %v13816_v28 = vld [vmem:[#allocation14_spill] sm:$0xff] }
 0x349   : > { %13793 = vst [vmem:[#allocation20_spill] sm:$0xff] %v11067_v21  ;;  %v4119_v27 = vpop.permute.xlu1 %4118  ;;  %v3979_v50 = vmul.bf16 %v10946_v34, %v13761_v22  ;;  %v3447_v56 = vadd.f32 %v13795_v51, %v3391_v6  ;;  %v3978_v37 = vmul.bf16 %v10890_v16, %v13771_v31 }
 0x34a   : > { %3508 = vrot.lane.b32.xlu0 %v3470_v23, %s7940_s23  ;;  %v3039_v58 = vadd.f32 %v2975_v20, %v2782_v10  ;;  %v3400_v3 = vadd.f32 %v3336_v62, %v3047_v14  ;;  %v4132_v34 = vsel %vm1479_vm8, %v11046_v7, %v4119_v27  ;;  %v13800_v20 = vld [vmem:[#allocation144_spill] sm:$0xff]  ;;  %v4133_v10 = vsel %vm1479_vm8, %v4119_v27, %v11067_v21  ;;  %v13802_v27 = vld [vmem:[#allocation190_spill] sm:$0xff] }
 0x34b   : > { %3506 = vrot.lane.b32.xlu1 %v3469_v9, %s7940_s23  ;;  %v3477_v44 = vpack.c.bf16 %v3455_v15, %v3447_v56  ;;  %v4149_v16 = vmul.bf16 %v4132_v34, %v10372_v60  ;;  %v3704_v6 = vmul.bf16 %v13800_v20, %v10409_v42  ;;  %v11135_v56 = vcombine.high %v13802_v27, %v13802_v27 }
 0x34c   : > { %v11084_v46 = vpop.permute.xlu0 %982  ;;  %v3392_v59 = vadd.f32 %v3328_v52, %v3039_v58  ;;  %v3456_v53 = vadd.f32 %v13794_v8, %v3400_v3  ;;  %v4148_v52 = vmul.bf16 %v11046_v7, %v10438_v12 }
 0x34d   : > { %v11087_v17 = vpop.permute.xlu1 %964 }
 0x34e   : > { %4027 = vrot.lane.b32.xlu0 %v3980_v55, %s7949_s30  ;;  %v3448_v41 = vadd.f32 %v13795_v51, %v3392_v59  ;;  %v13801_v55 = vld [vmem:[#allocation95_spill] sm:$0xff] }
 0x34f   : > { %4025 = vrot.lane.b32.xlu1 %v3979_v50, %s7949_s30  ;;  %v3613_v15 = vcombine.high %v13801_v55, %v13801_v55  ;;  %v4150_v50 = vmul.bf16 %v4133_v10, %v10409_v42  ;;  %v13803_v59 = vld [vmem:[#allocation15_spill] sm:$0xff] }
 0x350   : > { %v11096_v32 = vpop.permute.xlu0 %3504  ;;  %v3478_v9 = vpack.c.bf16 %v3456_v53, %v3448_v41  ;;  %v4158_v53 = vmul.bf16 %v4132_v34, %v13761_v22 }
 0x351   : > { %13796 = vst [vmem:[#allocation68_spill] sm:$0xff] %v11096_v32  ;;  %v3503_v62 = vpop.permute.xlu1 %3502 }
 0x352   : > { %3522 = vrot.lane.b32.xlu0 %v3477_v44, %s7940_s23  ;;  %v11102_v63 = vsel %vm13798_vm6, %v13797_v13, %v3503_v62  ;;  %v11106_v23 = vsel %vm13799_vm2, %v3503_v62, %v11096_v32  ;;  %v11139_v44 = vrot.slane %v3613_v15, %v13803_v59  ;;  %v3915_v13 = vshrl.u32 %v11135_v56, 16  ;;  %v13810_v59 = vld [vmem:[#allocation11_spill] sm:$0xff]  ;;  %vm13848_vm6 = vmmov %vm13653_vm1 }
 0x353   : > { %4023 = vrot.lane.b32.xlu1 %v3978_v37, %s7949_s30  ;;  %3565 = vst [vmem:[#allocation3 + $0x20] sm:$0xff] %v11106_v23  ;;  %v3705_v54 = vmul.bf16 %v13778_v1, %v11102_v63  ;;  %v4159_v37 = vmul.bf16 %v4133_v10, %v13757_v29  ;;  %v13806_v10 = vld [vmem:[#allocation148_spill] sm:$0xff]  ;;  %vm13849_vm2 = vmmov %vm13653_vm1 }
 0x354   : > { %v11113_v36 = vpop.permute.xlu0 %1340  ;;  %13804 = vst [vmem:[#allocation72_spill] sm:$0xff] %v11139_v44  ;;  %v3916_v34 = vpack.i.b16 %v3915_v13, %v3915_v13 }
 0x355   : > { %v11119_v14 = vpop.permute.xlu1 %1322  ;;  %5342 = vmatprep.subr.bf16.mxu1 %v3705_v54  ;;  %v4157_v54 = vmul.bf16 %v11046_v7, %v13771_v31 }
 0x356   : > { %4186 = vrot.lane.b32.xlu0 %v4149_v16, %s7950_s14  ;;  %5343 = vmatpush1.bf16.msra.mxu1 %v3704_v6  ;;  %v3908_v16 = vshrl.u32 %v11139_v44, 16 }
 0x357   : > { %3524 = vrot.lane.b32.xlu1 %v3478_v9, %s7940_s23 }
 0x358   : > { %v11128_v58 = vpop.permute.xlu0 %1018 }
 0x359   : > { %v11130_v3 = vpop.permute.xlu1 %1000 }
 0x35a   : > { %4184 = vrot.lane.b32.xlu0 %v4148_v52, %s7950_s14  ;;  %v3909_v52 = vpack.i.b16 %v3908_v16, %v3908_v16 }
 0x35b   : > { %4188 = vrot.lane.b32.xlu1 %v4150_v50, %s7950_s14 }
 0x35c   : > { %v11143_v62 = vpop.permute.xlu0 %1694 }
 0x35d   : > { %v11145_v41 = vpop.permute.xlu1 %1676 }
 0x35e   : > { %4206 = vrot.lane.b32.xlu0 %v4159_v37, %s7950_s14  ;;  %v11178_v37 = vrot.slane %v3916_v34, %v13810_v59  ;;  %v11213_v34 = vld [vmem:[#allocation3 + $0x8] sm:$0xff] }
 0x35f   : > { %4204 = vrot.lane.b32.xlu1 %v4158_v53, %s7950_s14  ;;  %v11183_v53 = vrot.slane %v3909_v52, %v13810_v59 }
 0x360   : > { %v11153_v9 = vpop.permute.xlu0 %3520  ;;  %13811 = vst [vmem:[#allocation96_spill] sm:$0xff] %v11178_v37 }
 0x361   : > { %13805 = vst [vmem:[#allocation91_spill] sm:$0xff] %v11153_v9  ;;  %v3519_v6 = vpop.permute.xlu1 %3518  ;;  %13812 = vst [vmem:[#allocation120_spill] sm:$0xff] %v11183_v53 }
 0x362   : > { %4307 = vrot.lane.b32.xlu0 %v10372_v60, %s7948_s29  ;;  %v11159_v55 = vsel %vm13807_vm4, %v13806_v10, %v3519_v6  ;;  %v11163_v15 = vsel %vm13653_vm1, %v3519_v6, %v11153_v9  ;;  %v3712_v60 = vmul.bf16 %v13800_v20, %v13757_v29  ;;  %v11225_v9 = vld [vmem:[#allocation3 + $0x10] sm:$0xff]  ;;  %vm13852_vm4 = vmmov %vm13653_vm1 }
 0x363   : > { %13808 = vst [vmem:[#allocation19_spill] sm:$0xff] %v11159_v55  ;;  %13809 = vst [vmem:[#allocation18_spill] sm:$0xff] %v11163_v15  ;;  %4202 = vrot.lane.b32.xlu1 %v4157_v54, %s7950_s14  ;;  %v3713_v7 = vmul.bf16 %v13778_v1, %v11159_v55 }
 0x364   : > { %3574 = vst [vmem:[#allocation3 + $0x68] sm:$0xff] %v11163_v15  ;;  %v11169_v50 = vpop.permute.xlu0 %1376 }
 0x365   : > { %v11173_v27 = vpop.permute.xlu1 %1358  ;;  %5344 = vmatprep.subr.bf16.mxu1 %v3713_v7 }
 0x366   : > { %4305 = vrot.lane.b32.xlu0 %v10438_v12, %s7948_s29  ;;  %5345 = vmatpush1.bf16.msra.mxu1 %v3712_v60 }
 0x367   : > { %4309 = vrot.lane.b32.xlu1 %v10409_v42, %s7948_s29 }
 0x368   : > { %v11185_v1 = vpop.permute.xlu0 %1951 }
 0x369   : > { %v11187_v13 = vpop.permute.xlu1 %1933 }
 0x36a   : > { %3949 = vrot.lane.b32.xlu0 %v11178_v37, %s7934_s20 }
 0x36b   : > { %3947 = vrot.lane.b32.xlu1 %v11183_v53, %s7934_s20 }
 0x36c   : > { %v11193_v12 = vpop.permute.xlu0 %1730 }
 0x36d   : > { %v11195_v20 = vpop.permute.xlu1 %1712 }
 0x36e   : > { %4327 = vrot.lane.b32.xlu0 %v13757_v29, %s7948_s29 }
 0x36f   : > { %4325 = vrot.lane.b32.xlu1 %v13761_v22, %s7948_s29 }
 0x370   : > { %v11201_v42 = vpop.permute.xlu0 %2304 }
 0x371   : > { %v11203_v16 = vpop.permute.xlu1 %2286 }
 0x372   : > { %3778 = vrot.lane.b32.xlu0 %v11106_v23, %s7947_s28 }
 0x373   : > { %3776 = vrot.lane.b32.xlu1 %v11102_v63, %s7947_s28 }
 0x374   : > { %v4411_v54 = vpop.permute.xlu0 %4410 }
 0x375   : > { %v11209_v6 = vpop.permute.xlu1 %4408 }
 0x376   : > { %4876 = vrot.lane.b32.xlu0 %v10729_v35, %s13739_s27  ;;  %v4424_v10 = vsel %vm2089_vm11, %v11209_v6, %v4411_v54 }
 0x377   : > { %4323 = vrot.lane.b32.xlu1 %v13771_v31, %s7948_s29  ;;  %v4441_v52 = vmul.bf16 %v4424_v10, %v11213_v34 }
 0x378   : > { %v11220_v7 = vpop.permute.xlu0 %1969 }
 0x379   : > { %v11222_v60 = vpop.permute.xlu1 %4412 }
 0x37a   : > { %13813 = vst [vmem:[#allocation66_spill] sm:$0xff] %v11222_v60  ;;  %4478 = vrot.lane.b32.xlu0 %v4441_v52, %s7951_s15  ;;  %v4425_v35 = vsel %vm2089_vm11, %v4411_v54, %v11222_v60  ;;  %v3689_v52 = vpack.i.b16 %v11135_v56, %v11135_v56  ;;  %v3682_v54 = vpack.i.b16 %v11139_v44, %v11139_v44  ;;  %v7921_v60 = vld [vmem:[#allocation3] sm:$0xff] }
 0x37b   : > { %4878 = vrot.lane.b32.xlu1 %v10742_v45, %s13739_s27  ;;  %v4442_v32 = vmul.bf16 %v4425_v35, %v11225_v9  ;;  %v4440_v45 = vmul.bf16 %v7921_v60, %v11209_v6  ;;  %v13817_v44 = vld [vmem:[#allocation187_spill] sm:$0xff]  ;;  %v4451_v60 = vmul.bf16 %v4425_v35, %v13757_v29  ;;  %v13821_v35 = vld [vmem:[#allocation34_spill] sm:$0xff] }
 0x37c   : > { %v11232_v37 = vpop.permute.xlu0 %2639  ;;  %v11248_v8 = vrot.slane %v3689_v52, %v13810_v59  ;;  %v11253_v56 = vrot.slane %v3682_v54, %v13810_v59  ;;  %v666_v30 = vrot.slane %v13817_v44, %v13816_v28  ;;  %v4450_v52 = vmul.bf16 %v4424_v10, %v13761_v22  ;;  %v13818_v28 = vld [vmem:[#allocation142_spill] sm:$0xff] }
 0x37d   : > { %v11234_v53 = vpop.permute.xlu1 %1987  ;;  %v1036_v44 = vsel %vm1020_vm12, %v13818_v28, %v11084_v46  ;;  %v1394_v22 = vsel %vm1378_vm14, %v10469_v48, %v11113_v36  ;;  %v1386_v46 = vsel %vm1378_vm14, %v10434_v24, %v11119_v14  ;;  %v1740_v48 = vsel %vm1732_vm15, %v10561_v38, %v11145_v41  ;;  %v13822_v41 = vld [vmem:[#allocation183_spill] sm:$0xff] }
 0x37e   : > { %3794 = vrot.lane.b32.xlu0 %v11159_v55, %s7947_s28  ;;  %13814 = vst [vmem:[#allocation126_spill] sm:$0xff] %v11248_v8  ;;  %13815 = vst [vmem:[#allocation123_spill] sm:$0xff] %v11253_v56  ;;  %v706_v54 = vrot.slane %v666_v30, %v13810_v59  ;;  %v2358_v38 = vsel %vm2342_vm0, %v13745_v25, %v11201_v42  ;;  %v2350_v25 = vsel %vm2342_vm0, %v13741_v43, %v11203_v16  ;;  %v13823_v42 = vld [vmem:[#allocation150_spill] sm:$0xff] }
 0x37f   : > { %4480 = vrot.lane.b32.xlu1 %v4442_v32, %s7951_s15  ;;  %v13824_v43 = vld [vmem:[#allocation90_spill] sm:$0xff] }
 0x380   : > { %v11244_v21 = vpop.permute.xlu0 %2322 }
 0x381   : > { %v2658_v51 = vpop.permute.xlu1 %2657 }
 0x382   : > { %4476 = vrot.lane.b32.xlu0 %v4440_v45, %s7951_s15 }
 0x383   : > { %3796 = vrot.lane.b32.xlu1 %v11163_v15, %s7947_s28 }
 0x384   : > { %v2897_v32 = vpop.permute.xlu0 %2896 }
 0x385   : > { %v11257_v55 = vpop.permute.xlu1 %2340 }
 0x386   : > { %4128 = vrot.lane.b32.xlu0 %v11248_v8, %s7935_s21  ;;  %v13819_v8 = vld [vmem:[#allocation182_spill] sm:$0xff] }
 0x387   : > { %4126 = vrot.lane.b32.xlu1 %v11253_v56, %s7935_s21  ;;  %v722_v2 = vmul.f32 %v13819_v8, %v706_v54  ;;  %v13820_v56 = vld [vmem:[#allocation140_spill] sm:$0xff]  ;;  %v1748_v8 = vsel %vm1732_vm15, %v10580_v57, %v11143_v62  ;;  %v1997_v57 = vsel %vm1989_vm13, %v10631_v4, %v11187_v13  ;;  %v1044_v4 = vsel %vm1020_vm12, %v10498_v19, %v11130_v3 }
 0x388   : > { %v11265_v45 = vpop.permute.xlu0 %2675  ;;  %v1028_v29 = vsel %vm1020_vm12, %v13820_v56, %v11087_v17  ;;  %v2711_v13 = vsel %vm2442_vm9, %v13751_v39, %v2658_v51  ;;  %v4449_v19 = vmul.bf16 %v11209_v6, %v13771_v31  ;;  %v2703_v3 = vsel %vm2442_vm9, %v13824_v43, %v11232_v37  ;;  %v13825_v39 = vld [vmem:[#allocation55_spill] sm:$0xff]  ;;  %v13827_v6 = vld [vmem:[#allocation164_spill] sm:$0xff] }
 0x389   : > { %v2915_v15 = vpop.permute.xlu1 %2914  ;;  %v1100_v10 = vadd.f32 %v1036_v44, %v722_v2  ;;  %v2005_v2 = vsel %vm1989_vm13, %v10641_v61, %v11185_v1  ;;  %v738_v61 = vmul.f32 %v13735_v26, %v706_v54  ;;  %v730_v1 = vmul.f32 %v13822_v41, %v706_v54 }
 0x38a   : > { %4498 = vrot.lane.b32.xlu0 %v4451_v60, %s7951_s15  ;;  %v714_v60 = vmul.f32 %v13821_v35, %v706_v54  ;;  %v1402_v54 = vsel %vm1378_vm14, %v13823_v42, %v11173_v27  ;;  %v2968_v51 = vsel %vm2952_vm3, %v13825_v39, %v2915_v15  ;;  %v13826_v27 = vmov 0   ;;  %v13828_v15 = vld [vmem:[#allocation165_spill] sm:$0xff] }
 0x38b   : > { %4496 = vrot.lane.b32.xlu1 %v4450_v52, %s7951_s15  ;;  %v1458_v17 = vadd.f32 %v1394_v22, %v1100_v10  ;;  %3462 = vst.msk [vmem:[#allocation3 + $0x40] sm:$0xff] %vm3461_vm10, %v13826_v27  ;;  %3463 = vst.msk [vmem:[#allocation3 + $0x88] sm:$0xff] %vm3461_vm10, %v13826_v27  ;;  %v1108_v10 = vadd.f32 %v1044_v4, %v730_v1  ;;  %v1410_v37 = vsel %vm1378_vm14, %v13827_v6, %v11169_v50  ;;  %v13837_v6 = vld [vmem:[#allocation19_spill] sm:$0xff]  ;;  %vm13856_vm10 = vcmask 539648  }
 0x38c   : > { %v3250_v30 = vpop.permute.xlu0 %3249  ;;  %v1092_v52 = vadd.f32 %v1028_v29, %v714_v60 }
 0x38d   : > { %v11281_v59 = vpop.permute.xlu1 %2693  ;;  %v1812_v28 = vadd.f32 %v1748_v8, %v1458_v17  ;;  %v13829_v8 = vld [vmem:[#allocation58_spill] sm:$0xff]  ;;  %v13830_v17 = vld [vmem:[#allocation65_spill] sm:$0xff] }
 0x38e   : > { %v1450_v56 = vadd.f32 %v1386_v46, %v1092_v52  ;;  %v1756_v46 = vsel %vm1732_vm15, %v13828_v15, %v11195_v20  ;;  %v2960_v52 = vsel %vm2952_vm3, %v13829_v8, %v2897_v32  ;;  %v13832_v32 = vld [vmem:[#allocation176_spill] sm:$0xff]  ;;  %v13838_v15 = vld [vmem:[#allocation71_spill] sm:$0xff] }
 0x38f   : > { %v2069_v29 = vadd.f32 %v2005_v2, %v1812_v28 }
 0x390   : > { %v3944_v36 = vpop.permute.xlu0 %3943  ;;  %v1804_v44 = vadd.f32 %v1740_v48, %v1450_v56  ;;  %v1466_v56 = vadd.f32 %v1402_v54, %v1108_v10 }
 0x391   : > { %v11297_v24 = vsel %vm1125_vm7, %v10925_v40, %v3944_v36  ;;  %v3268_v14 = vpop.permute.xlu1 %3267  ;;  %v1052_v40 = vsel %vm1020_vm12, %v10531_v33, %v11128_v58  ;;  %v2422_v33 = vadd.f32 %v2358_v38, %v2069_v29  ;;  %v13831_v38 = vld [vmem:[#allocation160_spill] sm:$0xff] }
 0x392   : > { %v3972_v62 = vmul.bf16 %v11297_v24, %v11102_v63  ;;  %v2061_v22 = vadd.f32 %v1997_v57, %v1804_v44  ;;  %v3321_v48 = vsel %vm3305_vm5, %v13830_v17, %v3268_v14  ;;  %v1764_v20 = vsel %vm1732_vm15, %v13831_v38, %v11193_v12  ;;  %v13833_v14 = vld [vmem:[#allocation179_spill] sm:$0xff] }
 0x393   : > { %v2775_v60 = vadd.f32 %v2711_v13, %v2422_v33  ;;  %v3313_v41 = vsel %vm3305_vm5, %v13833_v14, %v3250_v30  ;;  %v1820_v44 = vadd.f32 %v1756_v46, %v1466_v56  ;;  %v2374_v30 = vsel %vm2342_vm0, %v13782_v5, %v11257_v55  ;;  %v13839_v46 = vld [vmem:[#allocation32_spill] sm:$0xff] }
 0x394   : > { %v2933_v26 = vpop.permute.xlu0 %2932  ;;  %4011 = vrot.lane.b32.xlu1 %v3972_v62, %s7949_s30  ;;  %v2414_v35 = vadd.f32 %v2350_v25, %v2061_v22  ;;  %v2013_v62 = vsel %vm1989_vm13, %v13832_v32, %v11220_v7  ;;  %v2366_v7 = vsel %vm2342_vm0, %v13784_v47, %v11244_v21  ;;  %v2719_v47 = vsel %vm2442_vm9, %v13790_v11, %v11265_v45  ;;  %v13835_v21 = vld [vmem:[#allocation16_spill] sm:$0xff]  ;;  %v11416_v32 = vld [vmem:[#allocation3 + $0x58] sm:$0xff] }
 0x395   : > { %v11324_v58 = vpop.permute.xlu1 %3945  ;;  %v3032_v57 = vadd.f32 %v2968_v51, %v2775_v60  ;;  %v2077_v42 = vadd.f32 %v2013_v62, %v1820_v44  ;;  %v2727_v5 = vsel %vm2442_vm9, %v13835_v21, %v11281_v59  ;;  %v13836_v60 = vld [vmem:[#allocation67_spill] sm:$0xff]  ;;  %v3981_v59 = vmul.bf16 %v11297_v24, %v13837_v6  ;;  %v13842_v44 = vld [vmem:[#allocation181_spill] sm:$0xff] }
 0x396   : > { %v11335_v16 = vsel %vm1125_vm7, %v3944_v36, %v11324_v58  ;;  %v1116_v36 = vadd.f32 %v1052_v40, %v738_v61  ;;  %v2767_v28 = vadd.f32 %v2703_v3, %v2414_v35  ;;  %v13834_v40 = vld [vmem:[#allocation171_spill] sm:$0xff]  ;;  %v2976_v35 = vsel %vm2952_vm3, %v10959_v49, %v2933_v26 }
 0x397   : > { %v3973_v31 = vmul.bf16 %v11335_v16, %v11106_v23  ;;  %v3385_v29 = vadd.f32 %v3321_v48, %v3032_v57  ;;  %v2021_v4 = vsel %vm1989_vm13, %v13834_v40, %v11234_v53  ;;  %v2430_v39 = vadd.f32 %v2366_v7, %v2077_v42  ;;  %v11404_v26 = vld [vmem:[#allocation3] sm:$0xff] }
 0x398   : > { %v11351_v2 = vpop.permute.xlu0 %4579  ;;  %4494 = vrot.lane.b32.xlu1 %v4449_v19, %s7951_s15  ;;  %v1474_v1 = vadd.f32 %v1410_v37, %v1116_v36  ;;  %v3024_v61 = vadd.f32 %v2960_v52, %v2767_v28  ;;  %v13840_v36 = vld [vmem:[#allocation18_spill] sm:$0xff] }
 0x399   : > { %4013 = vrot.lane.b32.xlu0 %v3973_v31, %s7949_s30  ;;  %v2951_v50 = vpop.permute.xlu1 %2950  ;;  %v3441_v19 = vadd.f32 %v13783_v0, %v3385_v29  ;;  %v2783_v45 = vadd.f32 %v2719_v47, %v2430_v39  ;;  %v3982_v24 = vmul.bf16 %v11335_v16, %v13840_v36  ;;  %v4611_v56 = vmul.bf16 %v11351_v2, %v11404_v26  ;;  %v13843_v29 = vld [vmem:[#allocation20_spill] sm:$0xff] }
 0x39a   : > { %v1828_v13 = vadd.f32 %v1764_v20, %v1474_v1  ;;  %v3377_v12 = vadd.f32 %v3313_v41, %v3024_v61  ;;  %v2984_v11 = vsel %vm2952_vm3, %v13836_v60, %v2951_v50  ;;  %v11414_v20 = vld [vmem:[#allocation3 + $0x50] sm:$0xff] }
 0x39b   : > { %v3040_v17 = vadd.f32 %v2976_v35, %v2783_v45  ;;  %v13841_v41 = vld [vmem:[#allocation33_spill] sm:$0xff]  ;;  %v13844_v35 = vld [vmem:[#allocation120_spill] sm:$0xff] }
 0x39c   : > { %v11366_v25 = vpop.permute.xlu0 %4583  ;;  %v2085_v33 = vadd.f32 %v2021_v4, %v1828_v13  ;;  %v3433_v10 = vadd.f32 %v13788_v18, %v3377_v12 }
 0x39d   : > { %v4582_v54 = vpop.permute.xlu1 %4581 }
 0x39e   : > { %v4595_v22 = vsel %vm2442_vm9, %v11351_v2, %v4582_v54  ;;  %v4596_v53 = vsel %vm2442_vm9, %v4582_v54, %v11366_v25  ;;  %v2438_v51 = vadd.f32 %v2374_v30, %v2085_v33  ;;  %v3471_v37 = vpack.c.bf16 %v3441_v19, %v3433_v10 }
 0x39f   : > { %v4612_v43 = vmul.bf16 %v4595_v22, %v11213_v34  ;;  %v4613_v3 = vmul.bf16 %v4596_v53, %v11225_v9  ;;  %v4621_v16 = vmul.bf16 %v4595_v22, %v11414_v20  ;;  %v4622_v14 = vmul.bf16 %v4596_v53, %v11416_v32  ;;  %v7922_v53 = vld [vmem:[#allocation3 + $0x48] sm:$0xff] }
 0x3a0   : > { %v3304_v55 = vpop.permute.xlu0 %3303  ;;  %v2791_v31 = vadd.f32 %v2727_v5, %v2438_v51  ;;  %v4620_v33 = vmul.bf16 %v7922_v53, %v11351_v2 }
 0x3a1   : > { %4651 = vrot.lane.b32.xlu1 %v4613_v3, %s7941_s24  ;;  %4649 = vrot.lane.b32.xlu0 %v4612_v43, %s7941_s24  ;;  %v3286_v0 = vpop.permute.xlu1 %3285  ;;  %v3337_v18 = vsel %vm3305_vm5, %v13838_v15, %v3304_v55 }
 0x3a2   : > { %v3329_v8 = vsel %vm3305_vm5, %v13839_v46, %v3286_v0  ;;  %v3048_v48 = vadd.f32 %v2984_v11, %v2791_v31  ;;  %v13845_v11 = vld [vmem:[#allocation72_spill] sm:$0xff] }
 0x3a3   : > { %v3393_v57 = vadd.f32 %v3329_v8, %v3040_v17  ;;  %v3645_v45 = vcombine.high %v13845_v11, %v13845_v11 }
 0x3a4   : > { %v11400_v52 = vpop.permute.xlu0 %4124  ;;  %v3401_v28 = vadd.f32 %v3337_v18, %v3048_v48 }
 0x3a5   : > { %4029 = vrot.lane.b32.xlu1 %v3981_v59, %s7949_s30  ;;  %3510 = vrot.lane.b32.xlu0 %v3471_v37, %s7940_s23  ;;  %v4123_v49 = vpop.permute.xlu1 %4122  ;;  %v3449_v61 = vadd.f32 %v13842_v44, %v3393_v57  ;;  %v13846_v37 = vld [vmem:[#allocation96_spill] sm:$0xff]  ;;  %v3922_v46 = vshrl.u32 %v3645_v45, 16  ;;  %v3696_v53 = vpack.i.b16 %v3645_v45, %v3645_v45 }
 0x3a6   : > { %v3457_v1 = vadd.f32 %v13841_v41, %v3401_v28  ;;  %v4134_v40 = vsel %vm1479_vm8, %v13843_v29, %v4123_v49  ;;  %v4135_v54 = vsel %vm1479_vm8, %v4123_v49, %v11400_v52  ;;  %v13847_v49 = vld [vmem:[#allocation68_spill] sm:$0xff] }
 0x3a7   : > { %v4151_v12 = vmul.bf16 %v4134_v40, %v11102_v63  ;;  %v4152_v19 = vmul.bf16 %v4135_v54, %v11106_v23  ;;  %v4160_v5 = vmul.bf16 %v4134_v40, %v13837_v6  ;;  %v4161_v55 = vmul.bf16 %v4135_v54, %v13840_v36  ;;  %v11495_v28 = vld [vmem:[#allocation3 + $0x48] sm:$0xff] }
 0x3a8   : > { %v11410_v50 = vpop.permute.xlu0 %3774  ;;  %v3479_v42 = vpack.c.bf16 %v3457_v1, %v3449_v61  ;;  %v3923_v48 = vpack.i.b16 %v3922_v46, %v3922_v46  ;;  %v13851_v1 = vld [vmem:[#allocation91_spill] sm:$0xff] }
 0x3a9   : > { %4647 = vrot.lane.b32.xlu1 %v4611_v56, %s7941_s24  ;;  %4031 = vrot.lane.b32.xlu0 %v3982_v24, %s7949_s30  ;;  %v3773_v38 = vpop.permute.xlu1 %3772  ;;  %v11520_v40 = vld [vmem:[%s12786_s3 + $0x4] ss:$12 sps:$4 sm:$0xff]  }
 0x3aa   : > { %v3808_v62 = vsel %vm1020_vm12, %v3773_v38, %v11410_v50  ;;  %5268 = vmatprep.mubr.bf16.mxu0 %v11520_v40  ;;  %5374 = vmatprep.mubr.bf16.mxu1 %v11520_v40 }
 0x3ab   : > { %5240 = vmatprep.subr.bf16.mxu0 %v3808_v62  ;;  %v13850_v62 = vld [vmem:[#allocation11_spill] sm:$0xff] }
 0x3ac   : > { %v11426_v4 = vpop.permute.xlu0 %4416 }
 0x3ad   : > { %4669 = vrot.lane.b32.xlu1 %v4622_v14, %s7941_s24  ;;  %4667 = vrot.lane.b32.xlu0 %v4621_v16, %s7941_s24  ;;  %v11430_v13 = vpop.permute.xlu1 %4414  ;;  %v11504_v16 = vrot.slane %v3923_v48, %v13850_v62 }
 0x3b0   : > { %v11435_v7 = vpop.permute.xlu0 %4870 }
 0x3b1   : > { %3526 = vrot.lane.b32.xlu0 %v3479_v42, %s7940_s23  ;;  %4190 = vrot.lane.b32.xlu1 %v4151_v12, %s7950_s14  ;;  %v3771_v30 = vpop.permute.xlu1 %3770  ;;  %v13853_v42 = vld [vmem:[#allocation66_spill] sm:$0xff]  ;;  %s13133_s23 = smov 119  }
 0x3b2   : > { %v3807_v22 = vsel %vm1020_vm12, %v3771_v30, %v3773_v38  ;;  %v4426_v12 = vsel %vm2089_vm11, %v13853_v42, %v11430_v13  ;;  %v13854_v30 = vld [vmem:[#allocation123_spill] sm:$0xff] }
 0x3b3   : > { %5241 = vmatpush1.bf16.msra.mxu0 %v3807_v22 }
 0x3b4   : > { %v11442_v43 = vpop.permute.xlu0 %4874 }
 0x3b5   : > { %4192 = vrot.lane.b32.xlu0 %v4152_v19, %s7950_s14  ;;  %4665 = vrot.lane.b32.xlu1 %v4620_v33, %s7941_s24  ;;  %v11446_v3 = vpop.permute.xlu1 %4872  ;;  %v4443_v19 = vmul.bf16 %v4426_v12, %v11102_v63 }
 0x3b8   : > { %v11448_v47 = vpop.permute.xlu0 %3792 }
 0x3b9   : > { %4769 = vrot.lane.b32.xlu0 %v11213_v34, %s7952_s16  ;;  %4771 = vrot.lane.b32.xlu1 %v11225_v9, %s7952_s16  ;;  %v3791_v2 = vpop.permute.xlu1 %3790 }
 0x3ba   : > { %v3816_v21 = vsel %vm1020_vm12, %v3791_v2, %v11448_v47 }
 0x3bb   : > { %5242 = vmatprep.subr.bf16.mxu0 %v3816_v21 }
 0x3bc   : > { %v4008_v39 = vpop.permute.xlu0 %4007 }
 0x3bd   : > { %4208 = vrot.lane.b32.xlu0 %v4160_v5, %s7950_s14  ;;  %4210 = vrot.lane.b32.xlu1 %v4161_v55, %s7950_s14  ;;  %v3789_v51 = vpop.permute.xlu1 %3788  ;;  %v13855_v5 = vld [vmem:[#allocation126_spill] sm:$0xff] }
 0x3be   : > { %v3815_v10 = vsel %vm1020_vm12, %v3789_v51, %v3791_v2  ;;  %v4427_v2 = vsel %vm2089_vm11, %v11430_v13, %v11426_v4  ;;  %v11549_v51 = vrot.slane %v3696_v53, %v13850_v62  ;;  %v4886_v13 = vsel %vm13856_vm10, %v11435_v7, %v11446_v3 }
 0x3bf   : > { %5243 = vmatpush1.bf16.msra.mxu0 %v3815_v10  ;;  %v4444_v11 = vmul.bf16 %v4427_v2, %v11106_v23  ;;  %v4903_v46 = vmul.bf16 %v4886_v13, %v11213_v34 }
 0x3c0   : > { %v11461_v0 = vpop.permute.xlu0 %4585 }
 0x3c1   : > { %4767 = vrot.lane.b32.xlu0 %v11404_v26, %s7952_s16  ;;  %4418 = vrot.lane.b32.xlu1 %v13844_v35, %s13674_s22  ;;  %v11467_v60 = vpop.permute.xlu1 %4009  ;;  %v4597_v53 = vsel %vm2442_vm9, %v11366_v25, %v11461_v0 }
 0x3c2   : > { %v4043_v31 = vsel %vm1378_vm14, %v4008_v39, %v11467_v60 }
 0x3c3   : > { %5244 = vmatprep.subr.bf16.mxu0 %v4043_v31 }
 0x3c4   : > { %v4006_v59 = vpop.permute.xlu0 %4005 }
 0x3c5   : > { %4420 = vrot.lane.b32.xlu0 %v13846_v37, %s13674_s22  ;;  %4787 = vrot.lane.b32.xlu1 %v11414_v20, %s7952_s16  ;;  %v11477_v15 = vpop.permute.xlu1 %4587  ;;  %v4042_v18 = vsel %vm1378_vm14, %v4006_v59, %v4008_v39 }
 0x3c6   : > { %5245 = vmatpush1.bf16.msra.mxu0 %v4042_v18 }
 0x3c8   : > { %v11480_v8 = vpop.permute.xlu0 %3508 }
 0x3c9   : > { %4789 = vrot.lane.b32.xlu0 %v11416_v32, %s7952_s16  ;;  %4311 = vrot.lane.b32.xlu1 %v11102_v63, %s7948_s29  ;;  %v3507_v17 = vpop.permute.xlu1 %3506 }
 0x3ca   : > { %v11488_v24 = vsel %vm13848_vm6, %v13847_v49, %v3507_v17  ;;  %v11492_v56 = vsel %vm13849_vm2, %v3507_v17, %v11480_v8  ;;  %vm13857_vm6 = vmmov %vm13856_vm10 }
 0x3cb   : > { %3567 = vst [vmem:[#allocation3 + $0x30] sm:$0xff] %v11492_v56  ;;  %v4887_v45 = vsel %vm13857_vm6, %v11446_v3, %v11442_v43  ;;  %vm13858_vm2 = vmmov %vm13857_vm6 }
 0x3cc   : > { %v11497_v57 = vpop.permute.xlu0 %4027  ;;  %v4904_v17 = vmul.bf16 %v4887_v45, %v11225_v9  ;;  %vm13860_vm10 = vmmov %vm13653_vm1 }
 0x3cd   : > { %4313 = vrot.lane.b32.xlu0 %v11106_v23, %s7948_s29  ;;  %4785 = vrot.lane.b32.xlu1 %v11495_v28, %s7952_s16  ;;  %v4026_v38 = vpop.permute.xlu1 %4025  ;;  %vm13861_vm6 = vmmov %vm13653_vm1 }
 0x3ce   : > { %v4051_v14 = vsel %vm1378_vm14, %v4026_v38, %v11497_v57 }
 0x3cf   : > { %5246 = vmatprep.subr.bf16.mxu0 %v4051_v14  ;;  %v4902_v14 = vmul.bf16 %v11435_v7, %v11404_v26 }
 0x3d0   : > { %v3523_v41 = vpop.permute.xlu0 %3522 }
 0x3d1   : > { %v11510_v44 = vsel %vm13852_vm4, %v13851_v1, %v3523_v41  ;;  %3951 = vrot.lane.b32.xlu0 %v11504_v16, %s7934_s20  ;;  %4329 = vrot.lane.b32.xlu1 %v13837_v6, %s7948_s29  ;;  %v4024_v61 = vpop.permute.xlu1 %4023  ;;  %vm13859_vm4 = vmmov %vm13858_vm2 }
 0x3d2   : > { %v4050_v29 = vsel %vm1378_vm14, %v4024_v61, %v4026_v38  ;;  %v4452_v38 = vmul.bf16 %v4426_v12, %v13837_v6  ;;  %v4453_v61 = vmul.bf16 %v4427_v2, %v13840_v36  ;;  %v4911_v12 = vmul.bf16 %v11435_v7, %v11495_v28 }
 0x3d3   : > { %5247 = vmatpush1.bf16.msra.mxu0 %v4050_v29  ;;  %v4912_v29 = vmul.bf16 %v4886_v13, %v11414_v20  ;;  %v4598_v20 = vsel %vm2442_vm9, %v11461_v0, %v11477_v15 }
 0x3d4   : > { %v4187_v54 = vpop.permute.xlu0 %4186  ;;  %v4615_v28 = vmul.bf16 %v4598_v20, %v11106_v23 }
 0x3d5   : > { %4331 = vrot.lane.b32.xlu0 %v13840_v36, %s7948_s29  ;;  %4589 = vrot.lane.b32.xlu1 %v13854_v30, %s7941_s24  ;;  %v11529_v22 = vpop.permute.xlu1 %3524 }
 0x3d6   : > { %v11533_v33 = vsel %vm13653_vm1, %v3523_v41, %v11529_v22 }
 0x3d7   : > { %3576 = vst [vmem:[#allocation3 + $0x78] sm:$0xff] %v11533_v33 }
 0x3d8   : > { %v4185_v21 = vpop.permute.xlu0 %4184 }
 0x3d9   : > { %4591 = vrot.lane.b32.xlu0 %v13855_v5, %s7941_s24  ;;  %4482 = vrot.lane.b32.xlu1 %v4443_v19, %s7951_s15  ;;  %v11545_v55 = vpop.permute.xlu1 %4188  ;;  %v4221_v39 = vsel %vm1732_vm15, %v4185_v21, %v4187_v54 }
 0x3da   : > { %v4222_v10 = vsel %vm1732_vm15, %v4187_v54, %v11545_v55  ;;  %v4913_v54 = vmul.bf16 %v4887_v45, %v11416_v32  ;;  %v4614_v32 = vmul.bf16 %v4597_v53, %v11102_v63 }
 0x3db   : > { %5248 = vmatprep.subr.bf16.mxu0 %v4222_v10  ;;  %v4623_v10 = vmul.bf16 %v4597_v53, %v13837_v6 }
 0x3dc   : > { %5249 = vmatpush1.bf16.msra.mxu0 %v4221_v39  ;;  %v11560_v31 = vpop.permute.xlu0 %4206 }
 0x3dd   : > { %4484 = vrot.lane.b32.xlu0 %v4444_v11, %s7951_s15  ;;  %4130 = vrot.lane.b32.xlu1 %v11549_v51, %s7935_s21  ;;  %v4205_v59 = vpop.permute.xlu1 %4204  ;;  %v4624_v11 = vmul.bf16 %v4598_v20, %v13840_v36  ;;  %s13130_s21 = smov 112  }
 0x3de   : > { %v4230_v18 = vsel %vm1732_vm15, %v4205_v59, %v11560_v31 }
 0x3df   : > { %5250 = vmatprep.subr.bf16.mxu0 %v4230_v18 }
 0x3e0   : > { %v4308_v48 = vpop.permute.xlu0 %4307 }
 0x3e1   : > { %4942 = vrot.lane.b32.xlu1 %v4904_v17, %s7953_s17  ;;  %4940 = vrot.lane.b32.xlu0 %v4903_v46, %s7953_s17  ;;  %v4203_v3 = vpop.permute.xlu1 %4202 }
 0x3e2   : > { %v4229_v49 = vsel %vm1732_vm15, %v4203_v3, %v4205_v59 }
 0x3e3   : > { %5251 = vmatpush1.bf16.msra.mxu0 %v4229_v49 }
 0x3e4   : > { %v4306_v41 = vpop.permute.xlu0 %4305 }
 0x3e5   : > { %4500 = vrot.lane.b32.xlu1 %v4452_v38, %s7951_s15  ;;  %4938 = vrot.lane.b32.xlu0 %v4902_v14, %s7953_s17  ;;  %v11577_v9 = vpop.permute.xlu1 %4309  ;;  %v4342_v34 = vsel %vm1989_vm13, %v4306_v41, %v4308_v48 }
 0x3e6   : > { %v4343_v1 = vsel %vm1989_vm13, %v4308_v48, %v11577_v9 }
 0x3e7   : > { %5252 = vmatprep.subr.bf16.mxu0 %v4343_v1 }
 0x3e8   : > { %5253 = vmatpush1.bf16.msra.mxu0 %v4342_v34  ;;  %v11584_v26 = vpop.permute.xlu0 %3949 }
 0x3e9   : > { %4958 = vrot.lane.b32.xlu1 %v4912_v29, %s7953_s17  ;;  %4502 = vrot.lane.b32.xlu0 %v4453_v61, %s7951_s15  ;;  %v3948_v42 = vpop.permute.xlu1 %3947 }
 0x3ea   : > { %v3957_v61 = vsel %vm1125_vm7, %v11324_v58, %v3948_v42 }
 0x3ec   : > { %v11597_v19 = vpop.permute.xlu0 %4327 }
 0x3ed   : > { %4956 = vrot.lane.b32.xlu1 %v4911_v12, %s7953_s17  ;;  %4960 = vrot.lane.b32.xlu0 %v4913_v54, %s7953_s17  ;;  %v4326_v2 = vpop.permute.xlu1 %4325  ;;  %v3958_v54 = vsel %vm1125_vm7, %v3948_v42, %v11584_v26 }
 0x3ee   : > { %v4351_v7 = vsel %vm1989_vm13, %v4326_v2, %v11597_v19 }
 0x3ef   : > { %5254 = vmatprep.subr.bf16.mxu0 %v4351_v7 }
 0x3f0   : > { %v11605_v25 = vpop.permute.xlu0 %3778 }
 0x3f1   : > { %4653 = vrot.lane.b32.xlu0 %v4614_v32, %s7941_s24  ;;  %4655 = vrot.lane.b32.xlu1 %v4615_v28, %s7941_s24  ;;  %v3777_v0 = vpop.permute.xlu1 %3776  ;;  %v3983_v32 = vmul.bf16 %v3957_v61, %v11510_v44  ;;  %v3984_v28 = vmul.bf16 %v3958_v54, %v11533_v33 }
 0x3f2   : > { %v3810_v21 = vsel %vm1020_vm12, %v3777_v0, %v11605_v25  ;;  %v3809_v39 = vsel %vm1020_vm12, %v11410_v50, %v3777_v0 }
 0x3f3   : > { %5346 = vmatprep.subr.bf16.mxu1 %v3810_v21 }
 0x3f4   : > { %5347 = vmatpush1.bf16.msra.mxu1 %v3809_v39  ;;  %v4877_v13 = vpop.permute.xlu0 %4876 }
 0x3f5   : > { %4671 = vrot.lane.b32.xlu0 %v4623_v10, %s7941_s24  ;;  %4673 = vrot.lane.b32.xlu1 %v4624_v11, %s7941_s24  ;;  %v4324_v45 = vpop.permute.xlu1 %4323 }
 0x3f6   : > { %v4350_v59 = vsel %vm1989_vm13, %v4324_v45, %v4326_v2  ;;  %v3975_v2 = vmul.bf16 %v3958_v54, %v11492_v56 }
 0x3f7   : > { %5255 = vmatpush1.bf16.msra.mxu0 %v4350_v59 }
 0x3f8   : > { %v4479_v18 = vpop.permute.xlu0 %4478 }
 0x3f9   : > { %4773 = vrot.lane.b32.xlu0 %v11102_v63, %s7952_s16  ;;  %4775 = vrot.lane.b32.xlu1 %v11106_v23, %s7952_s16  ;;  %v11622_v50 = vpop.permute.xlu1 %4878 }
 0x3fa   : > { %v4889_v21 = vsel %vm13859_vm4, %v4877_v13, %v11622_v50 }
 0x3fb   : > { %v4906_v45 = vmul.bf16 %v4889_v21, %v11106_v23 }
 0x3fc   : > { %v3795_v46 = vpop.permute.xlu0 %3794 }
 0x3fd   : > { %3782 = vrot.lane.b32.xlu1 %v11492_v56, %s7947_s28  ;;  %3780 = vrot.lane.b32.xlu0 %v11488_v24, %s7947_s28  ;;  %v11628_v17 = vpop.permute.xlu1 %4480  ;;  %v3817_v41 = vsel %vm1020_vm12, %v11448_v47, %v3795_v46 }
 0x3fe   : > { %v4514_v48 = vsel %vm2342_vm0, %v4479_v18, %v11628_v17 }
 0x3ff   : > { %5256 = vmatprep.subr.bf16.mxu0 %v4514_v48 }
 0x400   : > { %v4477_v3 = vpop.permute.xlu0 %4476 }
 0x401   : > { %4791 = vrot.lane.b32.xlu1 %v13837_v6, %s7952_s16  ;;  %4422 = vrot.lane.b32.xlu0 %v11504_v16, %s13674_s22  ;;  %v11636_v49 = vpop.permute.xlu1 %3796  ;;  %v4513_v38 = vsel %vm2342_vm0, %v4477_v3, %v4479_v18 }
 0x402   : > { %5257 = vmatpush1.bf16.msra.mxu0 %v4513_v38  ;;  %v3818_v14 = vsel %vm1020_vm12, %v3795_v46, %v11636_v49 }
 0x403   : > { %5348 = vmatprep.subr.bf16.mxu1 %v3818_v14 }
 0x404   : > { %5349 = vmatpush1.bf16.msra.mxu1 %v3817_v41  ;;  %v11643_v34 = vpop.permute.xlu0 %4128  ;;  %v4915_v41 = vmul.bf16 %v4889_v21, %v13840_v36 }
 0x405   : > { %4880 = vrot.lane.b32.xlu1 %v13844_v35, %s13739_s27  ;;  %4793 = vrot.lane.b32.xlu0 %v13840_v36, %s7952_s16  ;;  %v4127_v1 = vpop.permute.xlu1 %4126  ;;  %v3974_v35 = vmul.bf16 %v3957_v61, %v11488_v24 }
 0x408   : > { %v11651_v29 = vpop.permute.xlu0 %4498 }
 0x409   : > { %3798 = vrot.lane.b32.xlu1 %v11510_v44, %s7947_s28  ;;  %4882 = vrot.lane.b32.xlu0 %v13846_v37, %s13739_s27  ;;  %v4497_v47 = vpop.permute.xlu1 %4496 }
 0x40a   : > { %v4522_v12 = vsel %vm2342_vm0, %v4497_v47, %v11651_v29 }
 0x40b   : > { %5258 = vmatprep.subr.bf16.mxu0 %v4522_v12 }
 0x40c   : > { %v11662_v53 = vpop.permute.xlu0 %4013 }
 0x40d   : > { %3800 = vrot.lane.b32.xlu0 %v11533_v33, %s7947_s28  ;;  %4015 = vrot.lane.b32.xlu1 %v3974_v35, %s7949_s30  ;;  %v4012_v58 = vpop.permute.xlu1 %4011 }
 0x40e   : > { %v4045_v37 = vsel %vm1378_vm14, %v4012_v58, %v11662_v53  ;;  %v4044_v20 = vsel %vm1378_vm14, %v11467_v60, %v4012_v58  ;;  %v4888_v60 = vsel %vm13858_vm2, %v11442_v43, %v4877_v13  ;;  %v4136_v43 = vsel %vm1479_vm8, %v11400_v52, %v4127_v1  ;;  %vm13862_vm2 = vmmov %vm13653_vm1 }
 0x40f   : > { %5350 = vmatprep.subr.bf16.mxu1 %v4045_v37  ;;  %v4905_v11 = vmul.bf16 %v4888_v60, %v11102_v63  ;;  %v4137_v13 = vsel %vm1479_vm8, %v4127_v1, %v11643_v34  ;;  %v4153_v23 = vmul.bf16 %v4136_v43, %v11488_v24  ;;  %v4914_v14 = vmul.bf16 %v4888_v60, %v13837_v6 }
 0x410   : > { %5351 = vmatpush1.bf16.msra.mxu1 %v4044_v20  ;;  %v4154_v46 = vmul.bf16 %v4137_v13, %v11492_v56  ;;  %v4163_v12 = vmul.bf16 %v4137_v13, %v11533_v33 }
 0x411   : > { %4017 = vrot.lane.b32.xlu0 %v3975_v2, %s7949_s30  ;;  %4593 = vrot.lane.b32.xlu1 %v11549_v51, %s7941_s24  ;;  %v4495_v42 = vpop.permute.xlu1 %4494 }
 0x412   : > { %v4521_v7 = vsel %vm2342_vm0, %v4495_v42, %v4497_v47 }
 0x413   : > { %v4650_v0 = vpop.permute.xlu0 %4649  ;;  %5259 = vmatpush1.bf16.msra.mxu0 %v4521_v7 }
 0x415   : > { %4033 = vrot.lane.b32.xlu0 %v3983_v32, %s7949_s30  ;;  %4035 = vrot.lane.b32.xlu1 %v3984_v28, %s7949_s30  ;;  %v11684_v39 = vpop.permute.xlu1 %4651 }
 0x416   : > { %v4684_v10 = vsel %vm2442_vm9, %v4650_v0, %v11684_v39 }
 0x417   : > { %v3511_v59 = vpop.permute.xlu0 %3510  ;;  %5260 = vmatprep.subr.bf16.mxu0 %v4684_v10 }
 0x418   : > { %v11696_v18 = vsel %vm13653_vm1, %v11480_v8, %v3511_v59  ;;  %3569 = vst.msk [vmem:[#allocation3 + $0x40] sm:$0xff] %vm13860_vm10, %v3511_v59 }
 0x419   : > { %4944 = vrot.lane.b32.xlu0 %v4905_v11, %s7953_s17  ;;  %4946 = vrot.lane.b32.xlu1 %v4906_v45, %s7953_s17  ;;  %v4030_v63 = vpop.permute.xlu1 %4029 }
 0x41a   : > { %v4052_v3 = vsel %vm1378_vm14, %v11497_v57, %v4030_v63  ;;  %v4162_v57 = vmul.bf16 %v4136_v43, %v11510_v44 }
 0x41b   : > { %v11703_v48 = vpop.permute.xlu0 %4031 }
 0x41c   : > { %v4053_v52 = vsel %vm1378_vm14, %v4030_v63, %v11703_v48 }
 0x41d   : > { %4196 = vrot.lane.b32.xlu1 %v4154_v46, %s7950_s14  ;;  %4194 = vrot.lane.b32.xlu0 %v4153_v23, %s7950_s14  ;;  %v4648_v8 = vpop.permute.xlu1 %4647 }
 0x41e   : > { %5352 = vmatprep.subr.bf16.mxu1 %v4053_v52  ;;  %v4683_v38 = vsel %vm2442_vm9, %v4648_v8, %v4650_v0 }
 0x41f   : > { %5353 = vmatpush1.bf16.msra.mxu1 %v4052_v3  ;;  %v4668_v1 = vpop.permute.xlu0 %4667  ;;  %5261 = vmatpush1.bf16.msra.mxu0 %v4683_v38  ;;  %v11748_v28 = vld [vmem:[#allocation3 + $0x40] sm:$0xff] }
 0x421   : > { %4964 = vrot.lane.b32.xlu1 %v4915_v41, %s7953_s17  ;;  %4962 = vrot.lane.b32.xlu0 %v4914_v14, %s7953_s17  ;;  %v11716_v61 = vpop.permute.xlu1 %4669 }
 0x422   : > { %v4692_v47 = vsel %vm2442_vm9, %v4668_v1, %v11716_v61 }
 0x423   : > { %v3527_v35 = vpop.permute.xlu0 %3526  ;;  %5262 = vmatprep.subr.bf16.mxu0 %v4692_v47 }
 0x424   : > { %v11724_v6 = vsel %vm13861_vm6, %v11529_v22, %v3527_v35  ;;  %3578 = vst.msk [vmem:[#allocation3 + $0x88] sm:$0xff] %vm13862_vm2, %v3527_v35 }
 0x425   : > { %4214 = vrot.lane.b32.xlu1 %v4163_v12, %s7950_s14  ;;  %4212 = vrot.lane.b32.xlu0 %v4162_v57, %s7950_s14  ;;  %v4191_v36 = vpop.permute.xlu1 %4190  ;;  %v11801_v12 = vld [vmem:[%s12786_s3 + $0x1c] ss:$12 sps:$4 sm:$0xff]  }
 0x426   : > { %v4223_v37 = vsel %vm1732_vm15, %v11545_v55, %v4191_v36 }
 0x427   : > { %v11729_v54 = vpop.permute.xlu0 %4192 }
 0x428   : > { %v4224_v58 = vsel %vm1732_vm15, %v4191_v36, %v11729_v54 }
 0x429   : > { %4317 = vrot.lane.b32.xlu1 %v11492_v56, %s7948_s29  ;;  %4315 = vrot.lane.b32.xlu0 %v11488_v24, %s7948_s29  ;;  %v4666_v22 = vpop.permute.xlu1 %4665 }
 0x42a   : > { %5354 = vmatprep.subr.bf16.mxu1 %v4224_v58  ;;  %v4691_v20 = vsel %vm2442_vm9, %v4666_v22, %v4668_v1  ;;  %v11794_v1 = vld [vmem:[%s12786_s3] ss:$12 sps:$4 sm:$0xff]  }
 0x42b   : > { %5355 = vmatpush1.bf16.msra.mxu1 %v4223_v37  ;;  %v4770_v2 = vpop.permute.xlu0 %4769  ;;  %5263 = vmatpush1.bf16.msra.mxu0 %v4691_v20  ;;  %v11781_v8 = vld [vmem:[#allocation3 + $0x88] sm:$0xff] }
 0x42d   : > { %4335 = vrot.lane.b32.xlu1 %v11533_v33, %s7948_s29  ;;  %4333 = vrot.lane.b32.xlu0 %v11510_v44, %s7948_s29  ;;  %v11744_v42 = vpop.permute.xlu1 %4771 }
 0x42e   : > { %v4805_v7 = vsel %vm2952_vm3, %v4770_v2, %v11744_v42 }
 0x42f   : > { %v4209_v32 = vpop.permute.xlu0 %4208  ;;  %5264 = vmatprep.subr.bf16.mxu0 %v4805_v7  ;;  %v11823_v7 = vld [vmem:[%s12786_s3 + $0x18] ss:$12 sps:$4 sm:$0xff]  }
 0x430   : > { %v4231_v21 = vsel %vm1732_vm15, %v11560_v31, %v4209_v32 }
 0x431   : > { %3786 = vrot.lane.b32.xlu1 %v11748_v28, %s7947_s28  ;;  %3784 = vrot.lane.b32.xlu0 %v11696_v18, %s7947_s28  ;;  %v11754_v55 = vpop.permute.xlu1 %4210 }
 0x432   : > { %v4232_v0 = vsel %vm1732_vm15, %v4209_v32, %v11754_v55 }
 0x433   : > { %v4768_v60 = vpop.permute.xlu0 %4767  ;;  %5356 = vmatprep.subr.bf16.mxu1 %v4232_v0 }
 0x434   : > { %5357 = vmatpush1.bf16.msra.mxu1 %v4231_v21  ;;  %v4804_v10 = vsel %vm2952_vm3, %v4768_v60, %v4770_v2 }
 0x435   : > { %5265 = vmatpush1.bf16.msra.mxu0 %v4804_v10  ;;  %v4419_v11 = vpop.permute.xlu1 %4418 }
 0x436   : > { %v4428_v45 = vsel %vm2089_vm11, %v11426_v4, %v4419_v11 }
 0x437   : > { %v4445_v59 = vmul.bf16 %v4428_v45, %v11488_v24  ;;  %v11764_v43 = vpop.permute.xlu0 %4420  ;;  %v4454_v38 = vmul.bf16 %v4428_v45, %v11510_v44 }
 0x438   : > { %v4429_v13 = vsel %vm2089_vm11, %v4419_v11, %v11764_v43 }
 0x439   : > { %v4446_v63 = vmul.bf16 %v4429_v13, %v11492_v56  ;;  %4486 = vrot.lane.b32.xlu0 %v4445_v59, %s7951_s15  ;;  %v4788_v31 = vpop.permute.xlu1 %4787  ;;  %v4455_v47 = vmul.bf16 %v4429_v13, %v11533_v33 }
 0x43b   : > { %v11770_v23 = vpop.permute.xlu0 %4789  ;;  %4488 = vrot.lane.b32.xlu1 %v4446_v63, %s7951_s15 }
 0x43c   : > { %v4813_v46 = vsel %vm2952_vm3, %v4788_v31, %v11770_v23 }
 0x43d   : > { %4884 = vrot.lane.b32.xlu0 %v11504_v16, %s13739_s27  ;;  %5266 = vmatprep.subr.bf16.mxu0 %v4813_v46  ;;  %v4312_v4 = vpop.permute.xlu1 %4311  ;;  %s7956_s27 = smov 18  }
 0x43e   : > { %v4344_v16 = vsel %vm1989_vm13, %v11577_v9, %v4312_v4 }
 0x43f   : > { %v11777_v52 = vpop.permute.xlu0 %4313  ;;  %3802 = vrot.lane.b32.xlu1 %v11724_v6, %s7947_s28 }
 0x440   : > { %v4345_v3 = vsel %vm1989_vm13, %v4312_v4, %v11777_v52 }
 0x441   : > { %3804 = vrot.lane.b32.xlu0 %v11781_v8, %s7947_s28  ;;  %5358 = vmatprep.subr.bf16.mxu1 %v4345_v3  ;;  %v4786_v14 = vpop.permute.xlu1 %4785 }
 0x442   : > { %5359 = vmatpush1.bf16.msra.mxu1 %v4344_v16  ;;  %v4812_v41 = vsel %vm2952_vm3, %v4786_v14, %v4788_v31 }
 0x443   : > { %v3952_v57 = vpop.permute.xlu0 %3951  ;;  %4504 = vrot.lane.b32.xlu1 %v4454_v38, %s7951_s15  ;;  %5267 = vmatpush1.bf16.msra.mxu0 %v4812_v41 }
 0x444   : > { %v3959_v9 = vsel %vm1125_vm7, %v11584_v26, %v3952_v57  ;;  %v3977_v58 = vmul.bf16 %v3952_v57, %v11748_v28  ;;  %v3986_v45 = vmul.bf16 %v3952_v57, %v11781_v8  ;;  %vm13864_vm7 = vmmov %vm13859_vm4 }
 0x445   : > { %v3976_v35 = vmul.bf16 %v3959_v9, %v11696_v18  ;;  %4506 = vrot.lane.b32.xlu0 %v4455_v47, %s7951_s15  ;;  %v4330_v36 = vpop.permute.xlu1 %4329 }
 0x446   : > { %5269 = vmatmul.mubr.bf16.vlgmr.msra.gmra.mrb[0].mxu0 %v11794_v1  ;;  %v4352_v20 = vsel %vm1989_vm13, %v11597_v19, %v4330_v36 }
 0x447   : > { %v11809_v22 = vpop.permute.xlu0 %4331  ;;  %4019 = vrot.lane.b32.xlu1 %v3976_v35, %s7949_s30  ;;  %5278 = vmatprep.mubr.bf16.mxu0 %v11801_v12 }
 0x448   : > { %v4353_v37 = vsel %vm1989_vm13, %v4330_v36, %v11809_v22 }
 0x449   : > { %4021 = vrot.lane.b32.xlu0 %v3977_v58, %s7949_s30  ;;  %5360 = vmatprep.subr.bf16.mxu1 %v4353_v37  ;;  %v4590_v26 = vpop.permute.xlu1 %4589 }
 0x44a   : > { %v4599_v2 = vsel %vm2442_vm9, %v11477_v15, %v4590_v26  ;;  %5361 = vmatpush1.bf16.msra.mxu1 %v4352_v20  ;;  %v3985_v15 = vmul.bf16 %v3959_v9, %v11724_v6 }
 0x44b   : > { %v4616_v32 = vmul.bf16 %v4599_v2, %v11488_v24  ;;  %v11826_v0 = vpop.permute.xlu0 %4591  ;;  %v4625_v63 = vmul.bf16 %v4599_v2, %v11510_v44 }
 0x44c   : > { %v4600_v60 = vsel %vm2442_vm9, %v4590_v26, %v11826_v0 }
 0x44d   : > { %v4617_v21 = vmul.bf16 %v4600_v60, %v11492_v56  ;;  %4657 = vrot.lane.b32.xlu1 %v4616_v32, %s7941_s24  ;;  %v4483_v19 = vpop.permute.xlu1 %4482  ;;  %v4626_v4 = vmul.bf16 %v4600_v60, %v11533_v33  ;;  %v11883_v32 = vld [vmem:[%s12786_s3 + $0x8] ss:$12 sps:$4 sm:$0xff]  }
 0x44e   : > { %5279 = vmatmul.mubr.bf16.gmra.mrb[4].mxu0 %v11823_v7  ;;  %v4515_v13 = vsel %vm2342_vm0, %v11628_v17, %v4483_v19 }
 0x44f   : > { %v11834_v10 = vpop.permute.xlu0 %4484  ;;  %4659 = vrot.lane.b32.xlu0 %v4617_v21, %s7941_s24  ;;  %5321 = vmatprep.mubr.bf16.mxu0 %v13826_v27  ;;  %v3584_v21 = vld [vmem:[#allocation3 + $0x20] sm:$0xff] }
 0x450   : > { %v4516_v11 = vsel %vm2342_vm0, %v4483_v19, %v11834_v10 }
 0x451   : > { %4037 = vrot.lane.b32.xlu1 %v3985_v15, %s7949_s30  ;;  %5362 = vmatprep.subr.bf16.mxu1 %v4516_v11  ;;  %v4131_v59 = vpop.permute.xlu1 %4130  ;;  %v13863_v11 = vld [vmem:[#allocation62_spill] sm:$0xff] }
 0x452   : > { %5363 = vmatpush1.bf16.msra.mxu1 %v4515_v13  ;;  %v4138_v46 = vsel %vm1479_vm8, %v11643_v34, %v4131_v59  ;;  %v4156_v41 = vmul.bf16 %v4131_v59, %v11748_v28  ;;  %v4165_v26 = vmul.bf16 %v4131_v59, %v11781_v8 }
 0x453   : > { %v4941_v31 = vpop.permute.xlu0 %4940  ;;  %4039 = vrot.lane.b32.xlu0 %v3986_v45, %s7949_s30  ;;  %v4155_v17 = vmul.bf16 %v4138_v46, %v11696_v18  ;;  %v4164_v36 = vmul.bf16 %v4138_v46, %v11724_v6  ;;  %v3706_v45 = vmul.bf16 %v13863_v11, %v3584_v21 }
 0x455   : > { %4675 = vrot.lane.b32.xlu1 %v4625_v63, %s7941_s24  ;;  %v11850_v3 = vpop.permute.xlu1 %4942  ;;  %v3715_v63 = vmul.bf16 %v13854_v30, %v11510_v44 }
 0x456   : > { %v4976_v38 = vsel %vm3305_vm5, %v4941_v31, %v11850_v3 }
 0x457   : > { %v4939_v14 = vpop.permute.xlu0 %4938  ;;  %4677 = vrot.lane.b32.xlu0 %v4626_v4, %s7941_s24  ;;  %5289 = vmatprep.subr.bf16.mxu0 %v4976_v38 }
 0x458   : > { %v4975_v16 = vsel %vm3305_vm5, %v4939_v14, %v4941_v31  ;;  %v3592_v31 = vld [vmem:[#allocation3 + $0x68] sm:$0xff] }
 0x459   : > { %4198 = vrot.lane.b32.xlu1 %v4155_v17, %s7950_s14  ;;  %5290 = vmatpush1.bf16.msra.mxu0 %v4975_v16  ;;  %v4501_v34 = vpop.permute.xlu1 %4500  ;;  %v3714_v38 = vmul.bf16 %v13863_v11, %v3592_v31 }
 0x45a   : > { %v4523_v35 = vsel %vm2342_vm0, %v11651_v29, %v4501_v34  ;;  %v3707_v29 = vmul.bf16 %v13854_v30, %v11488_v24  ;;  %v11912_v30 = vld [vmem:[%s12786_s3 + $0x20] ss:$12 sps:$4 sm:$0xff]  }
 0x45b   : > { %v11859_v47 = vpop.permute.xlu0 %4502  ;;  %4200 = vrot.lane.b32.xlu0 %v4156_v41, %s7950_s14 }
 0x45c   : > { %v4524_v57 = vsel %vm2342_vm0, %v4501_v34, %v11859_v47 }
 0x45d   : > { %4777 = vrot.lane.b32.xlu1 %v11488_v24, %s7952_s16  ;;  %5364 = vmatprep.subr.bf16.mxu1 %v4524_v57  ;;  %v4959_v9 = vpop.permute.xlu1 %4958 }
 0x45e   : > { %5365 = vmatpush1.bf16.msra.mxu1 %v4523_v35 }
 0x45f   : > { %v11869_v58 = vpop.permute.xlu0 %4960  ;;  %4779 = vrot.lane.b32.xlu0 %v11492_v56, %s7952_s16 }
 0x460   : > { %v4984_v37 = vsel %vm3305_vm5, %v4959_v9, %v11869_v58 }
 0x461   : > { %4216 = vrot.lane.b32.xlu1 %v4164_v36, %s7950_s14  ;;  %5291 = vmatprep.subr.bf16.mxu0 %v4984_v37  ;;  %v4957_v20 = vpop.permute.xlu1 %4956 }
 0x462   : > { %v4983_v2 = vsel %vm3305_vm5, %v4957_v20, %v4959_v9 }
 0x463   : > { %v4654_v60 = vpop.permute.xlu0 %4653  ;;  %4218 = vrot.lane.b32.xlu0 %v4165_v26, %s7950_s14  ;;  %5292 = vmatpush1.bf16.msra.mxu0 %v4983_v2  ;;  %s7964_s14 = smov 120  }
 0x464   : > { %5448 = vmatprep.subr.bf16.mxu0 %v3707_v29  ;;  %v4685_v13 = vsel %vm2442_vm9, %v11684_v39, %v4654_v60 }
 0x465   : > { %4795 = vrot.lane.b32.xlu1 %v11510_v44, %s7952_s16  ;;  %v11888_v19 = vpop.permute.xlu1 %4655 }
 0x466   : > { %7343 = vmatmul.mubr.msk.bf16.vlgmr.msra.gmra.mrb[0].mxu0 %vm1479_vm8, %v11883_v32  ;;  %v4686_v15 = vsel %vm2442_vm9, %v4654_v60, %v11888_v19 }
 0x467   : > { %v4672_v59 = vpop.permute.xlu0 %4671  ;;  %4797 = vrot.lane.b32.xlu0 %v11533_v33, %s7952_s16  ;;  %5366 = vmatprep.subr.bf16.mxu1 %v4686_v15 }
 0x468   : > { %5449 = vmatpush1.bf16.msra.mxu0 %v3706_v45  ;;  %5367 = vmatpush1.bf16.msra.mxu1 %v4685_v13  ;;  %v4693_v17 = vsel %vm2442_vm9, %v11716_v61, %v4672_v59 }
 0x469   : > { %5450 = vmatprep.subr.bf16.mxu0 %v3715_v63  ;;  %4319 = vrot.lane.b32.xlu1 %v11696_v18, %s7948_s29  ;;  %v11903_v46 = vpop.permute.xlu1 %4673 }
 0x46a   : > { %v4694_v4 = vsel %vm2442_vm9, %v4672_v59, %v11903_v46  ;;  %5331 = vmatprep.mubr.bf16.mxu0 %v13826_v27 }
 0x46b   : > { %v4774_v39 = vpop.permute.xlu0 %4773  ;;  %4321 = vrot.lane.b32.xlu0 %v11748_v28, %s7948_s29  ;;  %5368 = vmatprep.subr.bf16.mxu1 %v4694_v4 }
 0x46c   : > { %5451 = vmatpush1.bf16.msra.mxu0 %v3714_v38  ;;  %5369 = vmatpush1.bf16.msra.mxu1 %v4693_v17  ;;  %v4806_v61 = vsel %vm2952_vm3, %v11744_v42, %v4774_v39 }
 0x46d   : > { %4337 = vrot.lane.b32.xlu1 %v11724_v6, %s7948_s29  ;;  %v11920_v14 = vpop.permute.xlu1 %4775 }
 0x46e   : > { %7344 = vmatmul.mubr.msk.bf16.gmra.mrb[4].mxu0 %vm1479_vm8, %v11912_v30  ;;  %v4807_v16 = vsel %vm2952_vm3, %v4774_v39, %v11920_v14 }
 0x46f   : > { %v3781_v41 = vpop.permute.xlu0 %3780  ;;  %4339 = vrot.lane.b32.xlu0 %v11781_v8, %s7948_s29  ;;  %5370 = vmatprep.subr.bf16.mxu1 %v4807_v16 }
 0x470   : > { %5371 = vmatpush1.bf16.msra.mxu1 %v4806_v61  ;;  %5480 = vmatprep.mubr.bf16.mxu0 %v11520_v40  ;;  %v3811_v35 = vsel %vm1020_vm12, %v11605_v25, %v3781_v41 }
 0x471   : > { %v11931_v34 = vpop.permute.xlu1 %3782 }
 0x472   : > { %v3812_v57 = vsel %vm1020_vm12, %v3781_v41, %v11931_v34 }
 0x473   : > { %v4423_v9 = vpop.permute.xlu0 %4422  ;;  %5452 = vmatprep.subr.bf16.mxu0 %v3812_v57 }
 0x474   : > { %v4430_v36 = vsel %vm2089_vm11, %v11764_v43, %v4423_v9  ;;  %v4448_v37 = vmul.bf16 %v4423_v9, %v11748_v28  ;;  %5453 = vmatpush1.bf16.msra.mxu0 %v3811_v35  ;;  %vm13865_vm11 = vmmov %vm13859_vm4  ;;  %v4457_v59 = vmul.bf16 %v4423_v9, %v11781_v8 }
 0x475   : > { %v4447_v42 = vmul.bf16 %v4430_v36, %v11696_v18  ;;  %v4792_v26 = vpop.permute.xlu1 %4791 }
 0x476   : > { %4492 = vrot.lane.b32.xlu0 %v4448_v37, %s7951_s15  ;;  %v4814_v43 = vsel %vm2952_vm3, %v11770_v23, %v4792_v26  ;;  %v4456_v23 = vmul.bf16 %v4430_v36, %v11724_v6 }
 0x477   : > { %v11942_v20 = vpop.permute.xlu0 %4793  ;;  %4490 = vrot.lane.b32.xlu1 %v4447_v42, %s7951_s15 }
 0x478   : > { %v4815_v2 = vsel %vm2952_vm3, %v4792_v26, %v11942_v20 }
 0x479   : > { %5372 = vmatprep.subr.bf16.mxu1 %v4815_v2  ;;  %v4881_v25 = vpop.permute.xlu1 %4880 }
 0x47a   : > { %v4890_v29 = vsel %vm13864_vm7, %v11622_v50, %v4881_v25  ;;  %5373 = vmatpush1.bf16.msra.mxu1 %v4814_v43 }
 0x47b   : > { %v4907_v60 = vmul.bf16 %v4890_v29, %v11488_v24  ;;  %v11952_v21 = vpop.permute.xlu0 %4882  ;;  %v4916_v63 = vmul.bf16 %v4890_v29, %v11510_v44 }
 0x47c   : > { %v4891_v15 = vsel %vm13865_vm11, %v4881_v25, %v11952_v21 }
 0x47d   : > { %v4908_v11 = vmul.bf16 %v4891_v15, %v11492_v56  ;;  %4948 = vrot.lane.b32.xlu1 %v4907_v60, %s7953_s17  ;;  %v3799_v45 = vpop.permute.xlu1 %3798  ;;  %5375 = vmatmul.mubr.bf16.vlgmr.msra.gmra.mrb[0].mxu1 %v11794_v1  ;;  %v4917_v38 = vmul.bf16 %v4891_v15, %v11533_v33  ;;  %v3586_v15 = vld [vmem:[#allocation3 + $0x30] sm:$0xff] }
 0x47e   : > { %5384 = vmatprep.mubr.bf16.mxu1 %v11801_v12  ;;  %v3819_v13 = vsel %vm1020_vm12, %v11636_v49, %v3799_v45 }
 0x47f   : > { %v11961_v50 = vpop.permute.xlu0 %3800  ;;  %4950 = vrot.lane.b32.xlu0 %v4908_v11, %s7953_s17 }
 0x480   : > { %v3820_v24 = vsel %vm1020_vm12, %v3799_v45, %v11961_v50 }
 0x481   : > { %4508 = vrot.lane.b32.xlu1 %v4456_v23, %s7951_s15  ;;  %5454 = vmatprep.subr.bf16.mxu0 %v3820_v24  ;;  %v4016_v56 = vpop.permute.xlu1 %4015  ;;  %v3708_v23 = vmul.bf16 %v13855_v5, %v3586_v15 }
 0x482   : > { %5455 = vmatpush1.bf16.msra.mxu0 %v3819_v13  ;;  %v4046_v17 = vsel %vm1378_vm14, %v11662_v53, %v4016_v56 }
 0x483   : > { %v11971_v31 = vpop.permute.xlu0 %4017  ;;  %4510 = vrot.lane.b32.xlu0 %v4457_v59, %s7951_s15  ;;  %v3717_v59 = vmul.bf16 %v11549_v51, %v11724_v6  ;;  %s7954_s15 = smov 9  }
 0x484   : > { %v4047_v4 = vsel %vm1378_vm14, %v4016_v56, %v11971_v31  ;;  %v3594_v56 = vld [vmem:[#allocation3 + $0x78] sm:$0xff] }
 0x485   : > { %4966 = vrot.lane.b32.xlu1 %v4916_v63, %s7953_s17  ;;  %5456 = vmatprep.subr.bf16.mxu0 %v4047_v4  ;;  %v4594_v39 = vpop.permute.xlu1 %4593  ;;  %v3716_v4 = vmul.bf16 %v13855_v5, %v3594_v56 }
 0x486   : > { %v4601_v49 = vsel %vm2442_vm9, %v11826_v0, %v4594_v39  ;;  %5457 = vmatpush1.bf16.msra.mxu0 %v4046_v17  ;;  %5385 = vmatmul.mubr.bf16.gmra.mrb[4].mxu1 %v11823_v7  ;;  %v4619_v33 = vmul.bf16 %v4594_v39, %v11748_v28  ;;  %v4628_v9 = vmul.bf16 %v4594_v39, %v11781_v8 }
 0x487   : > { %v4618_v44 = vmul.bf16 %v4601_v49, %v11696_v18  ;;  %v4034_v16 = vpop.permute.xlu0 %4033  ;;  %4968 = vrot.lane.b32.xlu0 %v4917_v38, %s7953_s17  ;;  %5427 = vmatprep.mubr.bf16.mxu1 %v13826_v27  ;;  %v4627_v0 = vmul.bf16 %v4601_v49, %v11724_v6 }
 0x488   : > { %v4054_v57 = vsel %vm1378_vm14, %v11703_v48, %v4034_v16 }
 0x489   : > { %4661 = vrot.lane.b32.xlu1 %v4618_v44, %s7941_s24  ;;  %v11988_v41 = vpop.permute.xlu1 %4035 }
 0x48a   : > { %v4055_v53 = vsel %vm1378_vm14, %v4034_v16, %v11988_v41 }
 0x48b   : > { %v4945_v61 = vpop.permute.xlu0 %4944  ;;  %4663 = vrot.lane.b32.xlu0 %v4619_v33, %s7941_s24  ;;  %5458 = vmatprep.subr.bf16.mxu0 %v4055_v53 }
 0x48c   : > { %5459 = vmatpush1.bf16.msra.mxu0 %v4054_v57  ;;  %v4977_v42 = vsel %vm3305_vm5, %v11850_v3, %v4945_v61 }
 0x48d   : > { %4679 = vrot.lane.b32.xlu1 %v4627_v0, %s7941_s24  ;;  %v11998_v35 = vpop.permute.xlu1 %4946 }
 0x48e   : > { %v4978_v36 = vsel %vm3305_vm5, %v4945_v61, %v11998_v35 }
 0x48f   : > { %v4195_v37 = vpop.permute.xlu0 %4194  ;;  %4681 = vrot.lane.b32.xlu0 %v4628_v9, %s7941_s24  ;;  %5395 = vmatprep.subr.bf16.mxu1 %v4978_v36 }
 0x490   : > { %5396 = vmatpush1.bf16.msra.mxu1 %v4977_v42  ;;  %v4225_v25 = vsel %vm1732_vm15, %v11729_v54, %v4195_v37  ;;  %v3709_v54 = vmul.bf16 %v11549_v51, %v11696_v18 }
 0x491   : > { %4781 = vrot.lane.b32.xlu1 %v11696_v18, %s7952_s16  ;;  %v12007_v48 = vpop.permute.xlu1 %4196 }
 0x492   : > { %v4226_v26 = vsel %vm1732_vm15, %v4195_v37, %v12007_v48 }
 0x493   : > { %v4963_v2 = vpop.permute.xlu0 %4962  ;;  %4783 = vrot.lane.b32.xlu0 %v11748_v28, %s7952_s16  ;;  %5460 = vmatprep.subr.bf16.mxu0 %v4226_v26 }
 0x494   : > { %5461 = vmatpush1.bf16.msra.mxu0 %v4225_v25  ;;  %v4985_v60 = vsel %vm3305_vm5, %v11869_v58, %v4963_v2  ;;  %v5178_v25 = vld [vmem:[%s12787_s4 + $0x18] sm:$0xff] }
 0x495   : > { %4799 = vrot.lane.b32.xlu1 %v11724_v6, %s7952_s16  ;;  %v12017_v3 = vpop.permute.xlu1 %4964 }
 0x496   : > { %v4986_v43 = vsel %vm3305_vm5, %v4963_v2, %v12017_v3 }
 0x497   : > { %v4213_v29 = vpop.permute.xlu0 %4212  ;;  %4801 = vrot.lane.b32.xlu0 %v11781_v8, %s7952_s16  ;;  %5397 = vmatprep.subr.bf16.mxu1 %v4986_v43  ;;  %s7955_s16 = smov 10  }
 0x498   : > { %5398 = vmatpush1.bf16.msra.mxu1 %v4985_v60  ;;  %v4233_v58 = vsel %vm1732_vm15, %v11754_v55, %v4213_v29 }
 0x499   : > { %5554 = vmatprep.subr.bf16.mxu1 %v3709_v54  ;;  %v12027_v11 = vpop.permute.xlu1 %4214 }
 0x49a   : > { %v4234_v45 = vsel %vm1732_vm15, %v4213_v29, %v12027_v11  ;;  %v5177_v29 = vld [vmem:[%s12787_s4 + $0x10] sm:$0xff] }
 0x49b   : > { %v4316_v24 = vpop.permute.xlu0 %4315  ;;  %7345 = vmatmul.mubr.msk.bf16.vlgmr.msra.gmra.mrb[0].mxu1 %vm1479_vm8, %v11883_v32  ;;  %5462 = vmatprep.subr.bf16.mxu0 %v4234_v45 }
 0x49c   : > { %5463 = vmatpush1.bf16.msra.mxu0 %v4233_v58  ;;  %5555 = vmatpush1.bf16.msra.mxu1 %v3708_v23  ;;  %v4346_v55 = vsel %vm1989_vm13, %v11777_v52, %v4316_v24 }
 0x49d   : > { %5556 = vmatprep.subr.bf16.mxu1 %v3717_v59  ;;  %v12038_v13 = vpop.permute.xlu1 %4317  ;;  %5437 = vmatprep.mubr.bf16.mxu1 %v13826_v27 }
 0x49e   : > { %v4347_v63 = vsel %vm1989_vm13, %v4316_v24, %v12038_v13 }
 0x49f   : > { %v4334_v38 = vpop.permute.xlu0 %4333  ;;  %5464 = vmatprep.subr.bf16.mxu0 %v4347_v63 }
 0x4a0   : > { %5465 = vmatpush1.bf16.msra.mxu0 %v4346_v55  ;;  %5557 = vmatpush1.bf16.msra.mxu1 %v3716_v4  ;;  %v4354_v17 = vsel %vm1989_vm13, %v11809_v22, %v4334_v38 }
 0x4a1   : > { %v12046_v51 = vpop.permute.xlu1 %4335 }
 0x4a2   : > { %v4355_v39 = vsel %vm1989_vm13, %v4334_v38, %v12046_v51 }
 0x4a3   : > { %7346 = vmatmul.mubr.msk.bf16.gmra.mrb[4].mxu1 %vm1479_vm8, %v11912_v30  ;;  %5466 = vmatprep.subr.bf16.mxu0 %v4355_v39  ;;  %v3785_v5 = vpop.permute.xlu0 %3784 }
 0x4a4   : > { %5467 = vmatpush1.bf16.msra.mxu0 %v4354_v17  ;;  %5586 = vmatprep.mubr.bf16.mxu1 %v11520_v40  ;;  %v3813_v44 = vsel %vm1020_vm12, %v11931_v34, %v3785_v5 }
 0x4a5   : > { %v3787_v49 = vpop.permute.xlu1 %3786 }
 0x4a6   : > { %v3814_v52 = vsel %vm1020_vm12, %v3785_v5, %v3787_v49 }
 0x4a7   : > { %5558 = vmatprep.subr.bf16.mxu1 %v3814_v52 }
 0x4a8   : > { %5559 = vmatpush1.bf16.msra.mxu1 %v3813_v44 }
 0x4ab   : > { %v4487_v16 = vpop.permute.xlu0 %4486 }
 0x4ac   : > { %v4517_v22 = vsel %vm2342_vm0, %v11834_v10, %v4487_v16 }
 0x4ad   : > { %v12058_v33 = vpop.permute.xlu1 %4488 }
 0x4ae   : > { %v4518_v53 = vsel %vm2342_vm0, %v4487_v16, %v12058_v33 }
 0x4af   : > { %v4885_v0 = vpop.permute.xlu0 %4884  ;;  %5468 = vmatprep.subr.bf16.mxu0 %v4518_v53 }
 0x4b0   : > { %v4892_v40 = vsel %vm13859_vm4, %v11952_v21, %v4885_v0  ;;  %v4910_v61 = vmul.bf16 %v4885_v0, %v11748_v28  ;;  %5469 = vmatpush1.bf16.msra.mxu0 %v4517_v22  ;;  %v4919_v36 = vmul.bf16 %v4885_v0, %v11781_v8  ;;  %v5176_v8 = vld [vmem:[%s12787_s4 + $0x8] sm:$0xff] }
 0x4b1   : > { %v4909_v34 = vmul.bf16 %v4892_v40, %v11696_v18  ;;  %v3803_v57 = vpop.permute.xlu1 %3802  ;;  %v4918_v10 = vmul.bf16 %v4892_v40, %v11724_v6  ;;  %v5175_v6 = vld [vmem:[%s12787_s4] sm:$0xff] }
 0x4b2   : > { %4954 = vrot.lane.b32.xlu0 %v4910_v61, %s7953_s17  ;;  %v3821_v28 = vsel %vm1020_vm12, %v11961_v50, %v3803_v57 }
 0x4b3   : > { %v3805_v9 = vpop.permute.xlu0 %3804  ;;  %4952 = vrot.lane.b32.xlu1 %v4909_v34, %s7953_s17 }
 0x4b4   : > { %v3822_v37 = vsel %vm1020_vm12, %v3803_v57, %v3805_v9  ;;  %vm6677_vm12 = vcmask 72704  }
 0x4b5   : > { %5560 = vmatprep.subr.bf16.mxu1 %v3822_v37  ;;  %v4505_v42 = vpop.permute.xlu1 %4504  ;;  %6678 = vst.msk [vmem:[#allocation6] sm:$0xff] %vm6677_vm12, %v13826_v27  ;;  %6679 = vst.msk [vmem:[#allocation6 + $0x8] sm:$0xff] %vm6677_vm12, %v13826_v27 }
 0x4b6   : > { %4972 = vrot.lane.b32.xlu0 %v4919_v36, %s7953_s17  ;;  %5561 = vmatpush1.bf16.msra.mxu1 %v3821_v28  ;;  %v4525_v50 = vsel %vm2342_vm0, %v11859_v47, %v4505_v42  ;;  %6974 = vst.msk [vmem:[#allocation8] sm:$0xff] %vm6677_vm12, %v13826_v27 }
 0x4b7   : > { %v12076_v18 = vpop.permute.xlu0 %4506  ;;  %4970 = vrot.lane.b32.xlu1 %v4918_v10, %s7953_s17  ;;  %s7958_s17 = smov 8  }
 0x4b8   : > { %v4526_v21 = vsel %vm2342_vm0, %v4505_v42, %v12076_v18 }
 0x4b9   : > { %5470 = vmatprep.subr.bf16.mxu0 %v4526_v21  ;;  %v4020_v26 = vpop.permute.xlu1 %4019 }
 0x4ba   : > { %5186 = vperm.xlu0 %7827, %v5176_v8   ;;  %5471 = vmatpush1.bf16.msra.mxu0 %v4525_v50  ;;  %v4048_v60 = vsel %vm1378_vm14, %v11971_v31, %v4020_v26 }
 0x4bb   : > { %v4022_v2 = vpop.permute.xlu0 %4021  ;;  %5181 = vperm.xlu1 %7833, %v5175_v6  }
 0x4bc   : > { %v4049_v43 = vsel %vm1378_vm14, %v4020_v26, %v4022_v2 }
 0x4bd   : > { %5562 = vmatprep.subr.bf16.mxu1 %v4049_v43 }
 0x4be   : > { %5196 = vperm.xlu0 %7827, %v5178_v25   ;;  %5563 = vmatpush1.bf16.msra.mxu1 %v4048_v60 }
 0x4bf   : > { %5191 = vperm.xlu1 %7833, %v5177_v29   ;;  %v4658_v47 = vpop.permute.xlu1 %4657 }
 0x4c0   : > { %v4687_v23 = vsel %vm2442_vm9, %v11888_v19, %v4658_v47 }
 0x4c1   : > { %v12098_v54 = vpop.permute.xlu0 %4659 }
 0x4c2   : > { %v4688_v15 = vsel %vm2442_vm9, %v4658_v47, %v12098_v54 }
 0x4c3   : > { %5472 = vmatprep.subr.bf16.mxu0 %v4688_v15  ;;  %v4038_v45 = vpop.permute.xlu1 %4037 }
 0x4c4   : > { %5473 = vmatpush1.bf16.msra.mxu0 %v4687_v23  ;;  %v4056_v59 = vsel %vm1378_vm14, %v11988_v41, %v4038_v45 }
 0x4c5   : > { %v4040_v24 = vpop.permute.xlu0 %4039 }
 0x4c6   : > { %v4057_v58 = vsel %vm1378_vm14, %v4038_v45, %v4040_v24 }
 0x4c7   : > { %5564 = vmatprep.subr.bf16.mxu1 %v4057_v58  ;;  %v4676_v31 = vpop.permute.xlu1 %4675 }
 0x4c8   : > { %5565 = vmatpush1.bf16.msra.mxu1 %v4056_v59  ;;  %v4695_v19 = vsel %vm2442_vm9, %v11903_v46, %v4676_v31 }
 0x4c9   : > { %v12107_v56 = vpop.permute.xlu0 %4677 }
 0x4ca   : > { %v4696_v63 = vsel %vm2442_vm9, %v4676_v31, %v12107_v56 }
 0x4cb   : > { %5474 = vmatprep.subr.bf16.mxu0 %v4696_v63  ;;  %v4199_v4 = vpop.permute.xlu1 %4198 }
 0x4cc   : > { %5475 = vmatpush1.bf16.msra.mxu0 %v4695_v19  ;;  %v4227_v41 = vsel %vm1732_vm15, %v12007_v48, %v4199_v4 }
 0x4cd   : > { %v4201_v38 = vpop.permute.xlu0 %4200 }
 0x4ce   : > { %v4228_v55 = vsel %vm1732_vm15, %v4199_v4, %v4201_v38 }
 0x4cf   : > { %5566 = vmatprep.subr.bf16.mxu1 %v4228_v55  ;;  %v4778_v39 = vpop.permute.xlu1 %4777 }
 0x4d0   : > { %5567 = vmatpush1.bf16.msra.mxu1 %v4227_v41  ;;  %v4808_v46 = vsel %vm2952_vm3, %v11920_v14, %v4778_v39 }
 0x4d1   : > { %v12116_v17 = vpop.permute.xlu0 %4779 }
 0x4d2   : > { %v4809_v5 = vsel %vm2952_vm3, %v4778_v39, %v12116_v17 }
 0x4d3   : > { %5476 = vmatprep.subr.bf16.mxu0 %v4809_v5  ;;  %v4217_v49 = vpop.permute.xlu1 %4216 }
 0x4d4   : > { %5477 = vmatpush1.bf16.msra.mxu0 %v4808_v46  ;;  %v4235_v48 = vsel %vm1732_vm15, %v12027_v11, %v4217_v49 }
 0x4d5   : > { %v4219_v52 = vpop.permute.xlu0 %4218 }
 0x4d6   : > { %v4236_v44 = vsel %vm1732_vm15, %v4217_v49, %v4219_v52  ;;  %vm7966_vm15 = vmmov 0  }
 0x4d7   : > { %5568 = vmatprep.subr.bf16.mxu1 %v4236_v44  ;;  %v4796_v16 = vpop.permute.xlu1 %4795 }
 0x4d8   : > { %5569 = vmatpush1.bf16.msra.mxu1 %v4235_v48  ;;  %v4816_v14 = vsel %vm2952_vm3, %v11942_v20, %v4796_v16 }
 0x4d9   : > { %v12125_v53 = vpop.permute.xlu0 %4797 }
 0x4da   : > { %v4817_v0 = vsel %vm2952_vm3, %v4796_v16, %v12125_v53 }
 0x4db   : > { %5478 = vmatprep.subr.bf16.mxu0 %v4817_v0  ;;  %v4320_v22 = vpop.permute.xlu1 %4319 }
 0x4dc   : > { %5479 = vmatpush1.bf16.msra.mxu0 %v4816_v14  ;;  %v4348_v34 = vsel %vm1989_vm13, %v12038_v13, %v4320_v22 }
 0x4dd   : > { %v4322_v40 = vpop.permute.xlu0 %4321 }
 0x4de   : > { %v4349_v61 = vsel %vm1989_vm13, %v4320_v22, %v4322_v40 }
 0x4df   : > { %5570 = vmatprep.subr.bf16.mxu1 %v4349_v61  ;;  %5481 = vmatmul.mubr.bf16.vlgmr.msra.gmra.mrb[8].mxu0 %v11794_v1  ;;  %v4338_v11 = vpop.permute.xlu1 %4337 }
 0x4e0   : > { %5571 = vmatpush1.bf16.msra.mxu1 %v4348_v34  ;;  %5490 = vmatprep.mubr.bf16.mxu0 %v11801_v12  ;;  %v4356_v20 = vsel %vm1989_vm13, %v12046_v51, %v4338_v11 }
 0x4e1   : > { %v4340_v57 = vpop.permute.xlu0 %4339 }
 0x4e2   : > { %v4357_v9 = vsel %vm1989_vm13, %v4338_v11, %v4340_v57  ;;  %vm6680_vm13 = vcmask 671304  }
 0x4e3   : > { %5572 = vmatprep.subr.bf16.mxu1 %v4357_v9  ;;  %6681 = vst.msk [vmem:[#allocation6] sm:$0xff] %vm6680_vm13, %v13826_v27  ;;  %6682 = vst.msk [vmem:[#allocation6 + $0x8] sm:$0xff] %vm6680_vm13, %v13826_v27 }
 0x4e4   : > { %5573 = vmatpush1.bf16.msra.mxu1 %v4356_v20  ;;  %6975 = vst.msk [vmem:[#allocation8] sm:$0xff] %vm6680_vm13, %v13826_v27 }
 0x4e7   : > { %5491 = vmatmul.mubr.bf16.gmra.mrb[12].mxu0 %v11823_v7 }
 0x4e8   : > { %v4493_v36 = vpop.permute.xlu0 %4492  ;;  %5533 = vmatprep.mubr.bf16.mxu0 %v13826_v27 }
 0x4e9   : > { %v4491_v13 = vpop.permute.xlu1 %4490 }
 0x4ea   : > { %v4520_v37 = vsel %vm2342_vm0, %v4491_v13, %v4493_v36  ;;  %v4519_v10 = vsel %vm2342_vm0, %v12058_v33, %v4491_v13 }
 0x4eb   : > { %5574 = vmatprep.subr.bf16.mxu1 %v4520_v37 }
 0x4ec   : > { %5575 = vmatpush1.bf16.msra.mxu1 %v4519_v10 }
 0x4ef   : > { %v4949_v42 = vpop.permute.xlu1 %4948 }
 0x4f0   : > { %v4979_v21 = vsel %vm3305_vm5, %v11998_v35, %v4949_v42 }
 0x4f1   : > { %v4951_v28 = vpop.permute.xlu0 %4950 }
 0x4f2   : > { %v4980_v8 = vsel %vm3305_vm5, %v4949_v42, %v4951_v28 }
 0x4f3   : > { %5501 = vmatprep.subr.bf16.mxu0 %v4980_v8  ;;  %v4509_v51 = vpop.permute.xlu1 %4508 }
 0x4f4   : > { %5502 = vmatpush1.bf16.msra.mxu0 %v4979_v21  ;;  %v4527_v33 = vsel %vm2342_vm0, %v12076_v18, %v4509_v51 }
 0x4f5   : > { %v4511_v6 = vpop.permute.xlu0 %4510 }
 0x4f6   : > { %v4528_v50 = vsel %vm2342_vm0, %v4509_v51, %v4511_v6  ;;  %vm7149_vm0 = vcmask 671232  }
 0x4f7   : > { %5576 = vmatprep.subr.bf16.mxu1 %v4528_v50  ;;  %v4967_v26 = vpop.permute.xlu1 %4966 }
 0x4f8   : > { %5577 = vmatpush1.bf16.msra.mxu1 %v4527_v33  ;;  %v4987_v29 = vsel %vm3305_vm5, %v12017_v3, %v4967_v26 }
 0x4f9   : > { %v4969_v2 = vpop.permute.xlu0 %4968 }
 0x4fa   : > { %v4988_v25 = vsel %vm3305_vm5, %v4967_v26, %v4969_v2 }
 0x4fb   : > { %5503 = vmatprep.subr.bf16.mxu0 %v4988_v25  ;;  %v4662_v43 = vpop.permute.xlu1 %4661 }
 0x4fc   : > { %5504 = vmatpush1.bf16.msra.mxu0 %v4987_v29  ;;  %v4689_v47 = vsel %vm2442_vm9, %v12098_v54, %v4662_v43 }
 0x4fd   : > { %v4664_v35 = vpop.permute.xlu0 %4663 }
 0x4fe   : > { %v4690_v60 = vsel %vm2442_vm9, %v4662_v43, %v4664_v35 }
 0x4ff   : > { %7347 = vmatmul.mubr.msk.bf16.vlgmr.msra.gmra.mrb[8].mxu0 %vm1479_vm8, %v11883_v32  ;;  %5578 = vmatprep.subr.bf16.mxu1 %v4690_v60  ;;  %v4680_v18 = vpop.permute.xlu1 %4679 }
 0x500   : > { %5579 = vmatpush1.bf16.msra.mxu1 %v4689_v47  ;;  %5543 = vmatprep.mubr.bf16.mxu0 %v13826_v27  ;;  %v4697_v3 = vsel %vm2442_vm9, %v12107_v56, %v4680_v18 }
 0x501   : > { %v4682_v15 = vpop.permute.xlu0 %4681 }
 0x502   : > { %v4698_v45 = vsel %vm2442_vm9, %v4680_v18, %v4682_v15 }
 0x503   : > { %5580 = vmatprep.subr.bf16.mxu1 %v4698_v45  ;;  %v4782_v23 = vpop.permute.xlu1 %4781 }
 0x504   : > { %5581 = vmatpush1.bf16.msra.mxu1 %v4697_v3  ;;  %v4810_v58 = vsel %vm2952_vm3, %v12116_v17, %v4782_v23 }
 0x505   : > { %v4784_v24 = vpop.permute.xlu0 %4783 }
 0x506   : > { %v4811_v54 = vsel %vm2952_vm3, %v4782_v23, %v4784_v24 }
 0x507   : > { %7348 = vmatmul.mubr.msk.bf16.gmra.mrb[12].mxu0 %vm1479_vm8, %v11912_v30  ;;  %5582 = vmatprep.subr.bf16.mxu1 %v4811_v54  ;;  %v4800_v31 = vpop.permute.xlu1 %4799 }
 0x508   : > { %5583 = vmatpush1.bf16.msra.mxu1 %v4810_v58  ;;  %v4818_v56 = vsel %vm2952_vm3, %v12125_v53, %v4800_v31 }
 0x509   : > { %v4802_v59 = vpop.permute.xlu0 %4801 }
 0x50a   : > { %v4819_v63 = vsel %vm2952_vm3, %v4800_v31, %v4802_v59  ;;  %vm7267_vm3 = vcmask 31744  }
 0x50b   : > { %5584 = vmatprep.subr.bf16.mxu1 %v4819_v63 }
 0x50c   : > { %5585 = vmatpush1.bf16.msra.mxu1 %v4818_v56 }
 0x50f   : > { %5587 = vmatmul.mubr.bf16.vlgmr.msra.gmra.mrb[8].mxu1 %v11794_v1 }
 0x510   : > { %5596 = vmatprep.mubr.bf16.mxu1 %v11801_v12 }
 0x517   : > { %5597 = vmatmul.mubr.bf16.gmra.mrb[12].mxu1 %v11823_v7 }
 0x518   : > { %5639 = vmatprep.mubr.bf16.mxu1 %v13826_v27 }
 0x524   : > { %v4955_v4 = vpop.permute.xlu0 %4954 }
 0x525   : > { %v4953_v19 = vpop.permute.xlu1 %4952 }
 0x526   : > { %v4981_v38 = vsel %vm3305_vm5, %v4951_v28, %v4953_v19  ;;  %v4982_v55 = vsel %vm3305_vm5, %v4953_v19, %v4955_v4 }
 0x527   : > { %5607 = vmatprep.subr.bf16.mxu1 %v4982_v55 }
 0x528   : > { %v4973_v39 = vpop.permute.xlu0 %4972  ;;  %5608 = vmatpush1.bf16.msra.mxu1 %v4981_v38 }
 0x529   : > { %v4971_v41 = vpop.permute.xlu1 %4970 }
 0x52a   : > { %v4989_v17 = vsel %vm3305_vm5, %v4969_v2, %v4971_v41  ;;  %v4990_v1 = vsel %vm3305_vm5, %v4971_v41, %v4973_v39 }
 0x52b   : > { %5609 = vmatprep.subr.bf16.mxu1 %v4990_v1 }
 0x52c   : > { %5610 = vmatpush1.bf16.msra.mxu1 %v4989_v17 }
 0x52f   : > { %7349 = vmatmul.mubr.msk.bf16.vlgmr.msra.gmra.mrb[8].mxu1 %vm1479_vm8, %v11883_v32 }
 0x530   : > { %5649 = vmatprep.mubr.bf16.mxu1 %v13826_v27 }
 0x537   : > { %7350 = vmatmul.mubr.msk.bf16.gmra.mrb[12].mxu1 %vm1479_vm8, %v11912_v30 }
 0x539   : > { %v5323_v12 = vpop.f32.mrb[0].mxu0  ;;  %v12185_v49 = vpop.permute.xlu0 %5186 }
 0x53a   : > { %v5325_v7 = vpop.f32.mrb[1].mxu0  ;;  %v12183_v5 = vpop.permute.xlu1 %5181 }
 0x53b   : > { %v7626_v46 = vadd.f32 %v5323_v12, %v12183_v5  ;;  %v5327_v52 = vpop.f32.mrb[2].mxu0  ;;  %v7627_v44 = vadd.f32 %v5325_v7, %v12183_v5 }
 0x53c   : > { %v7628_v16 = vadd.f32 %v5327_v52, %v12185_v49  ;;  %v5329_v48 = vpop.f32.mrb[3].mxu0 }
 0x53d   : > { %v5660_v32 = vmax.f32 %v7626_v46, 0.0  ;;  %v7629_v53 = vadd.f32 %v5329_v48, %v12185_v49  ;;  %v5661_v22 = vmax.f32 %v7627_v44, 0.0  ;;  %v12198_v9 = vpop.permute.xlu0 %5196 }
 0x53e   : > { %v5668_v0 = vmax.f32 %v7628_v16, 0.0  ;;  %v12195_v61 = vpop.permute.xlu1 %5191 }
 0x53f   : > { %v5669_v30 = vmax.f32 %v7629_v53, 0.0 }
 0x540   : > { %v12191_v14 = vpack.c.bf16 %v5668_v0, %v5660_v32 }
 0x541   : > { %v12193_v40 = vpack.c.bf16 %v5669_v30, %v5661_v22  ;;  %v5333_v34 = vpop.f32.mrb[4].mxu0 }
 0x542   : > { %v7630_v11 = vadd.f32 %v5333_v34, %v12195_v61  ;;  %v5335_v57 = vpop.f32.mrb[5].mxu0 }
 0x543   : > { %v7631_v20 = vadd.f32 %v5335_v57, %v12195_v61  ;;  %v5337_v36 = vpop.f32.mrb[6].mxu0  ;;  %5765 = vrot.lane.b32.xlu1 %v12193_v40, %s7949_s30 }
 0x544   : > { %v7632_v13 = vadd.f32 %v5337_v36, %v12198_v9  ;;  %v5339_v37 = vpop.f32.mrb[7].mxu0  ;;  %v5676_v42 = vmax.f32 %v7630_v11, 0.0 }
 0x545   : > { %v7633_v10 = vadd.f32 %v5339_v37, %v12198_v9  ;;  %v5677_v8 = vmax.f32 %v7631_v20, 0.0 }
 0x546   : > { %v5684_v28 = vmax.f32 %v7632_v13, 0.0 }
 0x547   : > { %v5685_v51 = vmax.f32 %v7633_v10, 0.0 }
 0x548   : > { %v12205_v21 = vpack.c.bf16 %v5684_v28, %v5676_v42  ;;  %v7847_v42 = vld [vmem:[%s12794_s11 + $0x40] sm:$0xff]  }
 0x549   : > { %v12207_v6 = vpack.c.bf16 %v5685_v51, %v5677_v8  ;;  %v7848_v28 = vld [vmem:[%s12794_s11] sm:$0xff]   ;;  %v7849_v8 = vld [vmem:[%s12794_s11 + $0x48] sm:$0xff]   ;;  %7436 = vmatprep.subr.bf16.mxu0 %v7847_v42 }
 0x54a   : > { %7437 = vmatpush3.bf16.msra.mxu0 %v7848_v28  ;;  %v7863_v28 = vld [vmem:[%s12794_s11 + $0xc0] sm:$0xff]  }
 0x54b   : > { %7438 = vmatprep.subr.bf16.mxu0 %v7849_v8  ;;  %v7864_v8 = vld [vmem:[%s12794_s11 + $0x80] sm:$0xff]   ;;  %7464 = vmatprep.subr.bf16.mxu1 %v7863_v28 }
 0x54c   : > { %7465 = vmatpush3.bf16.msra.mxu1 %v7864_v8 }
 0x56e   : > { %v5429_v50 = vpop.f32.mrb[0].mxu1 }
 0x56f   : > { %v7634_v26 = vadd.f32 %v5429_v50, %v12183_v5  ;;  %v5431_v33 = vpop.f32.mrb[1].mxu1 }
 0x570   : > { %v7635_v2 = vadd.f32 %v5431_v33, %v12183_v5  ;;  %v5433_v25 = vpop.f32.mrb[2].mxu1 }
 0x571   : > { %v7636_v43 = vadd.f32 %v5433_v25, %v12185_v49  ;;  %v5435_v29 = vpop.f32.mrb[3].mxu1  ;;  %v5662_v60 = vmax.f32 %v7634_v26, 0.0  ;;  %v7850_v25 = vld [vmem:[%s12794_s11 + $0x8] sm:$0xff]  }
 0x572   : > { %v7637_v35 = vadd.f32 %v5435_v29, %v12185_v49  ;;  %v5663_v18 = vmax.f32 %v7635_v2, 0.0  ;;  %v7851_v29 = vld [vmem:[%s12794_s11 + $0x50] sm:$0xff]   ;;  %7439 = vmatpush3.bf16.msra.mxu0 %v7850_v25  ;;  %v12349_v25 = vld [vmem:[#allocation5 + $0x88] sm:$0xff] }
 0x573   : > { %v5670_v47 = vmax.f32 %v7636_v43, 0.0  ;;  %7440 = vmatprep.subr.bf16.mxu0 %v7851_v29  ;;  %v7866_v29 = vld [vmem:[%s12794_s11 + $0x88] sm:$0xff]  }
 0x574   : > { %v5671_v15 = vmax.f32 %v7637_v35, 0.0  ;;  %v7852_v35 = vld [vmem:[%s12794_s11 + $0x10] sm:$0xff]  }
 0x575   : > { %v12213_v45 = vpack.c.bf16 %v5670_v47, %v5662_v60  ;;  %v7853_v60 = vld [vmem:[%s12794_s11 + $0x58] sm:$0xff]  }
 0x576   : > { %v12215_v3 = vpack.c.bf16 %v5671_v15, %v5663_v18  ;;  %v5439_v23 = vpop.f32.mrb[4].mxu1  ;;  %7441 = vmatpush3.bf16.msra.mxu0 %v7852_v35  ;;  %v7854_v47 = vld [vmem:[%s12794_s11 + $0x18] sm:$0xff]  }
 0x577   : > { %v7638_v24 = vadd.f32 %v5439_v23, %v12195_v61  ;;  %v5441_v54 = vpop.f32.mrb[5].mxu1  ;;  %5767 = vrot.lane.b32.xlu0 %v12213_v45, %s7949_s30  ;;  %7442 = vmatprep.subr.bf16.mxu0 %v7853_v60 }
 0x578   : > { %v7639_v58 = vadd.f32 %v5441_v54, %v12195_v61  ;;  %v5443_v31 = vpop.f32.mrb[6].mxu1  ;;  %5769 = vrot.lane.b32.xlu1 %v12215_v3, %s7949_s30  ;;  %v7856_v54 = vld [vmem:[%s12794_s11 + $0x20] sm:$0xff]  }
 0x579   : > { %v7640_v59 = vadd.f32 %v5443_v31, %v12198_v9  ;;  %v5445_v63 = vpop.f32.mrb[7].mxu1  ;;  %v5678_v4 = vmax.f32 %v7638_v24, 0.0  ;;  %v7855_v24 = vld [vmem:[%s12794_s11 + $0x60] sm:$0xff]  }
 0x57a   : > { %v7641_v56 = vadd.f32 %v5445_v63, %v12198_v9  ;;  %v5679_v38 = vmax.f32 %v7639_v58, 0.0  ;;  %7443 = vmatpush3.bf16.msra.mxu0 %v7854_v47  ;;  %v7867_v47 = vld [vmem:[%s12794_s11 + $0xd0] sm:$0xff]  }
 0x57b   : > { %v5686_v19 = vmax.f32 %v7640_v59, 0.0  ;;  %5763 = vrot.lane.b32.xlu0 %v12191_v14, %s7949_s30  ;;  %7444 = vmatprep.subr.bf16.mxu0 %v7855_v24  ;;  %v7869_v24 = vld [vmem:[%s12794_s11 + $0xd8] sm:$0xff]  }
 0x57c   : > { %v5687_v55 = vmax.f32 %v7641_v56, 0.0 }
 0x57d   : > { %v12227_v39 = vpack.c.bf16 %v5686_v19, %v5678_v4 }
 0x57e   : > { %v12229_v41 = vpack.c.bf16 %v5687_v55, %v5679_v38  ;;  %7445 = vmatpush3.bf16.msra.mxu0 %v7856_v54  ;;  %v7857_v38 = vld [vmem:[%s12794_s11 + $0x68] sm:$0xff]   ;;  %v7872_v54 = vld [vmem:[%s12794_s11 + $0xa0] sm:$0xff]  }
 0x57f   : > { %7446 = vmatprep.subr.bf16.mxu0 %v7857_v38 }
 0x5d2   : > { %v5535_v17 = vpop.f32.mrb[8].mxu0 }
 0x5d3   : > { %v7642_v1 = vadd.f32 %v5535_v17, %v12183_v5  ;;  %v5537_v12 = vpop.f32.mrb[9].mxu0 }
 0x5d4   : > { %v7643_v7 = vadd.f32 %v5537_v12, %v12183_v5  ;;  %v5539_v46 = vpop.f32.mrb[10].mxu0 }
 0x5d5   : > { %v7644_v52 = vadd.f32 %v5539_v46, %v12185_v49  ;;  %v5541_v44 = vpop.f32.mrb[11].mxu0  ;;  %v5664_v48 = vmax.f32 %v7642_v1, 0.0 }
 0x5d6   : > { %v7645_v16 = vadd.f32 %v5541_v44, %v12185_v49  ;;  %v5665_v53 = vmax.f32 %v7643_v7, 0.0  ;;  %v7860_v44 = vld [vmem:[%s12794_s11 + $0x30] sm:$0xff]  }
 0x5d7   : > { %v5672_v32 = vmax.f32 %v7644_v52, 0.0  ;;  %v7859_v52 = vld [vmem:[%s12794_s11 + $0x70] sm:$0xff]  }
 0x5d8   : > { %v5673_v0 = vmax.f32 %v7645_v16, 0.0 }
 0x5d9   : > { %v12235_v22 = vpack.c.bf16 %v5672_v32, %v5664_v48  ;;  %v12319_v32 = vld [vmem:[#allocation5 + $0x40] sm:$0xff] }
 0x5da   : > { %v12237_v30 = vpack.c.bf16 %v5673_v0, %v5665_v53  ;;  %v5545_v34 = vpop.f32.mrb[12].mxu0 }
 0x5db   : > { %v7646_v11 = vadd.f32 %v5545_v34, %v12195_v61  ;;  %v5547_v57 = vpop.f32.mrb[13].mxu0  ;;  %5771 = vrot.lane.b32.xlu1 %v12235_v22, %s7949_s30 }
 0x5dc   : > { %v7647_v20 = vadd.f32 %v5547_v57, %v12195_v61  ;;  %v5549_v36 = vpop.f32.mrb[14].mxu0  ;;  %5773 = vrot.lane.b32.xlu0 %v12237_v30, %s7949_s30  ;;  %v5766_v57 = vpop.permute.xlu1 %5765 }
 0x5dd   : > { %v7648_v13 = vadd.f32 %v5549_v36, %v12198_v9  ;;  %v5551_v37 = vpop.f32.mrb[15].mxu0  ;;  %v5680_v51 = vmax.f32 %v7646_v11, 0.0 }
 0x5de   : > { %v7649_v10 = vadd.f32 %v5551_v37, %v12198_v9  ;;  %v5681_v26 = vmax.f32 %v7647_v20, 0.0 }
 0x5df   : > { %v5688_v50 = vmax.f32 %v7648_v13, 0.0  ;;  %5783 = vrot.lane.b32.xlu1 %v12207_v6, %s7949_s30 }
 0x5e0   : > { %v5689_v33 = vmax.f32 %v7649_v10, 0.0  ;;  %5785 = vrot.lane.b32.xlu0 %v12227_v39, %s7949_s30  ;;  %v7862_v10 = vld [vmem:[%s12794_s11 + $0x38] sm:$0xff]  }
 0x5e1   : > { %v12260_v2 = vpack.c.bf16 %v5688_v50, %v5680_v51  ;;  %v7865_v51 = vld [vmem:[%s12794_s11 + $0xc8] sm:$0xff]  }
 0x5e2   : > { %v12265_v43 = vpack.c.bf16 %v5689_v33, %v5681_v26  ;;  %7466 = vmatprep.subr.bf16.mxu1 %v7865_v51 }
 0x5e3   : > { %5787 = vrot.lane.b32.xlu1 %v12229_v41, %s7949_s30  ;;  %7467 = vmatpush3.bf16.msra.mxu1 %v7866_v29 }
 0x5e4   : > { %5781 = vrot.lane.b32.xlu0 %v12205_v21, %s7949_s30  ;;  %7468 = vmatprep.subr.bf16.mxu1 %v7867_v47 }
 0x5e7   : > { %5789 = vrot.lane.b32.xlu1 %v12260_v2, %s7949_s30 }
 0x5e8   : > { %5791 = vrot.lane.b32.xlu0 %v12265_v43, %s7949_s30 }
 0x5e9   : > { %v5768_v34 = vpop.permute.xlu0 %5767 }
 0x5ea   : > { %v5800_v50 = vsel %vm1378_vm14, %v5766_v57, %v5768_v34  ;;  %v5770_v26 = vpop.permute.xlu1 %5769 }
 0x5eb   : > { %v12355_v35 = vmax.bf16 %v5800_v50, %v12193_v40  ;;  %v5801_v60 = vsel %vm1378_vm14, %v5768_v34, %v5770_v26  ;;  %v7868_v40 = vld [vmem:[%s12794_s11 + $0x90] sm:$0xff]  }
 0x5ec   : > { %7469 = vmatpush3.bf16.msra.mxu1 %v7868_v40 }
 0x5ed   : > { %v5764_v33 = vpop.permute.xlu0 %5763  ;;  %7470 = vmatprep.subr.bf16.mxu1 %v7869_v24 }
 0x602   : > { %v5641_v18 = vpop.f32.mrb[8].mxu1 }
 0x603   : > { %v7650_v15 = vadd.f32 %v5641_v18, %v12183_v5  ;;  %v5643_v23 = vpop.f32.mrb[9].mxu1  ;;  %v5799_v18 = vsel %vm1378_vm14, %v5764_v33, %v5766_v57 }
 0x604   : > { %v7651_v58 = vadd.f32 %v5643_v23, %v12183_v5  ;;  %v5645_v31 = vpop.f32.mrb[10].mxu1  ;;  %v7858_v5 = vld [vmem:[%s12794_s11 + $0x28] sm:$0xff]   ;;  %v12373_v23 = vmax.bf16 %v5799_v18, %v12191_v14  ;;  %v7871_v14 = vld [vmem:[%s12794_s11 + $0xe0] sm:$0xff]  }
 0x605   : > { %v7652_v59 = vadd.f32 %v5645_v31, %v12185_v49  ;;  %v5647_v63 = vpop.f32.mrb[11].mxu1  ;;  %v5666_v4 = vmax.f32 %v7650_v15, 0.0  ;;  %7447 = vmatpush3.bf16.msra.mxu0 %v7858_v5  ;;  %v12367_v15 = vmax.bf16 %v5801_v60, %v12213_v45  ;;  %v7870_v45 = vld [vmem:[%s12794_s11 + $0x98] sm:$0xff]   ;;  %v7874_v31 = vld [vmem:[%s12794_s11 + $0xa8] sm:$0xff]  }
 0x606   : > { %v7653_v56 = vadd.f32 %v5647_v63, %v12185_v49  ;;  %v5667_v55 = vmax.f32 %v7651_v58, 0.0  ;;  %7448 = vmatprep.subr.bf16.mxu0 %v7859_v52  ;;  %7471 = vmatpush3.bf16.msra.mxu1 %v7870_v45  ;;  %v7873_v58 = vld [vmem:[%s12794_s11 + $0xe8] sm:$0xff]   ;;  %v7876_v63 = vld [vmem:[%s12794_s11 + $0xb0] sm:$0xff]  }
 0x607   : > { %v5674_v19 = vmax.f32 %v7652_v59, 0.0  ;;  %7472 = vmatprep.subr.bf16.mxu1 %v7871_v14  ;;  %v7875_v59 = vld [vmem:[%s12794_s11 + $0xf0] sm:$0xff]   ;;  %v7880_v14 = vld [vmem:[%s12794_s11 + $0x100] sm:$0xff]  }
 0x608   : > { %v5675_v17 = vmax.f32 %v7653_v56, 0.0  ;;  %v7877_v56 = vld [vmem:[%s12794_s11 + $0xf8] sm:$0xff]  }
 0x609   : > { %v12303_v1 = vpack.c.bf16 %v5674_v19, %v5666_v4  ;;  %7449 = vmatpush3.bf16.msra.mxu0 %v7860_v44  ;;  %v7878_v4 = vld [vmem:[%s12794_s11 + $0xb8] sm:$0xff]  }
 0x60a   : > { %v12305_v12 = vpack.c.bf16 %v5675_v17, %v5667_v55  ;;  %v5651_v7 = vpop.f32.mrb[12].mxu1  ;;  %7473 = vmatpush3.bf16.msra.mxu1 %v7872_v54  ;;  %v7881_v54 = vld [vmem:[%s12794_s11 + $0x148] sm:$0xff]  }
 0x60b   : > { %v7654_v49 = vadd.f32 %v5651_v7, %v12195_v61  ;;  %v5653_v46 = vpop.f32.mrb[13].mxu1  ;;  %5775 = vrot.lane.b32.xlu1 %v12303_v1, %s7949_s30  ;;  %7474 = vmatprep.subr.bf16.mxu1 %v7873_v58  ;;  %v7883_v58 = vld [vmem:[%s12794_s11 + $0x108] sm:$0xff]  }
 0x60c   : > { %v7655_v16 = vadd.f32 %v5653_v46, %v12195_v61  ;;  %v5655_v48 = vpop.f32.mrb[14].mxu1  ;;  %5777 = vrot.lane.b32.xlu0 %v12305_v12, %s7949_s30  ;;  %v7861_v61 = vld [vmem:[%s12794_s11 + $0x78] sm:$0xff]  }
 0x60d   : > { %v7656_v53 = vadd.f32 %v5655_v48, %v12198_v9  ;;  %v5657_v0 = vpop.f32.mrb[15].mxu1  ;;  %v5682_v20 = vmax.f32 %v7654_v49, 0.0  ;;  %7450 = vmatprep.subr.bf16.mxu0 %v7861_v61 }
 0x60e   : > { %v7657_v11 = vadd.f32 %v5657_v0, %v12198_v9  ;;  %v5683_v13 = vmax.f32 %v7655_v16, 0.0  ;;  %7451 = vmatpush3.bf16.msra.mxu0 %v7862_v10  ;;  %7475 = vmatpush3.bf16.msra.mxu1 %v7874_v31  ;;  %v7879_v16 = vld [vmem:[%s12794_s11 + $0x140] sm:$0xff]   ;;  %v7889_v31 = vld [vmem:[%s12794_s11 + $0x158] sm:$0xff]  }
 0x60f   : > { %v5690_v36 = vmax.f32 %v7656_v53, 0.0  ;;  %5779 = vrot.lane.b32.xlu1 %v12319_v32, %s7949_s30  ;;  %7476 = vmatprep.subr.bf16.mxu1 %v7875_v59  ;;  %v7882_v53 = vld [vmem:[%s12794_s11 + $0x1c0] sm:$0xff]   ;;  %v7891_v59 = vld [vmem:[%s12794_s11 + $0x118] sm:$0xff]  }
 0x610   : > { %v5691_v37 = vmax.f32 %v7657_v11, 0.0  ;;  %7492 = vmatprep.subr.bf16.mxu0 %v7879_v16 }
 0x611   : > { %v12331_v42 = vpack.c.bf16 %v5690_v36, %v5682_v20 }
 0x612   : > { %v12333_v9 = vpack.c.bf16 %v5691_v37, %v5683_v13  ;;  %7477 = vmatpush3.bf16.msra.mxu1 %v7876_v63  ;;  %v7893_v63 = vld [vmem:[%s12794_s11 + $0x160] sm:$0xff]  }
 0x613   : > { %5793 = vrot.lane.b32.xlu0 %v12331_v42, %s7949_s30  ;;  %7478 = vmatprep.subr.bf16.mxu1 %v7877_v56  ;;  %v7895_v56 = vld [vmem:[%s12794_s11 + $0x120] sm:$0xff]  }
 0x614   : > { %5795 = vrot.lane.b32.xlu1 %v12333_v9, %s7949_s30 }
 0x616   : > { %7479 = vmatpush3.bf16.msra.mxu1 %v7878_v4  ;;  %v7897_v4 = vld [vmem:[%s12794_s11 + $0x168] sm:$0xff]  }
 0x617   : > { %5797 = vrot.lane.b32.xlu0 %v12349_v25, %s7949_s30  ;;  %7520 = vmatprep.subr.bf16.mxu1 %v7882_v53 }
 0x618   : > { %5887 = vrot.lane.b32.xlu1 %v12355_v35, %s7941_s24 }
 0x61b   : > { %5889 = vrot.lane.b32.xlu0 %v12367_v15, %s7941_s24 }
 0x61c   : > { %5885 = vrot.lane.b32.xlu1 %v12373_v23, %s7941_s24 }
 0x64d   : > { %v5772_v19 = vpop.permute.xlu1 %5771 }
 0x64e   : > { %v5802_v38 = vsel %vm1378_vm14, %v5770_v26, %v5772_v19  ;;  %v5774_v55 = vpop.permute.xlu0 %5773 }
 0x64f   : > { %v12411_v17 = vmax.bf16 %v5802_v38, %v12215_v3  ;;  %v5803_v5 = vsel %vm1378_vm14, %v5772_v19, %v5774_v55  ;;  %v7899_v19 = vld [vmem:[%s12794_s11 + $0x128] sm:$0xff]   ;;  %v7901_v38 = vld [vmem:[%s12794_s11 + $0x170] sm:$0xff]  }
 0x650   : > { %v12415_v7 = vmax.bf16 %v5803_v5, %v12235_v22  ;;  %v7905_v5 = vld [vmem:[%s12794_s11 + $0x178] sm:$0xff]  }
 0x651   : > { %5891 = vrot.lane.b32.xlu0 %v12411_v17, %s7941_s24  ;;  %v5784_v49 = vpop.permute.xlu1 %5783 }
 0x652   : > { %v5786_v46 = vpop.permute.xlu0 %5785  ;;  %5893 = vrot.lane.b32.xlu1 %v12415_v7, %s7941_s24 }
 0x653   : > { %v5808_v52 = vsel %vm1378_vm14, %v5784_v49, %v5786_v46 }
 0x654   : > { %v12423_v44 = vmax.bf16 %v5808_v52, %v12207_v6 }
 0x655   : > { %v5788_v3 = vpop.permute.xlu1 %5787 }
 0x656   : > { %v5809_v22 = vsel %vm1378_vm14, %v5786_v46, %v5788_v3  ;;  %v5782_v48 = vpop.permute.xlu0 %5781  ;;  %5905 = vrot.lane.b32.xlu0 %v12423_v44, %s7941_s24 }
 0x657   : > { %v12435_v0 = vmax.bf16 %v5809_v22, %v12227_v39  ;;  %v5807_v6 = vsel %vm1378_vm14, %v5782_v48, %v5784_v49  ;;  %v7907_v49 = vld [vmem:[%s12794_s11 + $0x138] sm:$0xff]   ;;  %v7884_v48 = vld [vmem:[%s12794_s11 + $0x180] sm:$0xff]  }
 0x658   : > { %v12439_v34 = vmax.bf16 %v5807_v6, %v12205_v21  ;;  %v7886_v6 = vld [vmem:[%s12794_s11 + $0x1c8] sm:$0xff]  }
 0x659   : > { %5907 = vrot.lane.b32.xlu1 %v12435_v0, %s7941_s24  ;;  %v5790_v11 = vpop.permute.xlu1 %5789 }
 0x65a   : > { %v5810_v57 = vsel %vm1378_vm14, %v5788_v3, %v5790_v11  ;;  %v5792_v20 = vpop.permute.xlu0 %5791  ;;  %5903 = vrot.lane.b32.xlu0 %v12439_v34, %s7941_s24 }
 0x65b   : > { %v12447_v39 = vmax.bf16 %v5810_v57, %v12229_v41  ;;  %v5811_v36 = vsel %vm1378_vm14, %v5790_v11, %v5792_v20  ;;  %v7888_v57 = vld [vmem:[%s12794_s11 + $0x188] sm:$0xff]  }
 0x65c   : > { %v12451_v61 = vmax.bf16 %v5811_v36, %v12260_v2 }
 0x65d   : > { %5909 = vrot.lane.b32.xlu1 %v12447_v39, %s7941_s24 }
 0x65e   : > { %5911 = vrot.lane.b32.xlu0 %v12451_v61, %s7941_s24 }
 0x67d   : > { %v5776_v21 = vpop.permute.xlu1 %5775 }
 0x67e   : > { %v5804_v13 = vsel %vm1378_vm14, %v5774_v55, %v5776_v21  ;;  %v5778_v37 = vpop.permute.xlu0 %5777  ;;  %v7903_v55 = vld [vmem:[%s12794_s11 + $0x130] sm:$0xff]  }
 0x67f   : > { %v12459_v10 = vmax.bf16 %v5804_v13, %v12237_v30  ;;  %v5805_v41 = vsel %vm1378_vm14, %v5776_v21, %v5778_v37 }
 0x680   : > { %v12463_v28 = vmax.bf16 %v5805_v41, %v12303_v1  ;;  %v7892_v41 = vld [vmem:[%s12794_s11 + $0x190] sm:$0xff]  }
 0x681   : > { %5895 = vrot.lane.b32.xlu1 %v12459_v10, %s7941_s24  ;;  %v5780_v2 = vpop.permute.xlu1 %5779 }
 0x682   : > { %v5806_v8 = vsel %vm1378_vm14, %v5778_v37, %v5780_v2  ;;  %v5857_v51 = vmax.bf16 %v5780_v2, %v12319_v32  ;;  %5897 = vrot.lane.b32.xlu0 %v12463_v28, %s7941_s24 }
 0x683   : > { %v12472_v50 = vmax.bf16 %v5806_v8, %v12305_v12  ;;  %v7894_v8 = vld [vmem:[%s12794_s11 + $0x1d8] sm:$0xff]  }
 0x685   : > { %v5794_v30 = vpop.permute.xlu0 %5793  ;;  %5899 = vrot.lane.b32.xlu1 %v12472_v50, %s7941_s24 }
 0x686   : > { %v5812_v1 = vsel %vm1378_vm14, %v5792_v20, %v5794_v30  ;;  %5901 = vrot.lane.b32.xlu0 %v5857_v51, %s7941_s24  ;;  %v5796_v26 = vpop.permute.xlu1 %5795 }
 0x687   : > { %v12479_v33 = vmax.bf16 %v5812_v1, %v12265_v43  ;;  %v5813_v32 = vsel %vm1378_vm14, %v5794_v30, %v5796_v26  ;;  %v7896_v1 = vld [vmem:[%s12794_s11 + $0x198] sm:$0xff]  }
 0x688   : > { %v12483_v29 = vmax.bf16 %v5813_v32, %v12331_v42  ;;  %v7898_v32 = vld [vmem:[%s12794_s11 + $0x1e0] sm:$0xff]  }
 0x689   : > { %v5798_v60 = vpop.permute.xlu0 %5797  ;;  %5913 = vrot.lane.b32.xlu1 %v12479_v33, %s7941_s24 }
 0x68a   : > { %v5814_v12 = vsel %vm1378_vm14, %v5796_v26, %v5798_v60  ;;  %v5866_v47 = vmax.bf16 %v5798_v60, %v12349_v25  ;;  %5915 = vrot.lane.b32.xlu0 %v12483_v29, %s7941_s24  ;;  %v5888_v18 = vpop.permute.xlu1 %5887  ;;  %v7900_v60 = vld [vmem:[%s12794_s11 + $0x1a0] sm:$0xff]   ;;  %vm6693_vm14 = vcmask 597064  }
 0x68b   : > { %v12492_v43 = vmax.bf16 %v5814_v12, %v12333_v9  ;;  %v7906_v12 = vld [vmem:[%s12794_s11 + $0x1f0] sm:$0xff]  }
 0x68d   : > { %v5890_v40 = vpop.permute.xlu0 %5889  ;;  %5917 = vrot.lane.b32.xlu1 %v12492_v43, %s7941_s24 }
 0x68e   : > { %v5922_v42 = vsel %vm2442_vm9, %v5888_v18, %v5890_v40  ;;  %5919 = vrot.lane.b32.xlu0 %v5866_v47, %s7941_s24  ;;  %v5886_v24 = vpop.permute.xlu1 %5885  ;;  %v7908_v47 = vld [vmem:[%s12794_s11 + $0x1b0] sm:$0xff]   ;;  %s7957_s24 = smov 16  }
 0x68f   : > { %v5954_v45 = vmax.bf16 %v5922_v42, %v12355_v35  ;;  %v5921_v25 = vsel %vm2442_vm9, %v5886_v24, %v5888_v18  ;;  %v7885_v35 = vld [vmem:[%s12794_s11 + $0x150] sm:$0xff]   ;;  %v7909_v18 = vld [vmem:[%s12794_s11 + $0x1f8] sm:$0xff]  }
 0x690   : > { %v5953_v9 = vmax.bf16 %v5921_v25, %v12373_v23  ;;  %v7887_v23 = vld [vmem:[%s12794_s11 + $0x110] sm:$0xff]  }
 0x691   : > { %6513 = vmatprep.mubr.bf16.mxu0 %v5954_v45 }
 0x692   : > { %6514 = vmatmul.mubr.bf16.vlgmr.msra.gmra.mrb[16].mxu0 %v5953_v9 }
 0x693   : > { %7493 = vmatpush3.bf16.msra.mxu0 %v7880_v14 }
 0x694   : > { %7494 = vmatprep.subr.bf16.mxu0 %v7881_v54 }
 0x697   : > { %7495 = vmatpush3.bf16.msra.mxu0 %v7883_v58 }
 0x698   : > { %7496 = vmatprep.subr.bf16.mxu0 %v7885_v35 }
 0x69b   : > { %7497 = vmatpush3.bf16.msra.mxu0 %v7887_v23 }
 0x69c   : > { %7498 = vmatprep.subr.bf16.mxu0 %v7889_v31 }
 0x69f   : > { %7499 = vmatpush3.bf16.msra.mxu0 %v7891_v59 }
 0x6a0   : > { %7500 = vmatprep.subr.bf16.mxu0 %v7893_v63 }
 0x6a3   : > { %7501 = vmatpush3.bf16.msra.mxu0 %v7895_v56 }
 0x6a4   : > { %7502 = vmatprep.subr.bf16.mxu0 %v7897_v4 }
 0x6a7   : > { %7503 = vmatpush3.bf16.msra.mxu0 %v7899_v19 }
 0x6a8   : > { %7504 = vmatprep.subr.bf16.mxu0 %v7901_v38 }
 0x6ab   : > { %7505 = vmatpush3.bf16.msra.mxu0 %v7903_v55 }
 0x6ac   : > { %7506 = vmatprep.subr.bf16.mxu0 %v7905_v5 }
 0x6af   : > { %7507 = vmatpush3.bf16.msra.mxu0 %v7907_v49 }
 0x6c3   : > { %v5892_v46 = vpop.permute.xlu0 %5891 }
 0x6c4   : > { %v5923_v52 = vsel %vm2442_vm9, %v5890_v40, %v5892_v46  ;;  %v5894_v3 = vpop.permute.xlu1 %5893  ;;  %v7910_v40 = vld [vmem:[%s12794_s11 + $0x1b8] sm:$0xff]  }
 0x6c5   : > { %v5924_v16 = vsel %vm2442_vm9, %v5892_v46, %v5894_v3  ;;  %v5955_v53 = vmax.bf16 %v5923_v52, %v12367_v15 }
 0x6c6   : > { %v5956_v22 = vmax.bf16 %v5924_v16, %v12411_v17  ;;  %v7890_v17 = vld [vmem:[%s12794_s11 + $0x1d0] sm:$0xff]  }
 0x6c8   : > { %v5906_v11 = vpop.permute.xlu0 %5905  ;;  %6562 = vmatprep.mubr.bf16.mxu1 %v5956_v22 }
 0x6c9   : > { %6563 = vmatmul.mubr.bf16.vlgmr.msra.gmra.mrb[16].mxu1 %v5955_v53 }
 0x6ca   : > { %7521 = vmatpush3.bf16.msra.mxu1 %v7884_v48 }
 0x6cb   : > { %v5908_v20 = vpop.permute.xlu1 %5907  ;;  %7522 = vmatprep.subr.bf16.mxu1 %v7886_v6 }
 0x6cc   : > { %v5930_v15 = vsel %vm2442_vm9, %v5906_v11, %v5908_v20  ;;  %v5904_v36 = vpop.permute.xlu0 %5903 }
 0x6cd   : > { %v5962_v21 = vmax.bf16 %v5930_v15, %v12423_v44  ;;  %v5929_v13 = vsel %vm2442_vm9, %v5904_v36, %v5906_v11 }
 0x6ce   : > { %v5961_v37 = vmax.bf16 %v5929_v13, %v12439_v34  ;;  %7523 = vmatpush3.bf16.msra.mxu1 %v7888_v57 }
 0x6cf   : > { %6521 = vmatprep.mubr.bf16.mxu0 %v5962_v21  ;;  %v5910_v2 = vpop.permute.xlu1 %5909  ;;  %7524 = vmatprep.subr.bf16.mxu1 %v7890_v17 }
 0x6d0   : > { %v5931_v51 = vsel %vm2442_vm9, %v5908_v20, %v5910_v2  ;;  %v5912_v30 = vpop.permute.xlu0 %5911  ;;  %6522 = vmatmul.mubr.bf16.gmra.mrb[20].mxu0 %v5961_v37 }
 0x6d1   : > { %v5932_v44 = vsel %vm2442_vm9, %v5910_v2, %v5912_v30  ;;  %v5963_v26 = vmax.bf16 %v5931_v51, %v12435_v0  ;;  %v7904_v0 = vld [vmem:[%s12794_s11 + $0x1a8] sm:$0xff]  }
 0x6d2   : > { %v5964_v34 = vmax.bf16 %v5932_v44, %v12447_v39  ;;  %7525 = vmatpush3.bf16.msra.mxu1 %v7892_v41  ;;  %v7902_v39 = vld [vmem:[%s12794_s11 + $0x1e8] sm:$0xff]  }
 0x6d3   : > { %7526 = vmatprep.subr.bf16.mxu1 %v7894_v8 }
 0x6d4   : > { %6570 = vmatprep.mubr.bf16.mxu1 %v5964_v34 }
 0x6d5   : > { %6571 = vmatmul.mubr.bf16.gmra.mrb[20].mxu1 %v5963_v26 }
 0x6d6   : > { %7527 = vmatpush3.bf16.msra.mxu1 %v7896_v1 }
 0x6d7   : > { %7528 = vmatprep.subr.bf16.mxu1 %v7898_v32 }
 0x6da   : > { %7529 = vmatpush3.bf16.msra.mxu1 %v7900_v60 }
 0x6db   : > { %7530 = vmatprep.subr.bf16.mxu1 %v7902_v39 }
 0x6de   : > { %7531 = vmatpush3.bf16.msra.mxu1 %v7904_v0  ;;  %v6696_v0 = vld [vmem:[%s12793_s10] sm:$0x1] }
 0x6df   : > { %7532 = vmatprep.subr.bf16.mxu1 %v7906_v12 }
 0x6e2   : > { %7533 = vmatpush3.bf16.msra.mxu1 %v7908_v47 }
 0x6e3   : > { %7534 = vmatprep.subr.bf16.mxu1 %v7909_v18 }
 0x6e6   : > { %7535 = vmatpush3.bf16.msra.mxu1 %v7910_v40 }
 0x6f3   : > { %v5896_v42 = vpop.permute.xlu1 %5895 }
 0x6f4   : > { %v5925_v24 = vsel %vm2442_vm9, %v5894_v3, %v5896_v42  ;;  %v5898_v45 = vpop.permute.xlu0 %5897 }
 0x6f5   : > { %v5926_v25 = vsel %vm2442_vm9, %v5896_v42, %v5898_v45  ;;  %v5957_v9 = vmax.bf16 %v5925_v24, %v12415_v7 }
 0x6f6   : > { %v5958_v14 = vmax.bf16 %v5926_v25, %v12459_v10  ;;  %v6724_v25 = vshrl.u32 %v6696_v0, 16 }
 0x6f7   : > { %v5900_v54 = vpop.permute.xlu1 %5899 }
 0x6f8   : > { %v5927_v58 = vsel %vm2442_vm9, %v5898_v45, %v5900_v54  ;;  %v5902_v35 = vpop.permute.xlu0 %5901  ;;  %6611 = vmatprep.mubr.bf16.mxu0 %v5958_v14 }
 0x6f9   : > { %v5928_v23 = vsel %vm2442_vm9, %v5900_v54, %v5902_v35  ;;  %6612 = vmatmul.mubr.bf16.vlgmr.msra.gmra.mrb[24].mxu0 %v5957_v9  ;;  %v5959_v59 = vmax.bf16 %v5927_v58, %v12463_v28 }
 0x6fa   : > { %v5960_v31 = vmax.bf16 %v5928_v23, %v12472_v50 }
 0x6fb   : > { %v5914_v63 = vpop.permute.xlu1 %5913 }
 0x6fc   : > { %v5933_v56 = vsel %vm2442_vm9, %v5912_v30, %v5914_v63  ;;  %v5916_v4 = vpop.permute.xlu0 %5915  ;;  %6660 = vmatprep.mubr.bf16.mxu1 %v5960_v31 }
 0x6fd   : > { %v5934_v10 = vsel %vm2442_vm9, %v5914_v63, %v5916_v4  ;;  %6661 = vmatmul.mubr.bf16.vlgmr.msra.gmra.mrb[24].mxu1 %v5959_v59  ;;  %v5965_v19 = vmax.bf16 %v5933_v56, %v12451_v61  ;;  %v6725_v63 = vpack.i.b16 %v6724_v25, %v6724_v25 }
 0x6fe   : > { %v5966_v7 = vmax.bf16 %v5934_v10, %v12479_v33 }
 0x6ff   : > { %v5918_v38 = vpop.permute.xlu1 %5917 }
 0x700   : > { %v5935_v55 = vsel %vm2442_vm9, %v5916_v4, %v5918_v38  ;;  %v5920_v5 = vpop.permute.xlu0 %5919  ;;  %6619 = vmatprep.mubr.bf16.mxu0 %v5966_v7 }
 0x701   : > { %v5936_v50 = vsel %vm2442_vm9, %v5918_v38, %v5920_v5  ;;  %6620 = vmatmul.mubr.bf16.gmra.mrb[28].mxu0 %v5965_v19  ;;  %v5967_v49 = vmax.bf16 %v5935_v55, %v12483_v29 }
 0x702   : > { %v5968_v28 = vmax.bf16 %v5936_v50, %v12492_v43 }
 0x704   : > { %6668 = vmatprep.mubr.bf16.mxu1 %v5968_v28  ;;  %v6730_v28 = vrot.slane %v6725_v63, %v13850_v62 }
 0x705   : > { %6669 = vmatmul.mubr.bf16.gmra.mrb[28].mxu1 %v5967_v49 }
 0x765   : > { %v7452_v46 = vpop.f32.mrb[16].mxu0 }
 0x766   : > { %v7453_v52 = vpop.f32.mrb[17].mxu0 }
 0x767   : > { %v7454_v3 = vadd.f32 %v7453_v52, %v7452_v46  ;;  %v7455_v33 = vpop.f32.mrb[18].mxu0 }
 0x768   : > { %v7456_v16 = vpop.f32.mrb[19].mxu0 }
 0x769   : > { %v7457_v61 = vadd.f32 %v7456_v16, %v7455_v33  ;;  %v6700_v33 = vpack.i.b16 %v6696_v0, %v6696_v0 }
 0x79c   : > { %v7480_v29 = vpop.f32.mrb[16].mxu1 }
 0x79d   : > { %v7481_v43 = vpop.f32.mrb[17].mxu1 }
 0x79e   : > { %v7482_v22 = vadd.f32 %v7481_v43, %v7480_v29  ;;  %v7483_v48 = vpop.f32.mrb[18].mxu1 }
 0x79f   : > { %v7484_v53 = vpop.f32.mrb[19].mxu1 }
 0x7a0   : > { %v6565_v6 = vadd.f32 %v7482_v22, %v7454_v3  ;;  %v7485_v11 = vadd.f32 %v7484_v53, %v7483_v48 }
 0x7a2   : > { %v6568_v57 = vadd.f32 %v7485_v11, %v7457_v61  ;;  %v6705_v61 = vrot.slane %v6700_v33, %v13850_v62 }
 0x7a3   : > { %v7458_v20 = vpop.f32.mrb[20].mxu0 }
 0x7a4   : > { %v7459_v17 = vpop.f32.mrb[21].mxu0 }
 0x7a5   : > { %v7460_v15 = vadd.f32 %v7459_v17, %v7458_v20  ;;  %v7461_v36 = vpop.f32.mrb[22].mxu0 }
 0x7a6   : > { %v7462_v21 = vpop.f32.mrb[23].mxu0 }
 0x7a7   : > { %v7463_v13 = vadd.f32 %v7462_v21, %v7461_v36 }
 0x7a8   : > { %v7486_v37 = vpop.f32.mrb[20].mxu1 }
 0x7a9   : > { %v7487_v41 = vpop.f32.mrb[21].mxu1 }
 0x7aa   : > { %v7488_v2 = vadd.f32 %v7487_v41, %v7486_v37  ;;  %v7489_v8 = vpop.f32.mrb[22].mxu1 }
 0x7ab   : > { %v7490_v51 = vpop.f32.mrb[23].mxu1 }
 0x7ac   : > { %v6573_v30 = vadd.f32 %v7488_v2, %v7460_v15  ;;  %v7491_v44 = vadd.f32 %v7490_v51, %v7489_v8  ;;  %v7963_v2 = vmov 0.0  }
 0x7ad   : > { %7583 = vmatprep.subr.bf16.mxu1 %v7963_v2  ;;  %7587 = vmatprep.mubr.msk.bf16.mxu1 %vm7966_vm15, %v7963_v2  ;;  %7150 = vst.msk [vmem:[#allocation10] sm:$0xff] %vm7149_vm0, %v7963_v2  ;;  %7151 = vst.msk [vmem:[#allocation10 + $0x8] sm:$0xff] %vm7149_vm0, %v7963_v2 }
 0x7ae   : > { %v6576_v34 = vadd.f32 %v7491_v44, %v7463_v13 }
 0x7cc   : > { %v7508_v1 = vpop.f32.mrb[24].mxu0 }
 0x7cd   : > { %v7509_v26 = vpop.f32.mrb[25].mxu0 }
 0x7ce   : > { %v7510_v32 = vadd.f32 %v7509_v26, %v7508_v1  ;;  %v7511_v60 = vpop.f32.mrb[26].mxu0  ;;  %v6862_v1 = vld [vmem:[%s12789_s6] sm:$0xff] }
 0x7cf   : > { %v7512_v39 = vpop.f32.mrb[27].mxu0 }
 0x7d0   : > { %v6614_v12 = vadd.f32 %v7510_v32, %v6565_v6  ;;  %v7513_v47 = vadd.f32 %v7512_v39, %v7511_v60  ;;  %v7536_v18 = vpop.f32.mrb[24].mxu1  ;;  %v6863_v32 = vld [vmem:[%s12789_s6 + $0x8] sm:$0xff] }
 0x7d1   : > { %v7537_v40 = vpop.f32.mrb[25].mxu1 }
 0x7d2   : > { %v6617_v42 = vadd.f32 %v7513_v47, %v6568_v57  ;;  %v7538_v24 = vadd.f32 %v7537_v40, %v7536_v18  ;;  %v7539_v45 = vpop.f32.mrb[26].mxu1 }
 0x7d3   : > { %v7540_v14 = vpop.f32.mrb[27].mxu1 }
 0x7d4   : > { %v6663_v9 = vadd.f32 %v7538_v24, %v6614_v12  ;;  %v7541_v54 = vadd.f32 %v7540_v14, %v7539_v45  ;;  %v7514_v58 = vpop.f32.mrb[28].mxu0 }
 0x7d5   : > { %v7515_v35 = vpop.f32.mrb[29].mxu0 }
 0x7d6   : > { %v6666_v23 = vadd.f32 %v7541_v54, %v6617_v42  ;;  %v7516_v31 = vadd.f32 %v7515_v35, %v7514_v58  ;;  %v7517_v59 = vpop.f32.mrb[30].mxu0 }
 0x7d7   : > { %v7518_v56 = vpop.f32.mrb[31].mxu0 }
 0x7d8   : > { %v6683_v4 = vpack.c.bf16 %v6666_v23, %v6663_v9  ;;  %v6622_v10 = vadd.f32 %v7516_v31, %v6573_v30  ;;  %v7519_v7 = vadd.f32 %v7518_v56, %v7517_v59  ;;  %v7542_v19 = vpop.f32.mrb[28].mxu1  ;;  %v7913_v30 = vld [vmem:[%s12788_s5 + $0x4] ss:$12 sps:$4 sm:$0xff]  }
 0x7d9   : > { %v7543_v38 = vpop.f32.mrb[29].mxu1  ;;  %6924 = vmatprep.mubr.bf16.mxu0 %v7913_v30 }
 0x7da   : > { %v6625_v55 = vadd.f32 %v7519_v7, %v6576_v34  ;;  %v7544_v5 = vadd.f32 %v7543_v38, %v7542_v19  ;;  %6687 = vrot.lane.b32.xlu1 %v6683_v4, %s7954_s15  ;;  %v7545_v50 = vpop.f32.mrb[30].mxu1 }
 0x7db   : > { %v7546_v49 = vpop.f32.mrb[31].mxu1 }
 0x7dc   : > { %v6671_v46 = vadd.f32 %v7544_v5, %v6622_v10  ;;  %v7547_v52 = vadd.f32 %v7546_v49, %v7545_v50 }
 0x7de   : > { %v6674_v3 = vadd.f32 %v7547_v52, %v6625_v55  ;;  %6779 = vrot.lane.b32.xlu1 %v6730_v28, %s7955_s16 }
 0x7e0   : > { %v6684_v16 = vpack.c.bf16 %v6674_v3, %v6671_v46  ;;  %v7911_v3 = vld [vmem:[%s12788_s5] ss:$12 sps:$4 sm:$0xff]  }
 0x7e2   : > { %6732 = vrot.lane.b32.xlu1 %v6730_v28, %s7934_s20  ;;  %6689 = vrot.lane.b32.xlu0 %v6684_v16, %s7954_s15  ;;  %v7914_v16 = vld [vmem:[%s12788_s5 + $0x8] ss:$12 sps:$4 sm:$0xff]  }
 0x7e6   : > { %6825 = vrot.lane.b32.xlu1 %v6730_v28, %s7956_s27  ;;  %6796 = vrot.lane.b32.xlu0 %v6705_v61, %s7957_s24 }
 0x7ea   : > { %6750 = vrot.lane.b32.xlu0 %v6705_v61, %s7958_s17 }
 0x84c   : > { %v6688_v29 = vpop.permute.xlu1 %6687 }
 0x84d   : > { %6694 = vst.msk [vmem:[#allocation6] sm:$0xff] %vm6693_vm14, %v6688_v29 }
 0x850   : > { %v6780_v53 = vpop.permute.xlu1 %6779 }
 0x854   : > { %v6697_v43 = vld [vmem:[#allocation6] sm:$0xff]  ;;  %v6690_v22 = vpop.permute.xlu0 %6689  ;;  %v6733_v36 = vpop.permute.xlu1 %6732 }
 0x855   : > { %v6706_v48 = vmul.bf16 %v6705_v61, %v6697_v43  ;;  %6695 = vst.msk [vmem:[#allocation6 + $0x8] sm:$0xff] %vm6693_vm14, %v6690_v22  ;;  %6769 = vrot.lane.b32.xlu0 %v6697_v43, %s13133_s23  ;;  %v6782_v6 = vmul.bf16 %v6780_v53, %v6697_v43  ;;  %v6735_v13 = vmul.bf16 %v6733_v36, %v6697_v43 }
 0x857   : > { %6708 = vst.msk [vmem:[#allocation7] sm:$0xff] %vm2442_vm9, %v6706_v48 }
 0x858   : > { %v6797_v17 = vpop.permute.xlu0 %6796  ;;  %v6826_v8 = vpop.permute.xlu1 %6825 }
 0x859   : > { %6786 = vrot.lane.b32.xlu0 %v6782_v6, %s13132_s18  ;;  %v6799_v15 = vmul.bf16 %v6797_v17, %v6697_v43  ;;  %v6828_v44 = vmul.bf16 %v6826_v8, %v6697_v43 }
 0x85c   : > { %v6698_v11 = vld [vmem:[#allocation6 + $0x8] sm:$0xff]  ;;  %v6751_v41 = vpop.permute.xlu0 %6750 }
 0x85d   : > { %v6707_v57 = vmul.bf16 %v6705_v61, %v6698_v11  ;;  %6771 = vrot.lane.b32.xlu1 %v6698_v11, %s13133_s23  ;;  %v6783_v20 = vmul.bf16 %v6780_v53, %v6698_v11  ;;  %v6800_v21 = vmul.bf16 %v6797_v17, %v6698_v11  ;;  %v6736_v37 = vmul.bf16 %v6733_v36, %v6698_v11  ;;  %v6982_v61 = vld [vmem:[%s12793_s10] sm:$0x1] }
 0x85e   : > { %v6753_v51 = vmul.bf16 %v6751_v41, %v6697_v43  ;;  %v6754_v34 = vmul.bf16 %v6751_v41, %v6698_v11  ;;  %v6829_v26 = vmul.bf16 %v6826_v8, %v6698_v11  ;;  %v6844_v47 = vld [vmem:[#allocation7] sm:$0xff]  ;;  %v7000_v29 = vshrl.u32 %v6982_v61, 16 }
 0x85f   : > { %6709 = vst.msk [vmem:[#allocation7 + $0x8] sm:$0xff] %vm2442_vm9, %v6707_v57  ;;  %6788 = vrot.lane.b32.xlu0 %v6783_v20, %s13132_s18 }
 0x861   : > { %6714 = vrot.lane.b32.xlu1 %v6697_v43, %s7947_s28 }
 0x863   : > { %6803 = vrot.lane.b32.xlu0 %v6799_v15, %s13130_s21 }
 0x865   : > { %6716 = vrot.lane.b32.xlu1 %v6698_v11, %s7947_s28 }
 0x866   : > { %v6845_v25 = vld [vmem:[#allocation7 + $0x8] sm:$0xff] }
 0x867   : > { %6805 = vrot.lane.b32.xlu0 %v6800_v21, %s13130_s21  ;;  %s13134_s21 = smov 110  }
 0x869   : > { %6739 = vrot.lane.b32.xlu1 %v6735_v13, %s7949_s30 }
 0x86b   : > { %6815 = vrot.lane.b32.xlu0 %v6697_v43, %s13135_s19  ;;  %v7001_v43 = vpack.i.b16 %v7000_v29, %v7000_v29 }
 0x86d   : > { %6741 = vrot.lane.b32.xlu1 %v6736_v37, %s7949_s30  ;;  %v7006_v22 = vrot.slane %v7001_v43, %v13850_v62 }
 0x86f   : > { %6817 = vrot.lane.b32.xlu0 %v6698_v11, %s13135_s19 }
 0x871   : > { %6757 = vrot.lane.b32.xlu1 %v6753_v51, %s7964_s14 }
 0x873   : > { %6832 = vrot.lane.b32.xlu0 %v6828_v44, %s13134_s21  ;;  %v6985_v44 = vpack.i.b16 %v6982_v61, %v6982_v61 }
 0x875   : > { %6759 = vrot.lane.b32.xlu1 %v6754_v34, %s7964_s14 }
 0x877   : > { %6866 = vperm.xlu0 %7827, %v6862_v1   ;;  %v6990_v1 = vrot.slane %v6985_v44, %v13850_v62 }
 0x879   : > { %6834 = vrot.lane.b32.xlu1 %v6829_v26, %s13134_s21 }
 0x87d   : > { %6871 = vperm.xlu1 %7833, %v6863_v32  }
 0x881   : > { %7008 = vrot.lane.b32.xlu1 %v7006_v22, %s7934_s20  ;;  %s13866_s20 = smov 119  }
 0x885   : > { %7035 = vrot.lane.b32.xlu1 %v7006_v22, %s7955_s16  ;;  %s13868_s16 = smov 112  }
 0x889   : > { %7061 = vrot.lane.b32.xlu1 %v7006_v22, %s7956_s27  ;;  %v7178_v22 = vld [vmem:[%s12795_s12] sm:$0xff] }
 0x8c7   : > { %v6770_v60 = vpop.permute.xlu0 %6769 }
 0x8c8   : > { %6775 = vst.msk [vmem:[#allocation7 + $0x40] sm:$0xff] %vm2442_vm9, %v6770_v60 }
 0x8cb   : > { %v6787_v39 = vpop.permute.xlu0 %6786 }
 0x8cc   : > { %6792 = vst.msk [vmem:[#allocation7 + $0x50] sm:$0xff] %vm2442_vm9, %v6787_v39 }
 0x8cf   : > { %v6772_v0 = vpop.permute.xlu1 %6771  ;;  %v6852_v12 = vld [vmem:[#allocation7 + $0x40] sm:$0xff] }
 0x8d0   : > { %6776 = vst.msk [vmem:[#allocation7 + $0x48] sm:$0xff] %vm2442_vm9, %v6772_v0  ;;  %7548 = vmatprep.subr.bf16.mxu0 %v6852_v12 }
 0x8d1   : > { %7549 = vmatpush3.bf16.msra.mxu0 %v6844_v47  ;;  %v6789_v18 = vpop.permute.xlu0 %6788 }
 0x8d2   : > { %6793 = vst.msk [vmem:[#allocation7 + $0x58] sm:$0xff] %vm2442_vm9, %v6789_v18 }
 0x8d3   : > { %v6715_v40 = vpop.permute.xlu1 %6714  ;;  %v6854_v14 = vld [vmem:[#allocation7 + $0x50] sm:$0xff] }
 0x8d4   : > { %6720 = vst.msk [vmem:[#allocation7 + $0x10] sm:$0xff] %vm2442_vm9, %v6715_v40 }
 0x8d5   : > { %v6804_v42 = vpop.permute.xlu0 %6803 }
 0x8d6   : > { %6809 = vst.msk [vmem:[#allocation7 + $0x60] sm:$0xff] %vm2442_vm9, %v6804_v42 }
 0x8d7   : > { %v6717_v24 = vpop.permute.xlu1 %6716  ;;  %v6853_v45 = vld [vmem:[#allocation7 + $0x48] sm:$0xff] }
 0x8d8   : > { %6721 = vst.msk [vmem:[#allocation7 + $0x18] sm:$0xff] %vm2442_vm9, %v6717_v24  ;;  %7550 = vmatprep.subr.bf16.mxu0 %v6853_v45 }
 0x8d9   : > { %7551 = vmatpush3.bf16.msra.mxu0 %v6845_v25  ;;  %v6806_v9 = vpop.permute.xlu0 %6805  ;;  %v6855_v35 = vld [vmem:[#allocation7 + $0x58] sm:$0xff] }
 0x8da   : > { %7552 = vmatprep.subr.bf16.mxu0 %v6854_v14  ;;  %6810 = vst.msk [vmem:[#allocation7 + $0x68] sm:$0xff] %vm2442_vm9, %v6806_v9  ;;  %v7081_v14 = vld [vmem:[%s12791_s8] sm:$0xff]  ;;  %v7082_v9 = vld [vmem:[%s12791_s8 + $0x8] sm:$0xff] }
 0x8db   : > { %v6740_v54 = vpop.permute.xlu1 %6739  ;;  %v6846_v58 = vld [vmem:[#allocation7 + $0x10] sm:$0xff] }
 0x8dc   : > { %6745 = vst.msk [vmem:[#allocation7 + $0x20] sm:$0xff] %vm2442_vm9, %v6740_v54  ;;  %v7915_v54 = vld [vmem:[%s12790_s7 + $0x4] ss:$8 sps:$4 sm:$0xff]  }
 0x8dd   : > { %7553 = vmatpush3.bf16.msra.mxu0 %v6846_v58  ;;  %v6816_v23 = vpop.permute.xlu0 %6815  ;;  %v6856_v63 = vld [vmem:[#allocation7 + $0x60] sm:$0xff] }
 0x8de   : > { %7554 = vmatprep.subr.bf16.mxu0 %v6855_v35  ;;  %6821 = vst.msk [vmem:[#allocation7 + $0x70] sm:$0xff] %vm2442_vm9, %v6816_v23 }
 0x8df   : > { %v6742_v31 = vpop.permute.xlu1 %6741  ;;  %v6847_v59 = vld [vmem:[#allocation7 + $0x18] sm:$0xff] }
 0x8e0   : > { %6746 = vst.msk [vmem:[#allocation7 + $0x28] sm:$0xff] %vm2442_vm9, %v6742_v31 }
 0x8e1   : > { %7555 = vmatpush3.bf16.msra.mxu0 %v6847_v59  ;;  %v6818_v56 = vpop.permute.xlu0 %6817  ;;  %v6857_v7 = vld [vmem:[#allocation7 + $0x68] sm:$0xff] }
 0x8e2   : > { %7556 = vmatprep.subr.bf16.mxu0 %v6856_v63  ;;  %6822 = vst.msk [vmem:[#allocation7 + $0x78] sm:$0xff] %vm2442_vm9, %v6818_v56 }
 0x8e3   : > { %v6758_v4 = vpop.permute.xlu1 %6757  ;;  %v6848_v10 = vld [vmem:[#allocation7 + $0x20] sm:$0xff] }
 0x8e4   : > { %6763 = vst.msk [vmem:[#allocation7 + $0x30] sm:$0xff] %vm2442_vm9, %v6758_v4 }
 0x8e5   : > { %7557 = vmatpush3.bf16.msra.mxu0 %v6848_v10  ;;  %v6833_v19 = vpop.permute.xlu0 %6832  ;;  %v6858_v5 = vld [vmem:[#allocation7 + $0x70] sm:$0xff] }
 0x8e6   : > { %7558 = vmatprep.subr.bf16.mxu0 %v6857_v7  ;;  %6838 = vst.msk [vmem:[#allocation7 + $0x80] sm:$0xff] %vm2442_vm9, %v6833_v19 }
 0x8e7   : > { %v6760_v38 = vpop.permute.xlu1 %6759  ;;  %v6849_v55 = vld [vmem:[#allocation7 + $0x28] sm:$0xff] }
 0x8e8   : > { %6764 = vst.msk [vmem:[#allocation7 + $0x38] sm:$0xff] %vm2442_vm9, %v6760_v38 }
 0x8e9   : > { %7559 = vmatpush3.bf16.msra.mxu0 %v6849_v55  ;;  %v6859_v49 = vld [vmem:[#allocation7 + $0x78] sm:$0xff] }
 0x8ea   : > { %7560 = vmatprep.subr.bf16.mxu0 %v6858_v5 }
 0x8eb   : > { %v6835_v50 = vpop.permute.xlu1 %6834  ;;  %v6850_v28 = vld [vmem:[#allocation7 + $0x30] sm:$0xff] }
 0x8ec   : > { %6839 = vst.msk [vmem:[#allocation7 + $0x88] sm:$0xff] %vm2442_vm9, %v6835_v50 }
 0x8ed   : > { %7561 = vmatpush3.bf16.msra.mxu0 %v6850_v28  ;;  %v6860_v46 = vld [vmem:[#allocation7 + $0x80] sm:$0xff] }
 0x8ee   : > { %7562 = vmatprep.subr.bf16.mxu0 %v6859_v49  ;;  %7584 = vmatpush3.bf16.msra.mxu1 %v6860_v46  ;;  %v7917_v49 = vld [vmem:[%s12790_s7] ss:$8 sps:$4 sm:$0xff]  }
 0x8ef   : > { %v6851_v52 = vld [vmem:[#allocation7 + $0x38] sm:$0xff]  ;;  %7585 = vmatprep.subr.bf16.mxu1 %v7963_v2 }
 0x8f0   : > { %v7180_v2 = vld [vmem:[%s12795_s12 + $0x10] sm:$0xff] }
 0x8f1   : > { %7563 = vmatpush3.bf16.msra.mxu0 %v6851_v52 }
 0x8f3   : > { %v6861_v33 = vld [vmem:[#allocation7 + $0x88] sm:$0xff] }
 0x8f4   : > { %6925 = vmatmul.mubr.bf16.vlgmr.msra.gmra.mrb[32].mxu0 %v7911_v3  ;;  %7586 = vmatpush3.bf16.msra.mxu1 %v6861_v33 }
 0x8f5   : > { %7106 = vmatprep.subr.bf16.mxu1 %v13826_v27 }
 0x8f6   : > { %v6867_v6 = vpop.permute.xlu0 %6866 }
 0x8f7   : > { %7588 = vmatmul.mubr.msk.bf16.vlgmr.msra.gmra.mrb[32].mxu1 %vm1479_vm8, %v7914_v16  ;;  %vm7102_vm8 = vcmask 130048  }
 0x8f8   : > { %7421 = vmatprep.mubr.msk.bf16.mxu1 %vm7102_vm8, %v7915_v54 }
 0x8fc   : > { %v6872_v13 = vpop.permute.xlu1 %6871 }
 0x900   : > { %v7009_v32 = vpop.permute.xlu1 %7008 }
 0x904   : > { %v7036_v62 = vpop.permute.xlu1 %7035 }
 0x908   : > { %v7062_v24 = vpop.permute.xlu1 %7061 }
 0x9c7   : > { %v7564_v48 = vpop.f32.mrb[32].mxu0 }
 0x9c8   : > { %v7565_v53 = vpop.f32.mrb[33].mxu0 }
 0x9c9   : > { %v7566_v11 = vadd.f32 %v7565_v53, %v7564_v48  ;;  %v7567_v57 = vpop.f32.mrb[34].mxu0  ;;  %v7179_v48 = vld [vmem:[%s12795_s12 + $0x8] sm:$0xff] }
 0x9ca   : > { %v7568_v20 = vpop.f32.mrb[35].mxu0  ;;  %v6967_v17 = vpop.f32.mrb[32].mxu1 }
 0x9cb   : > { %v7569_v15 = vadd.f32 %v7568_v20, %v7567_v57  ;;  %v6927_v36 = vadd.f32 %v7566_v11, %v6867_v6  ;;  %v7589_v21 = vpop.f32.mrb[33].mxu1  ;;  %v7610_v6 = vpack.c.bf16 %v7179_v48, %v7178_v22  ;;  %v7181_v11 = vld [vmem:[%s12795_s12 + $0x18] sm:$0xff]  ;;  %v7182_v20 = vld [vmem:[%s12795_s12 + $0x20] sm:$0xff] }
 0x9cc   : > { %v6970_v37 = vpop.f32.mrb[34].mxu1  ;;  %v7614_v57 = vpack.c.bf16 %v7181_v11, %v7180_v2 }
 0x9cd   : > { %v6968_v41 = vadd.f32 %v6967_v17, %v6927_v36  ;;  %v6930_v8 = vadd.f32 %v7569_v15, %v6872_v13  ;;  %v7590_v51 = vpop.f32.mrb[35].mxu1  ;;  %v7183_v17 = vld [vmem:[%s12795_s12 + $0x28] sm:$0xff]  ;;  %7611 = vmatprep.subr.bf16.mxu0 %v7610_v6  ;;  %v7184_v13 = vld [vmem:[%s12795_s12 + $0x30] sm:$0xff] }
 0x9ce   : > { %7613 = vmatpush3.bf16.msra.mxu0 %v7610_v6  ;;  %v7618_v15 = vpack.c.bf16 %v7183_v17, %v7182_v20 }
 0x9cf   : > { %v6971_v30 = vadd.f32 %v6970_v37, %v6930_v8  ;;  %7615 = vmatprep.subr.bf16.mxu0 %v7614_v57  ;;  %v7185_v37 = vld [vmem:[%s12795_s12 + $0x38] sm:$0xff] }
 0x9d1   : > { %v6976_v34 = vpack.c.bf16 %v6971_v30, %v6968_v41  ;;  %v7622_v41 = vpack.c.bf16 %v7185_v37, %v7184_v13 }
 0x9d2   : > { %7617 = vmatpush3.bf16.msra.mxu0 %v7614_v57 }
 0x9d3   : > { %6978 = vrot.lane.b32.xlu0 %v6976_v34, %s7954_s15  ;;  %s13867_s15 = smov 118   ;;  %7619 = vmatprep.subr.bf16.mxu0 %v7618_v15 }
 0x9d6   : > { %7621 = vmatpush3.bf16.msra.mxu0 %v7618_v15 }
 0x9d7   : > { %7019 = vrot.lane.b32.xlu0 %v6990_v1, %s7958_s17  ;;  %s13870_s17 = smov 110   ;;  %7623 = vmatprep.subr.bf16.mxu0 %v7622_v41 }
 0x9da   : > { %7625 = vmatpush3.bf16.msra.mxu0 %v7622_v41 }
 0x9db   : > { %7045 = vrot.lane.b32.xlu0 %v6990_v1, %s7957_s24 }
 0xa45   : > { %v6979_v26 = vpop.permute.xlu0 %6978 }
 0xa46   : > { %6981 = vst.msk [vmem:[#allocation8] sm:$0xff] %vm6693_vm14, %v6979_v26 }
 0xa49   : > { %v7020_v39 = vpop.permute.xlu0 %7019 }
 0xa4d   : > { %v6983_v60 = vld [vmem:[#allocation8] sm:$0xff]  ;;  %v7046_v18 = vpop.permute.xlu0 %7045 }
 0xa4e   : > { %v6991_v0 = vmul.bf16 %v6990_v1, %v6983_v60  ;;  %v7011_v12 = vmul.bf16 %v7009_v32, %v6983_v60  ;;  %6995 = vrot.lane.b32.xlu0 %v6983_v60, %s7947_s28  ;;  %v7022_v47 = vmul.bf16 %v7020_v39, %v6983_v60  ;;  %v7038_v40 = vmul.bf16 %v7036_v62, %v6983_v60  ;;  %s13869_s28 = smov 111  }
 0xa4f   : > { %v7048_v42 = vmul.bf16 %v7046_v18, %v6983_v60  ;;  %v7064_v25 = vmul.bf16 %v7062_v24, %v6983_v60 }
 0xa50   : > { %6992 = vst.msk [vmem:[#allocation9] sm:$0xff] %vm2442_vm9, %v6991_v0  ;;  %7013 = vrot.lane.b32.xlu1 %v7011_v12, %s7949_s30 }
 0xa52   : > { %7024 = vrot.lane.b32.xlu0 %v7022_v47, %s7964_s14 }
 0xa54   : > { %7030 = vrot.lane.b32.xlu1 %v6983_v60, %s13866_s20 }
 0xa56   : > { %7040 = vrot.lane.b32.xlu0 %v7038_v40, %s13867_s15 }
 0xa57   : > { %v7072_v45 = vld [vmem:[#allocation9] sm:$0xff] }
 0xa58   : > { %7107 = vmatpush1.bf16.msra.mxu1 %v7072_v45  ;;  %7050 = vrot.lane.b32.xlu1 %v7048_v42, %s13868_s16 }
 0xa59   : > { %7108 = vmatprep.subr.bf16.mxu1 %v13826_v27 }
 0xa5a   : > { %7056 = vrot.lane.b32.xlu0 %v6983_v60, %s13869_s28 }
 0xa5c   : > { %7066 = vrot.lane.b32.xlu1 %v7064_v25, %s13870_s17 }
 0xa5e   : > { %7085 = vperm.xlu0 %7827, %v7081_v14  }
 0xa60   : > { %7090 = vperm.xlu1 %7833, %v7082_v9  }
 0xac0   : > { %v6996_v58 = vpop.permute.xlu0 %6995 }
 0xac1   : > { %6998 = vst.msk [vmem:[#allocation9 + $0x8] sm:$0xff] %vm2442_vm9, %v6996_v58 }
 0xac2   : > { %v7014_v35 = vpop.permute.xlu1 %7013 }
 0xac3   : > { %7016 = vst.msk [vmem:[#allocation9 + $0x10] sm:$0xff] %vm2442_vm9, %v7014_v35 }
 0xac4   : > { %v7025_v23 = vpop.permute.xlu0 %7024 }
 0xac5   : > { %7027 = vst.msk [vmem:[#allocation9 + $0x18] sm:$0xff] %vm2442_vm9, %v7025_v23 }
 0xac6   : > { %v7031_v31 = vpop.permute.xlu1 %7030 }
 0xac7   : > { %7033 = vst.msk [vmem:[#allocation9 + $0x20] sm:$0xff] %vm2442_vm9, %v7031_v31 }
 0xac8   : > { %v7041_v59 = vpop.permute.xlu0 %7040  ;;  %v7073_v63 = vld [vmem:[#allocation9 + $0x8] sm:$0xff] }
 0xac9   : > { %7043 = vst.msk [vmem:[#allocation9 + $0x28] sm:$0xff] %vm2442_vm9, %v7041_v59  ;;  %7109 = vmatpush1.bf16.msra.mxu1 %v7073_v63 }
 0xaca   : > { %v7051_v56 = vpop.permute.xlu1 %7050  ;;  %7110 = vmatprep.subr.bf16.mxu1 %v13826_v27  ;;  %v7074_v10 = vld [vmem:[#allocation9 + $0x10] sm:$0xff] }
 0xacb   : > { %7053 = vst.msk [vmem:[#allocation9 + $0x30] sm:$0xff] %vm2442_vm9, %v7051_v56 }
 0xacc   : > { %v7057_v4 = vpop.permute.xlu0 %7056  ;;  %v7075_v19 = vld [vmem:[#allocation9 + $0x18] sm:$0xff] }
 0xacd   : > { %7059 = vst.msk [vmem:[#allocation9 + $0x38] sm:$0xff] %vm2442_vm9, %v7057_v4  ;;  %7111 = vmatpush1.bf16.msra.mxu1 %v7074_v10 }
 0xace   : > { %v7067_v7 = vpop.permute.xlu1 %7066  ;;  %7112 = vmatprep.subr.bf16.mxu1 %v13826_v27  ;;  %v7076_v38 = vld [vmem:[#allocation9 + $0x20] sm:$0xff] }
 0xacf   : > { %7069 = vst.msk [vmem:[#allocation9 + $0x40] sm:$0xff] %vm2442_vm9, %v7067_v7 }
 0xad0   : > { %v7077_v55 = vld [vmem:[#allocation9 + $0x28] sm:$0xff] }
 0xad1   : > { %7113 = vmatpush1.bf16.msra.mxu1 %v7075_v19 }
 0xad2   : > { %7114 = vmatprep.subr.bf16.mxu1 %v13826_v27  ;;  %v7078_v5 = vld [vmem:[#allocation9 + $0x30] sm:$0xff] }
 0xad4   : > { %v7079_v50 = vld [vmem:[#allocation9 + $0x38] sm:$0xff] }
 0xad5   : > { %7115 = vmatpush1.bf16.msra.mxu1 %v7076_v38 }
 0xad6   : > { %7116 = vmatprep.subr.bf16.mxu1 %v13826_v27  ;;  %v7080_v28 = vld [vmem:[#allocation9 + $0x40] sm:$0xff] }
 0xad9   : > { %7117 = vmatpush1.bf16.msra.mxu1 %v7077_v55 }
 0xada   : > { %7118 = vmatprep.subr.bf16.mxu1 %v13826_v27 }
 0xadd   : > { %7119 = vmatpush1.bf16.msra.mxu1 %v7078_v5  ;;  %v7086_v46 = vpop.permute.xlu0 %7085 }
 0xade   : > { %7120 = vmatprep.subr.bf16.mxu1 %v13826_v27 }
 0xadf   : > { %v7091_v16 = vpop.permute.xlu1 %7090 }
 0xae1   : > { %7121 = vmatpush1.bf16.msra.mxu1 %v7079_v50 }
 0xae2   : > { %7122 = vmatprep.subr.bf16.mxu1 %v13826_v27 }
 0xae5   : > { %7123 = vmatpush1.bf16.msra.mxu1 %v7080_v28 }
 0xae8   : > { %7139 = vmatmul.mubr.bf16.vlgmr.msra.gmra.mrb[36].mxu1 %v7917_v49 }
 0xbbb   : > { %v7140_v52 = vpop.f32.mrb[36].mxu1 }
 0xbbc   : > { %v7141_v3 = vadd.f32 %v7140_v52, %v7086_v46  ;;  %v7142_v33 = vpop.f32.mrb[37].mxu1 }
 0xbbd   : > { %v7143_v61 = vpop.f32.mrb[38].mxu1 }
 0xbbe   : > { %v7147_v29 = vmax.f32 %v7141_v3, 0.0  ;;  %v7144_v27 = vadd.f32 %v7143_v61, %v7091_v16  ;;  %v7145_v43 = vpop.f32.mrb[39].mxu1 }
 0xbc0   : > { %7152 = vst.msk [vmem:[#allocation10] sm:$0xff] %vm2442_vm9, %v7147_v29  ;;  %v7148_v53 = vmax.f32 %v7144_v27, 0.0 }
 0xbc2   : > { %7153 = vst.msk [vmem:[#allocation10 + $0x8] sm:$0xff] %vm2442_vm9, %v7148_v53 }
 0xbc7   : > { %v7154_v36 = vld [vmem:[#allocation10] sm:$0xff] }
 0xbc8   : > { %7158 = vrot.lane.b32.xlu0 %v7154_v36, %s7949_s30 }
 0xbc9   : > { %v7155_v21 = vld [vmem:[#allocation10 + $0x8] sm:$0xff] }
 0xbca   : > { %7160 = vrot.lane.b32.xlu1 %v7155_v21, %s7949_s30  ;;  %s7426_s30 = sshll.u32 %s13872_s26, 4 }
 0xbcb   : > { %s437_s24 = scalar_lea.vmem %s12796_s13, %s7426_s30 }
 0xc3a   : > { %v7159_v8 = vpop.permute.xlu0 %7158 }
 0xc3b   : > { %v7166_v51 = vmax.f32 %v7154_v36, %v7159_v8  ;;  %v7164_v34 = vmax.f32 %v7147_v29, %v7159_v8 }
 0xc3c   : > { %v7161_v30 = vpop.permute.xlu1 %7160 }
 0xc3d   : > { %v7167_v44 = vmax.f32 %v7155_v21, %v7161_v30  ;;  %7170 = vrot.lane.b32.xlu0 %v7166_v51, %s13868_s16  ;;  %v7165_v26 = vmax.f32 %v7148_v53, %v7161_v30 }
 0xc3f   : > { %7172 = vrot.lane.b32.xlu1 %v7167_v44, %s13868_s16 }
 0xcaf   : > { %v7171_v1 = vpop.permute.xlu0 %7170 }
 0xcb0   : > { %v7176_v32 = vmax.f32 %v7164_v34, %v7171_v1 }
 0xcb1   : > { %v7173_v60 = vpop.permute.xlu1 %7172 }
 0xcb2   : > { %v7177_v39 = vmax.f32 %v7165_v26, %v7173_v60  ;;  %7607 = vmatprep.mubr.msk.f32.mxu0 %vm2442_vm9, %v7176_v32 }
 0xcb4   : > { %7608 = vmatmul.mubr.msk.f32.vlgmr.msra.gmra.mrb[36].mxu0 %vm2442_vm9, %v7177_v39 }
 0xd87   : > { %v7609_v0 = vpop.f32.mrb[36].mxu0 }
 0xd88   : > { %7269 = vst.msk [vmem:[%s437_s24 + $0x8] sm:$0xff] %vm7267_vm3, %v7609_v0  ;;  %v7258_v12 = vpop.f32.mrb[37].mxu0 }
 0xd89   : > { %7268 = vst.msk [vmem:[%s437_s24] sm:$0xff] %vm7267_vm3, %v7258_v12 }
 0xd8a PF: > { %s23_s25 = sadd.s32 1, %s7929_s25  }
 0xd8b   : > { %p20_p4 = scmp.ge.s32.totalorder %s23_s25, 4  }
 0xd8d   :  { %22 = sbr.rel (!%p20_p4) target bundleno = 1 (0x1), region = 102 }

</bundles_post_ra>
